<compile_context>
chip_gen: v5e
topology: v5e:2x2
jax: 0.10.0
libtpu: 0.0.40
codegen_flags: <defaults>
</compile_context>

<pallas_src>
import functools

import jax
import jax.numpy as jnp
from jax import lax
from jax.experimental import pallas as pl
from jax.experimental.pallas import tpu as pltpu


def _round_up(x, m):
    return (x + m - 1) // m * m


def _pick_tk(kp):
    for t in (512, 384, 256, 128):
        if kp % t == 0:
            return t
    return 128


# ----------------------------------------------------------------------------
# Pallas kernels: tiled matmul with fused bias (+ReLU) / (+residual, ReLU)
# ----------------------------------------------------------------------------
def _mm_bias_kernel(a_ref, b_ref, bias_ref, o_ref, acc_ref, *, relu):
    k = pl.program_id(2)

    @pl.when(k == 0)
    def _():
        acc_ref[...] = jnp.zeros_like(acc_ref)

    acc_ref[...] += jnp.dot(a_ref[...], b_ref[...],
                            preferred_element_type=jnp.float32)

    @pl.when(k == pl.num_programs(2) - 1)
    def _():
        y = acc_ref[...] + bias_ref[...]
        if relu:
            y = jnp.maximum(y, 0.0)
        o_ref[...] = y.astype(o_ref.dtype)


def _mm_bias_res_relu_kernel(a_ref, b_ref, bias_ref, res_ref, o_ref, acc_ref):
    k = pl.program_id(2)

    @pl.when(k == 0)
    def _():
        acc_ref[...] = jnp.zeros_like(acc_ref)

    acc_ref[...] += jnp.dot(a_ref[...], b_ref[...],
                            preferred_element_type=jnp.float32)

    @pl.when(k == pl.num_programs(2) - 1)
    def _():
        y = acc_ref[...] + bias_ref[...] + res_ref[...].astype(jnp.float32)
        o_ref[...] = jnp.maximum(y, 0.0).astype(o_ref.dtype)


def fused_matmul(a, w_p, bias_p, *, relu, residual=None, out_dtype=jnp.bfloat16):
    """out = act((a @ w_p) + bias [+ residual]).

    a:        (M, K)  unpadded activations (cast to bf16 here)
    w_p:      (Kp, Np) bf16 weight, already scale-folded / transposed / zero-padded
    bias_p:   (1, Np) f32 bias
    residual: (M, N)  optional, added (with ReLU) in the matmul epilogue
    Returns padded (Mp, Np); caller slices.
    """
    M, K = a.shape
    Kp, Np = w_p.shape

    tm = min(256, _round_up(max(M, 16), 16))
    Mp = _round_up(M, tm)
    tn = 256 if Np % 256 == 0 else 128
    tk = _pick_tk(Kp)
    nm, nn, nk = Mp // tm, Np // tn, Kp // tk

    # K-pad of `a` multiplies zero rows of the (pre-padded) weight, so zero-pad is safe.
    a_p = jnp.pad(a.astype(jnp.bfloat16), ((0, Mp - M), (0, Kp - K)))

    in_specs = [
        pl.BlockSpec((tm, tk), lambda i, j, k: (i, k)),
        pl.BlockSpec((tk, tn), lambda i, j, k: (k, j)),
        pl.BlockSpec((1, tn), lambda i, j, k: (0, j)),
    ]
    operands = [a_p, w_p, bias_p]

    if residual is not None:
        Mr, Nr = residual.shape
        res_p = jnp.pad(residual.astype(jnp.bfloat16),
                        ((0, Mp - Mr), (0, Np - Nr)))
        in_specs.append(pl.BlockSpec((tm, tn), lambda i, j, k: (i, j)))
        operands.append(res_p)
        kernel = _mm_bias_res_relu_kernel
    else:
        kernel = functools.partial(_mm_bias_kernel, relu=relu)

    out = pl.pallas_call(
        kernel,
        out_shape=jax.ShapeDtypeStruct((Mp, Np), out_dtype),
        grid_spec=pltpu.PrefetchScalarGridSpec(
            num_scalar_prefetch=0,
            grid=(nm, nn, nk),
            in_specs=in_specs,
            out_specs=pl.BlockSpec((tm, tn), lambda i, j, k: (i, j)),
            scratch_shapes=[pltpu.VMEM((tm, tn), jnp.float32)],
        ),
        compiler_params=pltpu.CompilerParams(
            dimension_semantics=("parallel", "parallel", "arbitrary")),
    )(*operands)
    return out


# ----------------------------------------------------------------------------
# Conv (+ folded BN, + optional fused residual/ReLU) via im2col + Pallas matmul
# ----------------------------------------------------------------------------
def _im2col(x, kh, kw, stride, padding):
    # x: (N, H, W, C) bf16 -> patches (N*Hout*Wout, kh*kw*C) bf16
    # TODO(synk): im2col patches are materialized in HBM; a tap-folded conv kernel
    # reading NHWC directly would cut this traffic further.
    N, H, W, C = x.shape
    Hout = (H + 2 * padding - kh) // stride + 1
    Wout = (W + 2 * padding - kw) // stride + 1
    if padding > 0:
        x = jnp.pad(x, ((0, 0), (padding, padding), (padding, padding), (0, 0)))
    cols = []
    for i in range(kh):
        for j in range(kw):
            cols.append(x[:, i:i + stride * Hout:stride,
                          j:j + stride * Wout:stride, :])
    patches = cols[0] if len(cols) == 1 else jnp.concatenate(cols, axis=-1)
    return patches.reshape(N * Hout * Wout, kh * kw * C), Hout, Wout


def conv_bn(x, p, *, stride, padding, relu, residual=None):
    """x: NHWC bf16; p: prepped conv params; residual (NHWC, same out shape) fused."""
    Nb = x.shape[0]
    patches, Hout, Wout = _im2col(x, p['kh'], p['kw'], stride, padding)
    M = Nb * Hout * Wout
    Cout = p['cout']
    res2 = residual.reshape(M, Cout) if residual is not None else None
    out = fused_matmul(patches, p['w'], p['bias'], relu=relu, residual=res2,
                       out_dtype=jnp.bfloat16)
    return out[:M, :Cout].reshape(Nb, Hout, Wout, Cout)


def max_pool_3x3_s2(x):
    # TODO(synk): maxpool is a small windowed reduction left to lax.reduce_window.
    return lax.reduce_window(
        x, jnp.asarray(-jnp.inf, x.dtype), lax.max,
        window_dimensions=(1, 3, 3, 1),
        window_strides=(1, 2, 2, 1),
        padding=((0, 0), (1, 1), (1, 1), (0, 0)),
    )


# ----------------------------------------------------------------------------
# Deterministic ResNet18 parameters (PyTorch init semantics)
# ----------------------------------------------------------------------------
def _kaiming_conv(key, cout, cin, kh, kw):
    fan_out = cout * kh * kw
    std = (2.0 / fan_out) ** 0.5
    return jax.random.normal(key, (cout, cin, kh, kw), jnp.float32) * std


def _bn_params(c):
    return (jnp.ones((c,), jnp.float32), jnp.zeros((c,), jnp.float32),
            jnp.zeros((c,), jnp.float32), jnp.ones((c,), jnp.float32))


def init_resnet18_params(key, num_classes=500):
    keys = iter(jax.random.split(key, 64))
    params = {
        'conv1': _kaiming_conv(next(keys), 64, 3, 7, 7),
        'bn1': _bn_params(64),
    }
    layers = []
    in_c = 64
    for out_c, blocks, stride in [(64, 2, 1), (128, 2, 2), (256, 2, 2), (512, 2, 2)]:
        layer = []
        for bi in range(blocks):
            s = stride if bi == 0 else 1
            block = {
                'stride': s,
                'conv1': _kaiming_conv(next(keys), out_c, in_c, 3, 3),
                'bn1': _bn_params(out_c),
                'conv2': _kaiming_conv(next(keys), out_c, out_c, 3, 3),
                'bn2': _bn_params(out_c),
            }
            if s != 1 or in_c != out_c:
                block['down_conv'] = _kaiming_conv(next(keys), out_c, in_c, 1, 1)
                block['down_bn'] = _bn_params(out_c)
            layer.append(block)
            in_c = out_c
        layers.append(layer)
    params['layers'] = layers
    params['fc_w'] = jax.random.normal(next(keys), (num_classes, 512), jnp.float32) * 0.01
    params['fc_b'] = jnp.zeros((num_classes,), jnp.float32)
    return params


# ----------------------------------------------------------------------------
# One-time weight preparation: fold BN into weights, transpose, pad, cast bf16
# ----------------------------------------------------------------------------
def prep_conv_bn(w, bn):
    cout, cin, kh, kw = w.shape
    gamma, beta, mean, var = bn
    scale = gamma / jnp.sqrt(var + 1e-5)
    bias = beta - mean * scale
    w2 = jnp.transpose(w, (2, 3, 1, 0)).reshape(kh * kw * cin, cout)
    w2 = w2 * scale[None, :]                    # fold BN scale into the weight
    K, N = kh * kw * cin, cout
    Kp = _round_up(K, 128)
    Np = _round_up(N, 128)
    w_p = jnp.pad(w2, ((0, Kp - K), (0, Np - N))).astype(jnp.bfloat16)
    b_p = jnp.pad(bias, (0, Np - N)).reshape(1, Np).astype(jnp.float32)
    return {'w': w_p, 'bias': b_p, 'kh': kh, 'kw': kw, 'cout': cout}


def prep_linear(w, b):
    n, k = w.shape
    Kp = _round_up(k, 128)
    Np = _round_up(n, 128)
    w_p = jnp.pad(w.T, ((0, Kp - k), (0, Np - n))).astype(jnp.bfloat16)
    b_p = jnp.pad(b, (0, Np - n)).reshape(1, Np).astype(jnp.float32)
    return {'w': w_p, 'bias': b_p, 'n': n}


def prep_resnet18_params(params):
    prepped = {
        'conv1': prep_conv_bn(params['conv1'], params['bn1']),
        'layers': [],
        'fc': prep_linear(params['fc_w'], params['fc_b']),
    }
    for layer in params['layers']:
        pblocks = []
        for block in layer:
            pb = {
                'stride': block['stride'],
                'conv1': prep_conv_bn(block['conv1'], block['bn1']),
                'conv2': prep_conv_bn(block['conv2'], block['bn2']),
            }
            if 'down_conv' in block:
                pb['down'] = prep_conv_bn(block['down_conv'], block['down_bn'])
            pblocks.append(pb)
        prepped['layers'].append(pblocks)
    return prepped


# ----------------------------------------------------------------------------
# Forward pass
# ----------------------------------------------------------------------------
def resnet18_forward(prepped, x_nchw):
    # layout: convert NCHW (PyTorch) -> NHWC, bf16 activations throughout.
    x = jnp.transpose(x_nchw, (0, 2, 3, 1)).astype(jnp.bfloat16)

    # Stem: 7x7/2 conv + folded BN + ReLU, then 3x3/2 maxpool.
    x = conv_bn(x, prepped['conv1'], stride=2, padding=3, relu=True)
    x = max_pool_3x3_s2(x)

    # 4 stages of 2 BasicBlocks; residual add + ReLU fused into conv2's epilogue.
    for layer in prepped['layers']:
        for block in layer:
            identity = x
            out = conv_bn(x, block['conv1'], stride=block['stride'],
                          padding=1, relu=True)
            if 'down' in block:
                identity = conv_bn(x, block['down'], stride=block['stride'],
                                   padding=0, relu=False)
            x = conv_bn(out, block['conv2'], stride=1, padding=1, relu=True,
                        residual=identity)

    # TODO(synk): global average pool is a tiny reduction left as jnp glue.
    pooled = jnp.mean(x.astype(jnp.float32), axis=(1, 2)).astype(jnp.bfloat16)
    fc = prepped['fc']
    logits = fused_matmul(pooled, fc['w'], fc['bias'], relu=False,
                          out_dtype=jnp.float32)
    return logits[:x_nchw.shape[0], :fc['n']]


if __name__ == "__main__":
    key = jax.random.PRNGKey(0)
    k_param, k_input = jax.random.split(key)

    num_classes = 500                       # config.get('num_classes', 500)
    raw_params = init_resnet18_params(k_param, num_classes=num_classes)
    prepped = prep_resnet18_params(raw_params)

    # Small but structurally valid input: batch=2, 3 channels, 32x32 spatial (NCHW).
    x = jax.random.normal(k_input, (2, 3, 32, 32), jnp.float32)

    forward = jax.jit(lambda inp: resnet18_forward(prepped, inp))
    logits = jax.block_until_ready(forward(x))

    assert logits.shape == (2, num_classes), logits.shape
    assert bool(jnp.all(jnp.isfinite(logits)))
    print("KERNEL_OK")
</pallas_src>

<mosaic_0001>
module attributes {stable_mosaic.version = 11 : i64} {
  func.func @_mm_bias_kernel(%arg0: i32, %arg1: i32, %arg2: i32, %arg3: memref<256x256xbf16, #tpu.memory_space<vmem>>, %arg4: memref<256x128xbf16, #tpu.memory_space<vmem>>, %arg5: memref<1x128xf32, #tpu.memory_space<vmem>>, %arg6: memref<256x128xbf16, #tpu.memory_space<vmem>>, %arg7: memref<256x128xf32, #tpu.memory_space<vmem>>) attributes {dimension_semantics = [#tpu.dimension_semantics<parallel>, #tpu.dimension_semantics<parallel>, #tpu.dimension_semantics<arbitrary>], iteration_bounds = array<i64: 2, 1, 1>, scalar_prefetch = 0 : i64, scratch_operands = 1 : i64, tpu.core_type = #tpu.core_type<tc>, window_params = [{transform_indices = @transform_0, window_bounds = array<i64: 256, 256>}, {transform_indices = @transform_1, window_bounds = array<i64: 256, 128>}, {transform_indices = @transform_2, window_bounds = array<i64: 1, 128>}, {transform_indices = @transform_3, window_bounds = array<i64: 256, 128>}]} {
    %c0_i32 = arith.constant 0 : i32
    %0 = arith.cmpi eq, %arg2, %c0_i32 : i32
    %1 = arith.extui %0 : i1 to i32
    %c0_i32_0 = arith.constant 0 : i32
    %2 = arith.cmpi ne, %1, %c0_i32_0 : i32
    scf.if %2 {
      %cst_10 = arith.constant 0.000000e+00 : f32
      %12 = vector.broadcast %cst_10 : f32 to vector<256x128xf32>
      %c0_11 = arith.constant 0 : index
      %c0_12 = arith.constant 0 : index
      %13 = vector.load %arg7[%c0_11, %c0_12] : memref<256x128xf32, #tpu.memory_space<vmem>>, vector<256x128xf32>
      tpu.vector_store %arg7[%c0_11, %c0_12], %12 {strides = array<i32>} : memref<256x128xf32, #tpu.memory_space<vmem>>, vector<256x128xf32>,
    } else {
    }
    %c0 = arith.constant 0 : index
    %c0_1 = arith.constant 0 : index
    %3 = vector.load %arg7[%c0, %c0_1] : memref<256x128xf32, #tpu.memory_space<vmem>>, vector<256x128xf32>
    %c0_2 = arith.constant 0 : index
    %c0_3 = arith.constant 0 : index
    %4 = vector.load %arg3[%c0_2, %c0_3] : memref<256x256xbf16, #tpu.memory_space<vmem>>, vector<256x256xbf16>
    %c0_4 = arith.constant 0 : index
    %c0_5 = arith.constant 0 : index
    %5 = vector.load %arg4[%c0_4, %c0_5] : memref<256x128xbf16, #tpu.memory_space<vmem>>, vector<256x128xbf16>
    %cst = arith.constant dense<0.000000e+00> : vector<256x128xf32>
    %6 = tpu.matmul %4, %5, %cst {dimension_numbers = #tpu.dot_dimension_numbers<[1], [0], [0], [1], [0, 0, 1, 1], [], []>} : vector<256x256xbf16>, vector<256x128xbf16>, vector<256x128xf32> -> vector<256x128xf32>
    %7 = arith.addf %3, %6 : vector<256x128xf32>
    %c0_6 = arith.constant 0 : index
    %c0_7 = arith.constant 0 : index
    %8 = vector.load %arg7[%c0_6, %c0_7] : memref<256x128xf32, #tpu.memory_space<vmem>>, vector<256x128xf32>
    tpu.vector_store %arg7[%c0_6, %c0_7], %7 {strides = array<i32>} : memref<256x128xf32, #tpu.memory_space<vmem>>, vector<256x128xf32>,
    %c0_i32_8 = arith.constant 0 : i32
    %9 = arith.cmpi eq, %arg2, %c0_i32_8 : i32
    %10 = arith.extui %9 : i1 to i32
    %c0_i32_9 = arith.constant 0 : i32
    %11 = arith.cmpi ne, %10, %c0_i32_9 : i32
    scf.if %11 {
      %c0_10 = arith.constant 0 : index
      %c0_11 = arith.constant 0 : index
      %12 = vector.load %arg7[%c0_10, %c0_11] : memref<256x128xf32, #tpu.memory_space<vmem>>, vector<256x128xf32>
      %c0_12 = arith.constant 0 : index
      %c0_13 = arith.constant 0 : index
      %13 = vector.load %arg5[%c0_12, %c0_13] : memref<1x128xf32, #tpu.memory_space<vmem>>, vector<1x128xf32>
      %14 = vector.broadcast %13 : vector<1x128xf32> to vector<256x128xf32>
      %15 = arith.addf %12, %14 : vector<256x128xf32>
      %cst_14 = arith.constant 0.000000e+00 : f32
      %16 = vector.broadcast %cst_14 : f32 to vector<256x128xf32>
      %17 = arith.maximumf %15, %16 : vector<256x128xf32>
      %18 = arith.truncf %17 : vector<256x128xf32> to vector<256x128xbf16>
      %c0_15 = arith.constant 0 : index
      %c0_16 = arith.constant 0 : index
      %19 = vector.load %arg6[%c0_15, %c0_16] : memref<256x128xbf16, #tpu.memory_space<vmem>>, vector<256x128xbf16>
      tpu.vector_store %arg6[%c0_15, %c0_16], %18 {strides = array<i32>} : memref<256x128xbf16, #tpu.memory_space<vmem>>, vector<256x128xbf16>,
    } else {
    }
    return
  }
  func.func @transform_0(%arg0: i32, %arg1: i32, %arg2: i32) -> (i32, i32) {
    %c0_i32 = arith.constant 0 : i32
    return %arg0, %arg2 : i32, i32
  }
  func.func @transform_1(%arg0: i32, %arg1: i32, %arg2: i32) -> (i32, i32) {
    %c0_i32 = arith.constant 0 : i32
    return %arg2, %arg1 : i32, i32
  }
  func.func @transform_2(%arg0: i32, %arg1: i32, %arg2: i32) -> (i32, i32) {
    %c0_i32 = arith.constant 0 : i32
    %c0_i32_0 = arith.constant 0 : i32
    return %c0_i32, %arg1 : i32, i32
  }
  func.func @transform_3(%arg0: i32, %arg1: i32, %arg2: i32) -> (i32, i32) {
    %c0_i32 = arith.constant 0 : i32
    return %arg0, %arg1 : i32, i32
  }
}

module attributes {stable_mosaic.version = 11 : i64} {
  func.func @_mm_bias_kernel(%arg0: i32, %arg1: i32, %arg2: i32, %arg3: memref<128x128xbf16, #tpu.memory_space<vmem>>, %arg4: memref<128x128xbf16, #tpu.memory_space<vmem>>, %arg5: memref<1x128xf32, #tpu.memory_space<vmem>>, %arg6: memref<128x128xbf16, #tpu.memory_space<vmem>>, %arg7: memref<128x128xf32, #tpu.memory_space<vmem>>) attributes {dimension_semantics = [#tpu.dimension_semantics<parallel>, #tpu.dimension_semantics<parallel>, #tpu.dimension_semantics<arbitrary>], iteration_bounds = array<i64: 1, 1, 5>, scalar_prefetch = 0 : i64, scratch_operands = 1 : i64, tpu.core_type = #tpu.core_type<tc>, window_params = [{transform_indices = @transform_0, window_bounds = array<i64: 128, 128>}, {transform_indices = @transform_1, window_bounds = array<i64: 128, 128>}, {transform_indices = @transform_2, window_bounds = array<i64: 1, 128>}, {transform_indices = @transform_3, window_bounds = array<i64: 128, 128>}]} {
    %c0_i32 = arith.constant 0 : i32
    %0 = arith.cmpi eq, %arg2, %c0_i32 : i32
    %1 = arith.extui %0 : i1 to i32
    %c0_i32_0 = arith.constant 0 : i32
    %2 = arith.cmpi ne, %1, %c0_i32_0 : i32
    scf.if %2 {
      %cst_9 = arith.constant 0.000000e+00 : f32
      %12 = vector.broadcast %cst_9 : f32 to vector<128x128xf32>
      %c0_10 = arith.constant 0 : index
      %c0_11 = arith.constant 0 : index
      %13 = vector.load %arg7[%c0_10, %c0_11] : memref<128x128xf32, #tpu.memory_space<vmem>>, vector<128x128xf32>
      tpu.vector_store %arg7[%c0_10, %c0_11], %12 {strides = array<i32>} : memref<128x128xf32, #tpu.memory_space<vmem>>, vector<128x128xf32>,
    } else {
    }
    %c0 = arith.constant 0 : index
    %c0_1 = arith.constant 0 : index
    %3 = vector.load %arg7[%c0, %c0_1] : memref<128x128xf32, #tpu.memory_space<vmem>>, vector<128x128xf32>
    %c0_2 = arith.constant 0 : index
    %c0_3 = arith.constant 0 : index
    %4 = vector.load %arg3[%c0_2, %c0_3] : memref<128x128xbf16, #tpu.memory_space<vmem>>, vector<128x128xbf16>
    %c0_4 = arith.constant 0 : index
    %c0_5 = arith.constant 0 : index
    %5 = vector.load %arg4[%c0_4, %c0_5] : memref<128x128xbf16, #tpu.memory_space<vmem>>, vector<128x128xbf16>
    %cst = arith.constant dense<0.000000e+00> : vector<128x128xf32>
    %6 = tpu.matmul %4, %5, %cst {dimension_numbers = #tpu.dot_dimension_numbers<[1], [0], [0], [1], [0, 0, 1, 1], [], []>} : vector<128x128xbf16>, vector<128x128xbf16>, vector<128x128xf32> -> vector<128x128xf32>
    %7 = arith.addf %3, %6 : vector<128x128xf32>
    %c0_6 = arith.constant 0 : index
    %c0_7 = arith.constant 0 : index
    %8 = vector.load %arg7[%c0_6, %c0_7] : memref<128x128xf32, #tpu.memory_space<vmem>>, vector<128x128xf32>
    tpu.vector_store %arg7[%c0_6, %c0_7], %7 {strides = array<i32>} : memref<128x128xf32, #tpu.memory_space<vmem>>, vector<128x128xf32>,
    %c4_i32 = arith.constant 4 : i32
    %9 = arith.cmpi eq, %arg2, %c4_i32 : i32
    %10 = arith.extui %9 : i1 to i32
    %c0_i32_8 = arith.constant 0 : i32
    %11 = arith.cmpi ne, %10, %c0_i32_8 : i32
    scf.if %11 {
      %c0_9 = arith.constant 0 : index
      %c0_10 = arith.constant 0 : index
      %12 = vector.load %arg7[%c0_9, %c0_10] : memref<128x128xf32, #tpu.memory_space<vmem>>, vector<128x128xf32>
      %c0_11 = arith.constant 0 : index
      %c0_12 = arith.constant 0 : index
      %13 = vector.load %arg5[%c0_11, %c0_12] : memref<1x128xf32, #tpu.memory_space<vmem>>, vector<1x128xf32>
      %14 = vector.broadcast %13 : vector<1x128xf32> to vector<128x128xf32>
      %15 = arith.addf %12, %14 : vector<128x128xf32>
      %cst_13 = arith.constant 0.000000e+00 : f32
      %16 = vector.broadcast %cst_13 : f32 to vector<128x128xf32>
      %17 = arith.maximumf %15, %16 : vector<128x128xf32>
      %18 = arith.truncf %17 : vector<128x128xf32> to vector<128x128xbf16>
      %c0_14 = arith.constant 0 : index
      %c0_15 = arith.constant 0 : index
      %19 = vector.load %arg6[%c0_14, %c0_15] : memref<128x128xbf16, #tpu.memory_space<vmem>>, vector<128x128xbf16>
      tpu.vector_store %arg6[%c0_14, %c0_15], %18 {strides = array<i32>} : memref<128x128xbf16, #tpu.memory_space<vmem>>, vector<128x128xbf16>,
    } else {
    }
    return
  }
  func.func @transform_0(%arg0: i32, %arg1: i32, %arg2: i32) -> (i32, i32) {
    %c0_i32 = arith.constant 0 : i32
    return %arg0, %arg2 : i32, i32
  }
  func.func @transform_1(%arg0: i32, %arg1: i32, %arg2: i32) -> (i32, i32) {
    %c0_i32 = arith.constant 0 : i32
    return %arg2, %arg1 : i32, i32
  }
  func.func @transform_2(%arg0: i32, %arg1: i32, %arg2: i32) -> (i32, i32) {
    %c0_i32 = arith.constant 0 : i32
    %c0_i32_0 = arith.constant 0 : i32
    return %c0_i32, %arg1 : i32, i32
  }
  func.func @transform_3(%arg0: i32, %arg1: i32, %arg2: i32) -> (i32, i32) {
    %c0_i32 = arith.constant 0 : i32
    return %arg0, %arg1 : i32, i32
  }
}

module attributes {stable_mosaic.version = 11 : i64} {
  func.func @_mm_bias_res_relu_kernel(%arg0: i32, %arg1: i32, %arg2: i32, %arg3: memref<128x128xbf16, #tpu.memory_space<vmem>>, %arg4: memref<128x128xbf16, #tpu.memory_space<vmem>>, %arg5: memref<1x128xf32, #tpu.memory_space<vmem>>, %arg6: memref<128x128xbf16, #tpu.memory_space<vmem>>, %arg7: memref<128x128xbf16, #tpu.memory_space<vmem>>, %arg8: memref<128x128xf32, #tpu.memory_space<vmem>>) attributes {dimension_semantics = [#tpu.dimension_semantics<parallel>, #tpu.dimension_semantics<parallel>, #tpu.dimension_semantics<arbitrary>], iteration_bounds = array<i64: 1, 1, 5>, scalar_prefetch = 0 : i64, scratch_operands = 1 : i64, tpu.core_type = #tpu.core_type<tc>, window_params = [{transform_indices = @transform_0, window_bounds = array<i64: 128, 128>}, {transform_indices = @transform_1, window_bounds = array<i64: 128, 128>}, {transform_indices = @transform_2, window_bounds = array<i64: 1, 128>}, {transform_indices = @transform_3, window_bounds = array<i64: 128, 128>}, {transform_indices = @transform_4, window_bounds = array<i64: 128, 128>}]} {
    %c0_i32 = arith.constant 0 : i32
    %0 = arith.cmpi eq, %arg2, %c0_i32 : i32
    %1 = arith.extui %0 : i1 to i32
    %c0_i32_0 = arith.constant 0 : i32
    %2 = arith.cmpi ne, %1, %c0_i32_0 : i32
    scf.if %2 {
      %cst_9 = arith.constant 0.000000e+00 : f32
      %12 = vector.broadcast %cst_9 : f32 to vector<128x128xf32>
      %c0_10 = arith.constant 0 : index
      %c0_11 = arith.constant 0 : index
      %13 = vector.load %arg8[%c0_10, %c0_11] : memref<128x128xf32, #tpu.memory_space<vmem>>, vector<128x128xf32>
      tpu.vector_store %arg8[%c0_10, %c0_11], %12 {strides = array<i32>} : memref<128x128xf32, #tpu.memory_space<vmem>>, vector<128x128xf32>,
    } else {
    }
    %c0 = arith.constant 0 : index
    %c0_1 = arith.constant 0 : index
    %3 = vector.load %arg8[%c0, %c0_1] : memref<128x128xf32, #tpu.memory_space<vmem>>, vector<128x128xf32>
    %c0_2 = arith.constant 0 : index
    %c0_3 = arith.constant 0 : index
    %4 = vector.load %arg3[%c0_2, %c0_3] : memref<128x128xbf16, #tpu.memory_space<vmem>>, vector<128x128xbf16>
    %c0_4 = arith.constant 0 : index
    %c0_5 = arith.constant 0 : index
    %5 = vector.load %arg4[%c0_4, %c0_5] : memref<128x128xbf16, #tpu.memory_space<vmem>>, vector<128x128xbf16>
    %cst = arith.constant dense<0.000000e+00> : vector<128x128xf32>
    %6 = tpu.matmul %4, %5, %cst {dimension_numbers = #tpu.dot_dimension_numbers<[1], [0], [0], [1], [0, 0, 1, 1], [], []>} : vector<128x128xbf16>, vector<128x128xbf16>, vector<128x128xf32> -> vector<128x128xf32>
    %7 = arith.addf %3, %6 : vector<128x128xf32>
    %c0_6 = arith.constant 0 : index
    %c0_7 = arith.constant 0 : index
    %8 = vector.load %arg8[%c0_6, %c0_7] : memref<128x128xf32, #tpu.memory_space<vmem>>, vector<128x128xf32>
    tpu.vector_store %arg8[%c0_6, %c0_7], %7 {strides = array<i32>} : memref<128x128xf32, #tpu.memory_space<vmem>>, vector<128x128xf32>,
    %c4_i32 = arith.constant 4 : i32
    %9 = arith.cmpi eq, %arg2, %c4_i32 : i32
    %10 = arith.extui %9 : i1 to i32
    %c0_i32_8 = arith.constant 0 : i32
    %11 = arith.cmpi ne, %10, %c0_i32_8 : i32
    scf.if %11 {
      %c0_9 = arith.constant 0 : index
      %c0_10 = arith.constant 0 : index
      %12 = vector.load %arg8[%c0_9, %c0_10] : memref<128x128xf32, #tpu.memory_space<vmem>>, vector<128x128xf32>
      %c0_11 = arith.constant 0 : index
      %c0_12 = arith.constant 0 : index
      %13 = vector.load %arg5[%c0_11, %c0_12] : memref<1x128xf32, #tpu.memory_space<vmem>>, vector<1x128xf32>
      %14 = vector.broadcast %13 : vector<1x128xf32> to vector<128x128xf32>
      %15 = arith.addf %12, %14 : vector<128x128xf32>
      %c0_13 = arith.constant 0 : index
      %c0_14 = arith.constant 0 : index
      %16 = vector.load %arg6[%c0_13, %c0_14] : memref<128x128xbf16, #tpu.memory_space<vmem>>, vector<128x128xbf16>
      %17 = arith.extf %16 : vector<128x128xbf16> to vector<128x128xf32>
      %18 = arith.addf %15, %17 : vector<128x128xf32>
      %cst_15 = arith.constant 0.000000e+00 : f32
      %19 = vector.broadcast %cst_15 : f32 to vector<128x128xf32>
      %20 = arith.maximumf %18, %19 : vector<128x128xf32>
      %21 = arith.truncf %20 : vector<128x128xf32> to vector<128x128xbf16>
      %c0_16 = arith.constant 0 : index
      %c0_17 = arith.constant 0 : index
      %22 = vector.load %arg7[%c0_16, %c0_17] : memref<128x128xbf16, #tpu.memory_space<vmem>>, vector<128x128xbf16>
      tpu.vector_store %arg7[%c0_16, %c0_17], %21 {strides = array<i32>} : memref<128x128xbf16, #tpu.memory_space<vmem>>, vector<128x128xbf16>,
    } else {
    }
    return
  }
  func.func @transform_0(%arg0: i32, %arg1: i32, %arg2: i32) -> (i32, i32) {
    %c0_i32 = arith.constant 0 : i32
    return %arg0, %arg2 : i32, i32
  }
  func.func @transform_1(%arg0: i32, %arg1: i32, %arg2: i32) -> (i32, i32) {
    %c0_i32 = arith.constant 0 : i32
    return %arg2, %arg1 : i32, i32
  }
  func.func @transform_2(%arg0: i32, %arg1: i32, %arg2: i32) -> (i32, i32) {
    %c0_i32 = arith.constant 0 : i32
    %c0_i32_0 = arith.constant 0 : i32
    return %c0_i32, %arg1 : i32, i32
  }
  func.func @transform_3(%arg0: i32, %arg1: i32, %arg2: i32) -> (i32, i32) {
    %c0_i32 = arith.constant 0 : i32
    return %arg0, %arg1 : i32, i32
  }
  func.func @transform_4(%arg0: i32, %arg1: i32, %arg2: i32) -> (i32, i32) {
    %c0_i32 = arith.constant 0 : i32
    return %arg0, %arg1 : i32, i32
  }
}

module attributes {stable_mosaic.version = 11 : i64} {
  func.func @_mm_bias_kernel(%arg0: i32, %arg1: i32, %arg2: i32, %arg3: memref<32x128xbf16, #tpu.memory_space<vmem>>, %arg4: memref<128x128xbf16, #tpu.memory_space<vmem>>, %arg5: memref<1x128xf32, #tpu.memory_space<vmem>>, %arg6: memref<32x128xbf16, #tpu.memory_space<vmem>>, %arg7: memref<32x128xf32, #tpu.memory_space<vmem>>) attributes {dimension_semantics = [#tpu.dimension_semantics<parallel>, #tpu.dimension_semantics<parallel>, #tpu.dimension_semantics<arbitrary>], iteration_bounds = array<i64: 1, 1, 5>, scalar_prefetch = 0 : i64, scratch_operands = 1 : i64, tpu.core_type = #tpu.core_type<tc>, window_params = [{transform_indices = @transform_0, window_bounds = array<i64: 32, 128>}, {transform_indices = @transform_1, window_bounds = array<i64: 128, 128>}, {transform_indices = @transform_2, window_bounds = array<i64: 1, 128>}, {transform_indices = @transform_3, window_bounds = array<i64: 32, 128>}]} {
    %c0_i32 = arith.constant 0 : i32
    %0 = arith.cmpi eq, %arg2, %c0_i32 : i32
    %1 = arith.extui %0 : i1 to i32
    %c0_i32_0 = arith.constant 0 : i32
    %2 = arith.cmpi ne, %1, %c0_i32_0 : i32
    scf.if %2 {
      %cst_9 = arith.constant 0.000000e+00 : f32
      %12 = vector.broadcast %cst_9 : f32 to vector<32x128xf32>
      %c0_10 = arith.constant 0 : index
      %c0_11 = arith.constant 0 : index
      %13 = vector.load %arg7[%c0_10, %c0_11] : memref<32x128xf32, #tpu.memory_space<vmem>>, vector<32x128xf32>
      tpu.vector_store %arg7[%c0_10, %c0_11], %12 {strides = array<i32>} : memref<32x128xf32, #tpu.memory_space<vmem>>, vector<32x128xf32>,
    } else {
    }
    %c0 = arith.constant 0 : index
    %c0_1 = arith.constant 0 : index
    %3 = vector.load %arg7[%c0, %c0_1] : memref<32x128xf32, #tpu.memory_space<vmem>>, vector<32x128xf32>
    %c0_2 = arith.constant 0 : index
    %c0_3 = arith.constant 0 : index
    %4 = vector.load %arg3[%c0_2, %c0_3] : memref<32x128xbf16, #tpu.memory_space<vmem>>, vector<32x128xbf16>
    %c0_4 = arith.constant 0 : index
    %c0_5 = arith.constant 0 : index
    %5 = vector.load %arg4[%c0_4, %c0_5] : memref<128x128xbf16, #tpu.memory_space<vmem>>, vector<128x128xbf16>
    %cst = arith.constant dense<0.000000e+00> : vector<32x128xf32>
    %6 = tpu.matmul %4, %5, %cst {dimension_numbers = #tpu.dot_dimension_numbers<[1], [0], [0], [1], [0, 0, 1, 1], [], []>} : vector<32x128xbf16>, vector<128x128xbf16>, vector<32x128xf32> -> vector<32x128xf32>
    %7 = arith.addf %3, %6 : vector<32x128xf32>
    %c0_6 = arith.constant 0 : index
    %c0_7 = arith.constant 0 : index
    %8 = vector.load %arg7[%c0_6, %c0_7] : memref<32x128xf32, #tpu.memory_space<vmem>>, vector<32x128xf32>
    tpu.vector_store %arg7[%c0_6, %c0_7], %7 {strides = array<i32>} : memref<32x128xf32, #tpu.memory_space<vmem>>, vector<32x128xf32>,
    %c4_i32 = arith.constant 4 : i32
    %9 = arith.cmpi eq, %arg2, %c4_i32 : i32
    %10 = arith.extui %9 : i1 to i32
    %c0_i32_8 = arith.constant 0 : i32
    %11 = arith.cmpi ne, %10, %c0_i32_8 : i32
    scf.if %11 {
      %c0_9 = arith.constant 0 : index
      %c0_10 = arith.constant 0 : index
      %12 = vector.load %arg7[%c0_9, %c0_10] : memref<32x128xf32, #tpu.memory_space<vmem>>, vector<32x128xf32>
      %c0_11 = arith.constant 0 : index
      %c0_12 = arith.constant 0 : index
      %13 = vector.load %arg5[%c0_11, %c0_12] : memref<1x128xf32, #tpu.memory_space<vmem>>, vector<1x128xf32>
      %14 = vector.broadcast %13 : vector<1x128xf32> to vector<32x128xf32>
      %15 = arith.addf %12, %14 : vector<32x128xf32>
      %cst_13 = arith.constant 0.000000e+00 : f32
      %16 = vector.broadcast %cst_13 : f32 to vector<32x128xf32>
      %17 = arith.maximumf %15, %16 : vector<32x128xf32>
      %18 = arith.truncf %17 : vector<32x128xf32> to vector<32x128xbf16>
      %c0_14 = arith.constant 0 : index
      %c0_15 = arith.constant 0 : index
      %19 = vector.load %arg6[%c0_14, %c0_15] : memref<32x128xbf16, #tpu.memory_space<vmem>>, vector<32x128xbf16>
      tpu.vector_store %arg6[%c0_14, %c0_15], %18 {strides = array<i32>} : memref<32x128xbf16, #tpu.memory_space<vmem>>, vector<32x128xbf16>,
    } else {
    }
    return
  }
  func.func @transform_0(%arg0: i32, %arg1: i32, %arg2: i32) -> (i32, i32) {
    %c0_i32 = arith.constant 0 : i32
    return %arg0, %arg2 : i32, i32
  }
  func.func @transform_1(%arg0: i32, %arg1: i32, %arg2: i32) -> (i32, i32) {
    %c0_i32 = arith.constant 0 : i32
    return %arg2, %arg1 : i32, i32
  }
  func.func @transform_2(%arg0: i32, %arg1: i32, %arg2: i32) -> (i32, i32) {
    %c0_i32 = arith.constant 0 : i32
    %c0_i32_0 = arith.constant 0 : i32
    return %c0_i32, %arg1 : i32, i32
  }
  func.func @transform_3(%arg0: i32, %arg1: i32, %arg2: i32) -> (i32, i32) {
    %c0_i32 = arith.constant 0 : i32
    return %arg0, %arg1 : i32, i32
  }
}

module attributes {stable_mosaic.version = 11 : i64} {
  func.func @_mm_bias_res_relu_kernel(%arg0: i32, %arg1: i32, %arg2: i32, %arg3: memref<32x384xbf16, #tpu.memory_space<vmem>>, %arg4: memref<384x128xbf16, #tpu.memory_space<vmem>>, %arg5: memref<1x128xf32, #tpu.memory_space<vmem>>, %arg6: memref<32x128xbf16, #tpu.memory_space<vmem>>, %arg7: memref<32x128xbf16, #tpu.memory_space<vmem>>, %arg8: memref<32x128xf32, #tpu.memory_space<vmem>>) attributes {dimension_semantics = [#tpu.dimension_semantics<parallel>, #tpu.dimension_semantics<parallel>, #tpu.dimension_semantics<arbitrary>], iteration_bounds = array<i64: 1, 1, 3>, scalar_prefetch = 0 : i64, scratch_operands = 1 : i64, tpu.core_type = #tpu.core_type<tc>, window_params = [{transform_indices = @transform_0, window_bounds = array<i64: 32, 384>}, {transform_indices = @transform_1, window_bounds = array<i64: 384, 128>}, {transform_indices = @transform_2, window_bounds = array<i64: 1, 128>}, {transform_indices = @transform_3, window_bounds = array<i64: 32, 128>}, {transform_indices = @transform_4, window_bounds = array<i64: 32, 128>}]} {
    %c0_i32 = arith.constant 0 : i32
    %0 = arith.cmpi eq, %arg2, %c0_i32 : i32
    %1 = arith.extui %0 : i1 to i32
    %c0_i32_0 = arith.constant 0 : i32
    %2 = arith.cmpi ne, %1, %c0_i32_0 : i32
    scf.if %2 {
      %cst_9 = arith.constant 0.000000e+00 : f32
      %12 = vector.broadcast %cst_9 : f32 to vector<32x128xf32>
      %c0_10 = arith.constant 0 : index
      %c0_11 = arith.constant 0 : index
      %13 = vector.load %arg8[%c0_10, %c0_11] : memref<32x128xf32, #tpu.memory_space<vmem>>, vector<32x128xf32>
      tpu.vector_store %arg8[%c0_10, %c0_11], %12 {strides = array<i32>} : memref<32x128xf32, #tpu.memory_space<vmem>>, vector<32x128xf32>,
    } else {
    }
    %c0 = arith.constant 0 : index
    %c0_1 = arith.constant 0 : index
    %3 = vector.load %arg8[%c0, %c0_1] : memref<32x128xf32, #tpu.memory_space<vmem>>, vector<32x128xf32>
    %c0_2 = arith.constant 0 : index
    %c0_3 = arith.constant 0 : index
    %4 = vector.load %arg3[%c0_2, %c0_3] : memref<32x384xbf16, #tpu.memory_space<vmem>>, vector<32x384xbf16>
    %c0_4 = arith.constant 0 : index
    %c0_5 = arith.constant 0 : index
    %5 = vector.load %arg4[%c0_4, %c0_5] : memref<384x128xbf16, #tpu.memory_space<vmem>>, vector<384x128xbf16>
    %cst = arith.constant dense<0.000000e+00> : vector<32x128xf32>
    %6 = tpu.matmul %4, %5, %cst {dimension_numbers = #tpu.dot_dimension_numbers<[1], [0], [0], [1], [0, 0, 1, 1], [], []>} : vector<32x384xbf16>, vector<384x128xbf16>, vector<32x128xf32> -> vector<32x128xf32>
    %7 = arith.addf %3, %6 : vector<32x128xf32>
    %c0_6 = arith.constant 0 : index
    %c0_7 = arith.constant 0 : index
    %8 = vector.load %arg8[%c0_6, %c0_7] : memref<32x128xf32, #tpu.memory_space<vmem>>, vector<32x128xf32>
    tpu.vector_store %arg8[%c0_6, %c0_7], %7 {strides = array<i32>} : memref<32x128xf32, #tpu.memory_space<vmem>>, vector<32x128xf32>,
    %c2_i32 = arith.constant 2 : i32
    %9 = arith.cmpi eq, %arg2, %c2_i32 : i32
    %10 = arith.extui %9 : i1 to i32
    %c0_i32_8 = arith.constant 0 : i32
    %11 = arith.cmpi ne, %10, %c0_i32_8 : i32
    scf.if %11 {
      %c0_9 = arith.constant 0 : index
      %c0_10 = arith.constant 0 : index
      %12 = vector.load %arg8[%c0_9, %c0_10] : memref<32x128xf32, #tpu.memory_space<vmem>>, vector<32x128xf32>
      %c0_11 = arith.constant 0 : index
      %c0_12 = arith.constant 0 : index
      %13 = vector.load %arg5[%c0_11, %c0_12] : memref<1x128xf32, #tpu.memory_space<vmem>>, vector<1x128xf32>
      %14 = vector.broadcast %13 : vector<1x128xf32> to vector<32x128xf32>
      %15 = arith.addf %12, %14 : vector<32x128xf32>
      %c0_13 = arith.constant 0 : index
      %c0_14 = arith.constant 0 : index
      %16 = vector.load %arg6[%c0_13, %c0_14] : memref<32x128xbf16, #tpu.memory_space<vmem>>, vector<32x128xbf16>
      %17 = arith.extf %16 : vector<32x128xbf16> to vector<32x128xf32>
      %18 = arith.addf %15, %17 : vector<32x128xf32>
      %cst_15 = arith.constant 0.000000e+00 : f32
      %19 = vector.broadcast %cst_15 : f32 to vector<32x128xf32>
      %20 = arith.maximumf %18, %19 : vector<32x128xf32>
      %21 = arith.truncf %20 : vector<32x128xf32> to vector<32x128xbf16>
      %c0_16 = arith.constant 0 : index
      %c0_17 = arith.constant 0 : index
      %22 = vector.load %arg7[%c0_16, %c0_17] : memref<32x128xbf16, #tpu.memory_space<vmem>>, vector<32x128xbf16>
      tpu.vector_store %arg7[%c0_16, %c0_17], %21 {strides = array<i32>} : memref<32x128xbf16, #tpu.memory_space<vmem>>, vector<32x128xbf16>,
    } else {
    }
    return
  }
  func.func @transform_0(%arg0: i32, %arg1: i32, %arg2: i32) -> (i32, i32) {
    %c0_i32 = arith.constant 0 : i32
    return %arg0, %arg2 : i32, i32
  }
  func.func @transform_1(%arg0: i32, %arg1: i32, %arg2: i32) -> (i32, i32) {
    %c0_i32 = arith.constant 0 : i32
    return %arg2, %arg1 : i32, i32
  }
  func.func @transform_2(%arg0: i32, %arg1: i32, %arg2: i32) -> (i32, i32) {
    %c0_i32 = arith.constant 0 : i32
    %c0_i32_0 = arith.constant 0 : i32
    return %c0_i32, %arg1 : i32, i32
  }
  func.func @transform_3(%arg0: i32, %arg1: i32, %arg2: i32) -> (i32, i32) {
    %c0_i32 = arith.constant 0 : i32
    return %arg0, %arg1 : i32, i32
  }
  func.func @transform_4(%arg0: i32, %arg1: i32, %arg2: i32) -> (i32, i32) {
    %c0_i32 = arith.constant 0 : i32
    return %arg0, %arg1 : i32, i32
  }
}

module attributes {stable_mosaic.version = 11 : i64} {
  func.func @_mm_bias_kernel(%arg0: i32, %arg1: i32, %arg2: i32, %arg3: memref<32x384xbf16, #tpu.memory_space<vmem>>, %arg4: memref<384x128xbf16, #tpu.memory_space<vmem>>, %arg5: memref<1x128xf32, #tpu.memory_space<vmem>>, %arg6: memref<32x128xbf16, #tpu.memory_space<vmem>>, %arg7: memref<32x128xf32, #tpu.memory_space<vmem>>) attributes {dimension_semantics = [#tpu.dimension_semantics<parallel>, #tpu.dimension_semantics<parallel>, #tpu.dimension_semantics<arbitrary>], iteration_bounds = array<i64: 1, 1, 3>, scalar_prefetch = 0 : i64, scratch_operands = 1 : i64, tpu.core_type = #tpu.core_type<tc>, window_params = [{transform_indices = @transform_0, window_bounds = array<i64: 32, 384>}, {transform_indices = @transform_1, window_bounds = array<i64: 384, 128>}, {transform_indices = @transform_2, window_bounds = array<i64: 1, 128>}, {transform_indices = @transform_3, window_bounds = array<i64: 32, 128>}]} {
    %c0_i32 = arith.constant 0 : i32
    %0 = arith.cmpi eq, %arg2, %c0_i32 : i32
    %1 = arith.extui %0 : i1 to i32
    %c0_i32_0 = arith.constant 0 : i32
    %2 = arith.cmpi ne, %1, %c0_i32_0 : i32
    scf.if %2 {
      %cst_9 = arith.constant 0.000000e+00 : f32
      %12 = vector.broadcast %cst_9 : f32 to vector<32x128xf32>
      %c0_10 = arith.constant 0 : index
      %c0_11 = arith.constant 0 : index
      %13 = vector.load %arg7[%c0_10, %c0_11] : memref<32x128xf32, #tpu.memory_space<vmem>>, vector<32x128xf32>
      tpu.vector_store %arg7[%c0_10, %c0_11], %12 {strides = array<i32>} : memref<32x128xf32, #tpu.memory_space<vmem>>, vector<32x128xf32>,
    } else {
    }
    %c0 = arith.constant 0 : index
    %c0_1 = arith.constant 0 : index
    %3 = vector.load %arg7[%c0, %c0_1] : memref<32x128xf32, #tpu.memory_space<vmem>>, vector<32x128xf32>
    %c0_2 = arith.constant 0 : index
    %c0_3 = arith.constant 0 : index
    %4 = vector.load %arg3[%c0_2, %c0_3] : memref<32x384xbf16, #tpu.memory_space<vmem>>, vector<32x384xbf16>
    %c0_4 = arith.constant 0 : index
    %c0_5 = arith.constant 0 : index
    %5 = vector.load %arg4[%c0_4, %c0_5] : memref<384x128xbf16, #tpu.memory_space<vmem>>, vector<384x128xbf16>
    %cst = arith.constant dense<0.000000e+00> : vector<32x128xf32>
    %6 = tpu.matmul %4, %5, %cst {dimension_numbers = #tpu.dot_dimension_numbers<[1], [0], [0], [1], [0, 0, 1, 1], [], []>} : vector<32x384xbf16>, vector<384x128xbf16>, vector<32x128xf32> -> vector<32x128xf32>
    %7 = arith.addf %3, %6 : vector<32x128xf32>
    %c0_6 = arith.constant 0 : index
    %c0_7 = arith.constant 0 : index
    %8 = vector.load %arg7[%c0_6, %c0_7] : memref<32x128xf32, #tpu.memory_space<vmem>>, vector<32x128xf32>
    tpu.vector_store %arg7[%c0_6, %c0_7], %7 {strides = array<i32>} : memref<32x128xf32, #tpu.memory_space<vmem>>, vector<32x128xf32>,
    %c2_i32 = arith.constant 2 : i32
    %9 = arith.cmpi eq, %arg2, %c2_i32 : i32
    %10 = arith.extui %9 : i1 to i32
    %c0_i32_8 = arith.constant 0 : i32
    %11 = arith.cmpi ne, %10, %c0_i32_8 : i32
    scf.if %11 {
      %c0_9 = arith.constant 0 : index
      %c0_10 = arith.constant 0 : index
      %12 = vector.load %arg7[%c0_9, %c0_10] : memref<32x128xf32, #tpu.memory_space<vmem>>, vector<32x128xf32>
      %c0_11 = arith.constant 0 : index
      %c0_12 = arith.constant 0 : index
      %13 = vector.load %arg5[%c0_11, %c0_12] : memref<1x128xf32, #tpu.memory_space<vmem>>, vector<1x128xf32>
      %14 = vector.broadcast %13 : vector<1x128xf32> to vector<32x128xf32>
      %15 = arith.addf %12, %14 : vector<32x128xf32>
      %cst_13 = arith.constant 0.000000e+00 : f32
      %16 = vector.broadcast %cst_13 : f32 to vector<32x128xf32>
      %17 = arith.maximumf %15, %16 : vector<32x128xf32>
      %18 = arith.truncf %17 : vector<32x128xf32> to vector<32x128xbf16>
      %c0_14 = arith.constant 0 : index
      %c0_15 = arith.constant 0 : index
      %19 = vector.load %arg6[%c0_14, %c0_15] : memref<32x128xbf16, #tpu.memory_space<vmem>>, vector<32x128xbf16>
      tpu.vector_store %arg6[%c0_14, %c0_15], %18 {strides = array<i32>} : memref<32x128xbf16, #tpu.memory_space<vmem>>, vector<32x128xbf16>,
    } else {
    }
    return
  }
  func.func @transform_0(%arg0: i32, %arg1: i32, %arg2: i32) -> (i32, i32) {
    %c0_i32 = arith.constant 0 : i32
    return %arg0, %arg2 : i32, i32
  }
  func.func @transform_1(%arg0: i32, %arg1: i32, %arg2: i32) -> (i32, i32) {
    %c0_i32 = arith.constant 0 : i32
    return %arg2, %arg1 : i32, i32
  }
  func.func @transform_2(%arg0: i32, %arg1: i32, %arg2: i32) -> (i32, i32) {
    %c0_i32 = arith.constant 0 : i32
    %c0_i32_0 = arith.constant 0 : i32
    return %c0_i32, %arg1 : i32, i32
  }
  func.func @transform_3(%arg0: i32, %arg1: i32, %arg2: i32) -> (i32, i32) {
    %c0_i32 = arith.constant 0 : i32
    return %arg0, %arg1 : i32, i32
  }
}

module attributes {stable_mosaic.version = 11 : i64} {
  func.func @_mm_bias_kernel(%arg0: i32, %arg1: i32, %arg2: i32, %arg3: memref<32x128xbf16, #tpu.memory_space<vmem>>, %arg4: memref<128x128xbf16, #tpu.memory_space<vmem>>, %arg5: memref<1x128xf32, #tpu.memory_space<vmem>>, %arg6: memref<32x128xbf16, #tpu.memory_space<vmem>>, %arg7: memref<32x128xf32, #tpu.memory_space<vmem>>) attributes {dimension_semantics = [#tpu.dimension_semantics<parallel>, #tpu.dimension_semantics<parallel>, #tpu.dimension_semantics<arbitrary>], iteration_bounds = array<i64: 1, 1, 1>, scalar_prefetch = 0 : i64, scratch_operands = 1 : i64, tpu.core_type = #tpu.core_type<tc>, window_params = [{transform_indices = @transform_0, window_bounds = array<i64: 32, 128>}, {transform_indices = @transform_1, window_bounds = array<i64: 128, 128>}, {transform_indices = @transform_2, window_bounds = array<i64: 1, 128>}, {transform_indices = @transform_3, window_bounds = array<i64: 32, 128>}]} {
    %c0_i32 = arith.constant 0 : i32
    %0 = arith.cmpi eq, %arg2, %c0_i32 : i32
    %1 = arith.extui %0 : i1 to i32
    %c0_i32_0 = arith.constant 0 : i32
    %2 = arith.cmpi ne, %1, %c0_i32_0 : i32
    scf.if %2 {
      %cst_10 = arith.constant 0.000000e+00 : f32
      %12 = vector.broadcast %cst_10 : f32 to vector<32x128xf32>
      %c0_11 = arith.constant 0 : index
      %c0_12 = arith.constant 0 : index
      %13 = vector.load %arg7[%c0_11, %c0_12] : memref<32x128xf32, #tpu.memory_space<vmem>>, vector<32x128xf32>
      tpu.vector_store %arg7[%c0_11, %c0_12], %12 {strides = array<i32>} : memref<32x128xf32, #tpu.memory_space<vmem>>, vector<32x128xf32>,
    } else {
    }
    %c0 = arith.constant 0 : index
    %c0_1 = arith.constant 0 : index
    %3 = vector.load %arg7[%c0, %c0_1] : memref<32x128xf32, #tpu.memory_space<vmem>>, vector<32x128xf32>
    %c0_2 = arith.constant 0 : index
    %c0_3 = arith.constant 0 : index
    %4 = vector.load %arg3[%c0_2, %c0_3] : memref<32x128xbf16, #tpu.memory_space<vmem>>, vector<32x128xbf16>
    %c0_4 = arith.constant 0 : index
    %c0_5 = arith.constant 0 : index
    %5 = vector.load %arg4[%c0_4, %c0_5] : memref<128x128xbf16, #tpu.memory_space<vmem>>, vector<128x128xbf16>
    %cst = arith.constant dense<0.000000e+00> : vector<32x128xf32>
    %6 = tpu.matmul %4, %5, %cst {dimension_numbers = #tpu.dot_dimension_numbers<[1], [0], [0], [1], [0, 0, 1, 1], [], []>} : vector<32x128xbf16>, vector<128x128xbf16>, vector<32x128xf32> -> vector<32x128xf32>
    %7 = arith.addf %3, %6 : vector<32x128xf32>
    %c0_6 = arith.constant 0 : index
    %c0_7 = arith.constant 0 : index
    %8 = vector.load %arg7[%c0_6, %c0_7] : memref<32x128xf32, #tpu.memory_space<vmem>>, vector<32x128xf32>
    tpu.vector_store %arg7[%c0_6, %c0_7], %7 {strides = array<i32>} : memref<32x128xf32, #tpu.memory_space<vmem>>, vector<32x128xf32>,
    %c0_i32_8 = arith.constant 0 : i32
    %9 = arith.cmpi eq, %arg2, %c0_i32_8 : i32
    %10 = arith.extui %9 : i1 to i32
    %c0_i32_9 = arith.constant 0 : i32
    %11 = arith.cmpi ne, %10, %c0_i32_9 : i32
    scf.if %11 {
      %c0_10 = arith.constant 0 : index
      %c0_11 = arith.constant 0 : index
      %12 = vector.load %arg7[%c0_10, %c0_11] : memref<32x128xf32, #tpu.memory_space<vmem>>, vector<32x128xf32>
      %c0_12 = arith.constant 0 : index
      %c0_13 = arith.constant 0 : index
      %13 = vector.load %arg5[%c0_12, %c0_13] : memref<1x128xf32, #tpu.memory_space<vmem>>, vector<1x128xf32>
      %14 = vector.broadcast %13 : vector<1x128xf32> to vector<32x128xf32>
      %15 = arith.addf %12, %14 : vector<32x128xf32>
      %16 = arith.truncf %15 : vector<32x128xf32> to vector<32x128xbf16>
      %c0_14 = arith.constant 0 : index
      %c0_15 = arith.constant 0 : index
      %17 = vector.load %arg6[%c0_14, %c0_15] : memref<32x128xbf16, #tpu.memory_space<vmem>>, vector<32x128xbf16>
      tpu.vector_store %arg6[%c0_14, %c0_15], %16 {strides = array<i32>} : memref<32x128xbf16, #tpu.memory_space<vmem>>, vector<32x128xbf16>,
    } else {
    }
    return
  }
  func.func @transform_0(%arg0: i32, %arg1: i32, %arg2: i32) -> (i32, i32) {
    %c0_i32 = arith.constant 0 : i32
    return %arg0, %arg2 : i32, i32
  }
  func.func @transform_1(%arg0: i32, %arg1: i32, %arg2: i32) -> (i32, i32) {
    %c0_i32 = arith.constant 0 : i32
    return %arg2, %arg1 : i32, i32
  }
  func.func @transform_2(%arg0: i32, %arg1: i32, %arg2: i32) -> (i32, i32) {
    %c0_i32 = arith.constant 0 : i32
    %c0_i32_0 = arith.constant 0 : i32
    return %c0_i32, %arg1 : i32, i32
  }
  func.func @transform_3(%arg0: i32, %arg1: i32, %arg2: i32) -> (i32, i32) {
    %c0_i32 = arith.constant 0 : i32
    return %arg0, %arg1 : i32, i32
  }
}

module attributes {stable_mosaic.version = 11 : i64} {
  func.func @_mm_bias_kernel(%arg0: i32, %arg1: i32, %arg2: i32, %arg3: memref<16x384xbf16, #tpu.memory_space<vmem>>, %arg4: memref<384x256xbf16, #tpu.memory_space<vmem>>, %arg5: memref<1x256xf32, #tpu.memory_space<vmem>>, %arg6: memref<16x256xbf16, #tpu.memory_space<vmem>>, %arg7: memref<16x256xf32, #tpu.memory_space<vmem>>) attributes {dimension_semantics = [#tpu.dimension_semantics<parallel>, #tpu.dimension_semantics<parallel>, #tpu.dimension_semantics<arbitrary>], iteration_bounds = array<i64: 1, 1, 3>, scalar_prefetch = 0 : i64, scratch_operands = 1 : i64, tpu.core_type = #tpu.core_type<tc>, window_params = [{transform_indices = @transform_0, window_bounds = array<i64: 16, 384>}, {transform_indices = @transform_1, window_bounds = array<i64: 384, 256>}, {transform_indices = @transform_2, window_bounds = array<i64: 1, 256>}, {transform_indices = @transform_3, window_bounds = array<i64: 16, 256>}]} {
    %c0_i32 = arith.constant 0 : i32
    %0 = arith.cmpi eq, %arg2, %c0_i32 : i32
    %1 = arith.extui %0 : i1 to i32
    %c0_i32_0 = arith.constant 0 : i32
    %2 = arith.cmpi ne, %1, %c0_i32_0 : i32
    scf.if %2 {
      %cst_9 = arith.constant 0.000000e+00 : f32
      %12 = vector.broadcast %cst_9 : f32 to vector<16x256xf32>
      %c0_10 = arith.constant 0 : index
      %c0_11 = arith.constant 0 : index
      %13 = vector.load %arg7[%c0_10, %c0_11] : memref<16x256xf32, #tpu.memory_space<vmem>>, vector<16x256xf32>
      tpu.vector_store %arg7[%c0_10, %c0_11], %12 {strides = array<i32>} : memref<16x256xf32, #tpu.memory_space<vmem>>, vector<16x256xf32>,
    } else {
    }
    %c0 = arith.constant 0 : index
    %c0_1 = arith.constant 0 : index
    %3 = vector.load %arg7[%c0, %c0_1] : memref<16x256xf32, #tpu.memory_space<vmem>>, vector<16x256xf32>
    %c0_2 = arith.constant 0 : index
    %c0_3 = arith.constant 0 : index
    %4 = vector.load %arg3[%c0_2, %c0_3] : memref<16x384xbf16, #tpu.memory_space<vmem>>, vector<16x384xbf16>
    %c0_4 = arith.constant 0 : index
    %c0_5 = arith.constant 0 : index
    %5 = vector.load %arg4[%c0_4, %c0_5] : memref<384x256xbf16, #tpu.memory_space<vmem>>, vector<384x256xbf16>
    %cst = arith.constant dense<0.000000e+00> : vector<16x256xf32>
    %6 = tpu.matmul %4, %5, %cst {dimension_numbers = #tpu.dot_dimension_numbers<[1], [0], [0], [1], [0, 0, 1, 1], [], []>} : vector<16x384xbf16>, vector<384x256xbf16>, vector<16x256xf32> -> vector<16x256xf32>
    %7 = arith.addf %3, %6 : vector<16x256xf32>
    %c0_6 = arith.constant 0 : index
    %c0_7 = arith.constant 0 : index
    %8 = vector.load %arg7[%c0_6, %c0_7] : memref<16x256xf32, #tpu.memory_space<vmem>>, vector<16x256xf32>
    tpu.vector_store %arg7[%c0_6, %c0_7], %7 {strides = array<i32>} : memref<16x256xf32, #tpu.memory_space<vmem>>, vector<16x256xf32>,
    %c2_i32 = arith.constant 2 : i32
    %9 = arith.cmpi eq, %arg2, %c2_i32 : i32
    %10 = arith.extui %9 : i1 to i32
    %c0_i32_8 = arith.constant 0 : i32
    %11 = arith.cmpi ne, %10, %c0_i32_8 : i32
    scf.if %11 {
      %c0_9 = arith.constant 0 : index
      %c0_10 = arith.constant 0 : index
      %12 = vector.load %arg7[%c0_9, %c0_10] : memref<16x256xf32, #tpu.memory_space<vmem>>, vector<16x256xf32>
      %c0_11 = arith.constant 0 : index
      %c0_12 = arith.constant 0 : index
      %13 = vector.load %arg5[%c0_11, %c0_12] : memref<1x256xf32, #tpu.memory_space<vmem>>, vector<1x256xf32>
      %14 = vector.broadcast %13 : vector<1x256xf32> to vector<16x256xf32>
      %15 = arith.addf %12, %14 : vector<16x256xf32>
      %cst_13 = arith.constant 0.000000e+00 : f32
      %16 = vector.broadcast %cst_13 : f32 to vector<16x256xf32>
      %17 = arith.maximumf %15, %16 : vector<16x256xf32>
      %18 = arith.truncf %17 : vector<16x256xf32> to vector<16x256xbf16>
      %c0_14 = arith.constant 0 : index
      %c0_15 = arith.constant 0 : index
      %19 = vector.load %arg6[%c0_14, %c0_15] : memref<16x256xbf16, #tpu.memory_space<vmem>>, vector<16x256xbf16>
      tpu.vector_store %arg6[%c0_14, %c0_15], %18 {strides = array<i32>} : memref<16x256xbf16, #tpu.memory_space<vmem>>, vector<16x256xbf16>,
    } else {
    }
    return
  }
  func.func @transform_0(%arg0: i32, %arg1: i32, %arg2: i32) -> (i32, i32) {
    %c0_i32 = arith.constant 0 : i32
    return %arg0, %arg2 : i32, i32
  }
  func.func @transform_1(%arg0: i32, %arg1: i32, %arg2: i32) -> (i32, i32) {
    %c0_i32 = arith.constant 0 : i32
    return %arg2, %arg1 : i32, i32
  }
  func.func @transform_2(%arg0: i32, %arg1: i32, %arg2: i32) -> (i32, i32) {
    %c0_i32 = arith.constant 0 : i32
    %c0_i32_0 = arith.constant 0 : i32
    return %c0_i32, %arg1 : i32, i32
  }
  func.func @transform_3(%arg0: i32, %arg1: i32, %arg2: i32) -> (i32, i32) {
    %c0_i32 = arith.constant 0 : i32
    return %arg0, %arg1 : i32, i32
  }
}

module attributes {stable_mosaic.version = 11 : i64} {
  func.func @_mm_bias_res_relu_kernel(%arg0: i32, %arg1: i32, %arg2: i32, %arg3: memref<16x384xbf16, #tpu.memory_space<vmem>>, %arg4: memref<384x256xbf16, #tpu.memory_space<vmem>>, %arg5: memref<1x256xf32, #tpu.memory_space<vmem>>, %arg6: memref<16x256xbf16, #tpu.memory_space<vmem>>, %arg7: memref<16x256xbf16, #tpu.memory_space<vmem>>, %arg8: memref<16x256xf32, #tpu.memory_space<vmem>>) attributes {dimension_semantics = [#tpu.dimension_semantics<parallel>, #tpu.dimension_semantics<parallel>, #tpu.dimension_semantics<arbitrary>], iteration_bounds = array<i64: 1, 1, 6>, scalar_prefetch = 0 : i64, scratch_operands = 1 : i64, tpu.core_type = #tpu.core_type<tc>, window_params = [{transform_indices = @transform_0, window_bounds = array<i64: 16, 384>}, {transform_indices = @transform_1, window_bounds = array<i64: 384, 256>}, {transform_indices = @transform_2, window_bounds = array<i64: 1, 256>}, {transform_indices = @transform_3, window_bounds = array<i64: 16, 256>}, {transform_indices = @transform_4, window_bounds = array<i64: 16, 256>}]} {
    %c0_i32 = arith.constant 0 : i32
    %0 = arith.cmpi eq, %arg2, %c0_i32 : i32
    %1 = arith.extui %0 : i1 to i32
    %c0_i32_0 = arith.constant 0 : i32
    %2 = arith.cmpi ne, %1, %c0_i32_0 : i32
    scf.if %2 {
      %cst_9 = arith.constant 0.000000e+00 : f32
      %12 = vector.broadcast %cst_9 : f32 to vector<16x256xf32>
      %c0_10 = arith.constant 0 : index
      %c0_11 = arith.constant 0 : index
      %13 = vector.load %arg8[%c0_10, %c0_11] : memref<16x256xf32, #tpu.memory_space<vmem>>, vector<16x256xf32>
      tpu.vector_store %arg8[%c0_10, %c0_11], %12 {strides = array<i32>} : memref<16x256xf32, #tpu.memory_space<vmem>>, vector<16x256xf32>,
    } else {
    }
    %c0 = arith.constant 0 : index
    %c0_1 = arith.constant 0 : index
    %3 = vector.load %arg8[%c0, %c0_1] : memref<16x256xf32, #tpu.memory_space<vmem>>, vector<16x256xf32>
    %c0_2 = arith.constant 0 : index
    %c0_3 = arith.constant 0 : index
    %4 = vector.load %arg3[%c0_2, %c0_3] : memref<16x384xbf16, #tpu.memory_space<vmem>>, vector<16x384xbf16>
    %c0_4 = arith.constant 0 : index
    %c0_5 = arith.constant 0 : index
    %5 = vector.load %arg4[%c0_4, %c0_5] : memref<384x256xbf16, #tpu.memory_space<vmem>>, vector<384x256xbf16>
    %cst = arith.constant dense<0.000000e+00> : vector<16x256xf32>
    %6 = tpu.matmul %4, %5, %cst {dimension_numbers = #tpu.dot_dimension_numbers<[1], [0], [0], [1], [0, 0, 1, 1], [], []>} : vector<16x384xbf16>, vector<384x256xbf16>, vector<16x256xf32> -> vector<16x256xf32>
    %7 = arith.addf %3, %6 : vector<16x256xf32>
    %c0_6 = arith.constant 0 : index
    %c0_7 = arith.constant 0 : index
    %8 = vector.load %arg8[%c0_6, %c0_7] : memref<16x256xf32, #tpu.memory_space<vmem>>, vector<16x256xf32>
    tpu.vector_store %arg8[%c0_6, %c0_7], %7 {strides = array<i32>} : memref<16x256xf32, #tpu.memory_space<vmem>>, vector<16x256xf32>,
    %c5_i32 = arith.constant 5 : i32
    %9 = arith.cmpi eq, %arg2, %c5_i32 : i32
    %10 = arith.extui %9 : i1 to i32
    %c0_i32_8 = arith.constant 0 : i32
    %11 = arith.cmpi ne, %10, %c0_i32_8 : i32
    scf.if %11 {
      %c0_9 = arith.constant 0 : index
      %c0_10 = arith.constant 0 : index
      %12 = vector.load %arg8[%c0_9, %c0_10] : memref<16x256xf32, #tpu.memory_space<vmem>>, vector<16x256xf32>
      %c0_11 = arith.constant 0 : index
      %c0_12 = arith.constant 0 : index
      %13 = vector.load %arg5[%c0_11, %c0_12] : memref<1x256xf32, #tpu.memory_space<vmem>>, vector<1x256xf32>
      %14 = vector.broadcast %13 : vector<1x256xf32> to vector<16x256xf32>
      %15 = arith.addf %12, %14 : vector<16x256xf32>
      %c0_13 = arith.constant 0 : index
      %c0_14 = arith.constant 0 : index
      %16 = vector.load %arg6[%c0_13, %c0_14] : memref<16x256xbf16, #tpu.memory_space<vmem>>, vector<16x256xbf16>
      %17 = arith.extf %16 : vector<16x256xbf16> to vector<16x256xf32>
      %18 = arith.addf %15, %17 : vector<16x256xf32>
      %cst_15 = arith.constant 0.000000e+00 : f32
      %19 = vector.broadcast %cst_15 : f32 to vector<16x256xf32>
      %20 = arith.maximumf %18, %19 : vector<16x256xf32>
      %21 = arith.truncf %20 : vector<16x256xf32> to vector<16x256xbf16>
      %c0_16 = arith.constant 0 : index
      %c0_17 = arith.constant 0 : index
      %22 = vector.load %arg7[%c0_16, %c0_17] : memref<16x256xbf16, #tpu.memory_space<vmem>>, vector<16x256xbf16>
      tpu.vector_store %arg7[%c0_16, %c0_17], %21 {strides = array<i32>} : memref<16x256xbf16, #tpu.memory_space<vmem>>, vector<16x256xbf16>,
    } else {
    }
    return
  }
  func.func @transform_0(%arg0: i32, %arg1: i32, %arg2: i32) -> (i32, i32) {
    %c0_i32 = arith.constant 0 : i32
    return %arg0, %arg2 : i32, i32
  }
  func.func @transform_1(%arg0: i32, %arg1: i32, %arg2: i32) -> (i32, i32) {
    %c0_i32 = arith.constant 0 : i32
    return %arg2, %arg1 : i32, i32
  }
  func.func @transform_2(%arg0: i32, %arg1: i32, %arg2: i32) -> (i32, i32) {
    %c0_i32 = arith.constant 0 : i32
    %c0_i32_0 = arith.constant 0 : i32
    return %c0_i32, %arg1 : i32, i32
  }
  func.func @transform_3(%arg0: i32, %arg1: i32, %arg2: i32) -> (i32, i32) {
    %c0_i32 = arith.constant 0 : i32
    return %arg0, %arg1 : i32, i32
  }
  func.func @transform_4(%arg0: i32, %arg1: i32, %arg2: i32) -> (i32, i32) {
    %c0_i32 = arith.constant 0 : i32
    return %arg0, %arg1 : i32, i32
  }
}

module attributes {stable_mosaic.version = 11 : i64} {
  func.func @_mm_bias_kernel(%arg0: i32, %arg1: i32, %arg2: i32, %arg3: memref<16x128xbf16, #tpu.memory_space<vmem>>, %arg4: memref<128x256xbf16, #tpu.memory_space<vmem>>, %arg5: memref<1x256xf32, #tpu.memory_space<vmem>>, %arg6: memref<16x256xbf16, #tpu.memory_space<vmem>>, %arg7: memref<16x256xf32, #tpu.memory_space<vmem>>) attributes {dimension_semantics = [#tpu.dimension_semantics<parallel>, #tpu.dimension_semantics<parallel>, #tpu.dimension_semantics<arbitrary>], iteration_bounds = array<i64: 1, 1, 1>, scalar_prefetch = 0 : i64, scratch_operands = 1 : i64, tpu.core_type = #tpu.core_type<tc>, window_params = [{transform_indices = @transform_0, window_bounds = array<i64: 16, 128>}, {transform_indices = @transform_1, window_bounds = array<i64: 128, 256>}, {transform_indices = @transform_2, window_bounds = array<i64: 1, 256>}, {transform_indices = @transform_3, window_bounds = array<i64: 16, 256>}]} {
    %c0_i32 = arith.constant 0 : i32
    %0 = arith.cmpi eq, %arg2, %c0_i32 : i32
    %1 = arith.extui %0 : i1 to i32
    %c0_i32_0 = arith.constant 0 : i32
    %2 = arith.cmpi ne, %1, %c0_i32_0 : i32
    scf.if %2 {
      %cst_10 = arith.constant 0.000000e+00 : f32
      %12 = vector.broadcast %cst_10 : f32 to vector<16x256xf32>
      %c0_11 = arith.constant 0 : index
      %c0_12 = arith.constant 0 : index
      %13 = vector.load %arg7[%c0_11, %c0_12] : memref<16x256xf32, #tpu.memory_space<vmem>>, vector<16x256xf32>
      tpu.vector_store %arg7[%c0_11, %c0_12], %12 {strides = array<i32>} : memref<16x256xf32, #tpu.memory_space<vmem>>, vector<16x256xf32>,
    } else {
    }
    %c0 = arith.constant 0 : index
    %c0_1 = arith.constant 0 : index
    %3 = vector.load %arg7[%c0, %c0_1] : memref<16x256xf32, #tpu.memory_space<vmem>>, vector<16x256xf32>
    %c0_2 = arith.constant 0 : index
    %c0_3 = arith.constant 0 : index
    %4 = vector.load %arg3[%c0_2, %c0_3] : memref<16x128xbf16, #tpu.memory_space<vmem>>, vector<16x128xbf16>
    %c0_4 = arith.constant 0 : index
    %c0_5 = arith.constant 0 : index
    %5 = vector.load %arg4[%c0_4, %c0_5] : memref<128x256xbf16, #tpu.memory_space<vmem>>, vector<128x256xbf16>
    %cst = arith.constant dense<0.000000e+00> : vector<16x256xf32>
    %6 = tpu.matmul %4, %5, %cst {dimension_numbers = #tpu.dot_dimension_numbers<[1], [0], [0], [1], [0, 0, 1, 1], [], []>} : vector<16x128xbf16>, vector<128x256xbf16>, vector<16x256xf32> -> vector<16x256xf32>
    %7 = arith.addf %3, %6 : vector<16x256xf32>
    %c0_6 = arith.constant 0 : index
    %c0_7 = arith.constant 0 : index
    %8 = vector.load %arg7[%c0_6, %c0_7] : memref<16x256xf32, #tpu.memory_space<vmem>>, vector<16x256xf32>
    tpu.vector_store %arg7[%c0_6, %c0_7], %7 {strides = array<i32>} : memref<16x256xf32, #tpu.memory_space<vmem>>, vector<16x256xf32>,
    %c0_i32_8 = arith.constant 0 : i32
    %9 = arith.cmpi eq, %arg2, %c0_i32_8 : i32
    %10 = arith.extui %9 : i1 to i32
    %c0_i32_9 = arith.constant 0 : i32
    %11 = arith.cmpi ne, %10, %c0_i32_9 : i32
    scf.if %11 {
      %c0_10 = arith.constant 0 : index
      %c0_11 = arith.constant 0 : index
      %12 = vector.load %arg7[%c0_10, %c0_11] : memref<16x256xf32, #tpu.memory_space<vmem>>, vector<16x256xf32>
      %c0_12 = arith.constant 0 : index
      %c0_13 = arith.constant 0 : index
      %13 = vector.load %arg5[%c0_12, %c0_13] : memref<1x256xf32, #tpu.memory_space<vmem>>, vector<1x256xf32>
      %14 = vector.broadcast %13 : vector<1x256xf32> to vector<16x256xf32>
      %15 = arith.addf %12, %14 : vector<16x256xf32>
      %16 = arith.truncf %15 : vector<16x256xf32> to vector<16x256xbf16>
      %c0_14 = arith.constant 0 : index
      %c0_15 = arith.constant 0 : index
      %17 = vector.load %arg6[%c0_14, %c0_15] : memref<16x256xbf16, #tpu.memory_space<vmem>>, vector<16x256xbf16>
      tpu.vector_store %arg6[%c0_14, %c0_15], %16 {strides = array<i32>} : memref<16x256xbf16, #tpu.memory_space<vmem>>, vector<16x256xbf16>,
    } else {
    }
    return
  }
  func.func @transform_0(%arg0: i32, %arg1: i32, %arg2: i32) -> (i32, i32) {
    %c0_i32 = arith.constant 0 : i32
    return %arg0, %arg2 : i32, i32
  }
  func.func @transform_1(%arg0: i32, %arg1: i32, %arg2: i32) -> (i32, i32) {
    %c0_i32 = arith.constant 0 : i32
    return %arg2, %arg1 : i32, i32
  }
  func.func @transform_2(%arg0: i32, %arg1: i32, %arg2: i32) -> (i32, i32) {
    %c0_i32 = arith.constant 0 : i32
    %c0_i32_0 = arith.constant 0 : i32
    return %c0_i32, %arg1 : i32, i32
  }
  func.func @transform_3(%arg0: i32, %arg1: i32, %arg2: i32) -> (i32, i32) {
    %c0_i32 = arith.constant 0 : i32
    return %arg0, %arg1 : i32, i32
  }
}

module attributes {stable_mosaic.version = 11 : i64} {
  func.func @_mm_bias_kernel(%arg0: i32, %arg1: i32, %arg2: i32, %arg3: memref<16x384xbf16, #tpu.memory_space<vmem>>, %arg4: memref<384x256xbf16, #tpu.memory_space<vmem>>, %arg5: memref<1x256xf32, #tpu.memory_space<vmem>>, %arg6: memref<16x256xbf16, #tpu.memory_space<vmem>>, %arg7: memref<16x256xf32, #tpu.memory_space<vmem>>) attributes {dimension_semantics = [#tpu.dimension_semantics<parallel>, #tpu.dimension_semantics<parallel>, #tpu.dimension_semantics<arbitrary>], iteration_bounds = array<i64: 1, 1, 6>, scalar_prefetch = 0 : i64, scratch_operands = 1 : i64, tpu.core_type = #tpu.core_type<tc>, window_params = [{transform_indices = @transform_0, window_bounds = array<i64: 16, 384>}, {transform_indices = @transform_1, window_bounds = array<i64: 384, 256>}, {transform_indices = @transform_2, window_bounds = array<i64: 1, 256>}, {transform_indices = @transform_3, window_bounds = array<i64: 16, 256>}]} {
    %c0_i32 = arith.constant 0 : i32
    %0 = arith.cmpi eq, %arg2, %c0_i32 : i32
    %1 = arith.extui %0 : i1 to i32
    %c0_i32_0 = arith.constant 0 : i32
    %2 = arith.cmpi ne, %1, %c0_i32_0 : i32
    scf.if %2 {
      %cst_9 = arith.constant 0.000000e+00 : f32
      %12 = vector.broadcast %cst_9 : f32 to vector<16x256xf32>
      %c0_10 = arith.constant 0 : index
      %c0_11 = arith.constant 0 : index
      %13 = vector.load %arg7[%c0_10, %c0_11] : memref<16x256xf32, #tpu.memory_space<vmem>>, vector<16x256xf32>
      tpu.vector_store %arg7[%c0_10, %c0_11], %12 {strides = array<i32>} : memref<16x256xf32, #tpu.memory_space<vmem>>, vector<16x256xf32>,
    } else {
    }
    %c0 = arith.constant 0 : index
    %c0_1 = arith.constant 0 : index
    %3 = vector.load %arg7[%c0, %c0_1] : memref<16x256xf32, #tpu.memory_space<vmem>>, vector<16x256xf32>
    %c0_2 = arith.constant 0 : index
    %c0_3 = arith.constant 0 : index
    %4 = vector.load %arg3[%c0_2, %c0_3] : memref<16x384xbf16, #tpu.memory_space<vmem>>, vector<16x384xbf16>
    %c0_4 = arith.constant 0 : index
    %c0_5 = arith.constant 0 : index
    %5 = vector.load %arg4[%c0_4, %c0_5] : memref<384x256xbf16, #tpu.memory_space<vmem>>, vector<384x256xbf16>
    %cst = arith.constant dense<0.000000e+00> : vector<16x256xf32>
    %6 = tpu.matmul %4, %5, %cst {dimension_numbers = #tpu.dot_dimension_numbers<[1], [0], [0], [1], [0, 0, 1, 1], [], []>} : vector<16x384xbf16>, vector<384x256xbf16>, vector<16x256xf32> -> vector<16x256xf32>
    %7 = arith.addf %3, %6 : vector<16x256xf32>
    %c0_6 = arith.constant 0 : index
    %c0_7 = arith.constant 0 : index
    %8 = vector.load %arg7[%c0_6, %c0_7] : memref<16x256xf32, #tpu.memory_space<vmem>>, vector<16x256xf32>
    tpu.vector_store %arg7[%c0_6, %c0_7], %7 {strides = array<i32>} : memref<16x256xf32, #tpu.memory_space<vmem>>, vector<16x256xf32>,
    %c5_i32 = arith.constant 5 : i32
    %9 = arith.cmpi eq, %arg2, %c5_i32 : i32
    %10 = arith.extui %9 : i1 to i32
    %c0_i32_8 = arith.constant 0 : i32
    %11 = arith.cmpi ne, %10, %c0_i32_8 : i32
    scf.if %11 {
      %c0_9 = arith.constant 0 : index
      %c0_10 = arith.constant 0 : index
      %12 = vector.load %arg7[%c0_9, %c0_10] : memref<16x256xf32, #tpu.memory_space<vmem>>, vector<16x256xf32>
      %c0_11 = arith.constant 0 : index
      %c0_12 = arith.constant 0 : index
      %13 = vector.load %arg5[%c0_11, %c0_12] : memref<1x256xf32, #tpu.memory_space<vmem>>, vector<1x256xf32>
      %14 = vector.broadcast %13 : vector<1x256xf32> to vector<16x256xf32>
      %15 = arith.addf %12, %14 : vector<16x256xf32>
      %cst_13 = arith.constant 0.000000e+00 : f32
      %16 = vector.broadcast %cst_13 : f32 to vector<16x256xf32>
      %17 = arith.maximumf %15, %16 : vector<16x256xf32>
      %18 = arith.truncf %17 : vector<16x256xf32> to vector<16x256xbf16>
      %c0_14 = arith.constant 0 : index
      %c0_15 = arith.constant 0 : index
      %19 = vector.load %arg6[%c0_14, %c0_15] : memref<16x256xbf16, #tpu.memory_space<vmem>>, vector<16x256xbf16>
      tpu.vector_store %arg6[%c0_14, %c0_15], %18 {strides = array<i32>} : memref<16x256xbf16, #tpu.memory_space<vmem>>, vector<16x256xbf16>,
    } else {
    }
    return
  }
  func.func @transform_0(%arg0: i32, %arg1: i32, %arg2: i32) -> (i32, i32) {
    %c0_i32 = arith.constant 0 : i32
    return %arg0, %arg2 : i32, i32
  }
  func.func @transform_1(%arg0: i32, %arg1: i32, %arg2: i32) -> (i32, i32) {
    %c0_i32 = arith.constant 0 : i32
    return %arg2, %arg1 : i32, i32
  }
  func.func @transform_2(%arg0: i32, %arg1: i32, %arg2: i32) -> (i32, i32) {
    %c0_i32 = arith.constant 0 : i32
    %c0_i32_0 = arith.constant 0 : i32
    return %c0_i32, %arg1 : i32, i32
  }
  func.func @transform_3(%arg0: i32, %arg1: i32, %arg2: i32) -> (i32, i32) {
    %c0_i32 = arith.constant 0 : i32
    return %arg0, %arg1 : i32, i32
  }
}

module attributes {stable_mosaic.version = 11 : i64} {
  func.func @_mm_bias_kernel(%arg0: i32, %arg1: i32, %arg2: i32, %arg3: memref<16x384xbf16, #tpu.memory_space<vmem>>, %arg4: memref<384x256xbf16, #tpu.memory_space<vmem>>, %arg5: memref<1x256xf32, #tpu.memory_space<vmem>>, %arg6: memref<16x256xbf16, #tpu.memory_space<vmem>>, %arg7: memref<16x256xf32, #tpu.memory_space<vmem>>) attributes {dimension_semantics = [#tpu.dimension_semantics<parallel>, #tpu.dimension_semantics<parallel>, #tpu.dimension_semantics<arbitrary>], iteration_bounds = array<i64: 1, 2, 6>, scalar_prefetch = 0 : i64, scratch_operands = 1 : i64, tpu.core_type = #tpu.core_type<tc>, window_params = [{transform_indices = @transform_0, window_bounds = array<i64: 16, 384>}, {transform_indices = @transform_1, window_bounds = array<i64: 384, 256>}, {transform_indices = @transform_2, window_bounds = array<i64: 1, 256>}, {transform_indices = @transform_3, window_bounds = array<i64: 16, 256>}]} {
    %c0_i32 = arith.constant 0 : i32
    %0 = arith.cmpi eq, %arg2, %c0_i32 : i32
    %1 = arith.extui %0 : i1 to i32
    %c0_i32_0 = arith.constant 0 : i32
    %2 = arith.cmpi ne, %1, %c0_i32_0 : i32
    scf.if %2 {
      %cst_9 = arith.constant 0.000000e+00 : f32
      %12 = vector.broadcast %cst_9 : f32 to vector<16x256xf32>
      %c0_10 = arith.constant 0 : index
      %c0_11 = arith.constant 0 : index
      %13 = vector.load %arg7[%c0_10, %c0_11] : memref<16x256xf32, #tpu.memory_space<vmem>>, vector<16x256xf32>
      tpu.vector_store %arg7[%c0_10, %c0_11], %12 {strides = array<i32>} : memref<16x256xf32, #tpu.memory_space<vmem>>, vector<16x256xf32>,
    } else {
    }
    %c0 = arith.constant 0 : index
    %c0_1 = arith.constant 0 : index
    %3 = vector.load %arg7[%c0, %c0_1] : memref<16x256xf32, #tpu.memory_space<vmem>>, vector<16x256xf32>
    %c0_2 = arith.constant 0 : index
    %c0_3 = arith.constant 0 : index
    %4 = vector.load %arg3[%c0_2, %c0_3] : memref<16x384xbf16, #tpu.memory_space<vmem>>, vector<16x384xbf16>
    %c0_4 = arith.constant 0 : index
    %c0_5 = arith.constant 0 : index
    %5 = vector.load %arg4[%c0_4, %c0_5] : memref<384x256xbf16, #tpu.memory_space<vmem>>, vector<384x256xbf16>
    %cst = arith.constant dense<0.000000e+00> : vector<16x256xf32>
    %6 = tpu.matmul %4, %5, %cst {dimension_numbers = #tpu.dot_dimension_numbers<[1], [0], [0], [1], [0, 0, 1, 1], [], []>} : vector<16x384xbf16>, vector<384x256xbf16>, vector<16x256xf32> -> vector<16x256xf32>
    %7 = arith.addf %3, %6 : vector<16x256xf32>
    %c0_6 = arith.constant 0 : index
    %c0_7 = arith.constant 0 : index
    %8 = vector.load %arg7[%c0_6, %c0_7] : memref<16x256xf32, #tpu.memory_space<vmem>>, vector<16x256xf32>
    tpu.vector_store %arg7[%c0_6, %c0_7], %7 {strides = array<i32>} : memref<16x256xf32, #tpu.memory_space<vmem>>, vector<16x256xf32>,
    %c5_i32 = arith.constant 5 : i32
    %9 = arith.cmpi eq, %arg2, %c5_i32 : i32
    %10 = arith.extui %9 : i1 to i32
    %c0_i32_8 = arith.constant 0 : i32
    %11 = arith.cmpi ne, %10, %c0_i32_8 : i32
    scf.if %11 {
      %c0_9 = arith.constant 0 : index
      %c0_10 = arith.constant 0 : index
      %12 = vector.load %arg7[%c0_9, %c0_10] : memref<16x256xf32, #tpu.memory_space<vmem>>, vector<16x256xf32>
      %c0_11 = arith.constant 0 : index
      %c0_12 = arith.constant 0 : index
      %13 = vector.load %arg5[%c0_11, %c0_12] : memref<1x256xf32, #tpu.memory_space<vmem>>, vector<1x256xf32>
      %14 = vector.broadcast %13 : vector<1x256xf32> to vector<16x256xf32>
      %15 = arith.addf %12, %14 : vector<16x256xf32>
      %cst_13 = arith.constant 0.000000e+00 : f32
      %16 = vector.broadcast %cst_13 : f32 to vector<16x256xf32>
      %17 = arith.maximumf %15, %16 : vector<16x256xf32>
      %18 = arith.truncf %17 : vector<16x256xf32> to vector<16x256xbf16>
      %c0_14 = arith.constant 0 : index
      %c0_15 = arith.constant 0 : index
      %19 = vector.load %arg6[%c0_14, %c0_15] : memref<16x256xbf16, #tpu.memory_space<vmem>>, vector<16x256xbf16>
      tpu.vector_store %arg6[%c0_14, %c0_15], %18 {strides = array<i32>} : memref<16x256xbf16, #tpu.memory_space<vmem>>, vector<16x256xbf16>,
    } else {
    }
    return
  }
  func.func @transform_0(%arg0: i32, %arg1: i32, %arg2: i32) -> (i32, i32) {
    %c0_i32 = arith.constant 0 : i32
    return %arg0, %arg2 : i32, i32
  }
  func.func @transform_1(%arg0: i32, %arg1: i32, %arg2: i32) -> (i32, i32) {
    %c0_i32 = arith.constant 0 : i32
    return %arg2, %arg1 : i32, i32
  }
  func.func @transform_2(%arg0: i32, %arg1: i32, %arg2: i32) -> (i32, i32) {
    %c0_i32 = arith.constant 0 : i32
    %c0_i32_0 = arith.constant 0 : i32
    return %c0_i32, %arg1 : i32, i32
  }
  func.func @transform_3(%arg0: i32, %arg1: i32, %arg2: i32) -> (i32, i32) {
    %c0_i32 = arith.constant 0 : i32
    return %arg0, %arg1 : i32, i32
  }
}

module attributes {stable_mosaic.version = 11 : i64} {
  func.func @_mm_bias_kernel(%arg0: i32, %arg1: i32, %arg2: i32, %arg3: memref<16x256xbf16, #tpu.memory_space<vmem>>, %arg4: memref<256x256xbf16, #tpu.memory_space<vmem>>, %arg5: memref<1x256xf32, #tpu.memory_space<vmem>>, %arg6: memref<16x256xbf16, #tpu.memory_space<vmem>>, %arg7: memref<16x256xf32, #tpu.memory_space<vmem>>) attributes {dimension_semantics = [#tpu.dimension_semantics<parallel>, #tpu.dimension_semantics<parallel>, #tpu.dimension_semantics<arbitrary>], iteration_bounds = array<i64: 1, 2, 1>, scalar_prefetch = 0 : i64, scratch_operands = 1 : i64, tpu.core_type = #tpu.core_type<tc>, window_params = [{transform_indices = @transform_0, window_bounds = array<i64: 16, 256>}, {transform_indices = @transform_1, window_bounds = array<i64: 256, 256>}, {transform_indices = @transform_2, window_bounds = array<i64: 1, 256>}, {transform_indices = @transform_3, window_bounds = array<i64: 16, 256>}]} {
    %c0_i32 = arith.constant 0 : i32
    %0 = arith.cmpi eq, %arg2, %c0_i32 : i32
    %1 = arith.extui %0 : i1 to i32
    %c0_i32_0 = arith.constant 0 : i32
    %2 = arith.cmpi ne, %1, %c0_i32_0 : i32
    scf.if %2 {
      %cst_10 = arith.constant 0.000000e+00 : f32
      %12 = vector.broadcast %cst_10 : f32 to vector<16x256xf32>
      %c0_11 = arith.constant 0 : index
      %c0_12 = arith.constant 0 : index
      %13 = vector.load %arg7[%c0_11, %c0_12] : memref<16x256xf32, #tpu.memory_space<vmem>>, vector<16x256xf32>
      tpu.vector_store %arg7[%c0_11, %c0_12], %12 {strides = array<i32>} : memref<16x256xf32, #tpu.memory_space<vmem>>, vector<16x256xf32>,
    } else {
    }
    %c0 = arith.constant 0 : index
    %c0_1 = arith.constant 0 : index
    %3 = vector.load %arg7[%c0, %c0_1] : memref<16x256xf32, #tpu.memory_space<vmem>>, vector<16x256xf32>
    %c0_2 = arith.constant 0 : index
    %c0_3 = arith.constant 0 : index
    %4 = vector.load %arg3[%c0_2, %c0_3] : memref<16x256xbf16, #tpu.memory_space<vmem>>, vector<16x256xbf16>
    %c0_4 = arith.constant 0 : index
    %c0_5 = arith.constant 0 : index
    %5 = vector.load %arg4[%c0_4, %c0_5] : memref<256x256xbf16, #tpu.memory_space<vmem>>, vector<256x256xbf16>
    %cst = arith.constant dense<0.000000e+00> : vector<16x256xf32>
    %6 = tpu.matmul %4, %5, %cst {dimension_numbers = #tpu.dot_dimension_numbers<[1], [0], [0], [1], [0, 0, 1, 1], [], []>} : vector<16x256xbf16>, vector<256x256xbf16>, vector<16x256xf32> -> vector<16x256xf32>
    %7 = arith.addf %3, %6 : vector<16x256xf32>
    %c0_6 = arith.constant 0 : index
    %c0_7 = arith.constant 0 : index
    %8 = vector.load %arg7[%c0_6, %c0_7] : memref<16x256xf32, #tpu.memory_space<vmem>>, vector<16x256xf32>
    tpu.vector_store %arg7[%c0_6, %c0_7], %7 {strides = array<i32>} : memref<16x256xf32, #tpu.memory_space<vmem>>, vector<16x256xf32>,
    %c0_i32_8 = arith.constant 0 : i32
    %9 = arith.cmpi eq, %arg2, %c0_i32_8 : i32
    %10 = arith.extui %9 : i1 to i32
    %c0_i32_9 = arith.constant 0 : i32
    %11 = arith.cmpi ne, %10, %c0_i32_9 : i32
    scf.if %11 {
      %c0_10 = arith.constant 0 : index
      %c0_11 = arith.constant 0 : index
      %12 = vector.load %arg7[%c0_10, %c0_11] : memref<16x256xf32, #tpu.memory_space<vmem>>, vector<16x256xf32>
      %c0_12 = arith.constant 0 : index
      %c0_13 = arith.constant 0 : index
      %13 = vector.load %arg5[%c0_12, %c0_13] : memref<1x256xf32, #tpu.memory_space<vmem>>, vector<1x256xf32>
      %14 = vector.broadcast %13 : vector<1x256xf32> to vector<16x256xf32>
      %15 = arith.addf %12, %14 : vector<16x256xf32>
      %16 = arith.truncf %15 : vector<16x256xf32> to vector<16x256xbf16>
      %c0_14 = arith.constant 0 : index
      %c0_15 = arith.constant 0 : index
      %17 = vector.load %arg6[%c0_14, %c0_15] : memref<16x256xbf16, #tpu.memory_space<vmem>>, vector<16x256xbf16>
      tpu.vector_store %arg6[%c0_14, %c0_15], %16 {strides = array<i32>} : memref<16x256xbf16, #tpu.memory_space<vmem>>, vector<16x256xbf16>,
    } else {
    }
    return
  }
  func.func @transform_0(%arg0: i32, %arg1: i32, %arg2: i32) -> (i32, i32) {
    %c0_i32 = arith.constant 0 : i32
    return %arg0, %arg2 : i32, i32
  }
  func.func @transform_1(%arg0: i32, %arg1: i32, %arg2: i32) -> (i32, i32) {
    %c0_i32 = arith.constant 0 : i32
    return %arg2, %arg1 : i32, i32
  }
  func.func @transform_2(%arg0: i32, %arg1: i32, %arg2: i32) -> (i32, i32) {
    %c0_i32 = arith.constant 0 : i32
    %c0_i32_0 = arith.constant 0 : i32
    return %c0_i32, %arg1 : i32, i32
  }
  func.func @transform_3(%arg0: i32, %arg1: i32, %arg2: i32) -> (i32, i32) {
    %c0_i32 = arith.constant 0 : i32
    return %arg0, %arg1 : i32, i32
  }
}

module attributes {stable_mosaic.version = 11 : i64} {
  func.func @_mm_bias_res_relu_kernel(%arg0: i32, %arg1: i32, %arg2: i32, %arg3: memref<16x512xbf16, #tpu.memory_space<vmem>>, %arg4: memref<512x256xbf16, #tpu.memory_space<vmem>>, %arg5: memref<1x256xf32, #tpu.memory_space<vmem>>, %arg6: memref<16x256xbf16, #tpu.memory_space<vmem>>, %arg7: memref<16x256xbf16, #tpu.memory_space<vmem>>, %arg8: memref<16x256xf32, #tpu.memory_space<vmem>>) attributes {dimension_semantics = [#tpu.dimension_semantics<parallel>, #tpu.dimension_semantics<parallel>, #tpu.dimension_semantics<arbitrary>], iteration_bounds = array<i64: 1, 2, 9>, scalar_prefetch = 0 : i64, scratch_operands = 1 : i64, tpu.core_type = #tpu.core_type<tc>, window_params = [{transform_indices = @transform_0, window_bounds = array<i64: 16, 512>}, {transform_indices = @transform_1, window_bounds = array<i64: 512, 256>}, {transform_indices = @transform_2, window_bounds = array<i64: 1, 256>}, {transform_indices = @transform_3, window_bounds = array<i64: 16, 256>}, {transform_indices = @transform_4, window_bounds = array<i64: 16, 256>}]} {
    %c0_i32 = arith.constant 0 : i32
    %0 = arith.cmpi eq, %arg2, %c0_i32 : i32
    %1 = arith.extui %0 : i1 to i32
    %c0_i32_0 = arith.constant 0 : i32
    %2 = arith.cmpi ne, %1, %c0_i32_0 : i32
    scf.if %2 {
      %cst_9 = arith.constant 0.000000e+00 : f32
      %12 = vector.broadcast %cst_9 : f32 to vector<16x256xf32>
      %c0_10 = arith.constant 0 : index
      %c0_11 = arith.constant 0 : index
      %13 = vector.load %arg8[%c0_10, %c0_11] : memref<16x256xf32, #tpu.memory_space<vmem>>, vector<16x256xf32>
      tpu.vector_store %arg8[%c0_10, %c0_11], %12 {strides = array<i32>} : memref<16x256xf32, #tpu.memory_space<vmem>>, vector<16x256xf32>,
    } else {
    }
    %c0 = arith.constant 0 : index
    %c0_1 = arith.constant 0 : index
    %3 = vector.load %arg8[%c0, %c0_1] : memref<16x256xf32, #tpu.memory_space<vmem>>, vector<16x256xf32>
    %c0_2 = arith.constant 0 : index
    %c0_3 = arith.constant 0 : index
    %4 = vector.load %arg3[%c0_2, %c0_3] : memref<16x512xbf16, #tpu.memory_space<vmem>>, vector<16x512xbf16>
    %c0_4 = arith.constant 0 : index
    %c0_5 = arith.constant 0 : index
    %5 = vector.load %arg4[%c0_4, %c0_5] : memref<512x256xbf16, #tpu.memory_space<vmem>>, vector<512x256xbf16>
    %cst = arith.constant dense<0.000000e+00> : vector<16x256xf32>
    %6 = tpu.matmul %4, %5, %cst {dimension_numbers = #tpu.dot_dimension_numbers<[1], [0], [0], [1], [0, 0, 1, 1], [], []>} : vector<16x512xbf16>, vector<512x256xbf16>, vector<16x256xf32> -> vector<16x256xf32>
    %7 = arith.addf %3, %6 : vector<16x256xf32>
    %c0_6 = arith.constant 0 : index
    %c0_7 = arith.constant 0 : index
    %8 = vector.load %arg8[%c0_6, %c0_7] : memref<16x256xf32, #tpu.memory_space<vmem>>, vector<16x256xf32>
    tpu.vector_store %arg8[%c0_6, %c0_7], %7 {strides = array<i32>} : memref<16x256xf32, #tpu.memory_space<vmem>>, vector<16x256xf32>,
    %c8_i32 = arith.constant 8 : i32
    %9 = arith.cmpi eq, %arg2, %c8_i32 : i32
    %10 = arith.extui %9 : i1 to i32
    %c0_i32_8 = arith.constant 0 : i32
    %11 = arith.cmpi ne, %10, %c0_i32_8 : i32
    scf.if %11 {
      %c0_9 = arith.constant 0 : index
      %c0_10 = arith.constant 0 : index
      %12 = vector.load %arg8[%c0_9, %c0_10] : memref<16x256xf32, #tpu.memory_space<vmem>>, vector<16x256xf32>
      %c0_11 = arith.constant 0 : index
      %c0_12 = arith.constant 0 : index
      %13 = vector.load %arg5[%c0_11, %c0_12] : memref<1x256xf32, #tpu.memory_space<vmem>>, vector<1x256xf32>
      %14 = vector.broadcast %13 : vector<1x256xf32> to vector<16x256xf32>
      %15 = arith.addf %12, %14 : vector<16x256xf32>
      %c0_13 = arith.constant 0 : index
      %c0_14 = arith.constant 0 : index
      %16 = vector.load %arg6[%c0_13, %c0_14] : memref<16x256xbf16, #tpu.memory_space<vmem>>, vector<16x256xbf16>
      %17 = arith.extf %16 : vector<16x256xbf16> to vector<16x256xf32>
      %18 = arith.addf %15, %17 : vector<16x256xf32>
      %cst_15 = arith.constant 0.000000e+00 : f32
      %19 = vector.broadcast %cst_15 : f32 to vector<16x256xf32>
      %20 = arith.maximumf %18, %19 : vector<16x256xf32>
      %21 = arith.truncf %20 : vector<16x256xf32> to vector<16x256xbf16>
      %c0_16 = arith.constant 0 : index
      %c0_17 = arith.constant 0 : index
      %22 = vector.load %arg7[%c0_16, %c0_17] : memref<16x256xbf16, #tpu.memory_space<vmem>>, vector<16x256xbf16>
      tpu.vector_store %arg7[%c0_16, %c0_17], %21 {strides = array<i32>} : memref<16x256xbf16, #tpu.memory_space<vmem>>, vector<16x256xbf16>,
    } else {
    }
    return
  }
  func.func @transform_0(%arg0: i32, %arg1: i32, %arg2: i32) -> (i32, i32) {
    %c0_i32 = arith.constant 0 : i32
    return %arg0, %arg2 : i32, i32
  }
  func.func @transform_1(%arg0: i32, %arg1: i32, %arg2: i32) -> (i32, i32) {
    %c0_i32 = arith.constant 0 : i32
    return %arg2, %arg1 : i32, i32
  }
  func.func @transform_2(%arg0: i32, %arg1: i32, %arg2: i32) -> (i32, i32) {
    %c0_i32 = arith.constant 0 : i32
    %c0_i32_0 = arith.constant 0 : i32
    return %c0_i32, %arg1 : i32, i32
  }
  func.func @transform_3(%arg0: i32, %arg1: i32, %arg2: i32) -> (i32, i32) {
    %c0_i32 = arith.constant 0 : i32
    return %arg0, %arg1 : i32, i32
  }
  func.func @transform_4(%arg0: i32, %arg1: i32, %arg2: i32) -> (i32, i32) {
    %c0_i32 = arith.constant 0 : i32
    return %arg0, %arg1 : i32, i32
  }
}

module attributes {stable_mosaic.version = 11 : i64} {
  func.func @_mm_bias_kernel(%arg0: i32, %arg1: i32, %arg2: i32, %arg3: memref<16x512xbf16, #tpu.memory_space<vmem>>, %arg4: memref<512x256xbf16, #tpu.memory_space<vmem>>, %arg5: memref<1x256xf32, #tpu.memory_space<vmem>>, %arg6: memref<16x256xbf16, #tpu.memory_space<vmem>>, %arg7: memref<16x256xf32, #tpu.memory_space<vmem>>) attributes {dimension_semantics = [#tpu.dimension_semantics<parallel>, #tpu.dimension_semantics<parallel>, #tpu.dimension_semantics<arbitrary>], iteration_bounds = array<i64: 1, 2, 9>, scalar_prefetch = 0 : i64, scratch_operands = 1 : i64, tpu.core_type = #tpu.core_type<tc>, window_params = [{transform_indices = @transform_0, window_bounds = array<i64: 16, 512>}, {transform_indices = @transform_1, window_bounds = array<i64: 512, 256>}, {transform_indices = @transform_2, window_bounds = array<i64: 1, 256>}, {transform_indices = @transform_3, window_bounds = array<i64: 16, 256>}]} {
    %c0_i32 = arith.constant 0 : i32
    %0 = arith.cmpi eq, %arg2, %c0_i32 : i32
    %1 = arith.extui %0 : i1 to i32
    %c0_i32_0 = arith.constant 0 : i32
    %2 = arith.cmpi ne, %1, %c0_i32_0 : i32
    scf.if %2 {
      %cst_9 = arith.constant 0.000000e+00 : f32
      %12 = vector.broadcast %cst_9 : f32 to vector<16x256xf32>
      %c0_10 = arith.constant 0 : index
      %c0_11 = arith.constant 0 : index
      %13 = vector.load %arg7[%c0_10, %c0_11] : memref<16x256xf32, #tpu.memory_space<vmem>>, vector<16x256xf32>
      tpu.vector_store %arg7[%c0_10, %c0_11], %12 {strides = array<i32>} : memref<16x256xf32, #tpu.memory_space<vmem>>, vector<16x256xf32>,
    } else {
    }
    %c0 = arith.constant 0 : index
    %c0_1 = arith.constant 0 : index
    %3 = vector.load %arg7[%c0, %c0_1] : memref<16x256xf32, #tpu.memory_space<vmem>>, vector<16x256xf32>
    %c0_2 = arith.constant 0 : index
    %c0_3 = arith.constant 0 : index
    %4 = vector.load %arg3[%c0_2, %c0_3] : memref<16x512xbf16, #tpu.memory_space<vmem>>, vector<16x512xbf16>
    %c0_4 = arith.constant 0 : index
    %c0_5 = arith.constant 0 : index
    %5 = vector.load %arg4[%c0_4, %c0_5] : memref<512x256xbf16, #tpu.memory_space<vmem>>, vector<512x256xbf16>
    %cst = arith.constant dense<0.000000e+00> : vector<16x256xf32>
    %6 = tpu.matmul %4, %5, %cst {dimension_numbers = #tpu.dot_dimension_numbers<[1], [0], [0], [1], [0, 0, 1, 1], [], []>} : vector<16x512xbf16>, vector<512x256xbf16>, vector<16x256xf32> -> vector<16x256xf32>
    %7 = arith.addf %3, %6 : vector<16x256xf32>
    %c0_6 = arith.constant 0 : index
    %c0_7 = arith.constant 0 : index
    %8 = vector.load %arg7[%c0_6, %c0_7] : memref<16x256xf32, #tpu.memory_space<vmem>>, vector<16x256xf32>
    tpu.vector_store %arg7[%c0_6, %c0_7], %7 {strides = array<i32>} : memref<16x256xf32, #tpu.memory_space<vmem>>, vector<16x256xf32>,
    %c8_i32 = arith.constant 8 : i32
    %9 = arith.cmpi eq, %arg2, %c8_i32 : i32
    %10 = arith.extui %9 : i1 to i32
    %c0_i32_8 = arith.constant 0 : i32
    %11 = arith.cmpi ne, %10, %c0_i32_8 : i32
    scf.if %11 {
      %c0_9 = arith.constant 0 : index
      %c0_10 = arith.constant 0 : index
      %12 = vector.load %arg7[%c0_9, %c0_10] : memref<16x256xf32, #tpu.memory_space<vmem>>, vector<16x256xf32>
      %c0_11 = arith.constant 0 : index
      %c0_12 = arith.constant 0 : index
      %13 = vector.load %arg5[%c0_11, %c0_12] : memref<1x256xf32, #tpu.memory_space<vmem>>, vector<1x256xf32>
      %14 = vector.broadcast %13 : vector<1x256xf32> to vector<16x256xf32>
      %15 = arith.addf %12, %14 : vector<16x256xf32>
      %cst_13 = arith.constant 0.000000e+00 : f32
      %16 = vector.broadcast %cst_13 : f32 to vector<16x256xf32>
      %17 = arith.maximumf %15, %16 : vector<16x256xf32>
      %18 = arith.truncf %17 : vector<16x256xf32> to vector<16x256xbf16>
      %c0_14 = arith.constant 0 : index
      %c0_15 = arith.constant 0 : index
      %19 = vector.load %arg6[%c0_14, %c0_15] : memref<16x256xbf16, #tpu.memory_space<vmem>>, vector<16x256xbf16>
      tpu.vector_store %arg6[%c0_14, %c0_15], %18 {strides = array<i32>} : memref<16x256xbf16, #tpu.memory_space<vmem>>, vector<16x256xbf16>,
    } else {
    }
    return
  }
  func.func @transform_0(%arg0: i32, %arg1: i32, %arg2: i32) -> (i32, i32) {
    %c0_i32 = arith.constant 0 : i32
    return %arg0, %arg2 : i32, i32
  }
  func.func @transform_1(%arg0: i32, %arg1: i32, %arg2: i32) -> (i32, i32) {
    %c0_i32 = arith.constant 0 : i32
    return %arg2, %arg1 : i32, i32
  }
  func.func @transform_2(%arg0: i32, %arg1: i32, %arg2: i32) -> (i32, i32) {
    %c0_i32 = arith.constant 0 : i32
    %c0_i32_0 = arith.constant 0 : i32
    return %c0_i32, %arg1 : i32, i32
  }
  func.func @transform_3(%arg0: i32, %arg1: i32, %arg2: i32) -> (i32, i32) {
    %c0_i32 = arith.constant 0 : i32
    return %arg0, %arg1 : i32, i32
  }
}

module attributes {stable_mosaic.version = 11 : i64} {
  func.func @_mm_bias_kernel(%arg0: i32, %arg1: i32, %arg2: i32, %arg3: memref<16x512xbf16, #tpu.memory_space<vmem>>, %arg4: memref<512x256xbf16, #tpu.memory_space<vmem>>, %arg5: memref<1x256xf32, #tpu.memory_space<vmem>>, %arg6: memref<16x256xf32, #tpu.memory_space<vmem>>, %arg7: memref<16x256xf32, #tpu.memory_space<vmem>>) attributes {dimension_semantics = [#tpu.dimension_semantics<parallel>, #tpu.dimension_semantics<parallel>, #tpu.dimension_semantics<arbitrary>], iteration_bounds = array<i64: 1, 2, 1>, scalar_prefetch = 0 : i64, scratch_operands = 1 : i64, tpu.core_type = #tpu.core_type<tc>, window_params = [{transform_indices = @transform_0, window_bounds = array<i64: 16, 512>}, {transform_indices = @transform_1, window_bounds = array<i64: 512, 256>}, {transform_indices = @transform_2, window_bounds = array<i64: 1, 256>}, {transform_indices = @transform_3, window_bounds = array<i64: 16, 256>}]} {
    %c0_i32 = arith.constant 0 : i32
    %0 = arith.cmpi eq, %arg2, %c0_i32 : i32
    %1 = arith.extui %0 : i1 to i32
    %c0_i32_0 = arith.constant 0 : i32
    %2 = arith.cmpi ne, %1, %c0_i32_0 : i32
    scf.if %2 {
      %cst_10 = arith.constant 0.000000e+00 : f32
      %12 = vector.broadcast %cst_10 : f32 to vector<16x256xf32>
      %c0_11 = arith.constant 0 : index
      %c0_12 = arith.constant 0 : index
      %13 = vector.load %arg7[%c0_11, %c0_12] : memref<16x256xf32, #tpu.memory_space<vmem>>, vector<16x256xf32>
      tpu.vector_store %arg7[%c0_11, %c0_12], %12 {strides = array<i32>} : memref<16x256xf32, #tpu.memory_space<vmem>>, vector<16x256xf32>,
    } else {
    }
    %c0 = arith.constant 0 : index
    %c0_1 = arith.constant 0 : index
    %3 = vector.load %arg7[%c0, %c0_1] : memref<16x256xf32, #tpu.memory_space<vmem>>, vector<16x256xf32>
    %c0_2 = arith.constant 0 : index
    %c0_3 = arith.constant 0 : index
    %4 = vector.load %arg3[%c0_2, %c0_3] : memref<16x512xbf16, #tpu.memory_space<vmem>>, vector<16x512xbf16>
    %c0_4 = arith.constant 0 : index
    %c0_5 = arith.constant 0 : index
    %5 = vector.load %arg4[%c0_4, %c0_5] : memref<512x256xbf16, #tpu.memory_space<vmem>>, vector<512x256xbf16>
    %cst = arith.constant dense<0.000000e+00> : vector<16x256xf32>
    %6 = tpu.matmul %4, %5, %cst {dimension_numbers = #tpu.dot_dimension_numbers<[1], [0], [0], [1], [0, 0, 1, 1], [], []>} : vector<16x512xbf16>, vector<512x256xbf16>, vector<16x256xf32> -> vector<16x256xf32>
    %7 = arith.addf %3, %6 : vector<16x256xf32>
    %c0_6 = arith.constant 0 : index
    %c0_7 = arith.constant 0 : index
    %8 = vector.load %arg7[%c0_6, %c0_7] : memref<16x256xf32, #tpu.memory_space<vmem>>, vector<16x256xf32>
    tpu.vector_store %arg7[%c0_6, %c0_7], %7 {strides = array<i32>} : memref<16x256xf32, #tpu.memory_space<vmem>>, vector<16x256xf32>,
    %c0_i32_8 = arith.constant 0 : i32
    %9 = arith.cmpi eq, %arg2, %c0_i32_8 : i32
    %10 = arith.extui %9 : i1 to i32
    %c0_i32_9 = arith.constant 0 : i32
    %11 = arith.cmpi ne, %10, %c0_i32_9 : i32
    scf.if %11 {
      %c0_10 = arith.constant 0 : index
      %c0_11 = arith.constant 0 : index
      %12 = vector.load %arg7[%c0_10, %c0_11] : memref<16x256xf32, #tpu.memory_space<vmem>>, vector<16x256xf32>
      %c0_12 = arith.constant 0 : index
      %c0_13 = arith.constant 0 : index
      %13 = vector.load %arg5[%c0_12, %c0_13] : memref<1x256xf32, #tpu.memory_space<vmem>>, vector<1x256xf32>
      %14 = vector.broadcast %13 : vector<1x256xf32> to vector<16x256xf32>
      %15 = arith.addf %12, %14 : vector<16x256xf32>
      %c0_14 = arith.constant 0 : index
      %c0_15 = arith.constant 0 : index
      %16 = vector.load %arg6[%c0_14, %c0_15] : memref<16x256xf32, #tpu.memory_space<vmem>>, vector<16x256xf32>
      tpu.vector_store %arg6[%c0_14, %c0_15], %15 {strides = array<i32>} : memref<16x256xf32, #tpu.memory_space<vmem>>, vector<16x256xf32>,
    } else {
    }
    return
  }
  func.func @transform_0(%arg0: i32, %arg1: i32, %arg2: i32) -> (i32, i32) {
    %c0_i32 = arith.constant 0 : i32
    return %arg0, %arg2 : i32, i32
  }
  func.func @transform_1(%arg0: i32, %arg1: i32, %arg2: i32) -> (i32, i32) {
    %c0_i32 = arith.constant 0 : i32
    return %arg2, %arg1 : i32, i32
  }
  func.func @transform_2(%arg0: i32, %arg1: i32, %arg2: i32) -> (i32, i32) {
    %c0_i32 = arith.constant 0 : i32
    %c0_i32_0 = arith.constant 0 : i32
    return %c0_i32, %arg1 : i32, i32
  }
  func.func @transform_3(%arg0: i32, %arg1: i32, %arg2: i32) -> (i32, i32) {
    %c0_i32 = arith.constant 0 : i32
    return %arg0, %arg1 : i32, i32
  }
}

</mosaic_0001>

<bundles_post_ra>
// kernel: _lambda_.21
= control target key start
LH: loop header
LB: loop body
LE: loop exit
PB: predicated region body
PF: predicated region fallthrough
CT: control target
= control target key end

     0   :  { %s1613_s12 = smov 0   ;;  %s1615_s13 = smov 0   ;;  %s1822_s0 = inlined_call_operand.vmem [shape: bf16[512,256], index: 0, kind: input, shape index: {}]   ;;  %s1823_s1 = inlined_call_operand.vmem [shape: bf16[256,128], index: 1, kind: input, shape index: {}]   ;;  %s1824_s2 = inlined_call_operand.vmem [shape: f32[1,128], index: 2, kind: input, shape index: {}]   ;;  %s1825_s3 = inlined_call_operand.vmem [shape: bf16[512,128], index: 3, kind: output, shape index: {}]  }
   0x1   :  { %s1617_s14 = smov 0  }
   0x2 LB: > { %s32_s15 = sadd.s32 1, %s1587_s13  ;;  %p1184_p0 = scmp.ge.s32.totalorder %s1591_s14, 1  ;;  %s1591_s14 = sphi %s1617_s14, %s13_s14   ;;  %s1587_s13 = sphi %s1615_s13, %s1827_s13   ;;  %s1583_s12 = sphi %s1613_s12, %s1826_s12  }
   0x3   : > { %p34_p1 = scmp.ge.s32.totalorder %s32_s15, 2  ;;  %p191_p2 = scmp.lt.s32.totalorder %s1591_s14, 3 }
   0x5   : > { %s1829_s15 = smov (%p34_p1, %s32_s15), 0  ;;  %p192_p3 = pnand %p1184_p0, %p191_p2 }
   0x6   : > { %s1185_s28 = sshll.u32 (!%p192_p3), %s1583_s12, 5 }
   0x7   : > { %195 = sbr.rel (%p192_p3) target bundleno = 306 (0x132), region = 32  ;;  %p236_p4 = scmp.lt.s32.totalorder (!%p192_p3), %s1185_s28, 63 }
   0xc   : > { %v1424_v0 = vld [vmem:[%s1823_s1 + $0x38] sm:$0xff]  ;;  %v1423_v2 = vld [vmem:[%s1823_s1 + $0x30] sm:$0xff]  ;;  %v1422_v4 = vld [vmem:[%s1823_s1 + $0x28] sm:$0xff]  ;;  %s1831_s28 = smov (!%p236_p4, %s1185_s28), 63 }
   0xd   : > { %v1432_v1 = vld [vmem:[%s1823_s1 + $0x78] sm:$0xff]  ;;  %655 = vmatpush.bf16.msra.mxu0 %v1424_v0  ;;  %1528 = vmatpush.bf16.msra.mxu2 %v1424_v0  ;;  %v1431_v3 = vld [vmem:[%s1823_s1 + $0x70] sm:$0xff]  ;;  %v1430_v5 = vld [vmem:[%s1823_s1 + $0x68] sm:$0xff]  ;;  %s1384_s17 = sshll.u32 %s1831_s28, 3  ;;  %s1189_s5 = sshll.u32 %s1831_s28, 2 }
   0xe   : > { %744 = vmatpush.bf16.msra.mxu1 %v1432_v1  ;;  %1536 = vmatpush.bf16.msra.mxu3 %v1432_v1  ;;  %v1421_v6 = vld [vmem:[%s1823_s1 + $0x20] sm:$0xff]  ;;  %v1420_v8 = vld [vmem:[%s1823_s1 + $0x18] sm:$0xff]  ;;  %v1419_v10 = vld [vmem:[%s1823_s1 + $0x10] sm:$0xff]  ;;  %s1679_s22 = scalar_lea.vmem %s1822_s0, %s1384_s17  ;;  %s1765_s8 = scalar_lea.vmem %s1825_s3, %s1189_s5 }
   0xf   : > { %v1429_v7 = vld [vmem:[%s1823_s1 + $0x60] sm:$0xff]  ;;  %v1428_v9 = vld [vmem:[%s1823_s1 + $0x58] sm:$0xff]  ;;  %v1427_v11 = vld [vmem:[%s1823_s1 + $0x50] sm:$0xff] }
  0x10   : > { %v1418_v12 = vld [vmem:[%s1823_s1 + $0x8] sm:$0xff]  ;;  %v1417_v14 = vld [vmem:[%s1823_s1] sm:$0xff]  ;;  %v1200_v28 = vld [vmem:[%s1679_s22 + $0x10] sm:$0xf] }
  0x11   : > { %656 = vmatpush.bf16.msra.mxu0 %v1423_v2  ;;  %1529 = vmatpush.bf16.msra.mxu2 %v1423_v2  ;;  %v1426_v13 = vld [vmem:[%s1823_s1 + $0x48] sm:$0xff]  ;;  %v1425_v15 = vld [vmem:[%s1823_s1 + $0x40] sm:$0xff]  ;;  %v1388_v29 = vld [vmem:[%s1679_s22 + $0x14] sm:$0xf0] }
  0x12   : > { %745 = vmatpush.bf16.msra.mxu1 %v1431_v3  ;;  %1537 = vmatpush.bf16.msra.mxu3 %v1431_v3  ;;  %v1192_v16 = vld [vmem:[%s1679_s22] sm:$0xf]  ;;  %v1386_v17 = vld [vmem:[%s1679_s22 + $0x4] sm:$0xf0]  ;;  %v1385_v20 = vld [vmem:[%s1679_s22 + $0x4] sm:$0xf]  ;;  %v1201_v36 = vor.u32 %v1388_v29, %v1200_v28 }
  0x13   : > { %v1256_v18 = vld [vmem:[%s1679_s22 + $0x80] sm:$0xf]  ;;  %v1402_v19 = vld [vmem:[%s1679_s22 + $0x84] sm:$0xf0]  ;;  %v1194_v21 = vld [vmem:[%s1679_s22 + $0x8] sm:$0xf0]  ;;  %v1193_v24 = vor.u32 %v1386_v17, %v1192_v16 }
  0x14   : > { %v1401_v22 = vld [vmem:[%s1679_s22 + $0x84] sm:$0xf]  ;;  %v1258_v23 = vld [vmem:[%s1679_s22 + $0x88] sm:$0xf0]  ;;  %v1257_v25 = vor.u32 %v1402_v19, %v1256_v18  ;;  %v1197_v26 = vor.u32 %v1385_v20, %v1194_v21  ;;  %v1264_v30 = vld [vmem:[%s1679_s22 + $0x90] sm:$0xf] }
  0x15   : > { %657 = vmatpush.bf16.msra.mxu0 %v1422_v4  ;;  %1530 = vmatpush.bf16.msra.mxu2 %v1422_v4  ;;  %v1261_v27 = vor.u32 %v1401_v22, %v1258_v23  ;;  %v1404_v31 = vld [vmem:[%s1679_s22 + $0x94] sm:$0xf0]  ;;  %v1387_v32 = vld [vmem:[%s1679_s22 + $0x14] sm:$0xf]  ;;  %v1202_v33 = vld [vmem:[%s1679_s22 + $0x18] sm:$0xf0] }
  0x16   : > { %746 = vmatpush.bf16.msra.mxu1 %v1430_v5  ;;  %1538 = vmatpush.bf16.msra.mxu3 %v1430_v5  ;;  %v1403_v34 = vld [vmem:[%s1679_s22 + $0x94] sm:$0xf]  ;;  %v1266_v35 = vld [vmem:[%s1679_s22 + $0x98] sm:$0xf0]  ;;  %v1265_v37 = vor.u32 %v1404_v31, %v1264_v30  ;;  %v1205_v38 = vor.u32 %v1387_v32, %v1202_v33  ;;  %v1208_v40 = vld [vmem:[%s1679_s22 + $0x20] sm:$0xf] }
  0x17   : > { %v1269_v39 = vor.u32 %v1403_v34, %v1266_v35  ;;  %v1390_v41 = vld [vmem:[%s1679_s22 + $0x24] sm:$0xf0]  ;;  %v1272_v42 = vld [vmem:[%s1679_s22 + $0xa0] sm:$0xf]  ;;  %v1389_v44 = vld [vmem:[%s1679_s22 + $0x24] sm:$0xf] }
  0x18   : > { %v1406_v43 = vld [vmem:[%s1679_s22 + $0xa4] sm:$0xf0]  ;;  %v1210_v45 = vld [vmem:[%s1679_s22 + $0x28] sm:$0xf0]  ;;  %v1405_v46 = vld [vmem:[%s1679_s22 + $0xa4] sm:$0xf]  ;;  %v1209_v48 = vor.u32 %v1390_v41, %v1208_v40 }
  0x19   : > { %658 = vmatpush.bf16.msra.mxu0 %v1421_v6  ;;  %1531 = vmatpush.bf16.msra.mxu2 %v1421_v6  ;;  %v1274_v47 = vld [vmem:[%s1679_s22 + $0xa8] sm:$0xf0]  ;;  %v1273_v49 = vor.u32 %v1406_v43, %v1272_v42  ;;  %v1213_v50 = vor.u32 %v1389_v44, %v1210_v45  ;;  %v1216_v52 = vld [vmem:[%s1679_s22 + $0x30] sm:$0xf]  ;;  %v1392_v53 = vld [vmem:[%s1679_s22 + $0x34] sm:$0xf0] }
  0x1a   : > { %747 = vmatpush.bf16.msra.mxu1 %v1429_v7  ;;  %1539 = vmatpush.bf16.msra.mxu3 %v1429_v7  ;;  %v1277_v51 = vor.u32 %v1405_v46, %v1274_v47  ;;  %v1280_v54 = vld [vmem:[%s1679_s22 + $0xb0] sm:$0xf]  ;;  %v1408_v55 = vld [vmem:[%s1679_s22 + $0xb4] sm:$0xf0]  ;;  %v1391_v56 = vld [vmem:[%s1679_s22 + $0x34] sm:$0xf]  ;;  %v1217_v60 = vor.u32 %v1392_v53, %v1216_v52 }
  0x1b   : > { %v1218_v57 = vld [vmem:[%s1679_s22 + $0x38] sm:$0xf0]  ;;  %v1407_v58 = vld [vmem:[%s1679_s22 + $0xb4] sm:$0xf]  ;;  %v1281_v61 = vor.u32 %v1408_v55, %v1280_v54  ;;  %v1224_v0 = vld [vmem:[%s1679_s22 + $0x40] sm:$0xf] }
  0x1c   : > { %v1282_v59 = vld [vmem:[%s1679_s22 + $0xb8] sm:$0xf0]  ;;  %v1221_v62 = vor.u32 %v1391_v56, %v1218_v57  ;;  %v1394_v1 = vld [vmem:[%s1679_s22 + $0x44] sm:$0xf0]  ;;  %v1288_v2 = vld [vmem:[%s1679_s22 + $0xc0] sm:$0xf] }
  0x1d   : > { %659 = vmatpush.bf16.msra.mxu0 %v1420_v8  ;;  %1532 = vmatpush.bf16.msra.mxu2 %v1420_v8  ;;  %v1285_v63 = vor.u32 %v1407_v58, %v1282_v59  ;;  %v1410_v3 = vld [vmem:[%s1679_s22 + $0xc4] sm:$0xf0]  ;;  %v1393_v4 = vld [vmem:[%s1679_s22 + $0x44] sm:$0xf]  ;;  %v1226_v5 = vld [vmem:[%s1679_s22 + $0x48] sm:$0xf0]  ;;  %v1225_v8 = vor.u32 %v1394_v1, %v1224_v0 }
  0x1e   : > { %748 = vmatpush.bf16.msra.mxu1 %v1428_v9  ;;  %1540 = vmatpush.bf16.msra.mxu3 %v1428_v9  ;;  %v1409_v6 = vld [vmem:[%s1679_s22 + $0xc4] sm:$0xf]  ;;  %v1290_v7 = vld [vmem:[%s1679_s22 + $0xc8] sm:$0xf0]  ;;  %v1289_v9 = vor.u32 %v1410_v3, %v1288_v2  ;;  %v1395_v16 = vld [vmem:[%s1679_s22 + $0x54] sm:$0xf] }
  0x1f   : > { %v1234_v17 = vld [vmem:[%s1679_s22 + $0x58] sm:$0xf0]  ;;  %v1411_v18 = vld [vmem:[%s1679_s22 + $0xd4] sm:$0xf]  ;;  %v1397_v28 = vld [vmem:[%s1679_s22 + $0x64] sm:$0xf] }
  0x20   : > { %v1298_v19 = vld [vmem:[%s1679_s22 + $0xd8] sm:$0xf0]  ;;  %v1237_v22 = vor.u32 %v1395_v16, %v1234_v17  ;;  %v1242_v29 = vld [vmem:[%s1679_s22 + $0x68] sm:$0xf0]  ;;  %v1413_v30 = vld [vmem:[%s1679_s22 + $0xe4] sm:$0xf] }
  0x21   : > { %660 = vmatpush.bf16.msra.mxu0 %v1419_v10  ;;  %1533 = vmatpush.bf16.msra.mxu2 %v1419_v10  ;;  %v1229_v10 = vor.u32 %v1393_v4, %v1226_v5  ;;  %v1301_v23 = vor.u32 %v1411_v18, %v1298_v19  ;;  %v1306_v31 = vld [vmem:[%s1679_s22 + $0xe8] sm:$0xf0]  ;;  %v1245_v34 = vor.u32 %v1397_v28, %v1242_v29  ;;  %v1399_v40 = vld [vmem:[%s1679_s22 + $0x74] sm:$0xf]  ;;  %v1250_v41 = vld [vmem:[%s1679_s22 + $0x78] sm:$0xf0] }
  0x22   : > { %749 = vmatpush.bf16.msra.mxu1 %v1427_v11  ;;  %1541 = vmatpush.bf16.msra.mxu3 %v1427_v11  ;;  %v1293_v11 = vor.u32 %v1409_v6, %v1290_v7  ;;  %v1309_v35 = vor.u32 %v1413_v30, %v1306_v31  ;;  %v1415_v42 = vld [vmem:[%s1679_s22 + $0xf4] sm:$0xf]  ;;  %v1314_v43 = vld [vmem:[%s1679_s22 + $0xf8] sm:$0xf0]  ;;  %v1253_v46 = vor.u32 %v1399_v40, %v1250_v41 }
  0x23   : > { %v1317_v47 = vor.u32 %v1415_v42, %v1314_v43 }
  0x25   : > { %661 = vmatpush.bf16.msra.mxu0 %v1418_v12  ;;  %1534 = vmatpush.bf16.msra.mxu2 %v1418_v12  ;;  %v1232_v12 = vld [vmem:[%s1679_s22 + $0x50] sm:$0xf] }
  0x26   : > { %750 = vmatpush.bf16.msra.mxu1 %v1426_v13  ;;  %1542 = vmatpush.bf16.msra.mxu3 %v1426_v13  ;;  %v1396_v13 = vld [vmem:[%s1679_s22 + $0x54] sm:$0xf0] }
  0x27   : > { %v1233_v20 = vor.u32 %v1396_v13, %v1232_v12 }
  0x29   : > { %662 = vmatpush.bf16.msra.mxu0 %v1417_v14  ;;  %1535 = vmatpush.bf16.msra.mxu2 %v1417_v14  ;;  %v1296_v14 = vld [vmem:[%s1679_s22 + $0xd0] sm:$0xf] }
  0x2a   : > { %751 = vmatpush.bf16.msra.mxu1 %v1425_v15  ;;  %1543 = vmatpush.bf16.msra.mxu3 %v1425_v15  ;;  %v1412_v15 = vld [vmem:[%s1679_s22 + $0xd4] sm:$0xf0] }
  0x2b   : > { %v1297_v21 = vor.u32 %v1412_v15, %v1296_v14 }
  0x2c   : > { %663 = vmatmul.bf16.vlgmr.msra.gmra.mxu0 %v1193_v24  ;;  %703 = vmatmul.bf16.vlgmr.msra.gmra.mxu2 %v1257_v25  ;;  %v1240_v24 = vld [vmem:[%s1679_s22 + $0x60] sm:$0xf]  ;;  %v1398_v25 = vld [vmem:[%s1679_s22 + $0x64] sm:$0xf0] }
  0x2d   : > { %752 = vmatmul.bf16.vlgmr.msra.gmra.mxu1 %v1197_v26  ;;  %792 = vmatmul.bf16.vlgmr.msra.gmra.mxu3 %v1261_v27  ;;  %v1304_v26 = vld [vmem:[%s1679_s22 + $0xe0] sm:$0xf]  ;;  %v1414_v27 = vld [vmem:[%s1679_s22 + $0xe4] sm:$0xf0]  ;;  %v1241_v32 = vor.u32 %v1398_v25, %v1240_v24 }
  0x2e   : > { %v1305_v33 = vor.u32 %v1414_v27, %v1304_v26 }
  0x3c   : > { %668 = vmatmul.bf16.gmra.mxu0 %v1201_v36  ;;  %708 = vmatmul.bf16.gmra.mxu2 %v1265_v37  ;;  %v1248_v36 = vld [vmem:[%s1679_s22 + $0x70] sm:$0xf]  ;;  %v1400_v37 = vld [vmem:[%s1679_s22 + $0x74] sm:$0xf0] }
  0x3d   : > { %757 = vmatmul.bf16.gmra.mxu1 %v1205_v38  ;;  %797 = vmatmul.bf16.gmra.mxu3 %v1269_v39  ;;  %v1312_v38 = vld [vmem:[%s1679_s22 + $0xf0] sm:$0xf]  ;;  %v1416_v39 = vld [vmem:[%s1679_s22 + $0xf4] sm:$0xf0]  ;;  %v1249_v44 = vor.u32 %v1400_v37, %v1248_v36 }
  0x3e   : > { %v1313_v45 = vor.u32 %v1416_v39, %v1312_v38 }
  0x4c   : > { %673 = vmatmul.bf16.gmra.mxu0 %v1209_v48  ;;  %713 = vmatmul.bf16.gmra.mxu2 %v1273_v49 }
  0x4d   : > { %762 = vmatmul.bf16.gmra.mxu1 %v1213_v50  ;;  %802 = vmatmul.bf16.gmra.mxu3 %v1277_v51  ;;  %v1757_v51 = vld [vmem:[%s1824_s2] ss:$0 sm:$0xff] }
  0x5c   : > { %678 = vmatmul.bf16.gmra.mxu0 %v1217_v60  ;;  %718 = vmatmul.bf16.gmra.mxu2 %v1281_v61 }
  0x5d   : > { %767 = vmatmul.bf16.gmra.mxu1 %v1221_v62  ;;  %807 = vmatmul.bf16.gmra.mxu3 %v1285_v63 }
  0x6c   : > { %683 = vmatmul.bf16.gmra.mxu0 %v1225_v8  ;;  %723 = vmatmul.bf16.gmra.mxu2 %v1289_v9 }
  0x6d   : > { %772 = vmatmul.bf16.gmra.mxu1 %v1229_v10  ;;  %812 = vmatmul.bf16.gmra.mxu3 %v1293_v11 }
  0x7c   : > { %688 = vmatmul.bf16.gmra.mxu0 %v1233_v20  ;;  %728 = vmatmul.bf16.gmra.mxu2 %v1297_v21 }
  0x7d   : > { %777 = vmatmul.bf16.gmra.mxu1 %v1237_v22  ;;  %817 = vmatmul.bf16.gmra.mxu3 %v1301_v23 }
  0x8c   : > { %693 = vmatmul.bf16.gmra.mxu0 %v1241_v32  ;;  %733 = vmatmul.bf16.gmra.mxu2 %v1305_v33 }
  0x8d   : > { %782 = vmatmul.bf16.gmra.mxu1 %v1245_v34  ;;  %822 = vmatmul.bf16.gmra.mxu3 %v1309_v35 }
  0x9c   : > { %698 = vmatmul.bf16.gmra.mxu0 %v1249_v44  ;;  %738 = vmatmul.bf16.gmra.mxu2 %v1313_v45 }
  0x9d   : > { %787 = vmatmul.bf16.gmra.mxu1 %v1253_v46  ;;  %827 = vmatmul.bf16.gmra.mxu3 %v1317_v47 }
  0xa9   : > { %v664_v48 = vpop.f32.mrf.mxu0 }
  0xaa   : > { %v753_v49 = vpop.f32.mrf.mxu1 }
  0xab   : > { %v754_v50 = vadd.f32 %v753_v49, %v664_v48 }
  0xad   : > { %v936_v56 = vadd.f32 %v1757_v51, %v754_v50 }
  0xaf   : > { %v704_v52 = vpop.f32.mrf.mxu2  ;;  %v968_v60 = vmax.f32 %v936_v56, 0.0 }
  0xb0   : > { %v793_v53 = vpop.f32.mrf.mxu3 }
  0xb1   : > { %v666_v54 = vpop.f32.mrf.mxu0  ;;  %v794_v58 = vadd.f32 %v793_v53, %v704_v52 }
  0xb2   : > { %v755_v55 = vpop.f32.mrf.mxu1 }
  0xb3   : > { %v756_v57 = vadd.f32 %v755_v55, %v666_v54  ;;  %v952_v0 = vadd.f32 %v1757_v51, %v794_v58 }
  0xb5   : > { %v937_v59 = vadd.f32 %v1757_v51, %v756_v57  ;;  %v984_v6 = vmax.f32 %v952_v0, 0.0 }
  0xb7   : > { %v969_v61 = vmax.f32 %v937_v59, 0.0  ;;  %v706_v62 = vpop.f32.mrf.mxu2 }
  0xb8   : > { %v795_v63 = vpop.f32.mrf.mxu3 }
  0xb9   : > { %v1436_v1 = vpack.c.bf16 %v969_v61, %v968_v60  ;;  %v796_v2 = vadd.f32 %v795_v63, %v706_v62  ;;  %v669_v3 = vpop.f32.mrf.mxu0 }
  0xba   : > { %v758_v4 = vpop.f32.mrf.mxu1 }
  0xbb   : > { %1437 = vst [vmem:[%s1765_s8] sm:$0xff] %v1436_v1   ;;  %v953_v5 = vadd.f32 %v1757_v51, %v796_v2  ;;  %v759_v9 = vadd.f32 %v758_v4, %v669_v3 }
  0xbd   : > { %v985_v7 = vmax.f32 %v953_v5, 0.0  ;;  %v938_v14 = vadd.f32 %v1757_v51, %v759_v9 }
  0xbf   : > { %v1476_v8 = vpack.c.bf16 %v985_v7, %v984_v6  ;;  %v709_v10 = vpop.f32.mrf.mxu2  ;;  %v970_v18 = vmax.f32 %v938_v14, 0.0 }
  0xc0   : > { %v798_v11 = vpop.f32.mrf.mxu3 }
  0xc1   : > { %1520 = vst [vmem:[%s1765_s8 + $0x40] sm:$0xff] %v1476_v8   ;;  %v671_v12 = vpop.f32.mrf.mxu0  ;;  %v799_v16 = vadd.f32 %v798_v11, %v709_v10 }
  0xc2   : > { %v760_v13 = vpop.f32.mrf.mxu1 }
  0xc3   : > { %v761_v15 = vadd.f32 %v760_v13, %v671_v12  ;;  %v954_v22 = vadd.f32 %v1757_v51, %v799_v16 }
  0xc5   : > { %v939_v17 = vadd.f32 %v1757_v51, %v761_v15  ;;  %v986_v28 = vmax.f32 %v954_v22, 0.0 }
  0xc7   : > { %v971_v19 = vmax.f32 %v939_v17, 0.0  ;;  %v711_v20 = vpop.f32.mrf.mxu2 }
  0xc8   : > { %v800_v21 = vpop.f32.mrf.mxu3 }
  0xc9   : > { %v1441_v23 = vpack.c.bf16 %v971_v19, %v970_v18  ;;  %v801_v24 = vadd.f32 %v800_v21, %v711_v20  ;;  %v674_v25 = vpop.f32.mrf.mxu0 }
  0xca   : > { %v763_v26 = vpop.f32.mrf.mxu1 }
  0xcb   : > { %1513 = vst [vmem:[%s1765_s8 + $0x8] sm:$0xff] %v1441_v23   ;;  %v955_v27 = vadd.f32 %v1757_v51, %v801_v24  ;;  %v764_v31 = vadd.f32 %v763_v26, %v674_v25 }
  0xcd   : > { %v987_v29 = vmax.f32 %v955_v27, 0.0  ;;  %v940_v36 = vadd.f32 %v1757_v51, %v764_v31 }
  0xcf   : > { %v1481_v30 = vpack.c.bf16 %v987_v29, %v986_v28  ;;  %v714_v32 = vpop.f32.mrf.mxu2  ;;  %v972_v40 = vmax.f32 %v940_v36, 0.0 }
  0xd0   : > { %v803_v33 = vpop.f32.mrf.mxu3 }
  0xd1   : > { %1521 = vst [vmem:[%s1765_s8 + $0x48] sm:$0xff] %v1481_v30   ;;  %v676_v34 = vpop.f32.mrf.mxu0  ;;  %v804_v38 = vadd.f32 %v803_v33, %v714_v32 }
  0xd2   : > { %v765_v35 = vpop.f32.mrf.mxu1 }
  0xd3   : > { %v766_v37 = vadd.f32 %v765_v35, %v676_v34  ;;  %v956_v44 = vadd.f32 %v1757_v51, %v804_v38 }
  0xd5   : > { %v941_v39 = vadd.f32 %v1757_v51, %v766_v37  ;;  %v988_v50 = vmax.f32 %v956_v44, 0.0 }
  0xd7   : > { %v973_v41 = vmax.f32 %v941_v39, 0.0  ;;  %v716_v42 = vpop.f32.mrf.mxu2 }
  0xd8   : > { %v805_v43 = vpop.f32.mrf.mxu3 }
  0xd9   : > { %v1446_v45 = vpack.c.bf16 %v973_v41, %v972_v40  ;;  %v806_v46 = vadd.f32 %v805_v43, %v716_v42  ;;  %v679_v47 = vpop.f32.mrf.mxu0 }
  0xda   : > { %v768_v48 = vpop.f32.mrf.mxu1 }
  0xdb   : > { %1514 = vst [vmem:[%s1765_s8 + $0x10] sm:$0xff] %v1446_v45   ;;  %v957_v49 = vadd.f32 %v1757_v51, %v806_v46  ;;  %v769_v54 = vadd.f32 %v768_v48, %v679_v47 }
  0xdd   : > { %v989_v52 = vmax.f32 %v957_v49, 0.0  ;;  %v942_v59 = vadd.f32 %v1757_v51, %v769_v54 }
  0xdf   : > { %v1486_v53 = vpack.c.bf16 %v989_v52, %v988_v50  ;;  %v719_v55 = vpop.f32.mrf.mxu2  ;;  %v974_v63 = vmax.f32 %v942_v59, 0.0 }
  0xe0   : > { %v808_v56 = vpop.f32.mrf.mxu3 }
  0xe1   : > { %1522 = vst [vmem:[%s1765_s8 + $0x50] sm:$0xff] %v1486_v53   ;;  %v681_v57 = vpop.f32.mrf.mxu0  ;;  %v809_v61 = vadd.f32 %v808_v56, %v719_v55 }
  0xe2   : > { %v770_v58 = vpop.f32.mrf.mxu1 }
  0xe3   : > { %v771_v60 = vadd.f32 %v770_v58, %v681_v57  ;;  %v958_v3 = vadd.f32 %v1757_v51, %v809_v61 }
  0xe5   : > { %v943_v62 = vadd.f32 %v1757_v51, %v771_v60  ;;  %v990_v9 = vmax.f32 %v958_v3, 0.0 }
  0xe7   : > { %v975_v0 = vmax.f32 %v943_v62, 0.0  ;;  %v721_v1 = vpop.f32.mrf.mxu2 }
  0xe8   : > { %v810_v2 = vpop.f32.mrf.mxu3 }
  0xe9   : > { %v1451_v4 = vpack.c.bf16 %v975_v0, %v974_v63  ;;  %v811_v5 = vadd.f32 %v810_v2, %v721_v1  ;;  %v684_v6 = vpop.f32.mrf.mxu0 }
  0xea   : > { %v773_v7 = vpop.f32.mrf.mxu1 }
  0xeb   : > { %1515 = vst [vmem:[%s1765_s8 + $0x18] sm:$0xff] %v1451_v4   ;;  %v959_v8 = vadd.f32 %v1757_v51, %v811_v5  ;;  %v774_v12 = vadd.f32 %v773_v7, %v684_v6 }
  0xed   : > { %v991_v10 = vmax.f32 %v959_v8, 0.0  ;;  %v944_v17 = vadd.f32 %v1757_v51, %v774_v12 }
  0xef   : > { %v1491_v11 = vpack.c.bf16 %v991_v10, %v990_v9  ;;  %v724_v13 = vpop.f32.mrf.mxu2  ;;  %v976_v21 = vmax.f32 %v944_v17, 0.0 }
  0xf0   : > { %v813_v14 = vpop.f32.mrf.mxu3 }
  0xf1   : > { %1523 = vst [vmem:[%s1765_s8 + $0x58] sm:$0xff] %v1491_v11   ;;  %v686_v15 = vpop.f32.mrf.mxu0  ;;  %v814_v19 = vadd.f32 %v813_v14, %v724_v13 }
  0xf2   : > { %v775_v16 = vpop.f32.mrf.mxu1 }
  0xf3   : > { %v776_v18 = vadd.f32 %v775_v16, %v686_v15  ;;  %v960_v25 = vadd.f32 %v1757_v51, %v814_v19 }
  0xf5   : > { %v945_v20 = vadd.f32 %v1757_v51, %v776_v18  ;;  %v992_v31 = vmax.f32 %v960_v25, 0.0 }
  0xf7   : > { %v977_v22 = vmax.f32 %v945_v20, 0.0  ;;  %v726_v23 = vpop.f32.mrf.mxu2 }
  0xf8   : > { %v815_v24 = vpop.f32.mrf.mxu3 }
  0xf9   : > { %v1456_v26 = vpack.c.bf16 %v977_v22, %v976_v21  ;;  %v816_v27 = vadd.f32 %v815_v24, %v726_v23  ;;  %v689_v28 = vpop.f32.mrf.mxu0 }
  0xfa   : > { %v778_v29 = vpop.f32.mrf.mxu1 }
  0xfb   : > { %1516 = vst [vmem:[%s1765_s8 + $0x20] sm:$0xff] %v1456_v26   ;;  %v961_v30 = vadd.f32 %v1757_v51, %v816_v27  ;;  %v779_v34 = vadd.f32 %v778_v29, %v689_v28 }
  0xfd   : > { %v993_v32 = vmax.f32 %v961_v30, 0.0  ;;  %v946_v39 = vadd.f32 %v1757_v51, %v779_v34 }
  0xff   : > { %v1496_v33 = vpack.c.bf16 %v993_v32, %v992_v31  ;;  %v729_v35 = vpop.f32.mrf.mxu2  ;;  %v978_v43 = vmax.f32 %v946_v39, 0.0 }
 0x100   : > { %v818_v36 = vpop.f32.mrf.mxu3 }
 0x101   : > { %1524 = vst [vmem:[%s1765_s8 + $0x60] sm:$0xff] %v1496_v33   ;;  %v691_v37 = vpop.f32.mrf.mxu0  ;;  %v819_v41 = vadd.f32 %v818_v36, %v729_v35 }
 0x102   : > { %v780_v38 = vpop.f32.mrf.mxu1 }
 0x103   : > { %v781_v40 = vadd.f32 %v780_v38, %v691_v37  ;;  %v962_v47 = vadd.f32 %v1757_v51, %v819_v41 }
 0x105   : > { %v947_v42 = vadd.f32 %v1757_v51, %v781_v40  ;;  %v994_v54 = vmax.f32 %v962_v47, 0.0 }
 0x107   : > { %v979_v44 = vmax.f32 %v947_v42, 0.0  ;;  %v731_v45 = vpop.f32.mrf.mxu2 }
 0x108   : > { %v820_v46 = vpop.f32.mrf.mxu3 }
 0x109   : > { %v1461_v48 = vpack.c.bf16 %v979_v44, %v978_v43  ;;  %v821_v49 = vadd.f32 %v820_v46, %v731_v45  ;;  %v694_v50 = vpop.f32.mrf.mxu0 }
 0x10a   : > { %v783_v52 = vpop.f32.mrf.mxu1 }
 0x10b   : > { %1517 = vst [vmem:[%s1765_s8 + $0x28] sm:$0xff] %v1461_v48   ;;  %v963_v53 = vadd.f32 %v1757_v51, %v821_v49  ;;  %v784_v57 = vadd.f32 %v783_v52, %v694_v50 }
 0x10d   : > { %v995_v55 = vmax.f32 %v963_v53, 0.0  ;;  %v948_v62 = vadd.f32 %v1757_v51, %v784_v57 }
 0x10f   : > { %v1501_v56 = vpack.c.bf16 %v995_v55, %v994_v54  ;;  %v734_v58 = vpop.f32.mrf.mxu2  ;;  %v980_v2 = vmax.f32 %v948_v62, 0.0 }
 0x110   : > { %v823_v59 = vpop.f32.mrf.mxu3 }
 0x111   : > { %1525 = vst [vmem:[%s1765_s8 + $0x68] sm:$0xff] %v1501_v56   ;;  %v696_v60 = vpop.f32.mrf.mxu0  ;;  %v824_v0 = vadd.f32 %v823_v59, %v734_v58 }
 0x112   : > { %v785_v61 = vpop.f32.mrf.mxu1 }
 0x113   : > { %v786_v63 = vadd.f32 %v785_v61, %v696_v60  ;;  %v964_v6 = vadd.f32 %v1757_v51, %v824_v0 }
 0x115   : > { %v949_v1 = vadd.f32 %v1757_v51, %v786_v63  ;;  %v996_v12 = vmax.f32 %v964_v6, 0.0 }
 0x117   : > { %v981_v3 = vmax.f32 %v949_v1, 0.0  ;;  %v736_v4 = vpop.f32.mrf.mxu2 }
 0x118   : > { %v825_v5 = vpop.f32.mrf.mxu3 }
 0x119   : > { %v1466_v7 = vpack.c.bf16 %v981_v3, %v980_v2  ;;  %v826_v8 = vadd.f32 %v825_v5, %v736_v4  ;;  %v699_v9 = vpop.f32.mrf.mxu0 }
 0x11a   : > { %v788_v10 = vpop.f32.mrf.mxu1 }
 0x11b   : > { %1518 = vst [vmem:[%s1765_s8 + $0x30] sm:$0xff] %v1466_v7   ;;  %v965_v11 = vadd.f32 %v1757_v51, %v826_v8  ;;  %v789_v15 = vadd.f32 %v788_v10, %v699_v9 }
 0x11d   : > { %v997_v13 = vmax.f32 %v965_v11, 0.0  ;;  %v950_v20 = vadd.f32 %v1757_v51, %v789_v15 }
 0x11f   : > { %v1506_v14 = vpack.c.bf16 %v997_v13, %v996_v12  ;;  %v739_v16 = vpop.f32.mrf.mxu2  ;;  %v982_v24 = vmax.f32 %v950_v20, 0.0 }
 0x120   : > { %v828_v17 = vpop.f32.mrf.mxu3 }
 0x121   : > { %1526 = vst [vmem:[%s1765_s8 + $0x70] sm:$0xff] %v1506_v14   ;;  %v701_v18 = vpop.f32.mrf.mxu0  ;;  %v829_v22 = vadd.f32 %v828_v17, %v739_v16 }
 0x122   : > { %v790_v19 = vpop.f32.mrf.mxu1 }
 0x123   : > { %v791_v21 = vadd.f32 %v790_v19, %v701_v18  ;;  %v966_v28 = vadd.f32 %v1757_v51, %v829_v22 }
 0x125   : > { %v951_v23 = vadd.f32 %v1757_v51, %v791_v21  ;;  %v998_v32 = vmax.f32 %v966_v28, 0.0 }
 0x127   : > { %v983_v25 = vmax.f32 %v951_v23, 0.0  ;;  %v741_v26 = vpop.f32.mrf.mxu2 }
 0x128   : > { %v830_v27 = vpop.f32.mrf.mxu3 }
 0x129   : > { %v1471_v29 = vpack.c.bf16 %v983_v25, %v982_v24  ;;  %v831_v30 = vadd.f32 %v830_v27, %v741_v26 }
 0x12b   : > { %1519 = vst [vmem:[%s1765_s8 + $0x38] sm:$0xff] %v1471_v29   ;;  %v967_v31 = vadd.f32 %v1757_v51, %v831_v30 }
 0x12d   : > { %v999_v33 = vmax.f32 %v967_v31, 0.0 }
 0x12f   : > { %v1511_v34 = vpack.c.bf16 %v999_v33, %v998_v32 }
 0x131   : > { %1527 = vst [vmem:[%s1765_s8 + $0x78] sm:$0xff] %v1511_v34  }
 0x132 PF: > { %s13_s14 = sadd.s32 1, %s1591_s14   ;;  %s1826_s12 = smov %s1587_s13 }
 0x133   : > { %p10_p5 = scmp.ge.s32.totalorder %s13_s14, 4   ;;  %s1827_s13 = smov %s1829_s15 }
 0x135   :  { %12 = sbr.rel (!%p10_p5) target bundleno = 2 (0x2), region = 76 }

// kernel: _lambda_.22
= control target key start
LH: loop header
LB: loop body
LE: loop exit
PB: predicated region body
PF: predicated region fallthrough
CT: control target
= control target key end

     0   :  { %s1068_s12 = smov 0   ;;  %s1070_s13 = smov 0   ;;  %s1200_s0 = inlined_call_operand.vmem [shape: bf16[128,640], index: 0, kind: input, shape index: {}]   ;;  %s1201_s1 = inlined_call_operand.vmem [shape: bf16[640,128], index: 1, kind: input, shape index: {}]   ;;  %s1202_s2 = inlined_call_operand.vmem [shape: f32[1,128], index: 2, kind: input, shape index: {}]   ;;  %s1203_s3 = inlined_call_operand.vmem [shape: bf16[128,128], index: 3, kind: output, shape index: {}]  }
   0x1   :  { %s1072_s14 = smov 0   ;;  %s1074_s15 = smov 0  }
   0x2   :  { %s1076_s16 = smov 0  }
   0x3 LB: > { %s25_s17 = sadd.s32 1, %s1041_s15  ;;  %p48_p1 = scmp.ne.s32.totalorder %s1033_s13, %s1029_s12  ;;  %s1045_s16 = sphi %s1076_s16, %s13_s16   ;;  %s1041_s15 = sphi %s1074_s15, %s1207_s15   ;;  %s1037_s14 = sphi %s1072_s14, %s1206_s14   ;;  %s1033_s13 = sphi %s1070_s13, %s1205_s13   ;;  %s1029_s12 = sphi %s1068_s12, %s1204_s12  }
   0x4   : > { %p26_p0 = scmp.ge.s32.totalorder %s25_s17, 5  ;;  %p49_p2 = scmp.eq.s32.totalorder %s1045_s16, 0 }
   0x5   : > { %s41_s19 = sadd.s32 1, %s1033_s13  ;;  %p801_p5 = scmp.ge.s32.totalorder %s1045_s16, 5 }
   0x6   : > { %s1209_s17 = smov (%p26_p0, %s25_s17), 0  ;;  %p50_p3 = por %p49_p2, %p48_p1 }
   0x7   : > { %s37_s18 = ssub.s32 %s1041_s15, %s1209_s17  ;;  %162 = sbr.rel (%p801_p5) target bundleno = 32 (0x20), region = 20 }
   0x8   : > { %p39_p4 = scmp.eq.s32.totalorder %s37_s18, 0 }
   0xa   : > { %s1103_s20 = scalar_select %p39_p4, %s1033_s13, %s41_s19  }
   0xc   : > { %165 = sbr.rel (!%p50_p3) target bundleno = 32 (0x20), region = 24  ;;  %s167_s21 = sand.u32 (%p50_p3), 1, %s1033_s13  }
   0xd   : > { %s803_s22 = sshll.u32 (%p50_p3), %s1041_s15, 2  ;;  %s802_s23 = sshll.u32 (%p50_p3), %s167_s21, 6 }
   0xe   : > { %s1111_s26 = scalar_lea.vmem (%p50_p3), %s1200_s0, %s803_s22  ;;  %s169_s27 = scalar_lea.vmem (%p50_p3), [#allocation3], %s802_s23 }
   0xf   : > { %v191_v0 = vld [vmem:[%s1111_s26] sm:$0xf] (%p50_p3)  ;;  %v193_v1 = vld [vmem:[%s1111_s26 + $0x14] sm:$0xf] (%p50_p3)  ;;  %v195_v2 = vld [vmem:[%s1111_s26 + $0x28] sm:$0xf] (%p50_p3) }
  0x10   : > { %192 = vst [vmem:[%s169_s27] sm:$0xf] (%p50_p3), %v191_v0  ;;  %v197_v3 = vld [vmem:[%s1111_s26 + $0x3c] sm:$0xf] (%p50_p3)  ;;  %v199_v4 = vld [vmem:[%s1111_s26 + $0x50] sm:$0xf] (%p50_p3) }
  0x11   : > { %194 = vst [vmem:[%s169_s27 + $0x4] sm:$0xf] %v193_v1  ;;  %v201_v5 = vld [vmem:[%s1111_s26 + $0x64] sm:$0xf]  ;;  %v203_v6 = vld [vmem:[%s1111_s26 + $0x78] sm:$0xf] }
  0x12   : > { %196 = vst [vmem:[%s169_s27 + $0x8] sm:$0xf] %v195_v2  ;;  %v205_v7 = vld [vmem:[%s1111_s26 + $0x8c] sm:$0xf]  ;;  %v207_v8 = vld [vmem:[%s1111_s26 + $0xa0] sm:$0xf] }
  0x13   : > { %198 = vst [vmem:[%s169_s27 + $0xc] sm:$0xf] %v197_v3  ;;  %v209_v9 = vld [vmem:[%s1111_s26 + $0xb4] sm:$0xf]  ;;  %v211_v10 = vld [vmem:[%s1111_s26 + $0xc8] sm:$0xf] }
  0x14   : > { %200 = vst [vmem:[%s169_s27 + $0x10] sm:$0xf] %v199_v4  ;;  %v213_v11 = vld [vmem:[%s1111_s26 + $0xdc] sm:$0xf]  ;;  %v215_v12 = vld [vmem:[%s1111_s26 + $0xf0] sm:$0xf] }
  0x15   : > { %202 = vst [vmem:[%s169_s27 + $0x14] sm:$0xf] %v201_v5  ;;  %v217_v13 = vld [vmem:[%s1111_s26 + $0x104] sm:$0xf]  ;;  %v219_v14 = vld [vmem:[%s1111_s26 + $0x118] sm:$0xf] }
  0x16   : > { %204 = vst [vmem:[%s169_s27 + $0x18] sm:$0xf] %v203_v6  ;;  %v221_v15 = vld [vmem:[%s1111_s26 + $0x12c] sm:$0xf] }
  0x17   : > { %206 = vst [vmem:[%s169_s27 + $0x1c] sm:$0xf] %v205_v7 }
  0x18   : > { %208 = vst [vmem:[%s169_s27 + $0x20] sm:$0xf] %v207_v8 }
  0x19   : > { %210 = vst [vmem:[%s169_s27 + $0x24] sm:$0xf] %v209_v9 }
  0x1a   : > { %212 = vst [vmem:[%s169_s27 + $0x28] sm:$0xf] %v211_v10 }
  0x1b   : > { %214 = vst [vmem:[%s169_s27 + $0x2c] sm:$0xf] %v213_v11 }
  0x1c   : > { %216 = vst [vmem:[%s169_s27 + $0x30] sm:$0xf] %v215_v12 }
  0x1d   : > { %218 = vst [vmem:[%s169_s27 + $0x34] sm:$0xf] %v217_v13 }
  0x1e   : > { %220 = vst [vmem:[%s169_s27 + $0x38] sm:$0xf] %v219_v14 }
  0x1f   : > { %222 = vst [vmem:[%s169_s27 + $0x3c] sm:$0xf] %v221_v15 }
  0x20 PF: > { %p804_p6 = scmp.ge.s32.totalorder %s1045_s16, 1  ;;  %p289_p7 = scmp.lt.s32.totalorder %s1045_s16, 6 }
  0x22   : > { %p290_p8 = pnand %p804_p6, %p289_p7 }
  0x23   : > { %s296_s28 = sand.u32 (!%p290_p8), 1, %s1029_s12   ;;  %s806_s29 = sshll.u32 (!%p290_p8), %s1037_s14, 4 }
  0x24   : > { %293 = sbr.rel (%p290_p8) target bundleno = 272 (0x110), region = 69  ;;  %s805_s30 = sshll.u32 (!%p290_p8), %s296_s28, 6 }
  0x25   : > { %p335_p9 = scmp.lt.s32.totalorder (!%p290_p8), %s806_s29, 79  ;;  %s1138_s8 = scalar_lea.vmem (!%p290_p8), [#allocation3], %s805_s30 }
  0x26   : > { %p808_p10 = scmp.ne.s32.totalorder (!%p290_p8), %s1037_s14, 0 }
  0x29   : > { %s1211_s29 = smov (!%p335_p9, %s806_s29), 79  ;;  %358 = sbr.rel (%p808_p10) target bundleno = 63 (0x3f), region = 77 }
  0x2a   : > { %s807_s4 = sshll.u32 %s1211_s29, 2 }
  0x2b   : > { %s1136_s7 = scalar_lea.vmem %s1201_s1, %s807_s4 }
  0x2e   : > { %v1047_v16 = vmov 0.0  }
  0x2f   : > { %359 = vst [vmem:[#allocation2 + $0x30] sm:$0xff] %v1047_v16 }
  0x30   : > { %360 = vst [vmem:[#allocation2] sm:$0xff] %v1047_v16 }
  0x31   : > { %361 = vst [vmem:[#allocation2 + $0x58] sm:$0xff] %v1047_v16 }
  0x32   : > { %362 = vst [vmem:[#allocation2 + $0x18] sm:$0xff] %v1047_v16 }
  0x33   : > { %363 = vst [vmem:[#allocation2 + $0x50] sm:$0xff] %v1047_v16 }
  0x34   : > { %364 = vst [vmem:[#allocation2 + $0x68] sm:$0xff] %v1047_v16 }
  0x35   : > { %365 = vst [vmem:[#allocation2 + $0x8] sm:$0xff] %v1047_v16 }
  0x36   : > { %366 = vst [vmem:[#allocation2 + $0x48] sm:$0xff] %v1047_v16 }
  0x37   : > { %367 = vst [vmem:[#allocation2 + $0x40] sm:$0xff] %v1047_v16 }
  0x38   : > { %368 = vst [vmem:[#allocation2 + $0x20] sm:$0xff] %v1047_v16 }
  0x39   : > { %369 = vst [vmem:[#allocation2 + $0x10] sm:$0xff] %v1047_v16 }
  0x3a   : > { %370 = vst [vmem:[#allocation2 + $0x38] sm:$0xff] %v1047_v16 }
  0x3b   : > { %371 = vst [vmem:[#allocation2 + $0x60] sm:$0xff] %v1047_v16 }
  0x3c   : > { %372 = vst [vmem:[#allocation2 + $0x70] sm:$0xff] %v1047_v16 }
  0x3d   : > { %373 = vst [vmem:[#allocation2 + $0x78] sm:$0xff] %v1047_v16 }
  0x3e   : > { %374 = vst [vmem:[#allocation2 + $0x28] sm:$0xff] %v1047_v16 }
  0x3f PF: > { %v893_v17 = vld [vmem:[%s1136_s7 + $0x38] sm:$0xff]  ;;  %v892_v18 = vld [vmem:[%s1136_s7 + $0x30] sm:$0xff]  ;;  %v891_v19 = vld [vmem:[%s1136_s7 + $0x28] sm:$0xff]  ;;  %p873_p11 = scmp.ne.s32.totalorder %s1037_s14, 4 }
  0x40   : > { %519 = vmatpush.bf16.msra.mxu0 %v893_v17  ;;  %941 = vmatpush.bf16.msra.mxu1 %v893_v17  ;;  %v890_v20 = vld [vmem:[%s1136_s7 + $0x20] sm:$0xff]  ;;  %v889_v21 = vld [vmem:[%s1136_s7 + $0x18] sm:$0xff]  ;;  %v888_v22 = vld [vmem:[%s1136_s7 + $0x10] sm:$0xff] }
  0x41   : > { %942 = vmatpush.bf16.msra.mxu2 %v893_v17  ;;  %943 = vmatpush.bf16.msra.mxu3 %v893_v17  ;;  %v887_v23 = vld [vmem:[%s1136_s7 + $0x8] sm:$0xff]  ;;  %v886_v24 = vld [vmem:[%s1136_s7] sm:$0xff]  ;;  %v880_v26 = vld [vmem:[%s1138_s8 + $0x10] sm:$0xff] }
  0x42   : > { %v878_v25 = vld [vmem:[%s1138_s8] sm:$0xff]  ;;  %v884_v28 = vld [vmem:[%s1138_s8 + $0x30] sm:$0xff]  ;;  %v879_v29 = vld [vmem:[%s1138_s8 + $0x8] sm:$0xff] }
  0x43   : > { %v882_v27 = vld [vmem:[%s1138_s8 + $0x20] sm:$0xff]  ;;  %v881_v30 = vld [vmem:[%s1138_s8 + $0x18] sm:$0xff]  ;;  %v883_v31 = vld [vmem:[%s1138_s8 + $0x28] sm:$0xff] }
  0x44   : > { %520 = vmatpush.bf16.msra.mxu0 %v892_v18  ;;  %944 = vmatpush.bf16.msra.mxu1 %v892_v18  ;;  %v885_v32 = vld [vmem:[%s1138_s8 + $0x38] sm:$0xff]  ;;  %v375_v33 = vld [vmem:[#allocation2 + $0x30] sm:$0xff]  ;;  %v383_v39 = vld [vmem:[#allocation2 + $0x40] sm:$0xff] }
  0x45   : > { %945 = vmatpush.bf16.msra.mxu2 %v892_v18  ;;  %946 = vmatpush.bf16.msra.mxu3 %v892_v18  ;;  %v379_v34 = vld [vmem:[#allocation2 + $0x50] sm:$0xff]  ;;  %v387_v40 = vld [vmem:[#allocation2 + $0x60] sm:$0xff]  ;;  %v380_v42 = vld [vmem:[#allocation2 + $0x68] sm:$0xff] }
  0x46   : > { %v376_v41 = vld [vmem:[#allocation2] sm:$0xff]  ;;  %v388_v52 = vld [vmem:[#allocation2 + $0x70] sm:$0xff]  ;;  %v377_v53 = vld [vmem:[#allocation2 + $0x58] sm:$0xff] }
  0x47   : > { %v384_v51 = vld [vmem:[#allocation2 + $0x20] sm:$0xff]  ;;  %v381_v54 = vld [vmem:[#allocation2 + $0x8] sm:$0xff]  ;;  %v385_v63 = vld [vmem:[#allocation2 + $0x10] sm:$0xff] }
  0x48   : > { %521 = vmatpush.bf16.msra.mxu0 %v891_v19  ;;  %947 = vmatpush.bf16.msra.mxu1 %v891_v19  ;;  %v389_v0 = vld [vmem:[#allocation2 + $0x78] sm:$0xff]  ;;  %v382_v2 = vld [vmem:[#allocation2 + $0x48] sm:$0xff] }
  0x49   : > { %948 = vmatpush.bf16.msra.mxu2 %v891_v19  ;;  %949 = vmatpush.bf16.msra.mxu3 %v891_v19  ;;  %v378_v1 = vld [vmem:[#allocation2 + $0x18] sm:$0xff]  ;;  %v390_v12 = vld [vmem:[#allocation2 + $0x28] sm:$0xff] }
  0x4a   : > { %v386_v11 = vld [vmem:[#allocation2 + $0x38] sm:$0xff] }
  0x4c   : > { %522 = vmatpush.bf16.msra.mxu0 %v890_v20  ;;  %950 = vmatpush.bf16.msra.mxu1 %v890_v20 }
  0x4d   : > { %951 = vmatpush.bf16.msra.mxu2 %v890_v20  ;;  %952 = vmatpush.bf16.msra.mxu3 %v890_v20 }
  0x50   : > { %523 = vmatpush.bf16.msra.mxu0 %v889_v21  ;;  %953 = vmatpush.bf16.msra.mxu1 %v889_v21 }
  0x51   : > { %954 = vmatpush.bf16.msra.mxu2 %v889_v21  ;;  %955 = vmatpush.bf16.msra.mxu3 %v889_v21 }
  0x54   : > { %524 = vmatpush.bf16.msra.mxu0 %v888_v22  ;;  %956 = vmatpush.bf16.msra.mxu1 %v888_v22 }
  0x55   : > { %957 = vmatpush.bf16.msra.mxu2 %v888_v22  ;;  %958 = vmatpush.bf16.msra.mxu3 %v888_v22 }
  0x58   : > { %525 = vmatpush.bf16.msra.mxu0 %v887_v23  ;;  %959 = vmatpush.bf16.msra.mxu1 %v887_v23 }
  0x59   : > { %960 = vmatpush.bf16.msra.mxu2 %v887_v23  ;;  %961 = vmatpush.bf16.msra.mxu3 %v887_v23 }
  0x5c   : > { %526 = vmatpush.bf16.msra.mxu0 %v886_v24  ;;  %962 = vmatpush.bf16.msra.mxu1 %v886_v24 }
  0x5d   : > { %963 = vmatpush.bf16.msra.mxu2 %v886_v24  ;;  %964 = vmatpush.bf16.msra.mxu3 %v886_v24 }
  0x5f   : > { %527 = vmatmul.bf16.vlgmr.msra.gmra.mxu0 %v878_v25  ;;  %537 = vmatmul.bf16.vlgmr.msra.gmra.mxu1 %v880_v26 }
  0x60   : > { %547 = vmatmul.bf16.vlgmr.msra.gmra.mxu2 %v882_v27  ;;  %557 = vmatmul.bf16.vlgmr.msra.gmra.mxu3 %v884_v28 }
  0x6f   : > { %532 = vmatmul.bf16.gmra.mxu0 %v879_v29  ;;  %542 = vmatmul.bf16.gmra.mxu1 %v881_v30 }
  0x70   : > { %552 = vmatmul.bf16.gmra.mxu2 %v883_v31  ;;  %562 = vmatmul.bf16.gmra.mxu3 %v885_v32 }
  0xdc   : > { %v528_v35 = vpop.f32.mrf.mxu0  ;;  %v538_v36 = vpop.f32.mrf.mxu1 }
  0xdd   : > { %v568_v37 = vadd.f32 %v528_v35, %v375_v33  ;;  %v572_v38 = vadd.f32 %v538_v36, %v379_v34 }
  0xdf   : > { %584 = vst [vmem:[#allocation2 + $0x30] sm:$0xff] %v568_v37 }
  0xe0   : > { %588 = vst [vmem:[#allocation2 + $0x50] sm:$0xff] %v572_v38 }
  0xe3   : > { %v548_v43 = vpop.f32.mrf.mxu2  ;;  %v558_v44 = vpop.f32.mrf.mxu3 }
  0xe4   : > { %v576_v45 = vadd.f32 %v548_v43, %v383_v39  ;;  %v580_v46 = vadd.f32 %v558_v44, %v387_v40  ;;  %v530_v47 = vpop.f32.mrf.mxu0  ;;  %v540_v48 = vpop.f32.mrf.mxu1 }
  0xe5   : > { %v569_v49 = vadd.f32 %v530_v47, %v376_v41  ;;  %v573_v50 = vadd.f32 %v540_v48, %v380_v42 }
  0xe6   : > { %592 = vst [vmem:[#allocation2 + $0x40] sm:$0xff] %v576_v45 }
  0xe7   : > { %596 = vst [vmem:[#allocation2 + $0x60] sm:$0xff] %v580_v46 }
  0xe8   : > { %585 = vst [vmem:[#allocation2] sm:$0xff] %v569_v49 }
  0xe9   : > { %589 = vst [vmem:[#allocation2 + $0x68] sm:$0xff] %v573_v50 }
  0xeb   : > { %v550_v55 = vpop.f32.mrf.mxu2  ;;  %v560_v56 = vpop.f32.mrf.mxu3 }
  0xec   : > { %v577_v57 = vadd.f32 %v550_v55, %v384_v51  ;;  %v581_v58 = vadd.f32 %v560_v56, %v388_v52  ;;  %v533_v59 = vpop.f32.mrf.mxu0  ;;  %v543_v60 = vpop.f32.mrf.mxu1 }
  0xed   : > { %v570_v61 = vadd.f32 %v533_v59, %v377_v53  ;;  %v574_v62 = vadd.f32 %v543_v60, %v381_v54 }
  0xee   : > { %593 = vst [vmem:[#allocation2 + $0x20] sm:$0xff] %v577_v57 }
  0xef   : > { %597 = vst [vmem:[#allocation2 + $0x70] sm:$0xff] %v581_v58 }
  0xf0   : > { %586 = vst [vmem:[#allocation2 + $0x58] sm:$0xff] %v570_v61 }
  0xf1   : > { %590 = vst [vmem:[#allocation2 + $0x8] sm:$0xff] %v574_v62 }
  0xf3   : > { %v553_v3 = vpop.f32.mrf.mxu2  ;;  %v563_v4 = vpop.f32.mrf.mxu3 }
  0xf4   : > { %v578_v5 = vadd.f32 %v553_v3, %v385_v63  ;;  %v582_v6 = vadd.f32 %v563_v4, %v389_v0  ;;  %v535_v7 = vpop.f32.mrf.mxu0  ;;  %v545_v8 = vpop.f32.mrf.mxu1 }
  0xf5   : > { %v571_v9 = vadd.f32 %v535_v7, %v378_v1  ;;  %v575_v10 = vadd.f32 %v545_v8, %v382_v2 }
  0xf6   : > { %594 = vst [vmem:[#allocation2 + $0x10] sm:$0xff] %v578_v5 }
  0xf7   : > { %598 = vst [vmem:[#allocation2 + $0x78] sm:$0xff] %v582_v6 }
  0xf8   : > { %587 = vst [vmem:[#allocation2 + $0x18] sm:$0xff] %v571_v9 }
  0xf9   : > { %591 = vst [vmem:[#allocation2 + $0x48] sm:$0xff] %v575_v10 }
  0xfb   : > { %v555_v13 = vpop.f32.mrf.mxu2  ;;  %v565_v14 = vpop.f32.mrf.mxu3  ;;  %603 = sbr.rel (%p873_p11) target bundleno = 272 (0x110), region = 81 }
  0xfc   : > { %v579_v15 = vadd.f32 %v555_v13, %v386_v11  ;;  %v583_v16 = vadd.f32 %v565_v14, %v390_v12 }
  0xfe   : > { %595 = vst [vmem:[#allocation2 + $0x38] sm:$0xff] %v579_v15 }
  0xff   : > { %599 = vst [vmem:[#allocation2 + $0x28] sm:$0xff] %v583_v16 }
 0x100   : > { %v604_v17 = vld [vmem:[#allocation2 + $0x30] sm:$0xff]  ;;  %v605_v18 = vld [vmem:[#allocation2] sm:$0xff]  ;;  %v606_v20 = vld [vmem:[#allocation2 + $0x58] sm:$0xff] }
 0x101   : > { %v1006_v19 = vld [vmem:[%s1202_s2] ss:$0 sm:$0xff]  ;;  %v607_v21 = vld [vmem:[#allocation2 + $0x18] sm:$0xff]  ;;  %v608_v22 = vld [vmem:[#allocation2 + $0x50] sm:$0xff] }
 0x102   : > { %v609_v23 = vld [vmem:[#allocation2 + $0x68] sm:$0xff]  ;;  %v624_v25 = vadd.f32 %v1006_v19, %v604_v17  ;;  %v625_v26 = vadd.f32 %v1006_v19, %v605_v18  ;;  %v626_v27 = vadd.f32 %v1006_v19, %v606_v20  ;;  %v627_v28 = vadd.f32 %v1006_v19, %v607_v21  ;;  %v612_v34 = vld [vmem:[#allocation2 + $0x40] sm:$0xff]  ;;  %v614_v40 = vld [vmem:[#allocation2 + $0x10] sm:$0xff] }
 0x103   : > { %v610_v24 = vld [vmem:[#allocation2 + $0x8] sm:$0xff]  ;;  %v628_v30 = vadd.f32 %v1006_v19, %v608_v22  ;;  %v629_v31 = vadd.f32 %v1006_v19, %v609_v23  ;;  %v613_v35 = vld [vmem:[#allocation2 + $0x20] sm:$0xff]  ;;  %v617_v47 = vld [vmem:[#allocation2 + $0x70] sm:$0xff]  ;;  %v632_v50 = vadd.f32 %v1006_v19, %v612_v34  ;;  %v634_v56 = vadd.f32 %v1006_v19, %v614_v40 }
 0x104   : > { %v611_v29 = vld [vmem:[#allocation2 + $0x48] sm:$0xff]  ;;  %v630_v32 = vadd.f32 %v1006_v19, %v610_v24  ;;  %v640_v36 = vmax.f32 %v624_v25, 0.0  ;;  %v641_v37 = vmax.f32 %v625_v26, 0.0  ;;  %v642_v38 = vmax.f32 %v626_v27, 0.0  ;;  %v616_v46 = vld [vmem:[#allocation2 + $0x60] sm:$0xff]  ;;  %v618_v52 = vld [vmem:[#allocation2 + $0x78] sm:$0xff] }
 0x105   : > { %v631_v33 = vadd.f32 %v1006_v19, %v611_v29  ;;  %v643_v39 = vmax.f32 %v627_v28, 0.0  ;;  %v615_v41 = vld [vmem:[#allocation2 + $0x38] sm:$0xff]  ;;  %v644_v42 = vmax.f32 %v628_v30, 0.0  ;;  %v645_v43 = vmax.f32 %v629_v31, 0.0 }
 0x106   : > { %v646_v44 = vmax.f32 %v630_v32, 0.0  ;;  %v897_v48 = vpack.c.bf16 %v641_v37, %v640_v36  ;;  %v633_v51 = vadd.f32 %v1006_v19, %v613_v35  ;;  %v619_v53 = vld [vmem:[#allocation2 + $0x28] sm:$0xff]  ;;  %v635_v57 = vadd.f32 %v1006_v19, %v615_v41 }
 0x107   : > { %v647_v45 = vmax.f32 %v631_v33, 0.0  ;;  %v902_v49 = vpack.c.bf16 %v643_v39, %v642_v38  ;;  %v907_v54 = vpack.c.bf16 %v645_v43, %v644_v42  ;;  %v648_v58 = vmax.f32 %v632_v50, 0.0 }
 0x108   : > { %898 = vst [vmem:[%s1203_s3] sm:$0xff] %v897_v48   ;;  %v649_v59 = vmax.f32 %v633_v51, 0.0  ;;  %v636_v60 = vadd.f32 %v1006_v19, %v616_v46  ;;  %v637_v61 = vadd.f32 %v1006_v19, %v617_v47  ;;  %v650_v62 = vmax.f32 %v634_v56, 0.0 }
 0x109   : > { %v912_v55 = vpack.c.bf16 %v647_v45, %v646_v44  ;;  %934 = vst [vmem:[%s1203_s3 + $0x8] sm:$0xff] %v902_v49   ;;  %v651_v63 = vmax.f32 %v635_v57, 0.0  ;;  %v638_v0 = vadd.f32 %v1006_v19, %v618_v52  ;;  %v639_v1 = vadd.f32 %v1006_v19, %v619_v53 }
 0x10a   : > { %935 = vst [vmem:[%s1203_s3 + $0x10] sm:$0xff] %v907_v54   ;;  %v917_v2 = vpack.c.bf16 %v649_v59, %v648_v58  ;;  %v652_v3 = vmax.f32 %v636_v60, 0.0  ;;  %v653_v4 = vmax.f32 %v637_v61, 0.0 }
 0x10b   : > { %936 = vst [vmem:[%s1203_s3 + $0x18] sm:$0xff] %v912_v55   ;;  %v922_v5 = vpack.c.bf16 %v651_v63, %v650_v62  ;;  %v654_v6 = vmax.f32 %v638_v0, 0.0  ;;  %v655_v7 = vmax.f32 %v639_v1, 0.0 }
 0x10c   : > { %937 = vst [vmem:[%s1203_s3 + $0x20] sm:$0xff] %v917_v2   ;;  %v927_v8 = vpack.c.bf16 %v653_v4, %v652_v3 }
 0x10d   : > { %938 = vst [vmem:[%s1203_s3 + $0x28] sm:$0xff] %v922_v5   ;;  %v932_v9 = vpack.c.bf16 %v655_v7, %v654_v6 }
 0x10e   : > { %939 = vst [vmem:[%s1203_s3 + $0x30] sm:$0xff] %v927_v8  }
 0x10f   : > { %940 = vst [vmem:[%s1203_s3 + $0x38] sm:$0xff] %v932_v9  }
 0x110 PF: > { %s13_s16 = sadd.s32 1, %s1045_s16   ;;  %s1204_s12 = smov %s1033_s13 }
 0x111   : > { %p10_p12 = scmp.ge.s32.totalorder %s13_s16, 7   ;;  %s1205_s13 = smov %s1103_s20 }
 0x112   : > { %s1206_s14 = smov %s1041_s15  ;;  %s1207_s15 = smov %s1209_s17 }
 0x113   :  { %12 = sbr.rel (!%p10_p12) target bundleno = 3 (0x3), region = 122 }

// kernel: _lambda_.23
= control target key start
LH: loop header
LB: loop body
LE: loop exit
PB: predicated region body
PF: predicated region fallthrough
CT: control target
= control target key end

     0   :  { %s1239_s15 = smov 0   ;;  %s1241_s16 = smov 0   ;;  %s1413_s0 = inlined_call_operand.vmem [shape: bf16[128,640], index: 0, kind: input, shape index: {}]   ;;  %s1414_s1 = inlined_call_operand.vmem [shape: bf16[640,128], index: 1, kind: input, shape index: {}]   ;;  %s1415_s2 = inlined_call_operand.vmem [shape: f32[1,128], index: 2, kind: input, shape index: {}]   ;;  %s1416_s3 = inlined_call_operand.vmem [shape: bf16[128,128], index: 3, kind: input, shape index: {}]   ;;  %s1417_s4 = inlined_call_operand.vmem [shape: bf16[128,128], index: 4, kind: output, shape index: {}]  }
   0x1   :  { %s1243_s17 = smov 0   ;;  %s1245_s18 = smov 0  }
   0x2   :  { %s1247_s19 = smov 0  }
   0x3 LB: > { %s26_s20 = sadd.s32 1, %s1207_s18  ;;  %p49_p1 = scmp.ne.s32.totalorder %s1199_s16, %s1195_s15  ;;  %s1211_s19 = sphi %s1247_s19, %s14_s19   ;;  %s1207_s18 = sphi %s1245_s18, %s1421_s18   ;;  %s1203_s17 = sphi %s1243_s17, %s1420_s17   ;;  %s1199_s16 = sphi %s1241_s16, %s1419_s16   ;;  %s1195_s15 = sphi %s1239_s15, %s1418_s15  }
   0x4   : > { %p27_p0 = scmp.ge.s32.totalorder %s26_s20, 5  ;;  %p50_p2 = scmp.eq.s32.totalorder %s1211_s19, 0 }
   0x5   : > { %s42_s22 = sadd.s32 1, %s1199_s16  ;;  %p928_p5 = scmp.ge.s32.totalorder %s1211_s19, 5 }
   0x6   : > { %s1423_s20 = smov (%p27_p0, %s26_s20), 0  ;;  %p51_p3 = por %p50_p2, %p49_p1 }
   0x7   : > { %s38_s21 = ssub.s32 %s1207_s18, %s1423_s20  ;;  %203 = sbr.rel (%p928_p5) target bundleno = 32 (0x20), region = 24 }
   0x8   : > { %p40_p4 = scmp.eq.s32.totalorder %s38_s21, 0 }
   0xa   : > { %s1274_s23 = scalar_select %p40_p4, %s1199_s16, %s42_s22  }
   0xc   : > { %206 = sbr.rel (!%p51_p3) target bundleno = 32 (0x20), region = 28  ;;  %s208_s24 = sand.u32 (%p51_p3), 1, %s1199_s16  }
   0xd   : > { %s930_s25 = sshll.u32 (%p51_p3), %s1207_s18, 2  ;;  %s929_s26 = sshll.u32 (%p51_p3), %s208_s24, 6 }
   0xe   : > { %s1282_s29 = scalar_lea.vmem (%p51_p3), %s1413_s0, %s930_s25  ;;  %s210_s30 = scalar_lea.vmem (%p51_p3), [#allocation3], %s929_s26 }
   0xf   : > { %v232_v0 = vld [vmem:[%s1282_s29] sm:$0xf] (%p51_p3)  ;;  %v234_v1 = vld [vmem:[%s1282_s29 + $0x14] sm:$0xf] (%p51_p3)  ;;  %v236_v2 = vld [vmem:[%s1282_s29 + $0x28] sm:$0xf] (%p51_p3) }
  0x10   : > { %233 = vst [vmem:[%s210_s30] sm:$0xf] (%p51_p3), %v232_v0  ;;  %v238_v3 = vld [vmem:[%s1282_s29 + $0x3c] sm:$0xf] (%p51_p3)  ;;  %v240_v4 = vld [vmem:[%s1282_s29 + $0x50] sm:$0xf] (%p51_p3) }
  0x11   : > { %235 = vst [vmem:[%s210_s30 + $0x4] sm:$0xf] %v234_v1  ;;  %v242_v5 = vld [vmem:[%s1282_s29 + $0x64] sm:$0xf]  ;;  %v244_v6 = vld [vmem:[%s1282_s29 + $0x78] sm:$0xf] }
  0x12   : > { %237 = vst [vmem:[%s210_s30 + $0x8] sm:$0xf] %v236_v2  ;;  %v246_v7 = vld [vmem:[%s1282_s29 + $0x8c] sm:$0xf]  ;;  %v248_v8 = vld [vmem:[%s1282_s29 + $0xa0] sm:$0xf] }
  0x13   : > { %239 = vst [vmem:[%s210_s30 + $0xc] sm:$0xf] %v238_v3  ;;  %v250_v9 = vld [vmem:[%s1282_s29 + $0xb4] sm:$0xf]  ;;  %v252_v10 = vld [vmem:[%s1282_s29 + $0xc8] sm:$0xf] }
  0x14   : > { %241 = vst [vmem:[%s210_s30 + $0x10] sm:$0xf] %v240_v4  ;;  %v254_v11 = vld [vmem:[%s1282_s29 + $0xdc] sm:$0xf]  ;;  %v256_v12 = vld [vmem:[%s1282_s29 + $0xf0] sm:$0xf] }
  0x15   : > { %243 = vst [vmem:[%s210_s30 + $0x14] sm:$0xf] %v242_v5  ;;  %v258_v13 = vld [vmem:[%s1282_s29 + $0x104] sm:$0xf]  ;;  %v260_v14 = vld [vmem:[%s1282_s29 + $0x118] sm:$0xf] }
  0x16   : > { %245 = vst [vmem:[%s210_s30 + $0x18] sm:$0xf] %v244_v6  ;;  %v262_v15 = vld [vmem:[%s1282_s29 + $0x12c] sm:$0xf] }
  0x17   : > { %247 = vst [vmem:[%s210_s30 + $0x1c] sm:$0xf] %v246_v7 }
  0x18   : > { %249 = vst [vmem:[%s210_s30 + $0x20] sm:$0xf] %v248_v8 }
  0x19   : > { %251 = vst [vmem:[%s210_s30 + $0x24] sm:$0xf] %v250_v9 }
  0x1a   : > { %253 = vst [vmem:[%s210_s30 + $0x28] sm:$0xf] %v252_v10 }
  0x1b   : > { %255 = vst [vmem:[%s210_s30 + $0x2c] sm:$0xf] %v254_v11 }
  0x1c   : > { %257 = vst [vmem:[%s210_s30 + $0x30] sm:$0xf] %v256_v12 }
  0x1d   : > { %259 = vst [vmem:[%s210_s30 + $0x34] sm:$0xf] %v258_v13 }
  0x1e   : > { %261 = vst [vmem:[%s210_s30 + $0x38] sm:$0xf] %v260_v14 }
  0x1f   : > { %263 = vst [vmem:[%s210_s30 + $0x3c] sm:$0xf] %v262_v15 }
  0x20 PF: > { %p931_p6 = scmp.ge.s32.totalorder %s1211_s19, 1  ;;  %p330_p7 = scmp.lt.s32.totalorder %s1211_s19, 6 }
  0x22   : > { %p331_p8 = pnand %p931_p6, %p330_p7 }
  0x23   : > { %s337_s5 = sand.u32 (!%p331_p8), 1, %s1195_s15   ;;  %s933_s6 = sshll.u32 (!%p331_p8), %s1203_s17, 4 }
  0x24   : > { %334 = sbr.rel (%p331_p8) target bundleno = 282 (0x11a), region = 73  ;;  %s932_s7 = sshll.u32 (!%p331_p8), %s337_s5, 6 }
  0x25   : > { %p386_p9 = scmp.lt.s32.totalorder (!%p331_p8), %s933_s6, 79  ;;  %s1309_s12 = scalar_lea.vmem (!%p331_p8), [#allocation3], %s932_s7 }
  0x26   : > { %p935_p10 = scmp.ne.s32.totalorder (!%p331_p8), %s1203_s17, 0 }
  0x29   : > { %s1425_s6 = smov (!%p386_p9, %s933_s6), 79  ;;  %418 = sbr.rel (%p935_p10) target bundleno = 63 (0x3f), region = 81 }
  0x2a   : > { %s934_s8 = sshll.u32 %s1425_s6, 2 }
  0x2b   : > { %s1307_s11 = scalar_lea.vmem %s1414_s1, %s934_s8 }
  0x2e   : > { %v1213_v16 = vmov 0.0  }
  0x2f   : > { %419 = vst [vmem:[#allocation2 + $0x30] sm:$0xff] %v1213_v16 }
  0x30   : > { %420 = vst [vmem:[#allocation2] sm:$0xff] %v1213_v16 }
  0x31   : > { %421 = vst [vmem:[#allocation2 + $0x58] sm:$0xff] %v1213_v16 }
  0x32   : > { %422 = vst [vmem:[#allocation2 + $0x18] sm:$0xff] %v1213_v16 }
  0x33   : > { %423 = vst [vmem:[#allocation2 + $0x50] sm:$0xff] %v1213_v16 }
  0x34   : > { %424 = vst [vmem:[#allocation2 + $0x68] sm:$0xff] %v1213_v16 }
  0x35   : > { %425 = vst [vmem:[#allocation2 + $0x8] sm:$0xff] %v1213_v16 }
  0x36   : > { %426 = vst [vmem:[#allocation2 + $0x48] sm:$0xff] %v1213_v16 }
  0x37   : > { %427 = vst [vmem:[#allocation2 + $0x40] sm:$0xff] %v1213_v16 }
  0x38   : > { %428 = vst [vmem:[#allocation2 + $0x20] sm:$0xff] %v1213_v16 }
  0x39   : > { %429 = vst [vmem:[#allocation2 + $0x10] sm:$0xff] %v1213_v16 }
  0x3a   : > { %430 = vst [vmem:[#allocation2 + $0x38] sm:$0xff] %v1213_v16 }
  0x3b   : > { %431 = vst [vmem:[#allocation2 + $0x60] sm:$0xff] %v1213_v16 }
  0x3c   : > { %432 = vst [vmem:[#allocation2 + $0x70] sm:$0xff] %v1213_v16 }
  0x3d   : > { %433 = vst [vmem:[#allocation2 + $0x78] sm:$0xff] %v1213_v16 }
  0x3e   : > { %434 = vst [vmem:[#allocation2 + $0x28] sm:$0xff] %v1213_v16 }
  0x3f PF: > { %v1020_v17 = vld [vmem:[%s1307_s11 + $0x38] sm:$0xff]  ;;  %v1019_v18 = vld [vmem:[%s1307_s11 + $0x30] sm:$0xff]  ;;  %v1018_v19 = vld [vmem:[%s1307_s11 + $0x28] sm:$0xff]  ;;  %p1000_p11 = scmp.ne.s32.totalorder %s1203_s17, 4 }
  0x40   : > { %579 = vmatpush.bf16.msra.mxu0 %v1020_v17  ;;  %1107 = vmatpush.bf16.msra.mxu1 %v1020_v17  ;;  %v1017_v20 = vld [vmem:[%s1307_s11 + $0x20] sm:$0xff]  ;;  %v1016_v21 = vld [vmem:[%s1307_s11 + $0x18] sm:$0xff]  ;;  %v1015_v22 = vld [vmem:[%s1307_s11 + $0x10] sm:$0xff] }
  0x41   : > { %1108 = vmatpush.bf16.msra.mxu2 %v1020_v17  ;;  %1109 = vmatpush.bf16.msra.mxu3 %v1020_v17  ;;  %v1014_v23 = vld [vmem:[%s1307_s11 + $0x8] sm:$0xff]  ;;  %v1013_v24 = vld [vmem:[%s1307_s11] sm:$0xff]  ;;  %v1007_v26 = vld [vmem:[%s1309_s12 + $0x10] sm:$0xff] }
  0x42   : > { %v1005_v25 = vld [vmem:[%s1309_s12] sm:$0xff]  ;;  %v1011_v28 = vld [vmem:[%s1309_s12 + $0x30] sm:$0xff]  ;;  %v1006_v29 = vld [vmem:[%s1309_s12 + $0x8] sm:$0xff] }
  0x43   : > { %v1009_v27 = vld [vmem:[%s1309_s12 + $0x20] sm:$0xff]  ;;  %v1008_v30 = vld [vmem:[%s1309_s12 + $0x18] sm:$0xff]  ;;  %v1010_v31 = vld [vmem:[%s1309_s12 + $0x28] sm:$0xff] }
  0x44   : > { %580 = vmatpush.bf16.msra.mxu0 %v1019_v18  ;;  %1110 = vmatpush.bf16.msra.mxu1 %v1019_v18  ;;  %v1012_v32 = vld [vmem:[%s1309_s12 + $0x38] sm:$0xff]  ;;  %v435_v33 = vld [vmem:[#allocation2 + $0x30] sm:$0xff]  ;;  %v443_v39 = vld [vmem:[#allocation2 + $0x40] sm:$0xff] }
  0x45   : > { %1111 = vmatpush.bf16.msra.mxu2 %v1019_v18  ;;  %1112 = vmatpush.bf16.msra.mxu3 %v1019_v18  ;;  %v439_v34 = vld [vmem:[#allocation2 + $0x50] sm:$0xff]  ;;  %v447_v40 = vld [vmem:[#allocation2 + $0x60] sm:$0xff]  ;;  %v440_v42 = vld [vmem:[#allocation2 + $0x68] sm:$0xff] }
  0x46   : > { %v436_v41 = vld [vmem:[#allocation2] sm:$0xff]  ;;  %v448_v52 = vld [vmem:[#allocation2 + $0x70] sm:$0xff]  ;;  %v437_v53 = vld [vmem:[#allocation2 + $0x58] sm:$0xff] }
  0x47   : > { %v444_v51 = vld [vmem:[#allocation2 + $0x20] sm:$0xff]  ;;  %v441_v54 = vld [vmem:[#allocation2 + $0x8] sm:$0xff]  ;;  %v445_v63 = vld [vmem:[#allocation2 + $0x10] sm:$0xff] }
  0x48   : > { %581 = vmatpush.bf16.msra.mxu0 %v1018_v19  ;;  %1113 = vmatpush.bf16.msra.mxu1 %v1018_v19  ;;  %v449_v0 = vld [vmem:[#allocation2 + $0x78] sm:$0xff]  ;;  %v442_v2 = vld [vmem:[#allocation2 + $0x48] sm:$0xff] }
  0x49   : > { %1114 = vmatpush.bf16.msra.mxu2 %v1018_v19  ;;  %1115 = vmatpush.bf16.msra.mxu3 %v1018_v19  ;;  %v438_v1 = vld [vmem:[#allocation2 + $0x18] sm:$0xff]  ;;  %v450_v12 = vld [vmem:[#allocation2 + $0x28] sm:$0xff] }
  0x4a   : > { %v446_v11 = vld [vmem:[#allocation2 + $0x38] sm:$0xff] }
  0x4c   : > { %582 = vmatpush.bf16.msra.mxu0 %v1017_v20  ;;  %1116 = vmatpush.bf16.msra.mxu1 %v1017_v20 }
  0x4d   : > { %1117 = vmatpush.bf16.msra.mxu2 %v1017_v20  ;;  %1118 = vmatpush.bf16.msra.mxu3 %v1017_v20 }
  0x50   : > { %583 = vmatpush.bf16.msra.mxu0 %v1016_v21  ;;  %1119 = vmatpush.bf16.msra.mxu1 %v1016_v21 }
  0x51   : > { %1120 = vmatpush.bf16.msra.mxu2 %v1016_v21  ;;  %1121 = vmatpush.bf16.msra.mxu3 %v1016_v21 }
  0x54   : > { %584 = vmatpush.bf16.msra.mxu0 %v1015_v22  ;;  %1122 = vmatpush.bf16.msra.mxu1 %v1015_v22 }
  0x55   : > { %1123 = vmatpush.bf16.msra.mxu2 %v1015_v22  ;;  %1124 = vmatpush.bf16.msra.mxu3 %v1015_v22 }
  0x58   : > { %585 = vmatpush.bf16.msra.mxu0 %v1014_v23  ;;  %1125 = vmatpush.bf16.msra.mxu1 %v1014_v23 }
  0x59   : > { %1126 = vmatpush.bf16.msra.mxu2 %v1014_v23  ;;  %1127 = vmatpush.bf16.msra.mxu3 %v1014_v23 }
  0x5c   : > { %586 = vmatpush.bf16.msra.mxu0 %v1013_v24  ;;  %1128 = vmatpush.bf16.msra.mxu1 %v1013_v24 }
  0x5d   : > { %1129 = vmatpush.bf16.msra.mxu2 %v1013_v24  ;;  %1130 = vmatpush.bf16.msra.mxu3 %v1013_v24 }
  0x5f   : > { %587 = vmatmul.bf16.vlgmr.msra.gmra.mxu0 %v1005_v25  ;;  %597 = vmatmul.bf16.vlgmr.msra.gmra.mxu1 %v1007_v26 }
  0x60   : > { %607 = vmatmul.bf16.vlgmr.msra.gmra.mxu2 %v1009_v27  ;;  %617 = vmatmul.bf16.vlgmr.msra.gmra.mxu3 %v1011_v28 }
  0x6f   : > { %592 = vmatmul.bf16.gmra.mxu0 %v1006_v29  ;;  %602 = vmatmul.bf16.gmra.mxu1 %v1008_v30 }
  0x70   : > { %612 = vmatmul.bf16.gmra.mxu2 %v1010_v31  ;;  %622 = vmatmul.bf16.gmra.mxu3 %v1012_v32 }
  0xdc   : > { %v588_v35 = vpop.f32.mrf.mxu0  ;;  %v598_v36 = vpop.f32.mrf.mxu1 }
  0xdd   : > { %v628_v37 = vadd.f32 %v588_v35, %v435_v33  ;;  %v632_v38 = vadd.f32 %v598_v36, %v439_v34 }
  0xdf   : > { %644 = vst [vmem:[#allocation2 + $0x30] sm:$0xff] %v628_v37 }
  0xe0   : > { %648 = vst [vmem:[#allocation2 + $0x50] sm:$0xff] %v632_v38 }
  0xe3   : > { %v608_v43 = vpop.f32.mrf.mxu2  ;;  %v618_v44 = vpop.f32.mrf.mxu3 }
  0xe4   : > { %v636_v45 = vadd.f32 %v608_v43, %v443_v39  ;;  %v640_v46 = vadd.f32 %v618_v44, %v447_v40  ;;  %v590_v47 = vpop.f32.mrf.mxu0  ;;  %v600_v48 = vpop.f32.mrf.mxu1 }
  0xe5   : > { %v629_v49 = vadd.f32 %v590_v47, %v436_v41  ;;  %v633_v50 = vadd.f32 %v600_v48, %v440_v42 }
  0xe6   : > { %652 = vst [vmem:[#allocation2 + $0x40] sm:$0xff] %v636_v45 }
  0xe7   : > { %656 = vst [vmem:[#allocation2 + $0x60] sm:$0xff] %v640_v46 }
  0xe8   : > { %645 = vst [vmem:[#allocation2] sm:$0xff] %v629_v49 }
  0xe9   : > { %649 = vst [vmem:[#allocation2 + $0x68] sm:$0xff] %v633_v50 }
  0xeb   : > { %v610_v55 = vpop.f32.mrf.mxu2  ;;  %v620_v56 = vpop.f32.mrf.mxu3 }
  0xec   : > { %v637_v57 = vadd.f32 %v610_v55, %v444_v51  ;;  %v641_v58 = vadd.f32 %v620_v56, %v448_v52  ;;  %v593_v59 = vpop.f32.mrf.mxu0  ;;  %v603_v60 = vpop.f32.mrf.mxu1 }
  0xed   : > { %v630_v61 = vadd.f32 %v593_v59, %v437_v53  ;;  %v634_v62 = vadd.f32 %v603_v60, %v441_v54 }
  0xee   : > { %653 = vst [vmem:[#allocation2 + $0x20] sm:$0xff] %v637_v57 }
  0xef   : > { %657 = vst [vmem:[#allocation2 + $0x70] sm:$0xff] %v641_v58 }
  0xf0   : > { %646 = vst [vmem:[#allocation2 + $0x58] sm:$0xff] %v630_v61 }
  0xf1   : > { %650 = vst [vmem:[#allocation2 + $0x8] sm:$0xff] %v634_v62 }
  0xf3   : > { %v613_v3 = vpop.f32.mrf.mxu2  ;;  %v623_v4 = vpop.f32.mrf.mxu3 }
  0xf4   : > { %v638_v5 = vadd.f32 %v613_v3, %v445_v63  ;;  %v642_v6 = vadd.f32 %v623_v4, %v449_v0  ;;  %v595_v7 = vpop.f32.mrf.mxu0  ;;  %v605_v8 = vpop.f32.mrf.mxu1 }
  0xf5   : > { %v631_v9 = vadd.f32 %v595_v7, %v438_v1  ;;  %v635_v10 = vadd.f32 %v605_v8, %v442_v2 }
  0xf6   : > { %654 = vst [vmem:[#allocation2 + $0x10] sm:$0xff] %v638_v5 }
  0xf7   : > { %658 = vst [vmem:[#allocation2 + $0x78] sm:$0xff] %v642_v6 }
  0xf8   : > { %647 = vst [vmem:[#allocation2 + $0x18] sm:$0xff] %v631_v9 }
  0xf9   : > { %651 = vst [vmem:[#allocation2 + $0x48] sm:$0xff] %v635_v10 }
  0xfb   : > { %v615_v13 = vpop.f32.mrf.mxu2  ;;  %v625_v14 = vpop.f32.mrf.mxu3  ;;  %663 = sbr.rel (%p1000_p11) target bundleno = 282 (0x11a), region = 85 }
  0xfc   : > { %v639_v15 = vadd.f32 %v615_v13, %v446_v11  ;;  %v643_v16 = vadd.f32 %v625_v14, %v450_v12 }
  0xfe   : > { %655 = vst [vmem:[#allocation2 + $0x38] sm:$0xff] %v639_v15 }
  0xff   : > { %659 = vst [vmem:[#allocation2 + $0x28] sm:$0xff] %v643_v16 }
 0x100   : > { %v664_v17 = vld [vmem:[#allocation2 + $0x30] sm:$0xff]  ;;  %v665_v18 = vld [vmem:[#allocation2] sm:$0xff]  ;;  %v666_v21 = vld [vmem:[#allocation2 + $0x58] sm:$0xff] }
 0x101   : > { %v1332_v19 = vld [vmem:[%s1415_s2] ss:$0 sm:$0xff]  ;;  %v667_v24 = vld [vmem:[#allocation2 + $0x18] sm:$0xff]  ;;  %v1093_v25 = vld [vmem:[%s1416_s3 + $0x8] sm:$0xff]  }
 0x102   : > { %v1022_v20 = vld [vmem:[%s1416_s3] sm:$0xff]   ;;  %v668_v26 = vld [vmem:[#allocation2 + $0x50] sm:$0xff]  ;;  %v684_v27 = vadd.f32 %v1332_v19, %v664_v17  ;;  %v685_v28 = vadd.f32 %v1332_v19, %v665_v18  ;;  %v686_v29 = vadd.f32 %v1332_v19, %v666_v21  ;;  %v687_v30 = vadd.f32 %v1332_v19, %v667_v24  ;;  %v669_v31 = vld [vmem:[#allocation2 + $0x68] sm:$0xff] }
 0x103   : > { %v1023_v22 = vunpack.c.l.bf16 %v1022_v20  ;;  %v1024_v23 = vunpack.c.h.bf16 %v1022_v20  ;;  %v1094_v32 = vld [vmem:[%s1416_s3 + $0x10] sm:$0xff]   ;;  %v670_v33 = vld [vmem:[#allocation2 + $0x8] sm:$0xff]  ;;  %v1027_v34 = vunpack.c.l.bf16 %v1093_v25  ;;  %v1028_v35 = vunpack.c.h.bf16 %v1093_v25  ;;  %v1095_v43 = vld [vmem:[%s1416_s3 + $0x18] sm:$0xff]  }
 0x104   : > { %v688_v36 = vadd.f32 %v1332_v19, %v668_v26  ;;  %v689_v37 = vadd.f32 %v1332_v19, %v669_v31  ;;  %v671_v38 = vld [vmem:[#allocation2 + $0x48] sm:$0xff]  ;;  %v1031_v41 = vunpack.c.l.bf16 %v1094_v32  ;;  %v1032_v42 = vunpack.c.h.bf16 %v1094_v32  ;;  %v672_v48 = vld [vmem:[#allocation2 + $0x40] sm:$0xff]  ;;  %v674_v59 = vld [vmem:[#allocation2 + $0x10] sm:$0xff] }
 0x105   : > { %v732_v39 = vadd.f32 %v1023_v22, %v684_v27  ;;  %v733_v40 = vadd.f32 %v1024_v23, %v685_v28  ;;  %v734_v44 = vadd.f32 %v1027_v34, %v686_v29  ;;  %v735_v45 = vadd.f32 %v1028_v35, %v687_v30  ;;  %v673_v53 = vld [vmem:[#allocation2 + $0x20] sm:$0xff]  ;;  %v675_v0 = vld [vmem:[#allocation2 + $0x38] sm:$0xff]  ;;  %v1097_v1 = vld [vmem:[%s1416_s3 + $0x28] sm:$0xff]  }
 0x106   : > { %v690_v46 = vadd.f32 %v1332_v19, %v670_v33  ;;  %v691_v47 = vadd.f32 %v1332_v19, %v671_v38  ;;  %v736_v51 = vadd.f32 %v1031_v41, %v688_v36  ;;  %v737_v52 = vadd.f32 %v1032_v42, %v689_v37  ;;  %v1096_v58 = vld [vmem:[%s1416_s3 + $0x20] sm:$0xff]   ;;  %v677_v11 = vld [vmem:[#allocation2 + $0x70] sm:$0xff]  ;;  %v678_v22 = vld [vmem:[#allocation2 + $0x78] sm:$0xff] }
 0x107   : > { %v748_v49 = vmax.f32 %v732_v39, 0.0  ;;  %v749_v50 = vmax.f32 %v733_v40, 0.0  ;;  %v750_v54 = vmax.f32 %v734_v44, 0.0  ;;  %v751_v55 = vmax.f32 %v735_v45, 0.0  ;;  %v676_v6 = vld [vmem:[#allocation2 + $0x60] sm:$0xff]  ;;  %v1098_v12 = vld [vmem:[%s1416_s3 + $0x30] sm:$0xff]  }
 0x108   : > { %v1035_v56 = vunpack.c.l.bf16 %v1095_v43  ;;  %v1036_v57 = vunpack.c.h.bf16 %v1095_v43  ;;  %v752_v61 = vmax.f32 %v736_v51, 0.0  ;;  %v753_v62 = vmax.f32 %v737_v52, 0.0  ;;  %v679_v23 = vld [vmem:[#allocation2 + $0x28] sm:$0xff]  ;;  %v1099_v28 = vld [vmem:[%s1416_s3 + $0x38] sm:$0xff]  }
 0x109   : > { %v1056_v60 = vpack.c.bf16 %v749_v50, %v748_v49  ;;  %v692_v63 = vadd.f32 %v1332_v19, %v672_v48  ;;  %v1061_v2 = vpack.c.bf16 %v751_v55, %v750_v54  ;;  %v693_v5 = vadd.f32 %v1332_v19, %v673_v53 }
 0x10a   : > { %v738_v3 = vadd.f32 %v1035_v56, %v690_v46  ;;  %v739_v4 = vadd.f32 %v1036_v57, %v691_v47  ;;  %v1066_v7 = vpack.c.bf16 %v753_v62, %v752_v61  ;;  %v1039_v8 = vunpack.c.l.bf16 %v1096_v58 }
 0x10b   : > { %1057 = vst [vmem:[%s1417_s4] sm:$0xff] %v1056_v60   ;;  %v1040_v9 = vunpack.c.h.bf16 %v1096_v58  ;;  %v694_v10 = vadd.f32 %v1332_v19, %v674_v59  ;;  %v695_v15 = vadd.f32 %v1332_v19, %v675_v0  ;;  %v1043_v16 = vunpack.c.l.bf16 %v1097_v1 }
 0x10c   : > { %1100 = vst [vmem:[%s1417_s4 + $0x8] sm:$0xff] %v1061_v2   ;;  %v754_v13 = vmax.f32 %v738_v3, 0.0  ;;  %v755_v14 = vmax.f32 %v739_v4, 0.0  ;;  %v740_v17 = vadd.f32 %v1039_v8, %v692_v63  ;;  %v1044_v20 = vunpack.c.h.bf16 %v1097_v1 }
 0x10d   : > { %1101 = vst [vmem:[%s1417_s4 + $0x10] sm:$0xff] %v1066_v7   ;;  %v741_v18 = vadd.f32 %v1040_v9, %v693_v5  ;;  %v696_v21 = vadd.f32 %v1332_v19, %v676_v6  ;;  %v742_v25 = vadd.f32 %v1043_v16, %v694_v10  ;;  %v697_v26 = vadd.f32 %v1332_v19, %v677_v11 }
 0x10e   : > { %v1071_v24 = vpack.c.bf16 %v755_v14, %v754_v13  ;;  %v1047_v27 = vunpack.c.l.bf16 %v1098_v12  ;;  %v756_v29 = vmax.f32 %v740_v17, 0.0  ;;  %v743_v31 = vadd.f32 %v1044_v20, %v695_v15 }
 0x10f   : > { %v757_v30 = vmax.f32 %v741_v18, 0.0  ;;  %v1048_v32 = vunpack.c.h.bf16 %v1098_v12  ;;  %v758_v33 = vmax.f32 %v742_v25, 0.0  ;;  %v698_v35 = vadd.f32 %v1332_v19, %v678_v22 }
 0x110   : > { %1102 = vst [vmem:[%s1417_s4 + $0x18] sm:$0xff] %v1071_v24   ;;  %v744_v34 = vadd.f32 %v1047_v27, %v696_v21  ;;  %v699_v36 = vadd.f32 %v1332_v19, %v679_v23  ;;  %v759_v38 = vmax.f32 %v743_v31, 0.0  ;;  %v1051_v40 = vunpack.c.l.bf16 %v1099_v28 }
 0x111   : > { %v1076_v37 = vpack.c.bf16 %v757_v30, %v756_v29  ;;  %v745_v39 = vadd.f32 %v1048_v32, %v697_v26  ;;  %v1052_v42 = vunpack.c.h.bf16 %v1099_v28 }
 0x112   : > { %v760_v41 = vmax.f32 %v744_v34, 0.0  ;;  %v1081_v43 = vpack.c.bf16 %v759_v38, %v758_v33  ;;  %v746_v45 = vadd.f32 %v1051_v40, %v698_v35 }
 0x113   : > { %1103 = vst [vmem:[%s1417_s4 + $0x20] sm:$0xff] %v1076_v37   ;;  %v761_v44 = vmax.f32 %v745_v39, 0.0  ;;  %v747_v46 = vadd.f32 %v1052_v42, %v699_v36 }
 0x114   : > { %1104 = vst [vmem:[%s1417_s4 + $0x28] sm:$0xff] %v1081_v43   ;;  %v762_v19 = vmax.f32 %v746_v45, 0.0 }
 0x115   : > { %v1086_v47 = vpack.c.bf16 %v761_v44, %v760_v41  ;;  %v763_v48 = vmax.f32 %v747_v46, 0.0 }
 0x117   : > { %1105 = vst [vmem:[%s1417_s4 + $0x30] sm:$0xff] %v1086_v47   ;;  %v1091_v49 = vpack.c.bf16 %v763_v48, %v762_v19 }
 0x119   : > { %1106 = vst [vmem:[%s1417_s4 + $0x38] sm:$0xff] %v1091_v49  }
 0x11a PF: > { %s14_s19 = sadd.s32 1, %s1211_s19   ;;  %s1418_s15 = smov %s1199_s16 }
 0x11b   : > { %p11_p12 = scmp.ge.s32.totalorder %s14_s19, 7   ;;  %s1419_s16 = smov %s1274_s23 }
 0x11c   : > { %s1420_s17 = smov %s1207_s18  ;;  %s1421_s18 = smov %s1423_s20 }
 0x11d   :  { %13 = sbr.rel (!%p11_p12) target bundleno = 3 (0x3), region = 129 }

// kernel: _lambda_.26
= control target key start
LH: loop header
LB: loop body
LE: loop exit
PB: predicated region body
PF: predicated region fallthrough
CT: control target
= control target key end

     0   :  { %s752_s12 = smov 0   ;;  %s754_s13 = smov 0   ;;  %s845_s0 = inlined_call_operand.vmem [shape: bf16[32,640], index: 0, kind: input, shape index: {}]   ;;  %s846_s1 = inlined_call_operand.vmem [shape: bf16[640,128], index: 1, kind: input, shape index: {}]   ;;  %s847_s2 = inlined_call_operand.vmem [shape: f32[1,128], index: 2, kind: input, shape index: {}]   ;;  %s848_s3 = inlined_call_operand.vmem [shape: bf16[32,128], index: 3, kind: output, shape index: {}]  }
   0x1   :  { %s756_s14 = smov 0   ;;  %s758_s15 = smov 0  }
   0x2   :  { %s760_s16 = smov 0  }
   0x3 LB: > { %s25_s17 = sadd.s32 1, %s725_s15  ;;  %p48_p1 = scmp.ne.s32.totalorder %s717_s13, %s713_s12  ;;  %s729_s16 = sphi %s760_s16, %s13_s16   ;;  %s725_s15 = sphi %s758_s15, %s852_s15   ;;  %s721_s14 = sphi %s756_s14, %s851_s14   ;;  %s717_s13 = sphi %s754_s13, %s850_s13   ;;  %s713_s12 = sphi %s752_s12, %s849_s12  }
   0x4   : > { %p26_p0 = scmp.ge.s32.totalorder %s25_s17, 5  ;;  %p49_p2 = scmp.eq.s32.totalorder %s729_s16, 0 }
   0x5   : > { %s41_s19 = sadd.s32 1, %s717_s13  ;;  %p567_p5 = scmp.ge.s32.totalorder %s729_s16, 5 }
   0x6   : > { %s854_s17 = smov (%p26_p0, %s25_s17), 0  ;;  %p50_p3 = por %p49_p2, %p48_p1 }
   0x7   : > { %s37_s18 = ssub.s32 %s725_s15, %s854_s17  ;;  %162 = sbr.rel (%p567_p5) target bundleno = 20 (0x14), region = 20 }
   0x8   : > { %p39_p4 = scmp.eq.s32.totalorder %s37_s18, 0 }
   0xa   : > { %s787_s20 = scalar_select %p39_p4, %s717_s13, %s41_s19  }
   0xc   : > { %165 = sbr.rel (!%p50_p3) target bundleno = 20 (0x14), region = 24  ;;  %s167_s21 = sand.u32 (%p50_p3), 1, %s717_s13  }
   0xd   : > { %s569_s22 = sshll.u32 (%p50_p3), %s725_s15, 2  ;;  %s568_s23 = sshll.u32 (%p50_p3), %s167_s21, 4 }
   0xe   : > { %s174_s26 = scalar_lea.vmem (%p50_p3), %s845_s0, %s569_s22  ;;  %s169_s27 = scalar_lea.vmem (%p50_p3), [#allocation3], %s568_s23 }
   0xf   : > { %v191_v0 = vld [vmem:[%s174_s26] sm:$0xf] (%p50_p3)  ;;  %v193_v1 = vld [vmem:[%s174_s26 + $0x14] sm:$0xf] (%p50_p3)  ;;  %v195_v2 = vld [vmem:[%s174_s26 + $0x28] sm:$0xf] (%p50_p3) }
  0x10   : > { %192 = vst [vmem:[%s169_s27] sm:$0xf] (%p50_p3), %v191_v0  ;;  %v197_v3 = vld [vmem:[%s174_s26 + $0x3c] sm:$0xf] (%p50_p3) }
  0x11   : > { %194 = vst [vmem:[%s169_s27 + $0x4] sm:$0xf] %v193_v1 }
  0x12   : > { %196 = vst [vmem:[%s169_s27 + $0x8] sm:$0xf] %v195_v2 }
  0x13   : > { %198 = vst [vmem:[%s169_s27 + $0xc] sm:$0xf] %v197_v3 }
  0x14 PF: > { %p570_p6 = scmp.ge.s32.totalorder %s729_s16, 1  ;;  %p241_p7 = scmp.lt.s32.totalorder %s729_s16, 6 }
  0x16   : > { %p242_p8 = pnand %p570_p6, %p241_p7 }
  0x17   : > { %s248_s28 = sand.u32 (!%p242_p8), 1, %s713_s12   ;;  %s572_s29 = sshll.u32 (!%p242_p8), %s721_s14, 4 }
  0x18   : > { %245 = sbr.rel (%p242_p8) target bundleno = 223 (0xdf), region = 69  ;;  %s799_s30 = sshll.u32 (!%p242_p8), %s248_s28, 4 }
  0x19   : > { %p287_p9 = scmp.lt.s32.totalorder (!%p242_p8), %s572_s29, 79  ;;  %s250_s8 = scalar_lea.vmem (!%p242_p8), [#allocation3], %s799_s30 }
  0x1a   : > { %p574_p10 = scmp.ne.s32.totalorder (!%p242_p8), %s721_s14, 0 }
  0x1d   : > { %s856_s29 = smov (!%p287_p9, %s572_s29), 79  ;;  %310 = sbr.rel (%p574_p10) target bundleno = 39 (0x27), region = 77 }
  0x1e   : > { %s573_s4 = sshll.u32 %s856_s29, 2 }
  0x1f   : > { %s804_s7 = scalar_lea.vmem %s846_s1, %s573_s4 }
  0x22   : > { %v731_v4 = vmov 0.0  }
  0x23   : > { %311 = vst [vmem:[#allocation2 + $0x10] sm:$0xff] %v731_v4 }
  0x24   : > { %312 = vst [vmem:[#allocation2] sm:$0xff] %v731_v4 }
  0x25   : > { %313 = vst [vmem:[#allocation2 + $0x18] sm:$0xff] %v731_v4 }
  0x26   : > { %314 = vst [vmem:[#allocation2 + $0x8] sm:$0xff] %v731_v4 }
  0x27 PF: > { %v629_v5 = vld [vmem:[%s804_s7 + $0x38] sm:$0xff]  ;;  %v628_v6 = vld [vmem:[%s804_s7 + $0x30] sm:$0xff]  ;;  %v627_v7 = vld [vmem:[%s804_s7 + $0x28] sm:$0xff]  ;;  %p615_p11 = scmp.ne.s32.totalorder %s721_s14, 4 }
  0x28   : > { %399 = vmatpush.bf16.msra.mxu0 %v629_v5  ;;  %641 = vmatpush.bf16.msra.mxu1 %v629_v5  ;;  %v626_v8 = vld [vmem:[%s804_s7 + $0x20] sm:$0xff]  ;;  %v625_v9 = vld [vmem:[%s804_s7 + $0x18] sm:$0xff]  ;;  %v624_v10 = vld [vmem:[%s804_s7 + $0x10] sm:$0xff] }
  0x29   : > { %v623_v11 = vld [vmem:[%s804_s7 + $0x8] sm:$0xff]  ;;  %v622_v12 = vld [vmem:[%s804_s7] sm:$0xff] }
  0x2a   : > { %v620_v13 = vld [vmem:[%s250_s8] sm:$0xff]  ;;  %v621_v14 = vld [vmem:[%s250_s8 + $0x8] sm:$0xff] }
  0x2b   : > { %v315_v15 = vld [vmem:[#allocation2 + $0x10] sm:$0xff]  ;;  %v316_v21 = vld [vmem:[#allocation2] sm:$0xff] }
  0x2c   : > { %400 = vmatpush.bf16.msra.mxu0 %v628_v6  ;;  %642 = vmatpush.bf16.msra.mxu1 %v628_v6  ;;  %v317_v16 = vld [vmem:[#allocation2 + $0x18] sm:$0xff] }
  0x2d   : > { %v318_v22 = vld [vmem:[#allocation2 + $0x8] sm:$0xff] }
  0x30   : > { %401 = vmatpush.bf16.msra.mxu0 %v627_v7  ;;  %643 = vmatpush.bf16.msra.mxu1 %v627_v7 }
  0x34   : > { %402 = vmatpush.bf16.msra.mxu0 %v626_v8  ;;  %644 = vmatpush.bf16.msra.mxu1 %v626_v8 }
  0x38   : > { %403 = vmatpush.bf16.msra.mxu0 %v625_v9  ;;  %645 = vmatpush.bf16.msra.mxu1 %v625_v9 }
  0x3c   : > { %404 = vmatpush.bf16.msra.mxu0 %v624_v10  ;;  %646 = vmatpush.bf16.msra.mxu1 %v624_v10 }
  0x40   : > { %405 = vmatpush.bf16.msra.mxu0 %v623_v11  ;;  %647 = vmatpush.bf16.msra.mxu1 %v623_v11 }
  0x44   : > { %406 = vmatpush.bf16.msra.mxu0 %v622_v12  ;;  %648 = vmatpush.bf16.msra.mxu1 %v622_v12 }
  0x47   : > { %407 = vmatmul.bf16.vlgmr.msra.gmra.mxu0 %v620_v13  ;;  %412 = vmatmul.bf16.vlgmr.msra.gmra.mxu1 %v621_v14 }
  0xc4   : > { %v408_v17 = vpop.f32.mrf.mxu0  ;;  %v413_v18 = vpop.f32.mrf.mxu1 }
  0xc5   : > { %v418_v19 = vadd.f32 %v408_v17, %v315_v15  ;;  %v420_v20 = vadd.f32 %v413_v18, %v317_v16 }
  0xc7   : > { %422 = vst [vmem:[#allocation2 + $0x10] sm:$0xff] %v418_v19 }
  0xc8   : > { %424 = vst [vmem:[#allocation2 + $0x18] sm:$0xff] %v420_v20 }
  0xcc   : > { %v410_v23 = vpop.f32.mrf.mxu0  ;;  %v415_v24 = vpop.f32.mrf.mxu1  ;;  %429 = sbr.rel (%p615_p11) target bundleno = 223 (0xdf), region = 81 }
  0xcd   : > { %v419_v25 = vadd.f32 %v410_v23, %v316_v21  ;;  %v421_v26 = vadd.f32 %v415_v24, %v318_v22 }
  0xcf   : > { %423 = vst [vmem:[#allocation2] sm:$0xff] %v419_v25 }
  0xd0   : > { %425 = vst [vmem:[#allocation2 + $0x8] sm:$0xff] %v421_v26 }
  0xd1   : > { %v430_v27 = vld [vmem:[#allocation2 + $0x10] sm:$0xff]  ;;  %v690_v29 = vld [vmem:[%s847_s2] ss:$0 sm:$0xff]  ;;  %v432_v30 = vld [vmem:[#allocation2 + $0x18] sm:$0xff] }
  0xd2   : > { %v438_v32 = vadd.f32 %v690_v29, %v430_v27  ;;  %v440_v34 = vadd.f32 %v690_v29, %v432_v30 }
  0xd4   : > { %v442_v36 = vmax.f32 %v438_v32, 0.0  ;;  %v444_v38 = vmax.f32 %v440_v34, 0.0 }
  0xd6   : > { %v431_v28 = vld [vmem:[#allocation2] sm:$0xff] }
  0xd7   : > { %v433_v31 = vld [vmem:[#allocation2 + $0x8] sm:$0xff]  ;;  %v439_v33 = vadd.f32 %v690_v29, %v431_v28 }
  0xd8   : > { %v441_v35 = vadd.f32 %v690_v29, %v433_v31 }
  0xd9   : > { %v443_v37 = vmax.f32 %v439_v33, 0.0 }
  0xda   : > { %v445_v39 = vmax.f32 %v441_v35, 0.0 }
  0xdb   : > { %v633_v40 = vpack.c.bf16 %v443_v37, %v442_v36 }
  0xdc   : > { %v638_v41 = vpack.c.bf16 %v445_v39, %v444_v38 }
  0xdd   : > { %634 = vst [vmem:[%s848_s3] sm:$0xff] %v633_v40  }
  0xde   : > { %640 = vst [vmem:[%s848_s3 + $0x8] sm:$0xff] %v638_v41  }
  0xdf PF: > { %s13_s16 = sadd.s32 1, %s729_s16   ;;  %s849_s12 = smov %s717_s13 }
  0xe0   : > { %p10_p12 = scmp.ge.s32.totalorder %s13_s16, 7   ;;  %s850_s13 = smov %s787_s20 }
  0xe1   : > { %s851_s14 = smov %s725_s15  ;;  %s852_s15 = smov %s854_s17 }
  0xe2   :  { %12 = sbr.rel (!%p10_p12) target bundleno = 3 (0x3), region = 122 }

// kernel: _lambda_.29
= control target key start
LH: loop header
LB: loop body
LE: loop exit
PB: predicated region body
PF: predicated region fallthrough
CT: control target
= control target key end

     0   :  { %s1045_s12 = smov 0   ;;  %s1047_s13 = smov 0   ;;  %s1161_s0 = inlined_call_operand.vmem [shape: bf16[32,1152], index: 0, kind: input, shape index: {}]   ;;  %s1162_s1 = inlined_call_operand.vmem [shape: bf16[1152,128], index: 1, kind: input, shape index: {}]   ;;  %s1163_s2 = inlined_call_operand.vmem [shape: f32[1,128], index: 2, kind: input, shape index: {}]   ;;  %s1164_s3 = inlined_call_operand.vmem [shape: bf16[32,128], index: 3, kind: output, shape index: {}]  }
   0x1   :  { %s1049_s14 = smov 0   ;;  %s1051_s15 = smov 0  }
   0x2   :  { %s1053_s16 = smov 0  }
   0x3 LB: > { %s25_s17 = sadd.s32 1, %s1018_s15  ;;  %p48_p1 = scmp.ne.s32.totalorder %s1010_s13, %s1006_s12  ;;  %s1022_s16 = sphi %s1053_s16, %s13_s16   ;;  %s1018_s15 = sphi %s1051_s15, %s1168_s15   ;;  %s1014_s14 = sphi %s1049_s14, %s1167_s14   ;;  %s1010_s13 = sphi %s1047_s13, %s1166_s13   ;;  %s1006_s12 = sphi %s1045_s12, %s1165_s12  }
   0x4   : > { %p26_p0 = scmp.ge.s32.totalorder %s25_s17, 3  ;;  %p49_p2 = scmp.eq.s32.totalorder %s1022_s16, 0 }
   0x5   : > { %s41_s19 = sadd.s32 1, %s1010_s13  ;;  %p752_p5 = scmp.ge.s32.totalorder %s1022_s16, 3 }
   0x6   : > { %s1170_s17 = smov (%p26_p0, %s25_s17), 0  ;;  %p50_p3 = por %p49_p2, %p48_p1 }
   0x7   : > { %s37_s18 = ssub.s32 %s1018_s15, %s1170_s17  ;;  %162 = sbr.rel (%p752_p5) target bundleno = 25 (0x19), region = 20 }
   0x8   : > { %p39_p4 = scmp.eq.s32.totalorder %s37_s18, 0 }
   0xa   : > { %s1080_s20 = scalar_select %p39_p4, %s1010_s13, %s41_s19  }
   0xc   : > { %165 = sbr.rel (!%p50_p3) target bundleno = 25 (0x19), region = 24  ;;  %s167_s21 = sand.u32 (%p50_p3), 1, %s1010_s13  }
   0xd   : > { %s890_s22 = smul.u32 (%p50_p3), 12, %s1018_s15 }
   0xe   : > { %s940_s23 = smul.u32 (%p50_p3), 48, %s167_s21 }
   0xf   : > { %s175_s26 = scalar_lea.vmem (%p50_p3), %s1161_s0, %s890_s22 }
  0x10   : > { %v190_v0 = vld [vmem:[%s175_s26] sm:$0xff] (%p50_p3)  ;;  %v194_v2 = vld [vmem:[%s175_s26 + $0x48] sm:$0xff] (%p50_p3)  ;;  %s169_s27 = scalar_lea.vmem (%p50_p3), [#allocation3], %s940_s23  ;;  %v758_v6 = vld [vmem:[%s175_s26 + $0x50] sm:$0xf] (%p50_p3) }
  0x11   : > { %v192_v1 = vld [vmem:[%s175_s26 + $0x24] sm:$0xff]  ;;  %191 = vst [vmem:[%s169_s27] sm:$0xff] %v190_v0  ;;  %v196_v3 = vld [vmem:[%s175_s26 + $0x6c] sm:$0xff]  ;;  %v760_v7 = vld [vmem:[%s175_s26 + $0x74] sm:$0xf] }
  0x12   : > { %193 = vst [vmem:[%s169_s27 + $0xc] sm:$0xff] %v192_v1  ;;  %v754_v4 = vld [vmem:[%s175_s26 + $0x8] sm:$0xf]  ;;  %v756_v5 = vld [vmem:[%s175_s26 + $0x2c] sm:$0xf] }
  0x13   : > { %195 = vst [vmem:[%s169_s27 + $0x18] sm:$0xff] %v194_v2 }
  0x14   : > { %197 = vst [vmem:[%s169_s27 + $0x24] sm:$0xff] %v196_v3 }
  0x15   : > { %755 = vst [vmem:[%s169_s27 + $0x8] sm:$0xf] %v754_v4 }
  0x16   : > { %757 = vst [vmem:[%s169_s27 + $0x14] sm:$0xf] %v756_v5 }
  0x17   : > { %759 = vst [vmem:[%s169_s27 + $0x20] sm:$0xf] %v758_v6 }
  0x18   : > { %761 = vst [vmem:[%s169_s27 + $0x2c] sm:$0xf] %v760_v7 }
  0x19 PF: > { %p762_p6 = scmp.ge.s32.totalorder %s1022_s16, 1  ;;  %p230_p7 = scmp.lt.s32.totalorder %s1022_s16, 4 }
  0x1b   : > { %p231_p8 = pnand %p762_p6, %p230_p7 }
  0x1c   : > { %s237_s28 = sand.u32 (!%p231_p8), 1, %s1006_s12   ;;  %s276_s29 = smul.u32 (!%p231_p8), 48, %s1014_s14 }
  0x1d   : > { %234 = sbr.rel (%p231_p8) target bundleno = 253 (0xfd), region = 54  ;;  %p764_p10 = scmp.ne.s32.totalorder (!%p231_p8), %s1014_s14, 0 }
  0x1e   : > { %s941_s30 = smul.u32 (!%p231_p8), 48, %s237_s28  ;;  %p277_p9 = scmp.lt.s32.totalorder (!%p231_p8), %s276_s29, 143 }
  0x20   : > { %s1097_s8 = scalar_lea.vmem (!%p231_p8), [#allocation3], %s941_s30 }
  0x22   : > { %s1172_s29 = smov (!%p277_p9, %s276_s29), 143  ;;  %300 = sbr.rel (%p764_p10) target bundleno = 44 (0x2c), region = 62 }
  0x23   : > { %s763_s4 = sshll.u32 %s1172_s29, 2 }
  0x24   : > { %s1095_s7 = scalar_lea.vmem %s1162_s1, %s763_s4 }
  0x27   : > { %v1024_v8 = vmov 0.0  }
  0x28   : > { %301 = vst [vmem:[#allocation2 + $0x10] sm:$0xff] %v1024_v8 }
  0x29   : > { %302 = vst [vmem:[#allocation2] sm:$0xff] %v1024_v8 }
  0x2a   : > { %303 = vst [vmem:[#allocation2 + $0x18] sm:$0xff] %v1024_v8 }
  0x2b   : > { %304 = vst [vmem:[#allocation2 + $0x8] sm:$0xff] %v1024_v8 }
  0x2c PF: > { %v904_v9 = vld [vmem:[%s1095_s7 + $0x38] sm:$0xff]  ;;  %v903_v12 = vld [vmem:[%s1095_s7 + $0x30] sm:$0xff]  ;;  %v902_v15 = vld [vmem:[%s1095_s7 + $0x28] sm:$0xff]  ;;  %p885_p11 = scmp.ne.s32.totalorder %s1014_s14, 2 }
  0x2d   : > { %v912_v10 = vld [vmem:[%s1095_s7 + $0x78] sm:$0xff]  ;;  %541 = vmatpush.bf16.msra.mxu0 %v904_v9  ;;  %v911_v13 = vld [vmem:[%s1095_s7 + $0x70] sm:$0xff]  ;;  %932 = vmatpush.bf16.msra.mxu3 %v904_v9  ;;  %v910_v16 = vld [vmem:[%s1095_s7 + $0x68] sm:$0xff] }
  0x2e   : > { %v920_v11 = vld [vmem:[%s1095_s7 + $0xb8] sm:$0xff]  ;;  %560 = vmatpush.bf16.msra.mxu1 %v912_v10  ;;  %v919_v14 = vld [vmem:[%s1095_s7 + $0xb0] sm:$0xff]  ;;  %v918_v17 = vld [vmem:[%s1095_s7 + $0xa8] sm:$0xff] }
  0x2f   : > { %579 = vmatpush.bf16.msra.mxu2 %v920_v11  ;;  %v901_v18 = vld [vmem:[%s1095_s7 + $0x20] sm:$0xff]  ;;  %v900_v21 = vld [vmem:[%s1095_s7 + $0x18] sm:$0xff]  ;;  %v899_v24 = vld [vmem:[%s1095_s7 + $0x10] sm:$0xff] }
  0x30   : > { %v909_v19 = vld [vmem:[%s1095_s7 + $0x60] sm:$0xff]  ;;  %v908_v22 = vld [vmem:[%s1095_s7 + $0x58] sm:$0xff]  ;;  %v907_v25 = vld [vmem:[%s1095_s7 + $0x50] sm:$0xff] }
  0x31   : > { %542 = vmatpush.bf16.msra.mxu0 %v903_v12  ;;  %933 = vmatpush.bf16.msra.mxu3 %v903_v12  ;;  %v917_v20 = vld [vmem:[%s1095_s7 + $0xa0] sm:$0xff]  ;;  %v916_v23 = vld [vmem:[%s1095_s7 + $0x98] sm:$0xff]  ;;  %v915_v26 = vld [vmem:[%s1095_s7 + $0x90] sm:$0xff] }
  0x32   : > { %561 = vmatpush.bf16.msra.mxu1 %v911_v13  ;;  %v898_v27 = vld [vmem:[%s1095_s7 + $0x8] sm:$0xff]  ;;  %v897_v30 = vld [vmem:[%s1095_s7] sm:$0xff]  ;;  %v305_v54 = vld [vmem:[#allocation2 + $0x10] sm:$0xff] }
  0x33   : > { %580 = vmatpush.bf16.msra.mxu2 %v919_v14  ;;  %v906_v28 = vld [vmem:[%s1095_s7 + $0x48] sm:$0xff]  ;;  %v905_v31 = vld [vmem:[%s1095_s7 + $0x40] sm:$0xff]  ;;  %v307_v4 = vld [vmem:[#allocation2 + $0x18] sm:$0xff] }
  0x34   : > { %v914_v29 = vld [vmem:[%s1095_s7 + $0x88] sm:$0xff]  ;;  %v913_v32 = vld [vmem:[%s1095_s7 + $0x80] sm:$0xff] }
  0x35   : > { %543 = vmatpush.bf16.msra.mxu0 %v902_v15  ;;  %934 = vmatpush.bf16.msra.mxu3 %v902_v15  ;;  %v767_v33 = vld [vmem:[%s1097_s8] sm:$0xf]  ;;  %v892_v34 = vld [vmem:[%s1097_s8 + $0x8] sm:$0xf0]  ;;  %v891_v35 = vld [vmem:[%s1097_s8 + $0x4] sm:$0xf] }
  0x36   : > { %562 = vmatpush.bf16.msra.mxu1 %v910_v16  ;;  %v769_v36 = vld [vmem:[%s1097_s8 + $0xc] sm:$0xf0]  ;;  %v775_v37 = vld [vmem:[%s1097_s8 + $0x8] sm:$0xf]  ;;  %v893_v38 = vld [vmem:[%s1097_s8 + $0x10] sm:$0xf0]  ;;  %v768_v41 = vor.u32 %v892_v34, %v767_v33 }
  0x37   : > { %581 = vmatpush.bf16.msra.mxu2 %v918_v17  ;;  %v779_v39 = vld [vmem:[%s1097_s8 + $0x18] sm:$0xf]  ;;  %v895_v40 = vld [vmem:[%s1097_s8 + $0x20] sm:$0xf0]  ;;  %v772_v42 = vor.u32 %v891_v35, %v769_v36  ;;  %v776_v43 = vor.u32 %v893_v38, %v775_v37  ;;  %v894_v45 = vld [vmem:[%s1097_s8 + $0x1c] sm:$0xf] }
  0x38   : > { %v780_v44 = vor.u32 %v895_v40, %v779_v39  ;;  %v781_v46 = vld [vmem:[%s1097_s8 + $0x24] sm:$0xf0]  ;;  %v787_v47 = vld [vmem:[%s1097_s8 + $0x20] sm:$0xf]  ;;  %v896_v48 = vld [vmem:[%s1097_s8 + $0x28] sm:$0xf0] }
  0x39   : > { %544 = vmatpush.bf16.msra.mxu0 %v901_v18  ;;  %935 = vmatpush.bf16.msra.mxu3 %v901_v18  ;;  %v784_v49 = vor.u32 %v894_v45, %v781_v46  ;;  %v788_v50 = vor.u32 %v896_v48, %v787_v47  ;;  %v306_v61 = vld [vmem:[#allocation2] sm:$0xff]  ;;  %v308_v11 = vld [vmem:[#allocation2 + $0x8] sm:$0xff] }
  0x3a   : > { %563 = vmatpush.bf16.msra.mxu1 %v909_v19 }
  0x3b   : > { %582 = vmatpush.bf16.msra.mxu2 %v917_v20 }
  0x3d   : > { %545 = vmatpush.bf16.msra.mxu0 %v900_v21  ;;  %936 = vmatpush.bf16.msra.mxu3 %v900_v21 }
  0x3e   : > { %564 = vmatpush.bf16.msra.mxu1 %v908_v22 }
  0x3f   : > { %583 = vmatpush.bf16.msra.mxu2 %v916_v23 }
  0x41   : > { %546 = vmatpush.bf16.msra.mxu0 %v899_v24  ;;  %937 = vmatpush.bf16.msra.mxu3 %v899_v24 }
  0x42   : > { %565 = vmatpush.bf16.msra.mxu1 %v907_v25 }
  0x43   : > { %584 = vmatpush.bf16.msra.mxu2 %v915_v26 }
  0x45   : > { %547 = vmatpush.bf16.msra.mxu0 %v898_v27  ;;  %938 = vmatpush.bf16.msra.mxu3 %v898_v27 }
  0x46   : > { %566 = vmatpush.bf16.msra.mxu1 %v906_v28 }
  0x47   : > { %585 = vmatpush.bf16.msra.mxu2 %v914_v29 }
  0x49   : > { %548 = vmatpush.bf16.msra.mxu0 %v897_v30  ;;  %939 = vmatpush.bf16.msra.mxu3 %v897_v30 }
  0x4a   : > { %567 = vmatpush.bf16.msra.mxu1 %v905_v31 }
  0x4b   : > { %586 = vmatpush.bf16.msra.mxu2 %v913_v32 }
  0x4c   : > { %549 = vmatmul.bf16.vlgmr.msra.gmra.mxu0 %v768_v41  ;;  %554 = vmatmul.bf16.vlgmr.msra.gmra.mxu3 %v780_v44 }
  0x4d   : > { %568 = vmatmul.bf16.vlgmr.msra.gmra.mxu1 %v772_v42 }
  0x4e   : > { %587 = vmatmul.bf16.vlgmr.msra.gmra.mxu2 %v776_v43 }
  0x5d   : > { %573 = vmatmul.bf16.gmra.mxu1 %v784_v49 }
  0x5e   : > { %592 = vmatmul.bf16.gmra.mxu2 %v788_v50 }
  0xc9   : > { %v550_v52 = vpop.f32.mrf.mxu0 }
  0xca   : > { %v569_v51 = vpop.f32.mrf.mxu1 }
  0xcb   : > { %v570_v53 = vadd.f32 %v569_v51, %v550_v52 }
  0xcf   : > { %v555_v2 = vpop.f32.mrf.mxu3 }
  0xd1   : > { %v588_v55 = vpop.f32.mrf.mxu2  ;;  %v552_v59 = vpop.f32.mrf.mxu0 }
  0xd2   : > { %v589_v56 = vadd.f32 %v588_v55, %v570_v53  ;;  %v571_v57 = vpop.f32.mrf.mxu1 }
  0xd3   : > { %v572_v60 = vadd.f32 %v571_v57, %v552_v59 }
  0xd4   : > { %v598_v58 = vadd.f32 %v589_v56, %v305_v54 }
  0xd6   : > { %602 = vst [vmem:[#allocation2 + $0x10] sm:$0xff] %v598_v58 }
  0xd7   : > { %v557_v9 = vpop.f32.mrf.mxu3 }
  0xd9   : > { %v590_v62 = vpop.f32.mrf.mxu2 }
  0xda   : > { %v591_v63 = vadd.f32 %v590_v62, %v572_v60  ;;  %v574_v0 = vpop.f32.mrf.mxu1 }
  0xdb   : > { %v575_v3 = vadd.f32 %v574_v0, %v555_v2 }
  0xdc   : > { %v599_v1 = vadd.f32 %v591_v63, %v306_v61 }
  0xde   : > { %603 = vst [vmem:[#allocation2] sm:$0xff] %v599_v1 }
  0xe1   : > { %v593_v5 = vpop.f32.mrf.mxu2 }
  0xe2   : > { %v594_v6 = vadd.f32 %v593_v5, %v575_v3  ;;  %v576_v8 = vpop.f32.mrf.mxu1 }
  0xe3   : > { %v577_v10 = vadd.f32 %v576_v8, %v557_v9 }
  0xe4   : > { %v600_v7 = vadd.f32 %v594_v6, %v307_v4 }
  0xe6   : > { %604 = vst [vmem:[#allocation2 + $0x18] sm:$0xff] %v600_v7 }
  0xe9   : > { %v595_v12 = vpop.f32.mrf.mxu2 }
  0xea   : > { %v596_v13 = vadd.f32 %v595_v12, %v577_v10  ;;  %609 = sbr.rel (%p885_p11) target bundleno = 253 (0xfd), region = 66 }
  0xec   : > { %v601_v14 = vadd.f32 %v596_v13, %v308_v11 }
  0xee   : > { %605 = vst [vmem:[#allocation2 + $0x8] sm:$0xff] %v601_v14 }
  0xef   : > { %v610_v15 = vld [vmem:[#allocation2 + $0x10] sm:$0xff]  ;;  %v611_v16 = vld [vmem:[#allocation2] sm:$0xff]  ;;  %v612_v18 = vld [vmem:[#allocation2 + $0x18] sm:$0xff] }
  0xf0   : > { %v983_v17 = vld [vmem:[%s1163_s2] ss:$0 sm:$0xff] }
  0xf1   : > { %v618_v20 = vadd.f32 %v983_v17, %v610_v15  ;;  %v619_v21 = vadd.f32 %v983_v17, %v611_v16  ;;  %v620_v22 = vadd.f32 %v983_v17, %v612_v18 }
  0xf3   : > { %v622_v24 = vmax.f32 %v618_v20, 0.0  ;;  %v623_v25 = vmax.f32 %v619_v21, 0.0  ;;  %v624_v26 = vmax.f32 %v620_v22, 0.0 }
  0xf5   : > { %v613_v19 = vld [vmem:[#allocation2 + $0x8] sm:$0xff]  ;;  %v924_v28 = vpack.c.bf16 %v623_v25, %v622_v24 }
  0xf6   : > { %v621_v23 = vadd.f32 %v983_v17, %v613_v19 }
  0xf7   : > { %925 = vst [vmem:[%s1164_s3] sm:$0xff] %v924_v28  }
  0xf8   : > { %v625_v27 = vmax.f32 %v621_v23, 0.0 }
  0xfa   : > { %v929_v29 = vpack.c.bf16 %v625_v27, %v624_v26 }
  0xfc   : > { %931 = vst [vmem:[%s1164_s3 + $0x8] sm:$0xff] %v929_v29  }
  0xfd PF: > { %s13_s16 = sadd.s32 1, %s1022_s16   ;;  %s1165_s12 = smov %s1010_s13 }
  0xfe   : > { %p10_p12 = scmp.ge.s32.totalorder %s13_s16, 5   ;;  %s1166_s13 = smov %s1080_s20 }
  0xff   : > { %s1167_s14 = smov %s1018_s15  ;;  %s1168_s15 = smov %s1170_s17 }
 0x100   :  { %12 = sbr.rel (!%p10_p12) target bundleno = 3 (0x3), region = 113 }

// kernel: _lambda_.27
= control target key start
LH: loop header
LB: loop body
LE: loop exit
PB: predicated region body
PF: predicated region fallthrough
CT: control target
= control target key end

     0   :  { %s289_s1 = inlined_call_operand.vmem [shape: bf16[128,128], index: 1, kind: input, shape index: {}]   ;;  %s290_s2 = inlined_call_operand.vmem [shape: f32[1,128], index: 2, kind: input, shape index: {}]   ;;  %s291_s0 = inlined_call_operand.vmem [shape: bf16[32,128], index: 0, kind: input, shape index: {}]   ;;  %s292_s3 = inlined_call_operand.vmem [shape: bf16[32,128], index: 3, kind: output, shape index: {}]  }
   0x1   :  { %v209_v0 = vld [vmem:[%s289_s1 + $0x38] sm:$0xff]  ;;  %v208_v1 = vld [vmem:[%s289_s1 + $0x30] sm:$0xff]  ;;  %v207_v2 = vld [vmem:[%s289_s1 + $0x28] sm:$0xff] }
   0x2   :  { %106 = vmatpush.bf16.msra.mxu0 %v209_v0  ;;  %221 = vmatpush.bf16.msra.mxu1 %v209_v0  ;;  %v206_v3 = vld [vmem:[%s289_s1 + $0x20] sm:$0xff]  ;;  %v205_v4 = vld [vmem:[%s289_s1 + $0x18] sm:$0xff]  ;;  %v204_v5 = vld [vmem:[%s289_s1 + $0x10] sm:$0xff] }
   0x3   :  { %v203_v6 = vld [vmem:[%s289_s1 + $0x8] sm:$0xff]  ;;  %v202_v7 = vld [vmem:[%s289_s1] sm:$0xff] }
   0x4   :  { %v200_v8 = vld [vmem:[%s291_s0] sm:$0xff]  ;;  %v201_v9 = vld [vmem:[%s291_s0 + $0x8] sm:$0xff] }
   0x5   :  { %v229_v12 = vld [vmem:[%s290_s2] ss:$0 sm:$0xff] }
   0x6   :  { %107 = vmatpush.bf16.msra.mxu0 %v208_v1  ;;  %222 = vmatpush.bf16.msra.mxu1 %v208_v1 }
   0xa   :  { %108 = vmatpush.bf16.msra.mxu0 %v207_v2  ;;  %223 = vmatpush.bf16.msra.mxu1 %v207_v2 }
   0xe   :  { %109 = vmatpush.bf16.msra.mxu0 %v206_v3  ;;  %224 = vmatpush.bf16.msra.mxu1 %v206_v3 }
  0x12   :  { %110 = vmatpush.bf16.msra.mxu0 %v205_v4  ;;  %225 = vmatpush.bf16.msra.mxu1 %v205_v4 }
  0x16   :  { %111 = vmatpush.bf16.msra.mxu0 %v204_v5  ;;  %226 = vmatpush.bf16.msra.mxu1 %v204_v5 }
  0x1a   :  { %112 = vmatpush.bf16.msra.mxu0 %v203_v6  ;;  %227 = vmatpush.bf16.msra.mxu1 %v203_v6 }
  0x1e   :  { %113 = vmatpush.bf16.msra.mxu0 %v202_v7  ;;  %228 = vmatpush.bf16.msra.mxu1 %v202_v7 }
  0x21   :  { %114 = vmatmul.bf16.vlgmr.msra.gmra.mxu0 %v200_v8  ;;  %119 = vmatmul.bf16.vlgmr.msra.gmra.mxu1 %v201_v9 }
  0x9e   :  { %v115_v10 = vpop.f32.mrf.mxu0  ;;  %v120_v11 = vpop.f32.mrf.mxu1 }
  0x9f   :  { %v144_v15 = vadd.f32 %v229_v12, %v115_v10  ;;  %v146_v16 = vadd.f32 %v229_v12, %v120_v11 }
  0xa6   :  { %v117_v13 = vpop.f32.mrf.mxu0  ;;  %v122_v14 = vpop.f32.mrf.mxu1 }
  0xa7   :  { %v145_v17 = vadd.f32 %v229_v12, %v117_v13  ;;  %v147_v18 = vadd.f32 %v229_v12, %v122_v14 }
  0xa9   :  { %v213_v19 = vpack.c.bf16 %v145_v17, %v144_v15  ;;  %v218_v20 = vpack.c.bf16 %v147_v18, %v146_v16 }
  0xab   :  { %214 = vst [vmem:[%s292_s3] sm:$0xff] %v213_v19  }
  0xac   :  { %220 = vst [vmem:[%s292_s3 + $0x8] sm:$0xff] %v218_v20  }

// kernel: _lambda_.28
= control target key start
LH: loop header
LB: loop body
LE: loop exit
PB: predicated region body
PF: predicated region fallthrough
CT: control target
= control target key end

     0   :  { %s1150_s15 = smov 0   ;;  %s1152_s16 = smov 0   ;;  %s1272_s0 = inlined_call_operand.vmem [shape: bf16[32,1152], index: 0, kind: input, shape index: {}]   ;;  %s1273_s1 = inlined_call_operand.vmem [shape: bf16[1152,128], index: 1, kind: input, shape index: {}]   ;;  %s1274_s2 = inlined_call_operand.vmem [shape: f32[1,128], index: 2, kind: input, shape index: {}]   ;;  %s1275_s3 = inlined_call_operand.vmem [shape: bf16[32,128], index: 3, kind: input, shape index: {}]   ;;  %s1276_s4 = inlined_call_operand.vmem [shape: bf16[32,128], index: 4, kind: output, shape index: {}]  }
   0x1   :  { %s1154_s17 = smov 0   ;;  %s1156_s18 = smov 0  }
   0x2   :  { %s1158_s19 = smov 0  }
   0x3 LB: > { %s26_s20 = sadd.s32 1, %s1118_s18  ;;  %p49_p1 = scmp.ne.s32.totalorder %s1110_s16, %s1106_s15  ;;  %s1122_s19 = sphi %s1158_s19, %s14_s19   ;;  %s1118_s18 = sphi %s1156_s18, %s1280_s18   ;;  %s1114_s17 = sphi %s1154_s17, %s1279_s17   ;;  %s1110_s16 = sphi %s1152_s16, %s1278_s16   ;;  %s1106_s15 = sphi %s1150_s15, %s1277_s15  }
   0x4   : > { %p27_p0 = scmp.ge.s32.totalorder %s26_s20, 3  ;;  %p50_p2 = scmp.eq.s32.totalorder %s1122_s19, 0 }
   0x5   : > { %s42_s22 = sadd.s32 1, %s1110_s16  ;;  %p843_p5 = scmp.ge.s32.totalorder %s1122_s19, 3 }
   0x6   : > { %s1282_s20 = smov (%p27_p0, %s26_s20), 0  ;;  %p51_p3 = por %p50_p2, %p49_p1 }
   0x7   : > { %s38_s21 = ssub.s32 %s1118_s18, %s1282_s20  ;;  %203 = sbr.rel (%p843_p5) target bundleno = 25 (0x19), region = 24 }
   0x8   : > { %p40_p4 = scmp.eq.s32.totalorder %s38_s21, 0 }
   0xa   : > { %s1185_s23 = scalar_select %p40_p4, %s1110_s16, %s42_s22  }
   0xc   : > { %206 = sbr.rel (!%p51_p3) target bundleno = 25 (0x19), region = 28  ;;  %s208_s24 = sand.u32 (%p51_p3), 1, %s1110_s16  }
   0xd   : > { %s981_s25 = smul.u32 (%p51_p3), 12, %s1118_s18 }
   0xe   : > { %s1040_s26 = smul.u32 (%p51_p3), 48, %s208_s24 }
   0xf   : > { %s216_s29 = scalar_lea.vmem (%p51_p3), %s1272_s0, %s981_s25 }
  0x10   : > { %v231_v0 = vld [vmem:[%s216_s29] sm:$0xff] (%p51_p3)  ;;  %v235_v2 = vld [vmem:[%s216_s29 + $0x48] sm:$0xff] (%p51_p3)  ;;  %s210_s30 = scalar_lea.vmem (%p51_p3), [#allocation3], %s1040_s26  ;;  %v849_v6 = vld [vmem:[%s216_s29 + $0x50] sm:$0xf] (%p51_p3) }
  0x11   : > { %v233_v1 = vld [vmem:[%s216_s29 + $0x24] sm:$0xff]  ;;  %232 = vst [vmem:[%s210_s30] sm:$0xff] %v231_v0  ;;  %v237_v3 = vld [vmem:[%s216_s29 + $0x6c] sm:$0xff]  ;;  %v851_v7 = vld [vmem:[%s216_s29 + $0x74] sm:$0xf] }
  0x12   : > { %234 = vst [vmem:[%s210_s30 + $0xc] sm:$0xff] %v233_v1  ;;  %v845_v4 = vld [vmem:[%s216_s29 + $0x8] sm:$0xf]  ;;  %v847_v5 = vld [vmem:[%s216_s29 + $0x2c] sm:$0xf] }
  0x13   : > { %236 = vst [vmem:[%s210_s30 + $0x18] sm:$0xff] %v235_v2 }
  0x14   : > { %238 = vst [vmem:[%s210_s30 + $0x24] sm:$0xff] %v237_v3 }
  0x15   : > { %846 = vst [vmem:[%s210_s30 + $0x8] sm:$0xf] %v845_v4 }
  0x16   : > { %848 = vst [vmem:[%s210_s30 + $0x14] sm:$0xf] %v847_v5 }
  0x17   : > { %850 = vst [vmem:[%s210_s30 + $0x20] sm:$0xf] %v849_v6 }
  0x18   : > { %852 = vst [vmem:[%s210_s30 + $0x2c] sm:$0xf] %v851_v7 }
  0x19 PF: > { %p853_p6 = scmp.ge.s32.totalorder %s1122_s19, 1  ;;  %p271_p7 = scmp.lt.s32.totalorder %s1122_s19, 4 }
  0x1b   : > { %p272_p8 = pnand %p853_p6, %p271_p7 }
  0x1c   : > { %s278_s5 = sand.u32 (!%p272_p8), 1, %s1106_s15   ;;  %s327_s6 = smul.u32 (!%p272_p8), 48, %s1114_s17 }
  0x1d   : > { %275 = sbr.rel (%p272_p8) target bundleno = 255 (0xff), region = 58  ;;  %p855_p10 = scmp.ne.s32.totalorder (!%p272_p8), %s1114_s17, 0 }
  0x1e   : > { %s1041_s7 = smul.u32 (!%p272_p8), 48, %s278_s5  ;;  %p328_p9 = scmp.lt.s32.totalorder (!%p272_p8), %s327_s6, 143 }
  0x20   : > { %s1202_s12 = scalar_lea.vmem (!%p272_p8), [#allocation3], %s1041_s7 }
  0x22   : > { %s1284_s6 = smov (!%p328_p9, %s327_s6), 143  ;;  %360 = sbr.rel (%p855_p10) target bundleno = 44 (0x2c), region = 66 }
  0x23   : > { %s854_s8 = sshll.u32 %s1284_s6, 2 }
  0x24   : > { %s1200_s11 = scalar_lea.vmem %s1273_s1, %s854_s8 }
  0x27   : > { %v1124_v8 = vmov 0.0  }
  0x28   : > { %361 = vst [vmem:[#allocation2 + $0x10] sm:$0xff] %v1124_v8 }
  0x29   : > { %362 = vst [vmem:[#allocation2] sm:$0xff] %v1124_v8 }
  0x2a   : > { %363 = vst [vmem:[#allocation2 + $0x18] sm:$0xff] %v1124_v8 }
  0x2b   : > { %364 = vst [vmem:[#allocation2 + $0x8] sm:$0xff] %v1124_v8 }
  0x2c PF: > { %v995_v9 = vld [vmem:[%s1200_s11 + $0x38] sm:$0xff]  ;;  %v994_v12 = vld [vmem:[%s1200_s11 + $0x30] sm:$0xff]  ;;  %v993_v15 = vld [vmem:[%s1200_s11 + $0x28] sm:$0xff]  ;;  %p976_p11 = scmp.ne.s32.totalorder %s1114_s17, 2 }
  0x2d   : > { %v1003_v10 = vld [vmem:[%s1200_s11 + $0x78] sm:$0xff]  ;;  %601 = vmatpush.bf16.msra.mxu0 %v995_v9  ;;  %v1002_v13 = vld [vmem:[%s1200_s11 + $0x70] sm:$0xff]  ;;  %1032 = vmatpush.bf16.msra.mxu3 %v995_v9  ;;  %v1001_v16 = vld [vmem:[%s1200_s11 + $0x68] sm:$0xff] }
  0x2e   : > { %v1011_v11 = vld [vmem:[%s1200_s11 + $0xb8] sm:$0xff]  ;;  %620 = vmatpush.bf16.msra.mxu1 %v1003_v10  ;;  %v1010_v14 = vld [vmem:[%s1200_s11 + $0xb0] sm:$0xff]  ;;  %v1009_v17 = vld [vmem:[%s1200_s11 + $0xa8] sm:$0xff] }
  0x2f   : > { %639 = vmatpush.bf16.msra.mxu2 %v1011_v11  ;;  %v992_v18 = vld [vmem:[%s1200_s11 + $0x20] sm:$0xff]  ;;  %v991_v21 = vld [vmem:[%s1200_s11 + $0x18] sm:$0xff]  ;;  %v990_v24 = vld [vmem:[%s1200_s11 + $0x10] sm:$0xff] }
  0x30   : > { %v1000_v19 = vld [vmem:[%s1200_s11 + $0x60] sm:$0xff]  ;;  %v999_v22 = vld [vmem:[%s1200_s11 + $0x58] sm:$0xff]  ;;  %v998_v25 = vld [vmem:[%s1200_s11 + $0x50] sm:$0xff] }
  0x31   : > { %602 = vmatpush.bf16.msra.mxu0 %v994_v12  ;;  %1033 = vmatpush.bf16.msra.mxu3 %v994_v12  ;;  %v1008_v20 = vld [vmem:[%s1200_s11 + $0xa0] sm:$0xff]  ;;  %v1007_v23 = vld [vmem:[%s1200_s11 + $0x98] sm:$0xff]  ;;  %v1006_v26 = vld [vmem:[%s1200_s11 + $0x90] sm:$0xff] }
  0x32   : > { %621 = vmatpush.bf16.msra.mxu1 %v1002_v13  ;;  %v989_v27 = vld [vmem:[%s1200_s11 + $0x8] sm:$0xff]  ;;  %v988_v30 = vld [vmem:[%s1200_s11] sm:$0xff]  ;;  %v365_v54 = vld [vmem:[#allocation2 + $0x10] sm:$0xff] }
  0x33   : > { %640 = vmatpush.bf16.msra.mxu2 %v1010_v14  ;;  %v997_v28 = vld [vmem:[%s1200_s11 + $0x48] sm:$0xff]  ;;  %v996_v31 = vld [vmem:[%s1200_s11 + $0x40] sm:$0xff]  ;;  %v367_v4 = vld [vmem:[#allocation2 + $0x18] sm:$0xff] }
  0x34   : > { %v1005_v29 = vld [vmem:[%s1200_s11 + $0x88] sm:$0xff]  ;;  %v1004_v32 = vld [vmem:[%s1200_s11 + $0x80] sm:$0xff] }
  0x35   : > { %603 = vmatpush.bf16.msra.mxu0 %v993_v15  ;;  %1034 = vmatpush.bf16.msra.mxu3 %v993_v15  ;;  %v858_v33 = vld [vmem:[%s1202_s12] sm:$0xf]  ;;  %v983_v34 = vld [vmem:[%s1202_s12 + $0x8] sm:$0xf0]  ;;  %v982_v35 = vld [vmem:[%s1202_s12 + $0x4] sm:$0xf] }
  0x36   : > { %622 = vmatpush.bf16.msra.mxu1 %v1001_v16  ;;  %v860_v36 = vld [vmem:[%s1202_s12 + $0xc] sm:$0xf0]  ;;  %v866_v37 = vld [vmem:[%s1202_s12 + $0x8] sm:$0xf]  ;;  %v984_v38 = vld [vmem:[%s1202_s12 + $0x10] sm:$0xf0]  ;;  %v859_v41 = vor.u32 %v983_v34, %v858_v33 }
  0x37   : > { %641 = vmatpush.bf16.msra.mxu2 %v1009_v17  ;;  %v870_v39 = vld [vmem:[%s1202_s12 + $0x18] sm:$0xf]  ;;  %v986_v40 = vld [vmem:[%s1202_s12 + $0x20] sm:$0xf0]  ;;  %v863_v42 = vor.u32 %v982_v35, %v860_v36  ;;  %v867_v43 = vor.u32 %v984_v38, %v866_v37  ;;  %v985_v45 = vld [vmem:[%s1202_s12 + $0x1c] sm:$0xf] }
  0x38   : > { %v871_v44 = vor.u32 %v986_v40, %v870_v39  ;;  %v872_v46 = vld [vmem:[%s1202_s12 + $0x24] sm:$0xf0]  ;;  %v878_v47 = vld [vmem:[%s1202_s12 + $0x20] sm:$0xf]  ;;  %v987_v48 = vld [vmem:[%s1202_s12 + $0x28] sm:$0xf0] }
  0x39   : > { %604 = vmatpush.bf16.msra.mxu0 %v992_v18  ;;  %1035 = vmatpush.bf16.msra.mxu3 %v992_v18  ;;  %v875_v49 = vor.u32 %v985_v45, %v872_v46  ;;  %v879_v50 = vor.u32 %v987_v48, %v878_v47  ;;  %v366_v61 = vld [vmem:[#allocation2] sm:$0xff]  ;;  %v368_v11 = vld [vmem:[#allocation2 + $0x8] sm:$0xff] }
  0x3a   : > { %623 = vmatpush.bf16.msra.mxu1 %v1000_v19 }
  0x3b   : > { %642 = vmatpush.bf16.msra.mxu2 %v1008_v20 }
  0x3d   : > { %605 = vmatpush.bf16.msra.mxu0 %v991_v21  ;;  %1036 = vmatpush.bf16.msra.mxu3 %v991_v21 }
  0x3e   : > { %624 = vmatpush.bf16.msra.mxu1 %v999_v22 }
  0x3f   : > { %643 = vmatpush.bf16.msra.mxu2 %v1007_v23 }
  0x41   : > { %606 = vmatpush.bf16.msra.mxu0 %v990_v24  ;;  %1037 = vmatpush.bf16.msra.mxu3 %v990_v24 }
  0x42   : > { %625 = vmatpush.bf16.msra.mxu1 %v998_v25 }
  0x43   : > { %644 = vmatpush.bf16.msra.mxu2 %v1006_v26 }
  0x45   : > { %607 = vmatpush.bf16.msra.mxu0 %v989_v27  ;;  %1038 = vmatpush.bf16.msra.mxu3 %v989_v27 }
  0x46   : > { %626 = vmatpush.bf16.msra.mxu1 %v997_v28 }
  0x47   : > { %645 = vmatpush.bf16.msra.mxu2 %v1005_v29 }
  0x49   : > { %608 = vmatpush.bf16.msra.mxu0 %v988_v30  ;;  %1039 = vmatpush.bf16.msra.mxu3 %v988_v30 }
  0x4a   : > { %627 = vmatpush.bf16.msra.mxu1 %v996_v31 }
  0x4b   : > { %646 = vmatpush.bf16.msra.mxu2 %v1004_v32 }
  0x4c   : > { %609 = vmatmul.bf16.vlgmr.msra.gmra.mxu0 %v859_v41  ;;  %614 = vmatmul.bf16.vlgmr.msra.gmra.mxu3 %v871_v44 }
  0x4d   : > { %628 = vmatmul.bf16.vlgmr.msra.gmra.mxu1 %v863_v42 }
  0x4e   : > { %647 = vmatmul.bf16.vlgmr.msra.gmra.mxu2 %v867_v43 }
  0x5d   : > { %633 = vmatmul.bf16.gmra.mxu1 %v875_v49 }
  0x5e   : > { %652 = vmatmul.bf16.gmra.mxu2 %v879_v50 }
  0xc9   : > { %v610_v52 = vpop.f32.mrf.mxu0 }
  0xca   : > { %v629_v51 = vpop.f32.mrf.mxu1 }
  0xcb   : > { %v630_v53 = vadd.f32 %v629_v51, %v610_v52 }
  0xcf   : > { %v615_v2 = vpop.f32.mrf.mxu3 }
  0xd1   : > { %v648_v55 = vpop.f32.mrf.mxu2  ;;  %v612_v59 = vpop.f32.mrf.mxu0 }
  0xd2   : > { %v649_v56 = vadd.f32 %v648_v55, %v630_v53  ;;  %v631_v57 = vpop.f32.mrf.mxu1 }
  0xd3   : > { %v632_v60 = vadd.f32 %v631_v57, %v612_v59 }
  0xd4   : > { %v658_v58 = vadd.f32 %v649_v56, %v365_v54 }
  0xd6   : > { %662 = vst [vmem:[#allocation2 + $0x10] sm:$0xff] %v658_v58 }
  0xd7   : > { %v617_v9 = vpop.f32.mrf.mxu3 }
  0xd9   : > { %v650_v62 = vpop.f32.mrf.mxu2 }
  0xda   : > { %v651_v63 = vadd.f32 %v650_v62, %v632_v60  ;;  %v634_v0 = vpop.f32.mrf.mxu1 }
  0xdb   : > { %v635_v3 = vadd.f32 %v634_v0, %v615_v2 }
  0xdc   : > { %v659_v1 = vadd.f32 %v651_v63, %v366_v61 }
  0xde   : > { %663 = vst [vmem:[#allocation2] sm:$0xff] %v659_v1 }
  0xe1   : > { %v653_v5 = vpop.f32.mrf.mxu2 }
  0xe2   : > { %v654_v6 = vadd.f32 %v653_v5, %v635_v3  ;;  %v636_v8 = vpop.f32.mrf.mxu1 }
  0xe3   : > { %v637_v10 = vadd.f32 %v636_v8, %v617_v9 }
  0xe4   : > { %v660_v7 = vadd.f32 %v654_v6, %v367_v4 }
  0xe6   : > { %664 = vst [vmem:[#allocation2 + $0x18] sm:$0xff] %v660_v7 }
  0xe9   : > { %v655_v12 = vpop.f32.mrf.mxu2 }
  0xea   : > { %v656_v13 = vadd.f32 %v655_v12, %v637_v10  ;;  %669 = sbr.rel (%p976_p11) target bundleno = 255 (0xff), region = 70 }
  0xec   : > { %v661_v14 = vadd.f32 %v656_v13, %v368_v11 }
  0xee   : > { %665 = vst [vmem:[#allocation2 + $0x8] sm:$0xff] %v661_v14 }
  0xef   : > { %v670_v15 = vld [vmem:[#allocation2 + $0x10] sm:$0xff]  ;;  %v671_v16 = vld [vmem:[#allocation2] sm:$0xff]  ;;  %v672_v19 = vld [vmem:[#allocation2 + $0x18] sm:$0xff] }
  0xf0   : > { %v1083_v17 = vld [vmem:[%s1274_s2] ss:$0 sm:$0xff]  ;;  %v1030_v23 = vld [vmem:[%s1275_s3 + $0x8] sm:$0xff]  }
  0xf1   : > { %v1013_v18 = vld [vmem:[%s1275_s3] sm:$0xff]   ;;  %v678_v24 = vadd.f32 %v1083_v17, %v670_v15  ;;  %v679_v25 = vadd.f32 %v1083_v17, %v671_v16  ;;  %v680_v26 = vadd.f32 %v1083_v17, %v672_v19  ;;  %v1018_v28 = vunpack.c.l.bf16 %v1030_v23 }
  0xf2   : > { %v1014_v20 = vunpack.c.l.bf16 %v1013_v18  ;;  %v1015_v21 = vunpack.c.h.bf16 %v1013_v18  ;;  %v1019_v29 = vunpack.c.h.bf16 %v1030_v23 }
  0xf3   : > { %v692_v32 = vadd.f32 %v1018_v28, %v680_v26 }
  0xf4   : > { %v690_v30 = vadd.f32 %v1014_v20, %v678_v24  ;;  %v691_v31 = vadd.f32 %v1015_v21, %v679_v25 }
  0xf5   : > { %v673_v22 = vld [vmem:[#allocation2 + $0x8] sm:$0xff]  ;;  %v696_v36 = vmax.f32 %v692_v32, 0.0 }
  0xf6   : > { %v681_v27 = vadd.f32 %v1083_v17, %v673_v22  ;;  %v694_v34 = vmax.f32 %v690_v30, 0.0  ;;  %v695_v35 = vmax.f32 %v691_v31, 0.0 }
  0xf8   : > { %v693_v33 = vadd.f32 %v1019_v29, %v681_v27  ;;  %v1023_v38 = vpack.c.bf16 %v695_v35, %v694_v34 }
  0xfa   : > { %v697_v37 = vmax.f32 %v693_v33, 0.0  ;;  %1024 = vst [vmem:[%s1276_s4] sm:$0xff] %v1023_v38  }
  0xfc   : > { %v1028_v39 = vpack.c.bf16 %v697_v37, %v696_v36 }
  0xfe   : > { %1031 = vst [vmem:[%s1276_s4 + $0x8] sm:$0xff] %v1028_v39  }
  0xff PF: > { %s14_s19 = sadd.s32 1, %s1122_s19   ;;  %s1277_s15 = smov %s1110_s16 }
 0x100   : > { %p11_p12 = scmp.ge.s32.totalorder %s14_s19, 5   ;;  %s1278_s16 = smov %s1185_s23 }
 0x101   : > { %s1279_s17 = smov %s1118_s18  ;;  %s1280_s18 = smov %s1282_s20 }
 0x102   :  { %13 = sbr.rel (!%p11_p12) target bundleno = 3 (0x3), region = 120 }

// kernel: _lambda_.31
= control target key start
LH: loop header
LB: loop body
LE: loop exit
PB: predicated region body
PF: predicated region fallthrough
CT: control target
= control target key end

     0   :  { %s1251_s12 = smov 0   ;;  %s1253_s13 = smov 0   ;;  %s1441_s0 = inlined_call_operand.vmem [shape: bf16[16,1152], index: 0, kind: input, shape index: {}]   ;;  %s1442_s1 = inlined_call_operand.vmem [shape: bf16[1152,256], index: 1, kind: input, shape index: {}]   ;;  %s1443_s2 = inlined_call_operand.vmem [shape: f32[1,256], index: 2, kind: input, shape index: {}]   ;;  %s1444_s3 = inlined_call_operand.vmem [shape: bf16[16,256], index: 3, kind: output, shape index: {}]  }
   0x1   :  { %s1255_s14 = smov 0   ;;  %s1257_s15 = smov 0  }
   0x2   :  { %s1259_s16 = smov 0  }
   0x3 LB: > { %s25_s17 = sadd.s32 1, %s1224_s15  ;;  %p48_p1 = scmp.ne.s32.totalorder %s1216_s13, %s1212_s12  ;;  %s1228_s16 = sphi %s1259_s16, %s13_s16   ;;  %s1224_s15 = sphi %s1257_s15, %s1448_s15   ;;  %s1220_s14 = sphi %s1255_s14, %s1447_s14   ;;  %s1216_s13 = sphi %s1253_s13, %s1446_s13   ;;  %s1212_s12 = sphi %s1251_s12, %s1445_s12  }
   0x4   : > { %p26_p0 = scmp.ge.s32.totalorder %s25_s17, 3  ;;  %p49_p2 = scmp.eq.s32.totalorder %s1228_s16, 0 }
   0x5   : > { %s41_s19 = sadd.s32 1, %s1216_s13  ;;  %p875_p5 = scmp.ge.s32.totalorder %s1228_s16, 3 }
   0x6   : > { %s1450_s17 = smov (%p26_p0, %s25_s17), 0  ;;  %p50_p3 = por %p49_p2, %p48_p1 }
   0x7   : > { %s37_s18 = ssub.s32 %s1224_s15, %s1450_s17  ;;  %164 = sbr.rel (%p875_p5) target bundleno = 21 (0x15), region = 20 }
   0x8   : > { %p39_p4 = scmp.eq.s32.totalorder %s37_s18, 0 }
   0xa   : > { %s1286_s20 = scalar_select %p39_p4, %s1216_s13, %s41_s19  }
   0xc   : > { %167 = sbr.rel (!%p50_p3) target bundleno = 21 (0x15), region = 24  ;;  %s169_s21 = sand.u32 (%p50_p3), 1, %s1216_s13  }
   0xd   : > { %s1094_s22 = smul.u32 (%p50_p3), 12, %s1224_s15 }
   0xe   : > { %s1147_s23 = smul.u32 (%p50_p3), 24, %s169_s21 }
   0xf   : > { %s177_s26 = scalar_lea.vmem (%p50_p3), %s1441_s0, %s1094_s22 }
  0x10   : > { %v192_v0 = vld [vmem:[%s177_s26] sm:$0xff] (%p50_p3)  ;;  %v877_v2 = vld [vmem:[%s177_s26 + $0x8] sm:$0xf] (%p50_p3)  ;;  %s171_s27 = scalar_lea.vmem (%p50_p3), [#allocation3], %s1147_s23  ;;  %v879_v3 = vld [vmem:[%s177_s26 + $0x2c] sm:$0xf] (%p50_p3) }
  0x11   : > { %v194_v1 = vld [vmem:[%s177_s26 + $0x24] sm:$0xff]  ;;  %193 = vst [vmem:[%s171_s27] sm:$0xff] %v192_v0 }
  0x12   : > { %195 = vst [vmem:[%s171_s27 + $0xc] sm:$0xff] %v194_v1 }
  0x13   : > { %878 = vst [vmem:[%s171_s27 + $0x8] sm:$0xf] %v877_v2 }
  0x14   : > { %880 = vst [vmem:[%s171_s27 + $0x14] sm:$0xf] %v879_v3 }
  0x15 PF: > { %p881_p6 = scmp.ge.s32.totalorder %s1228_s16, 1  ;;  %p227_p7 = scmp.lt.s32.totalorder %s1228_s16, 4 }
  0x17   : > { %p228_p8 = pnand %p881_p6, %p227_p7 }
  0x18   : > { %s234_s28 = sand.u32 (!%p228_p8), 1, %s1212_s12   ;;  %s278_s29 = smul.u32 (!%p228_p8), 48, %s1220_s14 }
  0x19   : > { %231 = sbr.rel (%p228_p8) target bundleno = 261 (0x105), region = 54  ;;  %p884_p10 = scmp.ne.s32.totalorder (!%p228_p8), %s1220_s14, 0 }
  0x1a   : > { %s1148_s30 = smul.u32 (!%p228_p8), 24, %s234_s28  ;;  %p280_p9 = scmp.lt.s32.totalorder (!%p228_p8), %s278_s29, 143 }
  0x1c   : > { %s1303_s8 = scalar_lea.vmem (!%p228_p8), [#allocation3], %s1148_s30 }
  0x1e   : > { %s1452_s29 = smov (!%p280_p9, %s278_s29), 143  ;;  %310 = sbr.rel (%p884_p10) target bundleno = 40 (0x28), region = 62 }
  0x1f   : > { %s1095_s4 = sshll.u32 %s1452_s29, 3 }
  0x20   : > { %s1301_s7 = scalar_lea.vmem %s1442_s1, %s1095_s4 }
  0x23   : > { %v1230_v4 = vmov 0.0  }
  0x24   : > { %311 = vst [vmem:[#allocation2 + $0x10] sm:$0xff] %v1230_v4 }
  0x25   : > { %312 = vst [vmem:[#allocation2] sm:$0xff] %v1230_v4 }
  0x26   : > { %313 = vst [vmem:[#allocation2 + $0x18] sm:$0xff] %v1230_v4 }
  0x27   : > { %314 = vst [vmem:[#allocation2 + $0x8] sm:$0xff] %v1230_v4 }
  0x28 PF: > { %v955_v5 = vld [vmem:[%s1301_s7 + $0x70] sm:$0xf]  ;;  %v1114_v6 = vld [vmem:[%s1301_s7 + $0x74] sm:$0xf0]  ;;  %v947_v14 = vld [vmem:[%s1301_s7 + $0x60] sm:$0xf] }
  0x29   : > { %v1019_v7 = vld [vmem:[%s1301_s7 + $0xf0] sm:$0xf]  ;;  %v956_v8 = vor.u32 %v1114_v6, %v955_v5  ;;  %v1130_v9 = vld [vmem:[%s1301_s7 + $0xf4] sm:$0xf0]  ;;  %v1112_v15 = vld [vmem:[%s1301_s7 + $0x64] sm:$0xf0] }
  0x2a   : > { %v1083_v10 = vld [vmem:[%s1301_s7 + $0x170] sm:$0xf]  ;;  %v1146_v11 = vld [vmem:[%s1301_s7 + $0x174] sm:$0xf0]  ;;  %v1020_v12 = vor.u32 %v1130_v9, %v1019_v7  ;;  %v1011_v16 = vld [vmem:[%s1301_s7 + $0xe0] sm:$0xf]  ;;  %v948_v17 = vor.u32 %v1112_v15, %v947_v14 }
  0x2b   : > { %v1084_v13 = vor.u32 %v1146_v11, %v1083_v10  ;;  %627 = vmatpush.bf16.msra.mxu0 %v956_v8  ;;  %v1128_v18 = vld [vmem:[%s1301_s7 + $0xe4] sm:$0xf0]  ;;  %v1075_v19 = vld [vmem:[%s1301_s7 + $0x160] sm:$0xf]  ;;  %v939_v23 = vld [vmem:[%s1301_s7 + $0x50] sm:$0xf] }
  0x2c   : > { %v1144_v20 = vld [vmem:[%s1301_s7 + $0x164] sm:$0xf0]  ;;  %641 = vmatpush.bf16.msra.mxu1 %v1020_v12  ;;  %v1012_v21 = vor.u32 %v1128_v18, %v1011_v16  ;;  %v1110_v24 = vld [vmem:[%s1301_s7 + $0x54] sm:$0xf0]  ;;  %v1003_v25 = vld [vmem:[%s1301_s7 + $0xd0] sm:$0xf] }
  0x2d   : > { %655 = vmatpush.bf16.msra.mxu2 %v1084_v13  ;;  %v1076_v22 = vor.u32 %v1144_v20, %v1075_v19  ;;  %v1126_v26 = vld [vmem:[%s1301_s7 + $0xd4] sm:$0xf0]  ;;  %v1067_v27 = vld [vmem:[%s1301_s7 + $0x150] sm:$0xf]  ;;  %v940_v29 = vor.u32 %v1110_v24, %v939_v23  ;;  %v931_v30 = vld [vmem:[%s1301_s7 + $0x40] sm:$0xf] }
  0x2e   : > { %v1142_v28 = vld [vmem:[%s1301_s7 + $0x154] sm:$0xf0]  ;;  %v1108_v31 = vld [vmem:[%s1301_s7 + $0x44] sm:$0xf0]  ;;  %v1004_v32 = vor.u32 %v1126_v26, %v1003_v25  ;;  %v995_v34 = vld [vmem:[%s1301_s7 + $0xc0] sm:$0xf] }
  0x2f   : > { %628 = vmatpush.bf16.msra.mxu0 %v948_v17  ;;  %v1068_v33 = vor.u32 %v1142_v28, %v1067_v27  ;;  %v1113_v35 = vld [vmem:[%s1301_s7 + $0x74] sm:$0xf]  ;;  %v957_v36 = vld [vmem:[%s1301_s7 + $0x78] sm:$0xf0]  ;;  %v1124_v37 = vld [vmem:[%s1301_s7 + $0xc4] sm:$0xf0]  ;;  %v932_v42 = vor.u32 %v1108_v31, %v931_v30 }
  0x30   : > { %642 = vmatpush.bf16.msra.mxu1 %v1012_v21  ;;  %v1059_v38 = vld [vmem:[%s1301_s7 + $0x140] sm:$0xf]  ;;  %v1140_v39 = vld [vmem:[%s1301_s7 + $0x144] sm:$0xf0]  ;;  %v960_v40 = vor.u32 %v1113_v35, %v957_v36  ;;  %v1111_v41 = vld [vmem:[%s1301_s7 + $0x64] sm:$0xf]  ;;  %v996_v46 = vor.u32 %v1124_v37, %v995_v34 }
  0x31   : > { %656 = vmatpush.bf16.msra.mxu2 %v1076_v22  ;;  %v923_v43 = vld [vmem:[%s1301_s7 + $0x30] sm:$0xf]  ;;  %v1106_v44 = vld [vmem:[%s1301_s7 + $0x34] sm:$0xf0]  ;;  %v949_v45 = vld [vmem:[%s1301_s7 + $0x68] sm:$0xf0]  ;;  %v1060_v47 = vor.u32 %v1140_v39, %v1059_v38 }
  0x32   : > { %669 = vmatpush.bf16.msra.mxu3 %v960_v40  ;;  %v987_v48 = vld [vmem:[%s1301_s7 + $0xb0] sm:$0xf]  ;;  %v1122_v49 = vld [vmem:[%s1301_s7 + $0xb4] sm:$0xf0]  ;;  %v952_v51 = vor.u32 %v1111_v41, %v949_v45  ;;  %v1109_v53 = vld [vmem:[%s1301_s7 + $0x54] sm:$0xf]  ;;  %v924_v55 = vor.u32 %v1106_v44, %v923_v43 }
  0x33   : > { %629 = vmatpush.bf16.msra.mxu0 %v940_v29  ;;  %v1051_v50 = vld [vmem:[%s1301_s7 + $0x130] sm:$0xf]  ;;  %v1138_v52 = vld [vmem:[%s1301_s7 + $0x134] sm:$0xf0]  ;;  %v941_v54 = vld [vmem:[%s1301_s7 + $0x58] sm:$0xf0]  ;;  %v988_v59 = vor.u32 %v1122_v49, %v987_v48 }
  0x34   : > { %643 = vmatpush.bf16.msra.mxu1 %v1004_v32  ;;  %v915_v56 = vld [vmem:[%s1301_s7 + $0x20] sm:$0xf]  ;;  %v1104_v57 = vld [vmem:[%s1301_s7 + $0x24] sm:$0xf0]  ;;  %v944_v58 = vor.u32 %v1109_v53, %v941_v54  ;;  %v1052_v60 = vor.u32 %v1138_v52, %v1051_v50  ;;  %v1107_v62 = vld [vmem:[%s1301_s7 + $0x44] sm:$0xf] }
  0x35   : > { %657 = vmatpush.bf16.msra.mxu2 %v1068_v33  ;;  %v979_v61 = vld [vmem:[%s1301_s7 + $0xa0] sm:$0xf]  ;;  %v933_v63 = vld [vmem:[%s1301_s7 + $0x48] sm:$0xf0]  ;;  %v1120_v0 = vld [vmem:[%s1301_s7 + $0xa4] sm:$0xf0]  ;;  %v916_v3 = vor.u32 %v1104_v57, %v915_v56 }
  0x36   : > { %670 = vmatpush.bf16.msra.mxu3 %v952_v51  ;;  %v1043_v1 = vld [vmem:[%s1301_s7 + $0x120] sm:$0xf]  ;;  %v1136_v2 = vld [vmem:[%s1301_s7 + $0x124] sm:$0xf0]  ;;  %v907_v4 = vld [vmem:[%s1301_s7 + $0x10] sm:$0xf]  ;;  %v936_v6 = vor.u32 %v1107_v62, %v933_v63  ;;  %v980_v7 = vor.u32 %v1120_v0, %v979_v61 }
  0x37   : > { %630 = vmatpush.bf16.msra.mxu0 %v932_v42  ;;  %v1102_v5 = vld [vmem:[%s1301_s7 + $0x14] sm:$0xf0]  ;;  %v1044_v8 = vor.u32 %v1136_v2, %v1043_v1  ;;  %v971_v9 = vld [vmem:[%s1301_s7 + $0x90] sm:$0xf]  ;;  %v1105_v10 = vld [vmem:[%s1301_s7 + $0x34] sm:$0xf] }
  0x38   : > { %644 = vmatpush.bf16.msra.mxu1 %v996_v46  ;;  %v925_v11 = vld [vmem:[%s1301_s7 + $0x38] sm:$0xf0]  ;;  %v1118_v12 = vld [vmem:[%s1301_s7 + $0x94] sm:$0xf0]  ;;  %v1035_v13 = vld [vmem:[%s1301_s7 + $0x110] sm:$0xf]  ;;  %v908_v15 = vor.u32 %v1102_v5, %v907_v4 }
  0x39   : > { %658 = vmatpush.bf16.msra.mxu2 %v1060_v47  ;;  %v1134_v14 = vld [vmem:[%s1301_s7 + $0x114] sm:$0xf0]  ;;  %v899_v16 = vld [vmem:[%s1301_s7] sm:$0xf]  ;;  %v1100_v17 = vld [vmem:[%s1301_s7 + $0x4] sm:$0xf0]  ;;  %v928_v19 = vor.u32 %v1105_v10, %v925_v11  ;;  %v972_v20 = vor.u32 %v1118_v12, %v971_v9 }
  0x3a   : > { %671 = vmatpush.bf16.msra.mxu3 %v944_v58  ;;  %v963_v18 = vld [vmem:[%s1301_s7 + $0x80] sm:$0xf]  ;;  %v1036_v21 = vor.u32 %v1134_v14, %v1035_v13  ;;  %v1116_v22 = vld [vmem:[%s1301_s7 + $0x84] sm:$0xf0]  ;;  %v1103_v23 = vld [vmem:[%s1301_s7 + $0x24] sm:$0xf]  ;;  %v900_v31 = vor.u32 %v1100_v17, %v899_v16 }
  0x3b   : > { %631 = vmatpush.bf16.msra.mxu0 %v924_v55  ;;  %v917_v24 = vld [vmem:[%s1301_s7 + $0x28] sm:$0xf0]  ;;  %v1027_v25 = vld [vmem:[%s1301_s7 + $0x100] sm:$0xf]  ;;  %v1132_v26 = vld [vmem:[%s1301_s7 + $0x104] sm:$0xf0]  ;;  %v964_v36 = vor.u32 %v1116_v22, %v963_v18 }
  0x3c   : > { %645 = vmatpush.bf16.msra.mxu1 %v988_v59  ;;  %v1129_v27 = vld [vmem:[%s1301_s7 + $0xf4] sm:$0xf]  ;;  %v1021_v28 = vld [vmem:[%s1301_s7 + $0xf8] sm:$0xf0]  ;;  %v895_v32 = vld [vmem:[%s1303_s8 + $0x8] sm:$0xf]  ;;  %v920_v33 = vor.u32 %v1103_v23, %v917_v24  ;;  %v1028_v37 = vor.u32 %v1132_v26, %v1027_v25 }
  0x3d   : > { %659 = vmatpush.bf16.msra.mxu2 %v1052_v60  ;;  %v1145_v29 = vld [vmem:[%s1301_s7 + $0x174] sm:$0xf]  ;;  %v1085_v30 = vld [vmem:[%s1301_s7 + $0x178] sm:$0xf0]  ;;  %v887_v34 = vld [vmem:[%s1303_s8] sm:$0xf]  ;;  %v1024_v41 = vor.u32 %v1129_v27, %v1021_v28 }
  0x3e   : > { %672 = vmatpush.bf16.msra.mxu3 %v936_v6  ;;  %v1097_v35 = vld [vmem:[%s1303_s8 + $0x8] sm:$0xf0]  ;;  %v1098_v38 = vld [vmem:[%s1303_s8 + $0x10] sm:$0xf0]  ;;  %v1096_v39 = vld [vmem:[%s1303_s8 + $0x4] sm:$0xf]  ;;  %v1088_v42 = vor.u32 %v1145_v29, %v1085_v30 }
  0x3f   : > { %632 = vmatpush.bf16.msra.mxu0 %v916_v3  ;;  %v889_v40 = vld [vmem:[%s1303_s8 + $0xc] sm:$0xf0]  ;;  %v1127_v43 = vld [vmem:[%s1301_s7 + $0xe4] sm:$0xf]  ;;  %v1101_v44 = vld [vmem:[%s1301_s7 + $0x14] sm:$0xf]  ;;  %v888_v49 = vor.u32 %v1097_v35, %v887_v34  ;;  %v1382_v50 = vor.u32 %v1098_v38, %v895_v32 }
  0x40   : > { %646 = vmatpush.bf16.msra.mxu1 %v980_v7  ;;  %v909_v45 = vld [vmem:[%s1301_s7 + $0x18] sm:$0xf0]  ;;  %v1013_v46 = vld [vmem:[%s1301_s7 + $0xe8] sm:$0xf0]  ;;  %v1143_v47 = vld [vmem:[%s1301_s7 + $0x164] sm:$0xf]  ;;  %v1384_v51 = vor.u32 %v1096_v39, %v889_v40 }
  0x41   : > { %660 = vmatpush.bf16.msra.mxu2 %v1044_v8  ;;  %v1077_v48 = vld [vmem:[%s1301_s7 + $0x168] sm:$0xf0]  ;;  %v912_v52 = vor.u32 %v1101_v44, %v909_v45  ;;  %v1016_v53 = vor.u32 %v1127_v43, %v1013_v46  ;;  %v1125_v55 = vld [vmem:[%s1301_s7 + $0xd4] sm:$0xf]  ;;  %v1099_v56 = vld [vmem:[%s1301_s7 + $0x4] sm:$0xf] }
  0x42   : > { %673 = vmatpush.bf16.msra.mxu3 %v928_v19  ;;  %v1080_v54 = vor.u32 %v1143_v47, %v1077_v48  ;;  %v901_v57 = vld [vmem:[%s1301_s7 + $0x8] sm:$0xf0]  ;;  %v1005_v58 = vld [vmem:[%s1301_s7 + $0xd8] sm:$0xf0]  ;;  %v1141_v59 = vld [vmem:[%s1301_s7 + $0x154] sm:$0xf] }
  0x43   : > { %633 = vmatpush.bf16.msra.mxu0 %v908_v15  ;;  %v1069_v60 = vld [vmem:[%s1301_s7 + $0x158] sm:$0xf0]  ;;  %v904_v61 = vor.u32 %v1099_v56, %v901_v57  ;;  %v1008_v62 = vor.u32 %v1125_v55, %v1005_v58  ;;  %v1123_v0 = vld [vmem:[%s1301_s7 + $0xc4] sm:$0xf]  ;;  %v997_v1 = vld [vmem:[%s1301_s7 + $0xc8] sm:$0xf0] }
  0x44   : > { %647 = vmatpush.bf16.msra.mxu1 %v972_v20  ;;  %v1072_v63 = vor.u32 %v1141_v59, %v1069_v60  ;;  %v1139_v2 = vld [vmem:[%s1301_s7 + $0x144] sm:$0xf]  ;;  %v1061_v3 = vld [vmem:[%s1301_s7 + $0x148] sm:$0xf0]  ;;  %v1000_v4 = vor.u32 %v1123_v0, %v997_v1  ;;  %v1121_v6 = vld [vmem:[%s1301_s7 + $0xb4] sm:$0xf] }
  0x45   : > { %661 = vmatpush.bf16.msra.mxu2 %v1036_v21  ;;  %v1064_v5 = vor.u32 %v1139_v2, %v1061_v3  ;;  %v989_v7 = vld [vmem:[%s1301_s7 + $0xb8] sm:$0xf0]  ;;  %v1137_v8 = vld [vmem:[%s1301_s7 + $0x134] sm:$0xf]  ;;  %v1119_v12 = vld [vmem:[%s1301_s7 + $0xa4] sm:$0xf] }
  0x46   : > { %674 = vmatpush.bf16.msra.mxu3 %v920_v33  ;;  %v1053_v9 = vld [vmem:[%s1301_s7 + $0x138] sm:$0xf0]  ;;  %v992_v10 = vor.u32 %v1121_v6, %v989_v7  ;;  %v981_v13 = vld [vmem:[%s1301_s7 + $0xa8] sm:$0xf0]  ;;  %v1135_v14 = vld [vmem:[%s1301_s7 + $0x124] sm:$0xf] }
  0x47   : > { %634 = vmatpush.bf16.msra.mxu0 %v900_v31  ;;  %v1056_v11 = vor.u32 %v1137_v8, %v1053_v9  ;;  %v1045_v15 = vld [vmem:[%s1301_s7 + $0x128] sm:$0xf0]  ;;  %v984_v16 = vor.u32 %v1119_v12, %v981_v13  ;;  %v1117_v18 = vld [vmem:[%s1301_s7 + $0x94] sm:$0xf]  ;;  %v973_v19 = vld [vmem:[%s1301_s7 + $0x98] sm:$0xf0] }
  0x48   : > { %648 = vmatpush.bf16.msra.mxu1 %v964_v36  ;;  %v1048_v17 = vor.u32 %v1135_v14, %v1045_v15  ;;  %v1133_v20 = vld [vmem:[%s1301_s7 + $0x114] sm:$0xf]  ;;  %v1037_v21 = vld [vmem:[%s1301_s7 + $0x118] sm:$0xf0]  ;;  %v976_v22 = vor.u32 %v1117_v18, %v973_v19  ;;  %v1115_v24 = vld [vmem:[%s1301_s7 + $0x84] sm:$0xf] }
  0x49   : > { %662 = vmatpush.bf16.msra.mxu2 %v1028_v37  ;;  %v1040_v23 = vor.u32 %v1133_v20, %v1037_v21  ;;  %v965_v25 = vld [vmem:[%s1301_s7 + $0x88] sm:$0xf0]  ;;  %v1131_v26 = vld [vmem:[%s1301_s7 + $0x104] sm:$0xf]  ;;  %v315_v33 = vld [vmem:[#allocation2 + $0x10] sm:$0xff]  ;;  %p1089_p11 = scmp.ne.s32.totalorder %s1220_s14, 2 }
  0x4a   : > { %635 = vmatmul.bf16.vlgmr.msra.gmra.mxu0 %v888_v49  ;;  %675 = vmatpush.bf16.msra.mxu3 %v912_v52  ;;  %v1029_v27 = vld [vmem:[%s1301_s7 + $0x108] sm:$0xf0]  ;;  %v968_v28 = vor.u32 %v1115_v24, %v965_v25  ;;  %v317_v40 = vld [vmem:[#allocation2 + $0x18] sm:$0xff]  ;;  %v316_v48 = vld [vmem:[#allocation2] sm:$0xff] }
  0x4b   : > { %683 = vmatpush.bf16.msrb.mxu0 %v1024_v41  ;;  %649 = vmatmul.bf16.vlgmr.msra.gmra.mxu1 %v1384_v51  ;;  %v1032_v29 = vor.u32 %v1131_v26, %v1029_v27 }
  0x4c   : > { %697 = vmatpush.bf16.msrb.mxu1 %v1088_v42  ;;  %663 = vmatmul.bf16.vlgmr.msra.gmra.mxu2 %v1382_v50 }
  0x4e   : > { %676 = vmatpush.bf16.msra.mxu3 %v904_v61 }
  0x4f   : > { %684 = vmatpush.bf16.msrb.mxu0 %v1016_v53 }
  0x50   : > { %698 = vmatpush.bf16.msrb.mxu1 %v1080_v54  ;;  %v318_v54 = vld [vmem:[#allocation2 + $0x8] sm:$0xff] }
  0x51   : > { %677 = vmatmul.bf16.vlgmr.msra.gmra.mxu3 %v888_v49 }
  0x53   : > { %685 = vmatpush.bf16.msrb.mxu0 %v1008_v62 }
  0x54   : > { %699 = vmatpush.bf16.msrb.mxu1 %v1072_v63 }
  0x57   : > { %686 = vmatpush.bf16.msrb.mxu0 %v1000_v4 }
  0x58   : > { %700 = vmatpush.bf16.msrb.mxu1 %v1064_v5 }
  0x5b   : > { %687 = vmatpush.bf16.msrb.mxu0 %v992_v10 }
  0x5c   : > { %701 = vmatpush.bf16.msrb.mxu1 %v1056_v11 }
  0x5f   : > { %688 = vmatpush.bf16.msrb.mxu0 %v984_v16 }
  0x60   : > { %702 = vmatpush.bf16.msrb.mxu1 %v1048_v17 }
  0x63   : > { %689 = vmatpush.bf16.msrb.mxu0 %v976_v22 }
  0x64   : > { %703 = vmatpush.bf16.msrb.mxu1 %v1040_v23 }
  0x67   : > { %690 = vmatpush.bf16.msrb.mxu0 %v968_v28 }
  0x68   : > { %704 = vmatpush.bf16.msrb.mxu1 %v1032_v29 }
  0x6a   : > { %691 = vmatmul.bf16.vlgmr.msrb.gmra.mxu0 %v1384_v51 }
  0x6b   : > { %705 = vmatmul.bf16.vlgmr.msrb.gmra.mxu1 %v1382_v50 }
  0xc7   : > { %v636_v30 = vpop.f32.mrf.mxu0 }
  0xc8   : > { %v650_v31 = vpop.f32.mrf.mxu1 }
  0xc9   : > { %v651_v32 = vadd.f32 %v650_v31, %v636_v30 }
  0xcf   : > { %v664_v34 = vpop.f32.mrf.mxu2  ;;  %v638_v36 = vpop.f32.mrf.mxu0 }
  0xd0   : > { %v665_v35 = vadd.f32 %v664_v34, %v651_v32  ;;  %v652_v37 = vpop.f32.mrf.mxu1 }
  0xd1   : > { %v653_v39 = vadd.f32 %v652_v37, %v638_v36 }
  0xd2   : > { %v711_v38 = vadd.f32 %v665_v35, %v315_v33 }
  0xd4   : > { %715 = vst [vmem:[#allocation2 + $0x10] sm:$0xff] %v711_v38  ;;  %v678_v44 = vpop.f32.mrf.mxu3 }
  0xd7   : > { %v666_v41 = vpop.f32.mrf.mxu2 }
  0xd8   : > { %v667_v42 = vadd.f32 %v666_v41, %v653_v39 }
  0xda   : > { %v713_v43 = vadd.f32 %v667_v42, %v317_v40 }
  0xdc   : > { %717 = vst [vmem:[#allocation2 + $0x18] sm:$0xff] %v713_v43  ;;  %v680_v51 = vpop.f32.mrf.mxu3 }
  0xe7   : > { %v692_v45 = vpop.f32.mrf.mxu0 }
  0xe8   : > { %v706_v46 = vpop.f32.mrf.mxu1  ;;  %v693_v47 = vadd.f32 %v692_v45, %v678_v44 }
  0xea   : > { %v707_v49 = vadd.f32 %v706_v46, %v693_v47 }
  0xec   : > { %v712_v50 = vadd.f32 %v707_v49, %v316_v48 }
  0xee   : > { %716 = vst [vmem:[#allocation2] sm:$0xff] %v712_v50 }
  0xef   : > { %v694_v52 = vpop.f32.mrf.mxu0 }
  0xf0   : > { %v695_v53 = vadd.f32 %v694_v52, %v680_v51  ;;  %v708_v55 = vpop.f32.mrf.mxu1 }
  0xf2   : > { %v709_v56 = vadd.f32 %v708_v55, %v695_v53  ;;  %722 = sbr.rel (%p1089_p11) target bundleno = 261 (0x105), region = 66 }
  0xf4   : > { %v714_v57 = vadd.f32 %v709_v56, %v318_v54 }
  0xf6   : > { %718 = vst [vmem:[#allocation2 + $0x8] sm:$0xff] %v714_v57 }
  0xf7   : > { %v723_v58 = vld [vmem:[#allocation2 + $0x10] sm:$0xff]  ;;  %v724_v59 = vld [vmem:[#allocation2] sm:$0xff]  ;;  %v725_v63 = vld [vmem:[#allocation2 + $0x18] sm:$0xff] }
  0xf8   : > { %v727_v60 = vld [vmem:[%s1443_s2] sm:$0x3] }
  0xf9   : > { %v729_v61 = vperm.slane %v727_v60, 0  ;;  %v730_v62 = vperm.slane %v727_v60, 1 }
  0xfb   : > { %v733_v1 = vadd.f32 %v729_v61, %v723_v58  ;;  %v734_v2 = vadd.f32 %v730_v62, %v724_v59  ;;  %v735_v3 = vadd.f32 %v729_v61, %v725_v63 }
  0xfd   : > { %v726_v0 = vld [vmem:[#allocation2 + $0x8] sm:$0xff]  ;;  %v737_v5 = vmax.f32 %v733_v1, 0.0  ;;  %v738_v6 = vmax.f32 %v734_v2, 0.0  ;;  %v739_v7 = vmax.f32 %v735_v3, 0.0 }
  0xfe   : > { %v736_v4 = vadd.f32 %v730_v62, %v726_v0 }
  0xff   : > { %v741_v9 = vpack.c.bf16 %v738_v6, %v737_v5 }
 0x100   : > { %v740_v8 = vmax.f32 %v736_v4, 0.0 }
 0x101   : > { %743 = vst [vmem:[%s1444_s3] sm:$0xff] %v741_v9 }
 0x102   : > { %v742_v10 = vpack.c.bf16 %v740_v8, %v739_v7 }
 0x104   : > { %744 = vst [vmem:[%s1444_s3 + $0x8] sm:$0xff] %v742_v10 }
 0x105 PF: > { %s13_s16 = sadd.s32 1, %s1228_s16   ;;  %s1445_s12 = smov %s1216_s13 }
 0x106   : > { %p10_p12 = scmp.ge.s32.totalorder %s13_s16, 5   ;;  %s1446_s13 = smov %s1286_s20 }
 0x107   : > { %s1447_s14 = smov %s1224_s15  ;;  %s1448_s15 = smov %s1450_s17 }
 0x108   :  { %12 = sbr.rel (!%p10_p12) target bundleno = 3 (0x3), region = 113 }

// kernel: _lambda_.32
= control target key start
LH: loop header
LB: loop body
LE: loop exit
PB: predicated region body
PF: predicated region fallthrough
CT: control target
= control target key end

     0   :  { %s404_s1 = inlined_call_operand.vmem [shape: bf16[128,256], index: 1, kind: input, shape index: {}]   ;;  %s405_s0 = inlined_call_operand.vmem [shape: bf16[16,128], index: 0, kind: input, shape index: {}]   ;;  %s406_s2 = inlined_call_operand.vmem [shape: f32[1,256], index: 2, kind: input, shape index: {}]   ;;  %s407_s3 = inlined_call_operand.vmem [shape: bf16[16,256], index: 3, kind: output, shape index: {}]  }
   0x1   :  { %v253_v0 = vld [vmem:[%s404_s1 + $0x70] sm:$0xf]  ;;  %v275_v1 = vld [vmem:[%s404_s1 + $0x74] sm:$0xf0]  ;;  %v274_v2 = vld [vmem:[%s404_s1 + $0x74] sm:$0xf] }
   0x2   :  { %v254_v3 = vor.u32 %v275_v1, %v253_v0  ;;  %v255_v4 = vld [vmem:[%s404_s1 + $0x78] sm:$0xf0]  ;;  %v245_v5 = vld [vmem:[%s404_s1 + $0x60] sm:$0xf]  ;;  %v273_v6 = vld [vmem:[%s404_s1 + $0x64] sm:$0xf0] }
   0x3   :  { %v258_v7 = vor.u32 %v274_v2, %v255_v4  ;;  %v272_v8 = vld [vmem:[%s404_s1 + $0x64] sm:$0xf]  ;;  %v247_v9 = vld [vmem:[%s404_s1 + $0x68] sm:$0xf0]  ;;  %v246_v10 = vor.u32 %v273_v6, %v245_v5  ;;  %v237_v12 = vld [vmem:[%s404_s1 + $0x50] sm:$0xf] }
   0x4   :  { %130 = vmatpush.bf16.msra.mxu0 %v254_v3  ;;  %v250_v11 = vor.u32 %v272_v8, %v247_v9  ;;  %v271_v13 = vld [vmem:[%s404_s1 + $0x54] sm:$0xf0]  ;;  %v270_v14 = vld [vmem:[%s404_s1 + $0x54] sm:$0xf]  ;;  %v239_v15 = vld [vmem:[%s404_s1 + $0x58] sm:$0xf0] }
   0x5   :  { %144 = vmatpush.bf16.msra.mxu1 %v258_v7  ;;  %v238_v16 = vor.u32 %v271_v13, %v237_v12  ;;  %v242_v17 = vor.u32 %v270_v14, %v239_v15  ;;  %v229_v18 = vld [vmem:[%s404_s1 + $0x40] sm:$0xf]  ;;  %v269_v19 = vld [vmem:[%s404_s1 + $0x44] sm:$0xf0]  ;;  %v268_v20 = vld [vmem:[%s404_s1 + $0x44] sm:$0xf] }
   0x6   :  { %v231_v21 = vld [vmem:[%s404_s1 + $0x48] sm:$0xf0]  ;;  %v230_v22 = vor.u32 %v269_v19, %v229_v18  ;;  %v221_v24 = vld [vmem:[%s404_s1 + $0x30] sm:$0xf]  ;;  %v267_v25 = vld [vmem:[%s404_s1 + $0x34] sm:$0xf0] }
   0x7   :  { %v234_v23 = vor.u32 %v268_v20, %v231_v21  ;;  %v266_v26 = vld [vmem:[%s404_s1 + $0x34] sm:$0xf]  ;;  %v223_v27 = vld [vmem:[%s404_s1 + $0x38] sm:$0xf0]  ;;  %v222_v28 = vor.u32 %v267_v25, %v221_v24  ;;  %v213_v30 = vld [vmem:[%s404_s1 + $0x20] sm:$0xf] }
   0x8   :  { %131 = vmatpush.bf16.msra.mxu0 %v246_v10  ;;  %v226_v29 = vor.u32 %v266_v26, %v223_v27  ;;  %v265_v31 = vld [vmem:[%s404_s1 + $0x24] sm:$0xf0]  ;;  %v264_v32 = vld [vmem:[%s404_s1 + $0x24] sm:$0xf]  ;;  %v215_v33 = vld [vmem:[%s404_s1 + $0x28] sm:$0xf0] }
   0x9   :  { %145 = vmatpush.bf16.msra.mxu1 %v250_v11  ;;  %v214_v34 = vor.u32 %v265_v31, %v213_v30  ;;  %v218_v35 = vor.u32 %v264_v32, %v215_v33  ;;  %v205_v36 = vld [vmem:[%s404_s1 + $0x10] sm:$0xf]  ;;  %v263_v37 = vld [vmem:[%s404_s1 + $0x14] sm:$0xf0]  ;;  %v262_v38 = vld [vmem:[%s404_s1 + $0x14] sm:$0xf] }
   0xa   :  { %v207_v39 = vld [vmem:[%s404_s1 + $0x18] sm:$0xf0]  ;;  %v206_v40 = vor.u32 %v263_v37, %v205_v36  ;;  %v197_v42 = vld [vmem:[%s404_s1] sm:$0xf]  ;;  %v261_v43 = vld [vmem:[%s404_s1 + $0x4] sm:$0xf0] }
   0xb   :  { %v210_v41 = vor.u32 %v262_v38, %v207_v39  ;;  %v260_v44 = vld [vmem:[%s404_s1 + $0x4] sm:$0xf]  ;;  %v199_v45 = vld [vmem:[%s404_s1 + $0x8] sm:$0xf0]  ;;  %v198_v46 = vor.u32 %v261_v43, %v197_v42  ;;  %v173_v49 = vld [vmem:[%s406_s2] sm:$0x3] }
   0xc   :  { %132 = vmatpush.bf16.msra.mxu0 %v238_v16  ;;  %v202_v47 = vor.u32 %v260_v44, %v199_v45  ;;  %v259_v48 = vld [vmem:[%s405_s0] sm:$0xff]  ;;  %v175_v50 = vperm.slane %v173_v49, 0  ;;  %v176_v51 = vperm.slane %v173_v49, 1 }
   0xd   :  { %146 = vmatpush.bf16.msra.mxu1 %v242_v17 }
  0x10   :  { %133 = vmatpush.bf16.msra.mxu0 %v230_v22 }
  0x11   :  { %147 = vmatpush.bf16.msra.mxu1 %v234_v23 }
  0x14   :  { %134 = vmatpush.bf16.msra.mxu0 %v222_v28 }
  0x15   :  { %148 = vmatpush.bf16.msra.mxu1 %v226_v29 }
  0x18   :  { %135 = vmatpush.bf16.msra.mxu0 %v214_v34 }
  0x19   :  { %149 = vmatpush.bf16.msra.mxu1 %v218_v35 }
  0x1c   :  { %136 = vmatpush.bf16.msra.mxu0 %v206_v40 }
  0x1d   :  { %150 = vmatpush.bf16.msra.mxu1 %v210_v41 }
  0x20   :  { %137 = vmatpush.bf16.msra.mxu0 %v198_v46 }
  0x21   :  { %151 = vmatpush.bf16.msra.mxu1 %v202_v47 }
  0x23   :  { %138 = vmatmul.bf16.vlgmr.msra.gmra.mxu0 %v259_v48 }
  0x24   :  { %152 = vmatmul.bf16.vlgmr.msra.gmra.mxu1 %v259_v48 }
  0xa0   :  { %v139_v52 = vpop.f32.mrf.mxu0 }
  0xa1   :  { %v179_v53 = vadd.f32 %v175_v50, %v139_v52  ;;  %v153_v54 = vpop.f32.mrf.mxu1 }
  0xa2   :  { %v180_v55 = vadd.f32 %v176_v51, %v153_v54 }
  0xa4   :  { %v183_v56 = vpack.c.bf16 %v180_v55, %v179_v53 }
  0xa6   :  { %185 = vst [vmem:[%s407_s3] sm:$0xff] %v183_v56 }
  0xa8   :  { %v141_v57 = vpop.f32.mrf.mxu0 }
  0xa9   :  { %v181_v58 = vadd.f32 %v175_v50, %v141_v57  ;;  %v155_v59 = vpop.f32.mrf.mxu1 }
  0xaa   :  { %v182_v60 = vadd.f32 %v176_v51, %v155_v59 }
  0xac   :  { %v184_v61 = vpack.c.bf16 %v182_v60, %v181_v58 }
  0xae   :  { %186 = vst [vmem:[%s407_s3 + $0x8] sm:$0xff] %v184_v61 }

// kernel: _lambda_.34
= control target key start
LH: loop header
LB: loop body
LE: loop exit
PB: predicated region body
PF: predicated region fallthrough
CT: control target
= control target key end

     0   :  { %s1251_s12 = smov 0   ;;  %s1253_s13 = smov 0   ;;  %s1441_s0 = inlined_call_operand.vmem [shape: bf16[16,2304], index: 0, kind: input, shape index: {}]   ;;  %s1442_s1 = inlined_call_operand.vmem [shape: bf16[2304,256], index: 1, kind: input, shape index: {}]   ;;  %s1443_s2 = inlined_call_operand.vmem [shape: f32[1,256], index: 2, kind: input, shape index: {}]   ;;  %s1444_s3 = inlined_call_operand.vmem [shape: bf16[16,256], index: 3, kind: output, shape index: {}]  }
   0x1   :  { %s1255_s14 = smov 0   ;;  %s1257_s15 = smov 0  }
   0x2   :  { %s1259_s16 = smov 0  }
   0x3 LB: > { %s25_s17 = sadd.s32 1, %s1224_s15  ;;  %p48_p1 = scmp.ne.s32.totalorder %s1216_s13, %s1212_s12  ;;  %s1228_s16 = sphi %s1259_s16, %s13_s16   ;;  %s1224_s15 = sphi %s1257_s15, %s1448_s15   ;;  %s1220_s14 = sphi %s1255_s14, %s1447_s14   ;;  %s1216_s13 = sphi %s1253_s13, %s1446_s13   ;;  %s1212_s12 = sphi %s1251_s12, %s1445_s12  }
   0x4   : > { %p26_p0 = scmp.ge.s32.totalorder %s25_s17, 6  ;;  %p49_p2 = scmp.eq.s32.totalorder %s1228_s16, 0 }
   0x5   : > { %s41_s19 = sadd.s32 1, %s1216_s13  ;;  %p875_p5 = scmp.ge.s32.totalorder %s1228_s16, 6 }
   0x6   : > { %s1450_s17 = smov (%p26_p0, %s25_s17), 0  ;;  %p50_p3 = por %p49_p2, %p48_p1 }
   0x7   : > { %s37_s18 = ssub.s32 %s1224_s15, %s1450_s17  ;;  %164 = sbr.rel (%p875_p5) target bundleno = 21 (0x15), region = 20 }
   0x8   : > { %p39_p4 = scmp.eq.s32.totalorder %s37_s18, 0 }
   0xa   : > { %s1286_s20 = scalar_select %p39_p4, %s1216_s13, %s41_s19  }
   0xc   : > { %167 = sbr.rel (!%p50_p3) target bundleno = 21 (0x15), region = 24  ;;  %s169_s21 = sand.u32 (%p50_p3), 1, %s1216_s13  }
   0xd   : > { %s1094_s22 = smul.u32 (%p50_p3), 12, %s1224_s15 }
   0xe   : > { %s1147_s23 = smul.u32 (%p50_p3), 24, %s169_s21 }
   0xf   : > { %s177_s26 = scalar_lea.vmem (%p50_p3), %s1441_s0, %s1094_s22 }
  0x10   : > { %v192_v0 = vld [vmem:[%s177_s26] sm:$0xff] (%p50_p3)  ;;  %v194_v1 = vld [vmem:[%s177_s26 + $0x48] sm:$0xff] (%p50_p3)  ;;  %s171_s27 = scalar_lea.vmem (%p50_p3), [#allocation3], %s1147_s23  ;;  %v879_v3 = vld [vmem:[%s177_s26 + $0x50] sm:$0xf] (%p50_p3) }
  0x11   : > { %v877_v2 = vld [vmem:[%s177_s26 + $0x8] sm:$0xf]  ;;  %193 = vst [vmem:[%s171_s27] sm:$0xff] %v192_v0 }
  0x12   : > { %195 = vst [vmem:[%s171_s27 + $0xc] sm:$0xff] %v194_v1 }
  0x13   : > { %878 = vst [vmem:[%s171_s27 + $0x8] sm:$0xf] %v877_v2 }
  0x14   : > { %880 = vst [vmem:[%s171_s27 + $0x14] sm:$0xf] %v879_v3 }
  0x15 PF: > { %p881_p6 = scmp.ge.s32.totalorder %s1228_s16, 1  ;;  %p227_p7 = scmp.lt.s32.totalorder %s1228_s16, 7 }
  0x17   : > { %p228_p8 = pnand %p881_p6, %p227_p7 }
  0x18   : > { %s234_s28 = sand.u32 (!%p228_p8), 1, %s1212_s12   ;;  %s278_s29 = smul.u32 (!%p228_p8), 48, %s1220_s14 }
  0x19   : > { %231 = sbr.rel (%p228_p8) target bundleno = 261 (0x105), region = 54  ;;  %p884_p10 = scmp.ne.s32.totalorder (!%p228_p8), %s1220_s14, 0 }
  0x1a   : > { %s1148_s30 = smul.u32 (!%p228_p8), 24, %s234_s28  ;;  %p280_p9 = scmp.lt.s32.totalorder (!%p228_p8), %s278_s29, 287 }
  0x1c   : > { %s1303_s8 = scalar_lea.vmem (!%p228_p8), [#allocation3], %s1148_s30 }
  0x1e   : > { %s1452_s29 = smov (!%p280_p9, %s278_s29), 287  ;;  %310 = sbr.rel (%p884_p10) target bundleno = 40 (0x28), region = 62 }
  0x1f   : > { %s1095_s4 = sshll.u32 %s1452_s29, 3 }
  0x20   : > { %s1301_s7 = scalar_lea.vmem %s1442_s1, %s1095_s4 }
  0x23   : > { %v1230_v4 = vmov 0.0  }
  0x24   : > { %311 = vst [vmem:[#allocation2 + $0x10] sm:$0xff] %v1230_v4 }
  0x25   : > { %312 = vst [vmem:[#allocation2] sm:$0xff] %v1230_v4 }
  0x26   : > { %313 = vst [vmem:[#allocation2 + $0x18] sm:$0xff] %v1230_v4 }
  0x27   : > { %314 = vst [vmem:[#allocation2 + $0x8] sm:$0xff] %v1230_v4 }
  0x28 PF: > { %v955_v5 = vld [vmem:[%s1301_s7 + $0x70] sm:$0xf]  ;;  %v1114_v6 = vld [vmem:[%s1301_s7 + $0x74] sm:$0xf0]  ;;  %v947_v14 = vld [vmem:[%s1301_s7 + $0x60] sm:$0xf] }
  0x29   : > { %v1019_v7 = vld [vmem:[%s1301_s7 + $0xf0] sm:$0xf]  ;;  %v956_v8 = vor.u32 %v1114_v6, %v955_v5  ;;  %v1130_v9 = vld [vmem:[%s1301_s7 + $0xf4] sm:$0xf0]  ;;  %v1112_v15 = vld [vmem:[%s1301_s7 + $0x64] sm:$0xf0] }
  0x2a   : > { %v1083_v10 = vld [vmem:[%s1301_s7 + $0x170] sm:$0xf]  ;;  %v1146_v11 = vld [vmem:[%s1301_s7 + $0x174] sm:$0xf0]  ;;  %v1020_v12 = vor.u32 %v1130_v9, %v1019_v7  ;;  %v1011_v16 = vld [vmem:[%s1301_s7 + $0xe0] sm:$0xf]  ;;  %v948_v17 = vor.u32 %v1112_v15, %v947_v14 }
  0x2b   : > { %v1084_v13 = vor.u32 %v1146_v11, %v1083_v10  ;;  %627 = vmatpush.bf16.msra.mxu0 %v956_v8  ;;  %v1128_v18 = vld [vmem:[%s1301_s7 + $0xe4] sm:$0xf0]  ;;  %v1075_v19 = vld [vmem:[%s1301_s7 + $0x160] sm:$0xf]  ;;  %v939_v23 = vld [vmem:[%s1301_s7 + $0x50] sm:$0xf] }
  0x2c   : > { %v1144_v20 = vld [vmem:[%s1301_s7 + $0x164] sm:$0xf0]  ;;  %641 = vmatpush.bf16.msra.mxu1 %v1020_v12  ;;  %v1012_v21 = vor.u32 %v1128_v18, %v1011_v16  ;;  %v1110_v24 = vld [vmem:[%s1301_s7 + $0x54] sm:$0xf0]  ;;  %v1003_v25 = vld [vmem:[%s1301_s7 + $0xd0] sm:$0xf] }
  0x2d   : > { %655 = vmatpush.bf16.msra.mxu2 %v1084_v13  ;;  %v1076_v22 = vor.u32 %v1144_v20, %v1075_v19  ;;  %v1126_v26 = vld [vmem:[%s1301_s7 + $0xd4] sm:$0xf0]  ;;  %v1067_v27 = vld [vmem:[%s1301_s7 + $0x150] sm:$0xf]  ;;  %v940_v29 = vor.u32 %v1110_v24, %v939_v23  ;;  %v931_v30 = vld [vmem:[%s1301_s7 + $0x40] sm:$0xf] }
  0x2e   : > { %v1142_v28 = vld [vmem:[%s1301_s7 + $0x154] sm:$0xf0]  ;;  %v1108_v31 = vld [vmem:[%s1301_s7 + $0x44] sm:$0xf0]  ;;  %v1004_v32 = vor.u32 %v1126_v26, %v1003_v25  ;;  %v995_v34 = vld [vmem:[%s1301_s7 + $0xc0] sm:$0xf] }
  0x2f   : > { %628 = vmatpush.bf16.msra.mxu0 %v948_v17  ;;  %v1068_v33 = vor.u32 %v1142_v28, %v1067_v27  ;;  %v1113_v35 = vld [vmem:[%s1301_s7 + $0x74] sm:$0xf]  ;;  %v957_v36 = vld [vmem:[%s1301_s7 + $0x78] sm:$0xf0]  ;;  %v1124_v37 = vld [vmem:[%s1301_s7 + $0xc4] sm:$0xf0]  ;;  %v932_v42 = vor.u32 %v1108_v31, %v931_v30 }
  0x30   : > { %642 = vmatpush.bf16.msra.mxu1 %v1012_v21  ;;  %v1059_v38 = vld [vmem:[%s1301_s7 + $0x140] sm:$0xf]  ;;  %v1140_v39 = vld [vmem:[%s1301_s7 + $0x144] sm:$0xf0]  ;;  %v960_v40 = vor.u32 %v1113_v35, %v957_v36  ;;  %v1111_v41 = vld [vmem:[%s1301_s7 + $0x64] sm:$0xf]  ;;  %v996_v46 = vor.u32 %v1124_v37, %v995_v34 }
  0x31   : > { %656 = vmatpush.bf16.msra.mxu2 %v1076_v22  ;;  %v923_v43 = vld [vmem:[%s1301_s7 + $0x30] sm:$0xf]  ;;  %v1106_v44 = vld [vmem:[%s1301_s7 + $0x34] sm:$0xf0]  ;;  %v949_v45 = vld [vmem:[%s1301_s7 + $0x68] sm:$0xf0]  ;;  %v1060_v47 = vor.u32 %v1140_v39, %v1059_v38 }
  0x32   : > { %669 = vmatpush.bf16.msra.mxu3 %v960_v40  ;;  %v987_v48 = vld [vmem:[%s1301_s7 + $0xb0] sm:$0xf]  ;;  %v1122_v49 = vld [vmem:[%s1301_s7 + $0xb4] sm:$0xf0]  ;;  %v952_v51 = vor.u32 %v1111_v41, %v949_v45  ;;  %v1109_v53 = vld [vmem:[%s1301_s7 + $0x54] sm:$0xf]  ;;  %v924_v55 = vor.u32 %v1106_v44, %v923_v43 }
  0x33   : > { %629 = vmatpush.bf16.msra.mxu0 %v940_v29  ;;  %v1051_v50 = vld [vmem:[%s1301_s7 + $0x130] sm:$0xf]  ;;  %v1138_v52 = vld [vmem:[%s1301_s7 + $0x134] sm:$0xf0]  ;;  %v941_v54 = vld [vmem:[%s1301_s7 + $0x58] sm:$0xf0]  ;;  %v988_v59 = vor.u32 %v1122_v49, %v987_v48 }
  0x34   : > { %643 = vmatpush.bf16.msra.mxu1 %v1004_v32  ;;  %v915_v56 = vld [vmem:[%s1301_s7 + $0x20] sm:$0xf]  ;;  %v1104_v57 = vld [vmem:[%s1301_s7 + $0x24] sm:$0xf0]  ;;  %v944_v58 = vor.u32 %v1109_v53, %v941_v54  ;;  %v1052_v60 = vor.u32 %v1138_v52, %v1051_v50  ;;  %v1107_v62 = vld [vmem:[%s1301_s7 + $0x44] sm:$0xf] }
  0x35   : > { %657 = vmatpush.bf16.msra.mxu2 %v1068_v33  ;;  %v979_v61 = vld [vmem:[%s1301_s7 + $0xa0] sm:$0xf]  ;;  %v933_v63 = vld [vmem:[%s1301_s7 + $0x48] sm:$0xf0]  ;;  %v1120_v0 = vld [vmem:[%s1301_s7 + $0xa4] sm:$0xf0]  ;;  %v916_v3 = vor.u32 %v1104_v57, %v915_v56 }
  0x36   : > { %670 = vmatpush.bf16.msra.mxu3 %v952_v51  ;;  %v1043_v1 = vld [vmem:[%s1301_s7 + $0x120] sm:$0xf]  ;;  %v1136_v2 = vld [vmem:[%s1301_s7 + $0x124] sm:$0xf0]  ;;  %v907_v4 = vld [vmem:[%s1301_s7 + $0x10] sm:$0xf]  ;;  %v936_v6 = vor.u32 %v1107_v62, %v933_v63  ;;  %v980_v7 = vor.u32 %v1120_v0, %v979_v61 }
  0x37   : > { %630 = vmatpush.bf16.msra.mxu0 %v932_v42  ;;  %v1102_v5 = vld [vmem:[%s1301_s7 + $0x14] sm:$0xf0]  ;;  %v1044_v8 = vor.u32 %v1136_v2, %v1043_v1  ;;  %v971_v9 = vld [vmem:[%s1301_s7 + $0x90] sm:$0xf]  ;;  %v1105_v10 = vld [vmem:[%s1301_s7 + $0x34] sm:$0xf] }
  0x38   : > { %644 = vmatpush.bf16.msra.mxu1 %v996_v46  ;;  %v925_v11 = vld [vmem:[%s1301_s7 + $0x38] sm:$0xf0]  ;;  %v1118_v12 = vld [vmem:[%s1301_s7 + $0x94] sm:$0xf0]  ;;  %v1035_v13 = vld [vmem:[%s1301_s7 + $0x110] sm:$0xf]  ;;  %v908_v15 = vor.u32 %v1102_v5, %v907_v4 }
  0x39   : > { %658 = vmatpush.bf16.msra.mxu2 %v1060_v47  ;;  %v1134_v14 = vld [vmem:[%s1301_s7 + $0x114] sm:$0xf0]  ;;  %v899_v16 = vld [vmem:[%s1301_s7] sm:$0xf]  ;;  %v1100_v17 = vld [vmem:[%s1301_s7 + $0x4] sm:$0xf0]  ;;  %v928_v19 = vor.u32 %v1105_v10, %v925_v11  ;;  %v972_v20 = vor.u32 %v1118_v12, %v971_v9 }
  0x3a   : > { %671 = vmatpush.bf16.msra.mxu3 %v944_v58  ;;  %v963_v18 = vld [vmem:[%s1301_s7 + $0x80] sm:$0xf]  ;;  %v1036_v21 = vor.u32 %v1134_v14, %v1035_v13  ;;  %v1116_v22 = vld [vmem:[%s1301_s7 + $0x84] sm:$0xf0]  ;;  %v1103_v23 = vld [vmem:[%s1301_s7 + $0x24] sm:$0xf]  ;;  %v900_v31 = vor.u32 %v1100_v17, %v899_v16 }
  0x3b   : > { %631 = vmatpush.bf16.msra.mxu0 %v924_v55  ;;  %v917_v24 = vld [vmem:[%s1301_s7 + $0x28] sm:$0xf0]  ;;  %v1027_v25 = vld [vmem:[%s1301_s7 + $0x100] sm:$0xf]  ;;  %v1132_v26 = vld [vmem:[%s1301_s7 + $0x104] sm:$0xf0]  ;;  %v964_v36 = vor.u32 %v1116_v22, %v963_v18 }
  0x3c   : > { %645 = vmatpush.bf16.msra.mxu1 %v988_v59  ;;  %v1129_v27 = vld [vmem:[%s1301_s7 + $0xf4] sm:$0xf]  ;;  %v1021_v28 = vld [vmem:[%s1301_s7 + $0xf8] sm:$0xf0]  ;;  %v895_v32 = vld [vmem:[%s1303_s8 + $0x8] sm:$0xf]  ;;  %v920_v33 = vor.u32 %v1103_v23, %v917_v24  ;;  %v1028_v37 = vor.u32 %v1132_v26, %v1027_v25 }
  0x3d   : > { %659 = vmatpush.bf16.msra.mxu2 %v1052_v60  ;;  %v1145_v29 = vld [vmem:[%s1301_s7 + $0x174] sm:$0xf]  ;;  %v1085_v30 = vld [vmem:[%s1301_s7 + $0x178] sm:$0xf0]  ;;  %v887_v34 = vld [vmem:[%s1303_s8] sm:$0xf]  ;;  %v1024_v41 = vor.u32 %v1129_v27, %v1021_v28 }
  0x3e   : > { %672 = vmatpush.bf16.msra.mxu3 %v936_v6  ;;  %v1097_v35 = vld [vmem:[%s1303_s8 + $0x8] sm:$0xf0]  ;;  %v1098_v38 = vld [vmem:[%s1303_s8 + $0x10] sm:$0xf0]  ;;  %v1096_v39 = vld [vmem:[%s1303_s8 + $0x4] sm:$0xf]  ;;  %v1088_v42 = vor.u32 %v1145_v29, %v1085_v30 }
  0x3f   : > { %632 = vmatpush.bf16.msra.mxu0 %v916_v3  ;;  %v889_v40 = vld [vmem:[%s1303_s8 + $0xc] sm:$0xf0]  ;;  %v1127_v43 = vld [vmem:[%s1301_s7 + $0xe4] sm:$0xf]  ;;  %v1101_v44 = vld [vmem:[%s1301_s7 + $0x14] sm:$0xf]  ;;  %v888_v49 = vor.u32 %v1097_v35, %v887_v34  ;;  %v1382_v50 = vor.u32 %v1098_v38, %v895_v32 }
  0x40   : > { %646 = vmatpush.bf16.msra.mxu1 %v980_v7  ;;  %v909_v45 = vld [vmem:[%s1301_s7 + $0x18] sm:$0xf0]  ;;  %v1013_v46 = vld [vmem:[%s1301_s7 + $0xe8] sm:$0xf0]  ;;  %v1143_v47 = vld [vmem:[%s1301_s7 + $0x164] sm:$0xf]  ;;  %v1384_v51 = vor.u32 %v1096_v39, %v889_v40 }
  0x41   : > { %660 = vmatpush.bf16.msra.mxu2 %v1044_v8  ;;  %v1077_v48 = vld [vmem:[%s1301_s7 + $0x168] sm:$0xf0]  ;;  %v912_v52 = vor.u32 %v1101_v44, %v909_v45  ;;  %v1016_v53 = vor.u32 %v1127_v43, %v1013_v46  ;;  %v1125_v55 = vld [vmem:[%s1301_s7 + $0xd4] sm:$0xf]  ;;  %v1099_v56 = vld [vmem:[%s1301_s7 + $0x4] sm:$0xf] }
  0x42   : > { %673 = vmatpush.bf16.msra.mxu3 %v928_v19  ;;  %v1080_v54 = vor.u32 %v1143_v47, %v1077_v48  ;;  %v901_v57 = vld [vmem:[%s1301_s7 + $0x8] sm:$0xf0]  ;;  %v1005_v58 = vld [vmem:[%s1301_s7 + $0xd8] sm:$0xf0]  ;;  %v1141_v59 = vld [vmem:[%s1301_s7 + $0x154] sm:$0xf] }
  0x43   : > { %633 = vmatpush.bf16.msra.mxu0 %v908_v15  ;;  %v1069_v60 = vld [vmem:[%s1301_s7 + $0x158] sm:$0xf0]  ;;  %v904_v61 = vor.u32 %v1099_v56, %v901_v57  ;;  %v1008_v62 = vor.u32 %v1125_v55, %v1005_v58  ;;  %v1123_v0 = vld [vmem:[%s1301_s7 + $0xc4] sm:$0xf]  ;;  %v997_v1 = vld [vmem:[%s1301_s7 + $0xc8] sm:$0xf0] }
  0x44   : > { %647 = vmatpush.bf16.msra.mxu1 %v972_v20  ;;  %v1072_v63 = vor.u32 %v1141_v59, %v1069_v60  ;;  %v1139_v2 = vld [vmem:[%s1301_s7 + $0x144] sm:$0xf]  ;;  %v1061_v3 = vld [vmem:[%s1301_s7 + $0x148] sm:$0xf0]  ;;  %v1000_v4 = vor.u32 %v1123_v0, %v997_v1  ;;  %v1121_v6 = vld [vmem:[%s1301_s7 + $0xb4] sm:$0xf] }
  0x45   : > { %661 = vmatpush.bf16.msra.mxu2 %v1036_v21  ;;  %v1064_v5 = vor.u32 %v1139_v2, %v1061_v3  ;;  %v989_v7 = vld [vmem:[%s1301_s7 + $0xb8] sm:$0xf0]  ;;  %v1137_v8 = vld [vmem:[%s1301_s7 + $0x134] sm:$0xf]  ;;  %v1119_v12 = vld [vmem:[%s1301_s7 + $0xa4] sm:$0xf] }
  0x46   : > { %674 = vmatpush.bf16.msra.mxu3 %v920_v33  ;;  %v1053_v9 = vld [vmem:[%s1301_s7 + $0x138] sm:$0xf0]  ;;  %v992_v10 = vor.u32 %v1121_v6, %v989_v7  ;;  %v981_v13 = vld [vmem:[%s1301_s7 + $0xa8] sm:$0xf0]  ;;  %v1135_v14 = vld [vmem:[%s1301_s7 + $0x124] sm:$0xf] }
  0x47   : > { %634 = vmatpush.bf16.msra.mxu0 %v900_v31  ;;  %v1056_v11 = vor.u32 %v1137_v8, %v1053_v9  ;;  %v1045_v15 = vld [vmem:[%s1301_s7 + $0x128] sm:$0xf0]  ;;  %v984_v16 = vor.u32 %v1119_v12, %v981_v13  ;;  %v1117_v18 = vld [vmem:[%s1301_s7 + $0x94] sm:$0xf]  ;;  %v973_v19 = vld [vmem:[%s1301_s7 + $0x98] sm:$0xf0] }
  0x48   : > { %648 = vmatpush.bf16.msra.mxu1 %v964_v36  ;;  %v1048_v17 = vor.u32 %v1135_v14, %v1045_v15  ;;  %v1133_v20 = vld [vmem:[%s1301_s7 + $0x114] sm:$0xf]  ;;  %v1037_v21 = vld [vmem:[%s1301_s7 + $0x118] sm:$0xf0]  ;;  %v976_v22 = vor.u32 %v1117_v18, %v973_v19  ;;  %v1115_v24 = vld [vmem:[%s1301_s7 + $0x84] sm:$0xf] }
  0x49   : > { %662 = vmatpush.bf16.msra.mxu2 %v1028_v37  ;;  %v1040_v23 = vor.u32 %v1133_v20, %v1037_v21  ;;  %v965_v25 = vld [vmem:[%s1301_s7 + $0x88] sm:$0xf0]  ;;  %v1131_v26 = vld [vmem:[%s1301_s7 + $0x104] sm:$0xf]  ;;  %v315_v33 = vld [vmem:[#allocation2 + $0x10] sm:$0xff]  ;;  %p1089_p11 = scmp.ne.s32.totalorder %s1220_s14, 5 }
  0x4a   : > { %635 = vmatmul.bf16.vlgmr.msra.gmra.mxu0 %v888_v49  ;;  %675 = vmatpush.bf16.msra.mxu3 %v912_v52  ;;  %v1029_v27 = vld [vmem:[%s1301_s7 + $0x108] sm:$0xf0]  ;;  %v968_v28 = vor.u32 %v1115_v24, %v965_v25  ;;  %v317_v40 = vld [vmem:[#allocation2 + $0x18] sm:$0xff]  ;;  %v316_v48 = vld [vmem:[#allocation2] sm:$0xff] }
  0x4b   : > { %683 = vmatpush.bf16.msrb.mxu0 %v1024_v41  ;;  %649 = vmatmul.bf16.vlgmr.msra.gmra.mxu1 %v1384_v51  ;;  %v1032_v29 = vor.u32 %v1131_v26, %v1029_v27 }
  0x4c   : > { %697 = vmatpush.bf16.msrb.mxu1 %v1088_v42  ;;  %663 = vmatmul.bf16.vlgmr.msra.gmra.mxu2 %v1382_v50 }
  0x4e   : > { %676 = vmatpush.bf16.msra.mxu3 %v904_v61 }
  0x4f   : > { %684 = vmatpush.bf16.msrb.mxu0 %v1016_v53 }
  0x50   : > { %698 = vmatpush.bf16.msrb.mxu1 %v1080_v54  ;;  %v318_v54 = vld [vmem:[#allocation2 + $0x8] sm:$0xff] }
  0x51   : > { %677 = vmatmul.bf16.vlgmr.msra.gmra.mxu3 %v888_v49 }
  0x53   : > { %685 = vmatpush.bf16.msrb.mxu0 %v1008_v62 }
  0x54   : > { %699 = vmatpush.bf16.msrb.mxu1 %v1072_v63 }
  0x57   : > { %686 = vmatpush.bf16.msrb.mxu0 %v1000_v4 }
  0x58   : > { %700 = vmatpush.bf16.msrb.mxu1 %v1064_v5 }
  0x5b   : > { %687 = vmatpush.bf16.msrb.mxu0 %v992_v10 }
  0x5c   : > { %701 = vmatpush.bf16.msrb.mxu1 %v1056_v11 }
  0x5f   : > { %688 = vmatpush.bf16.msrb.mxu0 %v984_v16 }
  0x60   : > { %702 = vmatpush.bf16.msrb.mxu1 %v1048_v17 }
  0x63   : > { %689 = vmatpush.bf16.msrb.mxu0 %v976_v22 }
  0x64   : > { %703 = vmatpush.bf16.msrb.mxu1 %v1040_v23 }
  0x67   : > { %690 = vmatpush.bf16.msrb.mxu0 %v968_v28 }
  0x68   : > { %704 = vmatpush.bf16.msrb.mxu1 %v1032_v29 }
  0x6a   : > { %691 = vmatmul.bf16.vlgmr.msrb.gmra.mxu0 %v1384_v51 }
  0x6b   : > { %705 = vmatmul.bf16.vlgmr.msrb.gmra.mxu1 %v1382_v50 }
  0xc7   : > { %v636_v30 = vpop.f32.mrf.mxu0 }
  0xc8   : > { %v650_v31 = vpop.f32.mrf.mxu1 }
  0xc9   : > { %v651_v32 = vadd.f32 %v650_v31, %v636_v30 }
  0xcf   : > { %v664_v34 = vpop.f32.mrf.mxu2  ;;  %v638_v36 = vpop.f32.mrf.mxu0 }
  0xd0   : > { %v665_v35 = vadd.f32 %v664_v34, %v651_v32  ;;  %v652_v37 = vpop.f32.mrf.mxu1 }
  0xd1   : > { %v653_v39 = vadd.f32 %v652_v37, %v638_v36 }
  0xd2   : > { %v711_v38 = vadd.f32 %v665_v35, %v315_v33 }
  0xd4   : > { %715 = vst [vmem:[#allocation2 + $0x10] sm:$0xff] %v711_v38  ;;  %v678_v44 = vpop.f32.mrf.mxu3 }
  0xd7   : > { %v666_v41 = vpop.f32.mrf.mxu2 }
  0xd8   : > { %v667_v42 = vadd.f32 %v666_v41, %v653_v39 }
  0xda   : > { %v713_v43 = vadd.f32 %v667_v42, %v317_v40 }
  0xdc   : > { %717 = vst [vmem:[#allocation2 + $0x18] sm:$0xff] %v713_v43  ;;  %v680_v51 = vpop.f32.mrf.mxu3 }
  0xe7   : > { %v692_v45 = vpop.f32.mrf.mxu0 }
  0xe8   : > { %v706_v46 = vpop.f32.mrf.mxu1  ;;  %v693_v47 = vadd.f32 %v692_v45, %v678_v44 }
  0xea   : > { %v707_v49 = vadd.f32 %v706_v46, %v693_v47 }
  0xec   : > { %v712_v50 = vadd.f32 %v707_v49, %v316_v48 }
  0xee   : > { %716 = vst [vmem:[#allocation2] sm:$0xff] %v712_v50 }
  0xef   : > { %v694_v52 = vpop.f32.mrf.mxu0 }
  0xf0   : > { %v695_v53 = vadd.f32 %v694_v52, %v680_v51  ;;  %v708_v55 = vpop.f32.mrf.mxu1 }
  0xf2   : > { %v709_v56 = vadd.f32 %v708_v55, %v695_v53  ;;  %722 = sbr.rel (%p1089_p11) target bundleno = 261 (0x105), region = 66 }
  0xf4   : > { %v714_v57 = vadd.f32 %v709_v56, %v318_v54 }
  0xf6   : > { %718 = vst [vmem:[#allocation2 + $0x8] sm:$0xff] %v714_v57 }
  0xf7   : > { %v723_v58 = vld [vmem:[#allocation2 + $0x10] sm:$0xff]  ;;  %v724_v59 = vld [vmem:[#allocation2] sm:$0xff]  ;;  %v725_v63 = vld [vmem:[#allocation2 + $0x18] sm:$0xff] }
  0xf8   : > { %v727_v60 = vld [vmem:[%s1443_s2] sm:$0x3] }
  0xf9   : > { %v729_v61 = vperm.slane %v727_v60, 0  ;;  %v730_v62 = vperm.slane %v727_v60, 1 }
  0xfb   : > { %v733_v1 = vadd.f32 %v729_v61, %v723_v58  ;;  %v734_v2 = vadd.f32 %v730_v62, %v724_v59  ;;  %v735_v3 = vadd.f32 %v729_v61, %v725_v63 }
  0xfd   : > { %v726_v0 = vld [vmem:[#allocation2 + $0x8] sm:$0xff]  ;;  %v737_v5 = vmax.f32 %v733_v1, 0.0  ;;  %v738_v6 = vmax.f32 %v734_v2, 0.0  ;;  %v739_v7 = vmax.f32 %v735_v3, 0.0 }
  0xfe   : > { %v736_v4 = vadd.f32 %v730_v62, %v726_v0 }
  0xff   : > { %v741_v9 = vpack.c.bf16 %v738_v6, %v737_v5 }
 0x100   : > { %v740_v8 = vmax.f32 %v736_v4, 0.0 }
 0x101   : > { %743 = vst [vmem:[%s1444_s3] sm:$0xff] %v741_v9 }
 0x102   : > { %v742_v10 = vpack.c.bf16 %v740_v8, %v739_v7 }
 0x104   : > { %744 = vst [vmem:[%s1444_s3 + $0x8] sm:$0xff] %v742_v10 }
 0x105 PF: > { %s13_s16 = sadd.s32 1, %s1228_s16   ;;  %s1445_s12 = smov %s1216_s13 }
 0x106   : > { %p10_p12 = scmp.ge.s32.totalorder %s13_s16, 8   ;;  %s1446_s13 = smov %s1286_s20 }
 0x107   : > { %s1447_s14 = smov %s1224_s15  ;;  %s1448_s15 = smov %s1450_s17 }
 0x108   :  { %12 = sbr.rel (!%p10_p12) target bundleno = 3 (0x3), region = 113 }

// kernel: _lambda_.33
= control target key start
LH: loop header
LB: loop body
LE: loop exit
PB: predicated region body
PF: predicated region fallthrough
CT: control target
= control target key end

     0   :  { %s1356_s15 = smov 0   ;;  %s1358_s16 = smov 0   ;;  %s1552_s0 = inlined_call_operand.vmem [shape: bf16[16,2304], index: 0, kind: input, shape index: {}]   ;;  %s1553_s1 = inlined_call_operand.vmem [shape: bf16[2304,256], index: 1, kind: input, shape index: {}]   ;;  %s1554_s2 = inlined_call_operand.vmem [shape: f32[1,256], index: 2, kind: input, shape index: {}]   ;;  %s1555_s3 = inlined_call_operand.vmem [shape: bf16[16,256], index: 3, kind: input, shape index: {}]   ;;  %s1556_s4 = inlined_call_operand.vmem [shape: bf16[16,256], index: 4, kind: output, shape index: {}]  }
   0x1   :  { %s1360_s17 = smov 0   ;;  %s1362_s18 = smov 0  }
   0x2   :  { %s1364_s19 = smov 0  }
   0x3 LB: > { %s26_s20 = sadd.s32 1, %s1324_s18  ;;  %p49_p1 = scmp.ne.s32.totalorder %s1316_s16, %s1312_s15  ;;  %s1328_s19 = sphi %s1364_s19, %s14_s19   ;;  %s1324_s18 = sphi %s1362_s18, %s1560_s18   ;;  %s1320_s17 = sphi %s1360_s17, %s1559_s17   ;;  %s1316_s16 = sphi %s1358_s16, %s1558_s16   ;;  %s1312_s15 = sphi %s1356_s15, %s1557_s15  }
   0x4   : > { %p27_p0 = scmp.ge.s32.totalorder %s26_s20, 6  ;;  %p50_p2 = scmp.eq.s32.totalorder %s1328_s19, 0 }
   0x5   : > { %s42_s22 = sadd.s32 1, %s1316_s16  ;;  %p975_p5 = scmp.ge.s32.totalorder %s1328_s19, 6 }
   0x6   : > { %s1562_s20 = smov (%p27_p0, %s26_s20), 0  ;;  %p51_p3 = por %p50_p2, %p49_p1 }
   0x7   : > { %s38_s21 = ssub.s32 %s1324_s18, %s1562_s20  ;;  %208 = sbr.rel (%p975_p5) target bundleno = 21 (0x15), region = 24 }
   0x8   : > { %p40_p4 = scmp.eq.s32.totalorder %s38_s21, 0 }
   0xa   : > { %s1391_s23 = scalar_select %p40_p4, %s1316_s16, %s42_s22  }
   0xc   : > { %211 = sbr.rel (!%p51_p3) target bundleno = 21 (0x15), region = 28  ;;  %s213_s24 = sand.u32 (%p51_p3), 1, %s1316_s16  }
   0xd   : > { %s1194_s25 = smul.u32 (%p51_p3), 12, %s1324_s18 }
   0xe   : > { %s1247_s26 = smul.u32 (%p51_p3), 24, %s213_s24 }
   0xf   : > { %s221_s29 = scalar_lea.vmem (%p51_p3), %s1552_s0, %s1194_s25 }
  0x10   : > { %v236_v0 = vld [vmem:[%s221_s29] sm:$0xff] (%p51_p3)  ;;  %v238_v1 = vld [vmem:[%s221_s29 + $0x48] sm:$0xff] (%p51_p3)  ;;  %s215_s30 = scalar_lea.vmem (%p51_p3), [#allocation3], %s1247_s26  ;;  %v979_v3 = vld [vmem:[%s221_s29 + $0x50] sm:$0xf] (%p51_p3) }
  0x11   : > { %v977_v2 = vld [vmem:[%s221_s29 + $0x8] sm:$0xf]  ;;  %237 = vst [vmem:[%s215_s30] sm:$0xff] %v236_v0 }
  0x12   : > { %239 = vst [vmem:[%s215_s30 + $0xc] sm:$0xff] %v238_v1 }
  0x13   : > { %978 = vst [vmem:[%s215_s30 + $0x8] sm:$0xf] %v977_v2 }
  0x14   : > { %980 = vst [vmem:[%s215_s30 + $0x14] sm:$0xf] %v979_v3 }
  0x15 PF: > { %p981_p6 = scmp.ge.s32.totalorder %s1328_s19, 1  ;;  %p271_p7 = scmp.lt.s32.totalorder %s1328_s19, 7 }
  0x17   : > { %p272_p8 = pnand %p981_p6, %p271_p7 }
  0x18   : > { %s278_s5 = sand.u32 (!%p272_p8), 1, %s1312_s15   ;;  %s334_s6 = smul.u32 (!%p272_p8), 48, %s1320_s17 }
  0x19   : > { %275 = sbr.rel (%p272_p8) target bundleno = 263 (0x107), region = 58  ;;  %p984_p10 = scmp.ne.s32.totalorder (!%p272_p8), %s1320_s17, 0 }
  0x1a   : > { %s1248_s7 = smul.u32 (!%p272_p8), 24, %s278_s5  ;;  %p336_p9 = scmp.lt.s32.totalorder (!%p272_p8), %s334_s6, 287 }
  0x1c   : > { %s1408_s12 = scalar_lea.vmem (!%p272_p8), [#allocation3], %s1248_s7 }
  0x1e   : > { %s1564_s6 = smov (!%p336_p9, %s334_s6), 287  ;;  %378 = sbr.rel (%p984_p10) target bundleno = 40 (0x28), region = 66 }
  0x1f   : > { %s1195_s8 = sshll.u32 %s1564_s6, 3 }
  0x20   : > { %s1406_s11 = scalar_lea.vmem %s1553_s1, %s1195_s8 }
  0x23   : > { %v1330_v4 = vmov 0.0  }
  0x24   : > { %379 = vst [vmem:[#allocation2 + $0x10] sm:$0xff] %v1330_v4 }
  0x25   : > { %380 = vst [vmem:[#allocation2] sm:$0xff] %v1330_v4 }
  0x26   : > { %381 = vst [vmem:[#allocation2 + $0x18] sm:$0xff] %v1330_v4 }
  0x27   : > { %382 = vst [vmem:[#allocation2 + $0x8] sm:$0xff] %v1330_v4 }
  0x28 PF: > { %v1055_v5 = vld [vmem:[%s1406_s11 + $0x70] sm:$0xf]  ;;  %v1214_v6 = vld [vmem:[%s1406_s11 + $0x74] sm:$0xf0]  ;;  %v1047_v14 = vld [vmem:[%s1406_s11 + $0x60] sm:$0xf] }
  0x29   : > { %v1119_v7 = vld [vmem:[%s1406_s11 + $0xf0] sm:$0xf]  ;;  %v1056_v8 = vor.u32 %v1214_v6, %v1055_v5  ;;  %v1230_v9 = vld [vmem:[%s1406_s11 + $0xf4] sm:$0xf0]  ;;  %v1212_v15 = vld [vmem:[%s1406_s11 + $0x64] sm:$0xf0] }
  0x2a   : > { %v1183_v10 = vld [vmem:[%s1406_s11 + $0x170] sm:$0xf]  ;;  %v1246_v11 = vld [vmem:[%s1406_s11 + $0x174] sm:$0xf0]  ;;  %v1120_v12 = vor.u32 %v1230_v9, %v1119_v7  ;;  %v1111_v16 = vld [vmem:[%s1406_s11 + $0xe0] sm:$0xf]  ;;  %v1048_v17 = vor.u32 %v1212_v15, %v1047_v14 }
  0x2b   : > { %v1184_v13 = vor.u32 %v1246_v11, %v1183_v10  ;;  %695 = vmatpush.bf16.msra.mxu0 %v1056_v8  ;;  %v1228_v18 = vld [vmem:[%s1406_s11 + $0xe4] sm:$0xf0]  ;;  %v1175_v19 = vld [vmem:[%s1406_s11 + $0x160] sm:$0xf]  ;;  %v1039_v23 = vld [vmem:[%s1406_s11 + $0x50] sm:$0xf] }
  0x2c   : > { %v1244_v20 = vld [vmem:[%s1406_s11 + $0x164] sm:$0xf0]  ;;  %709 = vmatpush.bf16.msra.mxu1 %v1120_v12  ;;  %v1112_v21 = vor.u32 %v1228_v18, %v1111_v16  ;;  %v1210_v24 = vld [vmem:[%s1406_s11 + $0x54] sm:$0xf0]  ;;  %v1103_v25 = vld [vmem:[%s1406_s11 + $0xd0] sm:$0xf] }
  0x2d   : > { %723 = vmatpush.bf16.msra.mxu2 %v1184_v13  ;;  %v1176_v22 = vor.u32 %v1244_v20, %v1175_v19  ;;  %v1226_v26 = vld [vmem:[%s1406_s11 + $0xd4] sm:$0xf0]  ;;  %v1167_v27 = vld [vmem:[%s1406_s11 + $0x150] sm:$0xf]  ;;  %v1040_v29 = vor.u32 %v1210_v24, %v1039_v23  ;;  %v1031_v30 = vld [vmem:[%s1406_s11 + $0x40] sm:$0xf] }
  0x2e   : > { %v1242_v28 = vld [vmem:[%s1406_s11 + $0x154] sm:$0xf0]  ;;  %v1208_v31 = vld [vmem:[%s1406_s11 + $0x44] sm:$0xf0]  ;;  %v1104_v32 = vor.u32 %v1226_v26, %v1103_v25  ;;  %v1095_v34 = vld [vmem:[%s1406_s11 + $0xc0] sm:$0xf] }
  0x2f   : > { %696 = vmatpush.bf16.msra.mxu0 %v1048_v17  ;;  %v1168_v33 = vor.u32 %v1242_v28, %v1167_v27  ;;  %v1213_v35 = vld [vmem:[%s1406_s11 + $0x74] sm:$0xf]  ;;  %v1057_v36 = vld [vmem:[%s1406_s11 + $0x78] sm:$0xf0]  ;;  %v1224_v37 = vld [vmem:[%s1406_s11 + $0xc4] sm:$0xf0]  ;;  %v1032_v42 = vor.u32 %v1208_v31, %v1031_v30 }
  0x30   : > { %710 = vmatpush.bf16.msra.mxu1 %v1112_v21  ;;  %v1159_v38 = vld [vmem:[%s1406_s11 + $0x140] sm:$0xf]  ;;  %v1240_v39 = vld [vmem:[%s1406_s11 + $0x144] sm:$0xf0]  ;;  %v1060_v40 = vor.u32 %v1213_v35, %v1057_v36  ;;  %v1211_v41 = vld [vmem:[%s1406_s11 + $0x64] sm:$0xf]  ;;  %v1096_v46 = vor.u32 %v1224_v37, %v1095_v34 }
  0x31   : > { %724 = vmatpush.bf16.msra.mxu2 %v1176_v22  ;;  %v1023_v43 = vld [vmem:[%s1406_s11 + $0x30] sm:$0xf]  ;;  %v1206_v44 = vld [vmem:[%s1406_s11 + $0x34] sm:$0xf0]  ;;  %v1049_v45 = vld [vmem:[%s1406_s11 + $0x68] sm:$0xf0]  ;;  %v1160_v47 = vor.u32 %v1240_v39, %v1159_v38 }
  0x32   : > { %737 = vmatpush.bf16.msra.mxu3 %v1060_v40  ;;  %v1087_v48 = vld [vmem:[%s1406_s11 + $0xb0] sm:$0xf]  ;;  %v1222_v49 = vld [vmem:[%s1406_s11 + $0xb4] sm:$0xf0]  ;;  %v1052_v51 = vor.u32 %v1211_v41, %v1049_v45  ;;  %v1209_v53 = vld [vmem:[%s1406_s11 + $0x54] sm:$0xf]  ;;  %v1024_v55 = vor.u32 %v1206_v44, %v1023_v43 }
  0x33   : > { %697 = vmatpush.bf16.msra.mxu0 %v1040_v29  ;;  %v1151_v50 = vld [vmem:[%s1406_s11 + $0x130] sm:$0xf]  ;;  %v1238_v52 = vld [vmem:[%s1406_s11 + $0x134] sm:$0xf0]  ;;  %v1041_v54 = vld [vmem:[%s1406_s11 + $0x58] sm:$0xf0]  ;;  %v1088_v59 = vor.u32 %v1222_v49, %v1087_v48 }
  0x34   : > { %711 = vmatpush.bf16.msra.mxu1 %v1104_v32  ;;  %v1015_v56 = vld [vmem:[%s1406_s11 + $0x20] sm:$0xf]  ;;  %v1204_v57 = vld [vmem:[%s1406_s11 + $0x24] sm:$0xf0]  ;;  %v1044_v58 = vor.u32 %v1209_v53, %v1041_v54  ;;  %v1152_v60 = vor.u32 %v1238_v52, %v1151_v50  ;;  %v1207_v62 = vld [vmem:[%s1406_s11 + $0x44] sm:$0xf] }
  0x35   : > { %725 = vmatpush.bf16.msra.mxu2 %v1168_v33  ;;  %v1079_v61 = vld [vmem:[%s1406_s11 + $0xa0] sm:$0xf]  ;;  %v1033_v63 = vld [vmem:[%s1406_s11 + $0x48] sm:$0xf0]  ;;  %v1220_v0 = vld [vmem:[%s1406_s11 + $0xa4] sm:$0xf0]  ;;  %v1016_v3 = vor.u32 %v1204_v57, %v1015_v56 }
  0x36   : > { %738 = vmatpush.bf16.msra.mxu3 %v1052_v51  ;;  %v1143_v1 = vld [vmem:[%s1406_s11 + $0x120] sm:$0xf]  ;;  %v1236_v2 = vld [vmem:[%s1406_s11 + $0x124] sm:$0xf0]  ;;  %v1007_v4 = vld [vmem:[%s1406_s11 + $0x10] sm:$0xf]  ;;  %v1036_v6 = vor.u32 %v1207_v62, %v1033_v63  ;;  %v1080_v7 = vor.u32 %v1220_v0, %v1079_v61 }
  0x37   : > { %698 = vmatpush.bf16.msra.mxu0 %v1032_v42  ;;  %v1202_v5 = vld [vmem:[%s1406_s11 + $0x14] sm:$0xf0]  ;;  %v1144_v8 = vor.u32 %v1236_v2, %v1143_v1  ;;  %v1071_v9 = vld [vmem:[%s1406_s11 + $0x90] sm:$0xf]  ;;  %v1205_v10 = vld [vmem:[%s1406_s11 + $0x34] sm:$0xf] }
  0x38   : > { %712 = vmatpush.bf16.msra.mxu1 %v1096_v46  ;;  %v1025_v11 = vld [vmem:[%s1406_s11 + $0x38] sm:$0xf0]  ;;  %v1218_v12 = vld [vmem:[%s1406_s11 + $0x94] sm:$0xf0]  ;;  %v1135_v13 = vld [vmem:[%s1406_s11 + $0x110] sm:$0xf]  ;;  %v1008_v15 = vor.u32 %v1202_v5, %v1007_v4 }
  0x39   : > { %726 = vmatpush.bf16.msra.mxu2 %v1160_v47  ;;  %v1234_v14 = vld [vmem:[%s1406_s11 + $0x114] sm:$0xf0]  ;;  %v999_v16 = vld [vmem:[%s1406_s11] sm:$0xf]  ;;  %v1200_v17 = vld [vmem:[%s1406_s11 + $0x4] sm:$0xf0]  ;;  %v1028_v19 = vor.u32 %v1205_v10, %v1025_v11  ;;  %v1072_v20 = vor.u32 %v1218_v12, %v1071_v9 }
  0x3a   : > { %739 = vmatpush.bf16.msra.mxu3 %v1044_v58  ;;  %v1063_v18 = vld [vmem:[%s1406_s11 + $0x80] sm:$0xf]  ;;  %v1136_v21 = vor.u32 %v1234_v14, %v1135_v13  ;;  %v1216_v22 = vld [vmem:[%s1406_s11 + $0x84] sm:$0xf0]  ;;  %v1203_v23 = vld [vmem:[%s1406_s11 + $0x24] sm:$0xf]  ;;  %v1000_v31 = vor.u32 %v1200_v17, %v999_v16 }
  0x3b   : > { %699 = vmatpush.bf16.msra.mxu0 %v1024_v55  ;;  %v1017_v24 = vld [vmem:[%s1406_s11 + $0x28] sm:$0xf0]  ;;  %v1127_v25 = vld [vmem:[%s1406_s11 + $0x100] sm:$0xf]  ;;  %v1232_v26 = vld [vmem:[%s1406_s11 + $0x104] sm:$0xf0]  ;;  %v1064_v36 = vor.u32 %v1216_v22, %v1063_v18 }
  0x3c   : > { %713 = vmatpush.bf16.msra.mxu1 %v1088_v59  ;;  %v1229_v27 = vld [vmem:[%s1406_s11 + $0xf4] sm:$0xf]  ;;  %v1121_v28 = vld [vmem:[%s1406_s11 + $0xf8] sm:$0xf0]  ;;  %v995_v32 = vld [vmem:[%s1408_s12 + $0x8] sm:$0xf]  ;;  %v1020_v33 = vor.u32 %v1203_v23, %v1017_v24  ;;  %v1128_v37 = vor.u32 %v1232_v26, %v1127_v25 }
  0x3d   : > { %727 = vmatpush.bf16.msra.mxu2 %v1152_v60  ;;  %v1245_v29 = vld [vmem:[%s1406_s11 + $0x174] sm:$0xf]  ;;  %v1185_v30 = vld [vmem:[%s1406_s11 + $0x178] sm:$0xf0]  ;;  %v987_v34 = vld [vmem:[%s1408_s12] sm:$0xf]  ;;  %v1124_v41 = vor.u32 %v1229_v27, %v1121_v28 }
  0x3e   : > { %740 = vmatpush.bf16.msra.mxu3 %v1036_v6  ;;  %v1197_v35 = vld [vmem:[%s1408_s12 + $0x8] sm:$0xf0]  ;;  %v1198_v38 = vld [vmem:[%s1408_s12 + $0x10] sm:$0xf0]  ;;  %v1196_v39 = vld [vmem:[%s1408_s12 + $0x4] sm:$0xf]  ;;  %v1188_v42 = vor.u32 %v1245_v29, %v1185_v30 }
  0x3f   : > { %700 = vmatpush.bf16.msra.mxu0 %v1016_v3  ;;  %v989_v40 = vld [vmem:[%s1408_s12 + $0xc] sm:$0xf0]  ;;  %v1227_v43 = vld [vmem:[%s1406_s11 + $0xe4] sm:$0xf]  ;;  %v1201_v44 = vld [vmem:[%s1406_s11 + $0x14] sm:$0xf]  ;;  %v988_v49 = vor.u32 %v1197_v35, %v987_v34  ;;  %v1487_v50 = vor.u32 %v1198_v38, %v995_v32 }
  0x40   : > { %714 = vmatpush.bf16.msra.mxu1 %v1080_v7  ;;  %v1009_v45 = vld [vmem:[%s1406_s11 + $0x18] sm:$0xf0]  ;;  %v1113_v46 = vld [vmem:[%s1406_s11 + $0xe8] sm:$0xf0]  ;;  %v1243_v47 = vld [vmem:[%s1406_s11 + $0x164] sm:$0xf]  ;;  %v1489_v51 = vor.u32 %v1196_v39, %v989_v40 }
  0x41   : > { %728 = vmatpush.bf16.msra.mxu2 %v1144_v8  ;;  %v1177_v48 = vld [vmem:[%s1406_s11 + $0x168] sm:$0xf0]  ;;  %v1012_v52 = vor.u32 %v1201_v44, %v1009_v45  ;;  %v1116_v53 = vor.u32 %v1227_v43, %v1113_v46  ;;  %v1225_v55 = vld [vmem:[%s1406_s11 + $0xd4] sm:$0xf]  ;;  %v1199_v56 = vld [vmem:[%s1406_s11 + $0x4] sm:$0xf] }
  0x42   : > { %741 = vmatpush.bf16.msra.mxu3 %v1028_v19  ;;  %v1180_v54 = vor.u32 %v1243_v47, %v1177_v48  ;;  %v1001_v57 = vld [vmem:[%s1406_s11 + $0x8] sm:$0xf0]  ;;  %v1105_v58 = vld [vmem:[%s1406_s11 + $0xd8] sm:$0xf0]  ;;  %v1241_v59 = vld [vmem:[%s1406_s11 + $0x154] sm:$0xf] }
  0x43   : > { %701 = vmatpush.bf16.msra.mxu0 %v1008_v15  ;;  %v1169_v60 = vld [vmem:[%s1406_s11 + $0x158] sm:$0xf0]  ;;  %v1004_v61 = vor.u32 %v1199_v56, %v1001_v57  ;;  %v1108_v62 = vor.u32 %v1225_v55, %v1105_v58  ;;  %v1223_v0 = vld [vmem:[%s1406_s11 + $0xc4] sm:$0xf]  ;;  %v1097_v1 = vld [vmem:[%s1406_s11 + $0xc8] sm:$0xf0] }
  0x44   : > { %715 = vmatpush.bf16.msra.mxu1 %v1072_v20  ;;  %v1172_v63 = vor.u32 %v1241_v59, %v1169_v60  ;;  %v1239_v2 = vld [vmem:[%s1406_s11 + $0x144] sm:$0xf]  ;;  %v1161_v3 = vld [vmem:[%s1406_s11 + $0x148] sm:$0xf0]  ;;  %v1100_v4 = vor.u32 %v1223_v0, %v1097_v1  ;;  %v1221_v6 = vld [vmem:[%s1406_s11 + $0xb4] sm:$0xf] }
  0x45   : > { %729 = vmatpush.bf16.msra.mxu2 %v1136_v21  ;;  %v1164_v5 = vor.u32 %v1239_v2, %v1161_v3  ;;  %v1089_v7 = vld [vmem:[%s1406_s11 + $0xb8] sm:$0xf0]  ;;  %v1237_v8 = vld [vmem:[%s1406_s11 + $0x134] sm:$0xf]  ;;  %v1219_v12 = vld [vmem:[%s1406_s11 + $0xa4] sm:$0xf] }
  0x46   : > { %742 = vmatpush.bf16.msra.mxu3 %v1020_v33  ;;  %v1153_v9 = vld [vmem:[%s1406_s11 + $0x138] sm:$0xf0]  ;;  %v1092_v10 = vor.u32 %v1221_v6, %v1089_v7  ;;  %v1081_v13 = vld [vmem:[%s1406_s11 + $0xa8] sm:$0xf0]  ;;  %v1235_v14 = vld [vmem:[%s1406_s11 + $0x124] sm:$0xf] }
  0x47   : > { %702 = vmatpush.bf16.msra.mxu0 %v1000_v31  ;;  %v1156_v11 = vor.u32 %v1237_v8, %v1153_v9  ;;  %v1145_v15 = vld [vmem:[%s1406_s11 + $0x128] sm:$0xf0]  ;;  %v1084_v16 = vor.u32 %v1219_v12, %v1081_v13  ;;  %v1217_v18 = vld [vmem:[%s1406_s11 + $0x94] sm:$0xf]  ;;  %v1073_v19 = vld [vmem:[%s1406_s11 + $0x98] sm:$0xf0] }
  0x48   : > { %716 = vmatpush.bf16.msra.mxu1 %v1064_v36  ;;  %v1148_v17 = vor.u32 %v1235_v14, %v1145_v15  ;;  %v1233_v20 = vld [vmem:[%s1406_s11 + $0x114] sm:$0xf]  ;;  %v1137_v21 = vld [vmem:[%s1406_s11 + $0x118] sm:$0xf0]  ;;  %v1076_v22 = vor.u32 %v1217_v18, %v1073_v19  ;;  %v1215_v24 = vld [vmem:[%s1406_s11 + $0x84] sm:$0xf] }
  0x49   : > { %730 = vmatpush.bf16.msra.mxu2 %v1128_v37  ;;  %v1140_v23 = vor.u32 %v1233_v20, %v1137_v21  ;;  %v1065_v25 = vld [vmem:[%s1406_s11 + $0x88] sm:$0xf0]  ;;  %v1231_v26 = vld [vmem:[%s1406_s11 + $0x104] sm:$0xf]  ;;  %v383_v33 = vld [vmem:[#allocation2 + $0x10] sm:$0xff]  ;;  %p1189_p11 = scmp.ne.s32.totalorder %s1320_s17, 5 }
  0x4a   : > { %703 = vmatmul.bf16.vlgmr.msra.gmra.mxu0 %v988_v49  ;;  %743 = vmatpush.bf16.msra.mxu3 %v1012_v52  ;;  %v1129_v27 = vld [vmem:[%s1406_s11 + $0x108] sm:$0xf0]  ;;  %v1068_v28 = vor.u32 %v1215_v24, %v1065_v25  ;;  %v385_v40 = vld [vmem:[#allocation2 + $0x18] sm:$0xff]  ;;  %v384_v48 = vld [vmem:[#allocation2] sm:$0xff] }
  0x4b   : > { %751 = vmatpush.bf16.msrb.mxu0 %v1124_v41  ;;  %717 = vmatmul.bf16.vlgmr.msra.gmra.mxu1 %v1489_v51  ;;  %v1132_v29 = vor.u32 %v1231_v26, %v1129_v27 }
  0x4c   : > { %765 = vmatpush.bf16.msrb.mxu1 %v1188_v42  ;;  %731 = vmatmul.bf16.vlgmr.msra.gmra.mxu2 %v1487_v50 }
  0x4e   : > { %744 = vmatpush.bf16.msra.mxu3 %v1004_v61 }
  0x4f   : > { %752 = vmatpush.bf16.msrb.mxu0 %v1116_v53 }
  0x50   : > { %766 = vmatpush.bf16.msrb.mxu1 %v1180_v54  ;;  %v386_v54 = vld [vmem:[#allocation2 + $0x8] sm:$0xff] }
  0x51   : > { %745 = vmatmul.bf16.vlgmr.msra.gmra.mxu3 %v988_v49 }
  0x53   : > { %753 = vmatpush.bf16.msrb.mxu0 %v1108_v62 }
  0x54   : > { %767 = vmatpush.bf16.msrb.mxu1 %v1172_v63 }
  0x57   : > { %754 = vmatpush.bf16.msrb.mxu0 %v1100_v4 }
  0x58   : > { %768 = vmatpush.bf16.msrb.mxu1 %v1164_v5 }
  0x5b   : > { %755 = vmatpush.bf16.msrb.mxu0 %v1092_v10 }
  0x5c   : > { %769 = vmatpush.bf16.msrb.mxu1 %v1156_v11 }
  0x5f   : > { %756 = vmatpush.bf16.msrb.mxu0 %v1084_v16 }
  0x60   : > { %770 = vmatpush.bf16.msrb.mxu1 %v1148_v17 }
  0x63   : > { %757 = vmatpush.bf16.msrb.mxu0 %v1076_v22 }
  0x64   : > { %771 = vmatpush.bf16.msrb.mxu1 %v1140_v23 }
  0x67   : > { %758 = vmatpush.bf16.msrb.mxu0 %v1068_v28 }
  0x68   : > { %772 = vmatpush.bf16.msrb.mxu1 %v1132_v29 }
  0x6a   : > { %759 = vmatmul.bf16.vlgmr.msrb.gmra.mxu0 %v1489_v51 }
  0x6b   : > { %773 = vmatmul.bf16.vlgmr.msrb.gmra.mxu1 %v1487_v50 }
  0xc7   : > { %v704_v30 = vpop.f32.mrf.mxu0 }
  0xc8   : > { %v718_v31 = vpop.f32.mrf.mxu1 }
  0xc9   : > { %v719_v32 = vadd.f32 %v718_v31, %v704_v30 }
  0xcf   : > { %v732_v34 = vpop.f32.mrf.mxu2  ;;  %v706_v36 = vpop.f32.mrf.mxu0 }
  0xd0   : > { %v733_v35 = vadd.f32 %v732_v34, %v719_v32  ;;  %v720_v37 = vpop.f32.mrf.mxu1 }
  0xd1   : > { %v721_v39 = vadd.f32 %v720_v37, %v706_v36 }
  0xd2   : > { %v779_v38 = vadd.f32 %v733_v35, %v383_v33 }
  0xd4   : > { %783 = vst [vmem:[#allocation2 + $0x10] sm:$0xff] %v779_v38  ;;  %v746_v44 = vpop.f32.mrf.mxu3 }
  0xd7   : > { %v734_v41 = vpop.f32.mrf.mxu2 }
  0xd8   : > { %v735_v42 = vadd.f32 %v734_v41, %v721_v39 }
  0xda   : > { %v781_v43 = vadd.f32 %v735_v42, %v385_v40 }
  0xdc   : > { %785 = vst [vmem:[#allocation2 + $0x18] sm:$0xff] %v781_v43  ;;  %v748_v51 = vpop.f32.mrf.mxu3 }
  0xe7   : > { %v760_v45 = vpop.f32.mrf.mxu0 }
  0xe8   : > { %v774_v46 = vpop.f32.mrf.mxu1  ;;  %v761_v47 = vadd.f32 %v760_v45, %v746_v44 }
  0xea   : > { %v775_v49 = vadd.f32 %v774_v46, %v761_v47 }
  0xec   : > { %v780_v50 = vadd.f32 %v775_v49, %v384_v48 }
  0xee   : > { %784 = vst [vmem:[#allocation2] sm:$0xff] %v780_v50 }
  0xef   : > { %v762_v52 = vpop.f32.mrf.mxu0 }
  0xf0   : > { %v763_v53 = vadd.f32 %v762_v52, %v748_v51  ;;  %v776_v55 = vpop.f32.mrf.mxu1 }
  0xf2   : > { %v777_v56 = vadd.f32 %v776_v55, %v763_v53  ;;  %790 = sbr.rel (%p1189_p11) target bundleno = 263 (0x107), region = 70 }
  0xf4   : > { %v782_v57 = vadd.f32 %v777_v56, %v386_v54 }
  0xf6   : > { %786 = vst [vmem:[#allocation2 + $0x8] sm:$0xff] %v782_v57 }
  0xf7   : > { %v791_v58 = vld [vmem:[#allocation2 + $0x10] sm:$0xff]  ;;  %v792_v59 = vld [vmem:[#allocation2] sm:$0xff]  ;;  %v793_v0 = vld [vmem:[#allocation2 + $0x18] sm:$0xff] }
  0xf8   : > { %v795_v60 = vld [vmem:[%s1554_s2] sm:$0x3]  ;;  %v806_v4 = vld [vmem:[%s1555_s3 + $0x8] sm:$0xff] }
  0xf9   : > { %v797_v61 = vperm.slane %v795_v60, 0  ;;  %v798_v62 = vperm.slane %v795_v60, 1  ;;  %v805_v63 = vld [vmem:[%s1555_s3] sm:$0xff]  ;;  %v809_v9 = vunpack.c.l.bf16 %v806_v4  ;;  %v810_v10 = vunpack.c.h.bf16 %v806_v4 }
  0xfa   : > { %v807_v2 = vunpack.c.l.bf16 %v805_v63  ;;  %v808_v3 = vunpack.c.h.bf16 %v805_v63 }
  0xfb   : > { %v801_v5 = vadd.f32 %v797_v61, %v791_v58  ;;  %v802_v6 = vadd.f32 %v798_v62, %v792_v59  ;;  %v803_v7 = vadd.f32 %v797_v61, %v793_v0 }
  0xfd   : > { %v794_v1 = vld [vmem:[#allocation2 + $0x8] sm:$0xff]  ;;  %v811_v11 = vadd.f32 %v807_v2, %v801_v5  ;;  %v812_v12 = vadd.f32 %v808_v3, %v802_v6  ;;  %v813_v13 = vadd.f32 %v809_v9, %v803_v7 }
  0xfe   : > { %v804_v8 = vadd.f32 %v798_v62, %v794_v1 }
  0xff   : > { %v815_v15 = vmax.f32 %v811_v11, 0.0  ;;  %v816_v16 = vmax.f32 %v812_v12, 0.0  ;;  %v817_v17 = vmax.f32 %v813_v13, 0.0 }
 0x100   : > { %v814_v14 = vadd.f32 %v810_v10, %v804_v8 }
 0x101   : > { %v819_v19 = vpack.c.bf16 %v816_v16, %v815_v15 }
 0x102   : > { %v818_v18 = vmax.f32 %v814_v14, 0.0 }
 0x103   : > { %821 = vst [vmem:[%s1556_s4] sm:$0xff] %v819_v19 }
 0x104   : > { %v820_v20 = vpack.c.bf16 %v818_v18, %v817_v17 }
 0x106   : > { %822 = vst [vmem:[%s1556_s4 + $0x8] sm:$0xff] %v820_v20 }
 0x107 PF: > { %s14_s19 = sadd.s32 1, %s1328_s19   ;;  %s1557_s15 = smov %s1316_s16 }
 0x108   : > { %p11_p12 = scmp.ge.s32.totalorder %s14_s19, 8   ;;  %s1558_s16 = smov %s1391_s23 }
 0x109   : > { %s1559_s17 = smov %s1324_s18  ;;  %s1560_s18 = smov %s1562_s20 }
 0x10a   :  { %13 = sbr.rel (!%p11_p12) target bundleno = 3 (0x3), region = 120 }

// kernel: _lambda_.36
= control target key start
LH: loop header
LB: loop body
LE: loop exit
PB: predicated region body
PF: predicated region fallthrough
CT: control target
= control target key end

     0   :  { %s1974_s0 = inlined_call_operand.vmem [shape: bf16[16,2304], index: 0, kind: input, shape index: {}]   ;;  %s1975_s1 = inlined_call_operand.vmem [shape: bf16[2304,512], index: 1, kind: input, shape index: {}]   ;;  %s1976_s2 = inlined_call_operand.vmem [shape: f32[1,512], index: 2, kind: input, shape index: {}]   ;;  %s1977_s3 = inlined_call_operand.vmem [shape: bf16[16,512], index: 3, kind: output, shape index: {}]  }
   0x1   :  { %1979 = sst [smem:[#allocation7_spill]] %s1974_s0 }
   0x2   :  { %1980 = sst [smem:[#allocation8_spill]] %s1975_s1 }
   0x3   :  { %s1582_s12 = smov 0   ;;  %s1584_s13 = smov 0  }
   0x4   :  { %s1586_s14 = smov 0   ;;  %s1588_s15 = smov 0  }
   0x5   :  { %s1590_s16 = smov 0   ;;  %s1592_s17 = smov 0  }
   0x6   :  { %s1594_s18 = smov 0   ;;  %s1596_s19 = smov 0  }
   0x7   :  { %s1598_s20 = smov 0   ;;  %s1600_s21 = smov 0  }
   0x8   :  { %s1602_s22 = smov 0  }
   0x9 LB: > { %s1100_s23 = sadd.s32 4294967295, %s1559_s22   ;;  %s25_s24 = sadd.s32 1, %s1551_s20  ;;  %s1559_s22 = sphi %s1602_s22, %s13_s22   ;;  %s1555_s21 = sphi %s1600_s21, %s1997_s21   ;;  %s1551_s20 = sphi %s1598_s20, %s1996_s20   ;;  %s1547_s19 = sphi %s1596_s19, %s1995_s19   ;;  %s1543_s18 = sphi %s1594_s18, %s1994_s18   ;;  %s1539_s17 = sphi %s1592_s17, %s1993_s17   ;;  %s1535_s16 = sphi %s1590_s16, %s1992_s16   ;;  %s1531_s15 = sphi %s1588_s15, %s1991_s15   ;;  %s1527_s14 = sphi %s1586_s14, %s1990_s14   ;;  %s1523_s13 = sphi %s1584_s13, %s1989_s13   ;;  %s1519_s12 = sphi %s1582_s12, %s1988_s12  }
   0xa   : > { %p26_p0 = scmp.ge.s32.totalorder %s25_s24, 6  ;;  %s28_s25 = sadd.s32 1, %s1555_s21 }
   0xb   : > { %s41_s26 = sadd.s32 1, %s1539_s17  ;;  %p48_p1 = scmp.ne.s32.totalorder %s1539_s17, %s1535_s16 }
   0xc   : > { %s1999_s24 = smov (%p26_p0, %s25_s24), 0  ;;  %s2001_s25 = smov (!%p26_p0, %s28_s25), %s1555_s21 }
   0xd   : > { %s37_s27 = ssub.s32 %s1551_s20, %s1999_s24  ;;  %p49_p2 = scmp.eq.s32.totalorder %s1559_s22, 0 }
   0xe   : > { %p30_p3 = scmp.ge.s32.totalorder %s2001_s25, 2  ;;  %p39_p4 = scmp.eq.s32.totalorder %s37_s27, 0 }
   0xf   : > { %p1649_p5 = por %p49_p2, %p48_p1  ;;  %s69_s29 = sadd.s32 1, %s1531_s15 }
  0x10   : > { %s2003_s25 = smov (%p30_p3, %s2001_s25), 0  ;;  %p76_p6 = scmp.ne.s32.totalorder %s1531_s15, %s1527_s14 }
  0x11   : > { %1982 = sst [smem:[#allocation6_spill]] %s2003_s25  ;;  %s65_s4 = ssub.s32 %s1555_s21, %s2003_s25 }
  0x12   : > { %s1657_s30 = scalar_select %p39_p4, %s1539_s17, %s41_s26  }
  0x13   : > { %s66_s5 = sor.u32 %s65_s4, %s37_s27  ;;  %p121_p7 = scmp.eq.s32.totalorder %s65_s4, 0 }
  0x14   : > { %p67_p8 = scmp.eq.s32.totalorder %s66_s5, 0  ;;  %p1663_p9 = por %p76_p6, %p49_p2 }
  0x15   : > { %s123_s7 = sadd.s32 1, %s1523_s13  ;;  %p133_p10 = scmp.ne.s32.totalorder %s1523_s13, %s1519_s12 }
  0x16   : > { %s1671_s8 = scalar_select %p67_p8, %s1531_s15, %s69_s29  }
  0x17   : > { %s1674_s9 = scalar_select %p121_p7, %s1523_s13, %s123_s7  }
  0x18   : > { %p134_p11 = scmp.eq.s32.totalorder %s1100_s23, 11  ;;  %p1103_p13 = scmp.ge.s32.totalorder %s1559_s22, 12 }
  0x1a   : > { %p1676_p12 = por %p134_p11, %p133_p10  ;;  %156 = sbr.rel (%p1103_p13) target bundleno = 102 (0x66), region = 16 }
  0x1f   : > { %159 = sbr.rel (!%p1649_p5) target bundleno = 44 (0x2c), region = 20  ;;  %s161_s11 = sand.u32 (%p1649_p5), 1, %s1539_s17  }
  0x20   : > { %s1326_s26 = smul.u32 (%p1649_p5), 12, %s1551_s20  ;;  %s1985_s0 = sld [smem:[#allocation7_spill]] (%p1649_p5) }
  0x21   : > { %s1380_s27 = smul.u32 (%p1649_p5), 24, %s161_s11 }
  0x23   : > { %s163_s23 = scalar_lea.vmem (%p1649_p5), [#allocation3], %s1380_s27 }
  0x26   : > { %s169_s5 = scalar_lea.vmem %s1985_s0, %s1326_s26 }
  0x27   : > { %v184_v0 = vld [vmem:[%s169_s5] sm:$0xff]  ;;  %v186_v1 = vld [vmem:[%s169_s5 + $0x48] sm:$0xff]  ;;  %v1107_v3 = vld [vmem:[%s169_s5 + $0x50] sm:$0xf] }
  0x28   : > { %v1105_v2 = vld [vmem:[%s169_s5 + $0x8] sm:$0xf]  ;;  %185 = vst [vmem:[%s163_s23] sm:$0xff] %v184_v0 }
  0x29   : > { %187 = vst [vmem:[%s163_s23 + $0xc] sm:$0xff] %v186_v1 }
  0x2a   : > { %1106 = vst [vmem:[%s163_s23 + $0x8] sm:$0xf] %v1105_v2 }
  0x2b   : > { %1108 = vst [vmem:[%s163_s23 + $0x14] sm:$0xf] %v1107_v3 }
  0x2c PF: > { %205 = sbr.rel (!%p1663_p9) target bundleno = 102 (0x66), region = 46  ;;  %s207_s28 = sand.u32 (%p1663_p9), 1, %s1531_s15  }
  0x2d   : > { %s1381_s7 = smul.u32 (%p1663_p9), 384, %s207_s28  ;;  %s1109_s11 = sshll.u32 (%p1663_p9), %s1555_s21, 1 }
  0x2e   : > { %s1327_s26 = smul.u32 (%p1663_p9), 192, %s1551_s20  ;;  %s1986_s1 = sld [smem:[#allocation8_spill]] (%p1663_p9) }
  0x2f   : > { %s1701_s6 = scalar_lea.vmem (%p1663_p9), [#allocation4], %s1381_s7 }
  0x30   : > { %s213_s29 = sadd.s32 (%p1663_p9), %s1327_s26, %s1109_s11 }
  0x31   : > { %s1111_s4 = sshll.u32 %s213_s29, 2 }
  0x34   : > { %s1696_s5 = scalar_lea.vmem %s1986_s1, %s1111_s4 }
  0x35   : > { %v338_v4 = vld [vmem:[%s1696_s5] sm:$0xff]  ;;  %v340_v5 = vld [vmem:[%s1696_s5 + $0x10] sm:$0xff] }
  0x36   : > { %v342_v6 = vld [vmem:[%s1696_s5 + $0x20] sm:$0xff]  ;;  %339 = vst [vmem:[%s1701_s6] sm:$0xff] %v338_v4  ;;  %v344_v7 = vld [vmem:[%s1696_s5 + $0x30] sm:$0xff] }
  0x37   : > { %341 = vst [vmem:[%s1701_s6 + $0x8] sm:$0xff] %v340_v5  ;;  %v346_v8 = vld [vmem:[%s1696_s5 + $0x40] sm:$0xff]  ;;  %v348_v9 = vld [vmem:[%s1696_s5 + $0x50] sm:$0xff] }
  0x38   : > { %343 = vst [vmem:[%s1701_s6 + $0x10] sm:$0xff] %v342_v6  ;;  %v350_v10 = vld [vmem:[%s1696_s5 + $0x60] sm:$0xff]  ;;  %v352_v11 = vld [vmem:[%s1696_s5 + $0x70] sm:$0xff] }
  0x39   : > { %345 = vst [vmem:[%s1701_s6 + $0x18] sm:$0xff] %v344_v7  ;;  %v354_v12 = vld [vmem:[%s1696_s5 + $0x80] sm:$0xff]  ;;  %v356_v13 = vld [vmem:[%s1696_s5 + $0x90] sm:$0xff] }
  0x3a   : > { %347 = vst [vmem:[%s1701_s6 + $0x20] sm:$0xff] %v346_v8  ;;  %v358_v14 = vld [vmem:[%s1696_s5 + $0xa0] sm:$0xff]  ;;  %v360_v15 = vld [vmem:[%s1696_s5 + $0xb0] sm:$0xff] }
  0x3b   : > { %349 = vst [vmem:[%s1701_s6 + $0x28] sm:$0xff] %v348_v9  ;;  %v362_v16 = vld [vmem:[%s1696_s5 + $0xc0] sm:$0xff]  ;;  %v364_v17 = vld [vmem:[%s1696_s5 + $0xd0] sm:$0xff] }
  0x3c   : > { %351 = vst [vmem:[%s1701_s6 + $0x30] sm:$0xff] %v350_v10  ;;  %v366_v18 = vld [vmem:[%s1696_s5 + $0xe0] sm:$0xff]  ;;  %v368_v19 = vld [vmem:[%s1696_s5 + $0xf0] sm:$0xff] }
  0x3d   : > { %353 = vst [vmem:[%s1701_s6 + $0x38] sm:$0xff] %v352_v11  ;;  %v370_v20 = vld [vmem:[%s1696_s5 + $0x100] sm:$0xff]  ;;  %v372_v21 = vld [vmem:[%s1696_s5 + $0x110] sm:$0xff] }
  0x3e   : > { %355 = vst [vmem:[%s1701_s6 + $0x40] sm:$0xff] %v354_v12  ;;  %v374_v22 = vld [vmem:[%s1696_s5 + $0x120] sm:$0xff]  ;;  %v376_v23 = vld [vmem:[%s1696_s5 + $0x130] sm:$0xff] }
  0x3f   : > { %357 = vst [vmem:[%s1701_s6 + $0x48] sm:$0xff] %v356_v13  ;;  %v378_v24 = vld [vmem:[%s1696_s5 + $0x140] sm:$0xff]  ;;  %v380_v25 = vld [vmem:[%s1696_s5 + $0x150] sm:$0xff] }
  0x40   : > { %359 = vst [vmem:[%s1701_s6 + $0x50] sm:$0xff] %v358_v14  ;;  %v382_v26 = vld [vmem:[%s1696_s5 + $0x160] sm:$0xff]  ;;  %v384_v27 = vld [vmem:[%s1696_s5 + $0x170] sm:$0xff] }
  0x41   : > { %361 = vst [vmem:[%s1701_s6 + $0x58] sm:$0xff] %v360_v15  ;;  %v386_v28 = vld [vmem:[%s1696_s5 + $0x180] sm:$0xff]  ;;  %v388_v29 = vld [vmem:[%s1696_s5 + $0x190] sm:$0xff] }
  0x42   : > { %363 = vst [vmem:[%s1701_s6 + $0x60] sm:$0xff] %v362_v16  ;;  %v390_v30 = vld [vmem:[%s1696_s5 + $0x1a0] sm:$0xff]  ;;  %v392_v31 = vld [vmem:[%s1696_s5 + $0x1b0] sm:$0xff] }
  0x43   : > { %365 = vst [vmem:[%s1701_s6 + $0x68] sm:$0xff] %v364_v17  ;;  %v394_v32 = vld [vmem:[%s1696_s5 + $0x1c0] sm:$0xff]  ;;  %v396_v33 = vld [vmem:[%s1696_s5 + $0x1d0] sm:$0xff] }
  0x44   : > { %367 = vst [vmem:[%s1701_s6 + $0x70] sm:$0xff] %v366_v18  ;;  %v398_v34 = vld [vmem:[%s1696_s5 + $0x1e0] sm:$0xff]  ;;  %v400_v35 = vld [vmem:[%s1696_s5 + $0x1f0] sm:$0xff] }
  0x45   : > { %369 = vst [vmem:[%s1701_s6 + $0x78] sm:$0xff] %v368_v19  ;;  %v402_v36 = vld [vmem:[%s1696_s5 + $0x200] sm:$0xff]  ;;  %v404_v37 = vld [vmem:[%s1696_s5 + $0x210] sm:$0xff] }
  0x46   : > { %371 = vst [vmem:[%s1701_s6 + $0x80] sm:$0xff] %v370_v20  ;;  %v406_v38 = vld [vmem:[%s1696_s5 + $0x220] sm:$0xff]  ;;  %v408_v39 = vld [vmem:[%s1696_s5 + $0x230] sm:$0xff] }
  0x47   : > { %373 = vst [vmem:[%s1701_s6 + $0x88] sm:$0xff] %v372_v21  ;;  %v410_v40 = vld [vmem:[%s1696_s5 + $0x240] sm:$0xff]  ;;  %v412_v41 = vld [vmem:[%s1696_s5 + $0x250] sm:$0xff] }
  0x48   : > { %375 = vst [vmem:[%s1701_s6 + $0x90] sm:$0xff] %v374_v22  ;;  %v414_v42 = vld [vmem:[%s1696_s5 + $0x260] sm:$0xff]  ;;  %v416_v43 = vld [vmem:[%s1696_s5 + $0x270] sm:$0xff] }
  0x49   : > { %377 = vst [vmem:[%s1701_s6 + $0x98] sm:$0xff] %v376_v23  ;;  %v418_v44 = vld [vmem:[%s1696_s5 + $0x280] sm:$0xff]  ;;  %v420_v45 = vld [vmem:[%s1696_s5 + $0x290] sm:$0xff] }
  0x4a   : > { %379 = vst [vmem:[%s1701_s6 + $0xa0] sm:$0xff] %v378_v24  ;;  %v422_v46 = vld [vmem:[%s1696_s5 + $0x2a0] sm:$0xff]  ;;  %v424_v47 = vld [vmem:[%s1696_s5 + $0x2b0] sm:$0xff] }
  0x4b   : > { %381 = vst [vmem:[%s1701_s6 + $0xa8] sm:$0xff] %v380_v25  ;;  %v426_v48 = vld [vmem:[%s1696_s5 + $0x2c0] sm:$0xff]  ;;  %v428_v49 = vld [vmem:[%s1696_s5 + $0x2d0] sm:$0xff] }
  0x4c   : > { %383 = vst [vmem:[%s1701_s6 + $0xb0] sm:$0xff] %v382_v26  ;;  %v430_v50 = vld [vmem:[%s1696_s5 + $0x2e0] sm:$0xff]  ;;  %v432_v51 = vld [vmem:[%s1696_s5 + $0x2f0] sm:$0xff] }
  0x4d   : > { %385 = vst [vmem:[%s1701_s6 + $0xb8] sm:$0xff] %v384_v27 }
  0x4e   : > { %387 = vst [vmem:[%s1701_s6 + $0xc0] sm:$0xff] %v386_v28 }
  0x4f   : > { %389 = vst [vmem:[%s1701_s6 + $0xc8] sm:$0xff] %v388_v29 }
  0x50   : > { %391 = vst [vmem:[%s1701_s6 + $0xd0] sm:$0xff] %v390_v30 }
  0x51   : > { %393 = vst [vmem:[%s1701_s6 + $0xd8] sm:$0xff] %v392_v31 }
  0x52   : > { %395 = vst [vmem:[%s1701_s6 + $0xe0] sm:$0xff] %v394_v32 }
  0x53   : > { %397 = vst [vmem:[%s1701_s6 + $0xe8] sm:$0xff] %v396_v33 }
  0x54   : > { %399 = vst [vmem:[%s1701_s6 + $0xf0] sm:$0xff] %v398_v34 }
  0x55   : > { %401 = vst [vmem:[%s1701_s6 + $0xf8] sm:$0xff] %v400_v35 }
  0x56   : > { %403 = vst [vmem:[%s1701_s6 + $0x100] sm:$0xff] %v402_v36 }
  0x57   : > { %405 = vst [vmem:[%s1701_s6 + $0x108] sm:$0xff] %v404_v37 }
  0x58   : > { %407 = vst [vmem:[%s1701_s6 + $0x110] sm:$0xff] %v406_v38 }
  0x59   : > { %409 = vst [vmem:[%s1701_s6 + $0x118] sm:$0xff] %v408_v39 }
  0x5a   : > { %411 = vst [vmem:[%s1701_s6 + $0x120] sm:$0xff] %v410_v40 }
  0x5b   : > { %413 = vst [vmem:[%s1701_s6 + $0x128] sm:$0xff] %v412_v41 }
  0x5c   : > { %415 = vst [vmem:[%s1701_s6 + $0x130] sm:$0xff] %v414_v42 }
  0x5d   : > { %417 = vst [vmem:[%s1701_s6 + $0x138] sm:$0xff] %v416_v43 }
  0x5e   : > { %419 = vst [vmem:[%s1701_s6 + $0x140] sm:$0xff] %v418_v44 }
  0x5f   : > { %421 = vst [vmem:[%s1701_s6 + $0x148] sm:$0xff] %v420_v45 }
  0x60   : > { %423 = vst [vmem:[%s1701_s6 + $0x150] sm:$0xff] %v422_v46 }
  0x61   : > { %425 = vst [vmem:[%s1701_s6 + $0x158] sm:$0xff] %v424_v47 }
  0x62   : > { %427 = vst [vmem:[%s1701_s6 + $0x160] sm:$0xff] %v426_v48 }
  0x63   : > { %429 = vst [vmem:[%s1701_s6 + $0x168] sm:$0xff] %v428_v49 }
  0x64   : > { %431 = vst [vmem:[%s1701_s6 + $0x170] sm:$0xff] %v430_v50 }
  0x65   : > { %433 = vst [vmem:[%s1701_s6 + $0x178] sm:$0xff] %v432_v51 }
  0x66 PF: > { %p1112_p0 = scmp.ge.s32.totalorder %s1559_s22, 1  ;;  %p446_p1 = scmp.lt.s32.totalorder %s1559_s22, 13 }
  0x68   : > { %p447_p2 = pnand %p1112_p0, %p446_p1 }
  0x69   : > { %s453_s0 = sand.u32 (!%p447_p2), 1, %s1535_s16   ;;  %s460_s23 = sand.u32 (!%p447_p2), 1, %s1527_s14  }
  0x6a   : > { %450 = sbr.rel (%p447_p2) target bundleno = 352 (0x160), region = 88  ;;  %s487_s7 = sand.u32 (!%p447_p2), 1, %s1519_s12  }
  0x6b   : > { %s1382_s28 = smul.u32 (!%p447_p2), 24, %s453_s0  ;;  %s1113_s26 = sshll.u32 (!%p447_p2), %s487_s7, 4 }
  0x6c   : > { %s1383_s11 = smul.u32 (!%p447_p2), 384, %s460_s23  ;;  %s1114_s29 = sshll.u32 (!%p447_p2), %s1547_s19, 1 }
  0x6d   : > { %p495_p3 = scmp.lt.s32.totalorder (!%p447_p2), %s1114_s29, 3  ;;  %s1808_s6 = scalar_lea.vmem (!%p447_p2), [#allocation3], %s1382_s28 }
  0x6e   : > { %s1810_s1 = scalar_lea.vmem (!%p447_p2), [#allocation4], %s1383_s11  ;;  %s1812_s25 = scalar_lea.vmem (!%p447_p2), [#allocation5], %s1113_s26 }
  0x6f   : > { %s2005_s29 = smov (!%p495_p3, %s1114_s29), 3  ;;  %p1115_p4 = scmp.ne.s32.totalorder %s1543_s18, 0 }
  0x70   : > { %s497_s5 = scalar_lea.vmem %s1976_s2, %s2005_s29 }
  0x71   : > { %504 = sbr.rel (%p1115_p4) target bundleno = 123 (0x7b), region = 100 }
  0x76   : > { %v1561_v52 = vmov 0.0  }
  0x77   : > { %505 = vst [vmem:[#allocation2 + $0x10] sm:$0xff] %v1561_v52 }
  0x78   : > { %506 = vst [vmem:[#allocation2] sm:$0xff] %v1561_v52 }
  0x79   : > { %507 = vst [vmem:[#allocation2 + $0x18] sm:$0xff] %v1561_v52 }
  0x7a   : > { %508 = vst [vmem:[#allocation2 + $0x8] sm:$0xff] %v1561_v52 }
  0x7b PF: > { %v1186_v53 = vld [vmem:[%s1810_s1 + $0x70] sm:$0xf]  ;;  %v1346_v54 = vld [vmem:[%s1810_s1 + $0x74] sm:$0xf0]  ;;  %v1178_v62 = vld [vmem:[%s1810_s1 + $0x60] sm:$0xf] }
  0x7c   : > { %v1250_v55 = vld [vmem:[%s1810_s1 + $0xf0] sm:$0xf]  ;;  %v1187_v56 = vor.u32 %v1346_v54, %v1186_v53  ;;  %v1362_v57 = vld [vmem:[%s1810_s1 + $0xf4] sm:$0xf0]  ;;  %v1344_v63 = vld [vmem:[%s1810_s1 + $0x64] sm:$0xf0] }
  0x7d   : > { %v1314_v58 = vld [vmem:[%s1810_s1 + $0x170] sm:$0xf]  ;;  %v1378_v59 = vld [vmem:[%s1810_s1 + $0x174] sm:$0xf0]  ;;  %v1251_v60 = vor.u32 %v1362_v57, %v1250_v55  ;;  %v1242_v0 = vld [vmem:[%s1810_s1 + $0xe0] sm:$0xf]  ;;  %v1179_v1 = vor.u32 %v1344_v63, %v1178_v62 }
  0x7e   : > { %v1315_v61 = vor.u32 %v1378_v59, %v1314_v58  ;;  %821 = vmatpush.bf16.msra.mxu0 %v1187_v56  ;;  %v1360_v2 = vld [vmem:[%s1810_s1 + $0xe4] sm:$0xf0]  ;;  %v1306_v3 = vld [vmem:[%s1810_s1 + $0x160] sm:$0xf]  ;;  %v1170_v7 = vld [vmem:[%s1810_s1 + $0x50] sm:$0xf] }
  0x7f   : > { %v1376_v4 = vld [vmem:[%s1810_s1 + $0x164] sm:$0xf0]  ;;  %835 = vmatpush.bf16.msra.mxu1 %v1251_v60  ;;  %v1243_v5 = vor.u32 %v1360_v2, %v1242_v0  ;;  %v1342_v8 = vld [vmem:[%s1810_s1 + $0x54] sm:$0xf0]  ;;  %v1234_v9 = vld [vmem:[%s1810_s1 + $0xd0] sm:$0xf] }
  0x80   : > { %849 = vmatpush.bf16.msra.mxu2 %v1315_v61  ;;  %v1307_v6 = vor.u32 %v1376_v4, %v1306_v3  ;;  %v1358_v10 = vld [vmem:[%s1810_s1 + $0xd4] sm:$0xf0]  ;;  %v1298_v11 = vld [vmem:[%s1810_s1 + $0x150] sm:$0xf]  ;;  %v1171_v13 = vor.u32 %v1342_v8, %v1170_v7  ;;  %v1162_v14 = vld [vmem:[%s1810_s1 + $0x40] sm:$0xf] }
  0x81   : > { %v1374_v12 = vld [vmem:[%s1810_s1 + $0x154] sm:$0xf0]  ;;  %v1340_v15 = vld [vmem:[%s1810_s1 + $0x44] sm:$0xf0]  ;;  %v1235_v16 = vor.u32 %v1358_v10, %v1234_v9  ;;  %v1226_v18 = vld [vmem:[%s1810_s1 + $0xc0] sm:$0xf] }
  0x82   : > { %822 = vmatpush.bf16.msra.mxu0 %v1179_v1  ;;  %v1299_v17 = vor.u32 %v1374_v12, %v1298_v11  ;;  %v1345_v19 = vld [vmem:[%s1810_s1 + $0x74] sm:$0xf]  ;;  %v1188_v20 = vld [vmem:[%s1810_s1 + $0x78] sm:$0xf0]  ;;  %v1356_v21 = vld [vmem:[%s1810_s1 + $0xc4] sm:$0xf0]  ;;  %v1163_v26 = vor.u32 %v1340_v15, %v1162_v14 }
  0x83   : > { %836 = vmatpush.bf16.msra.mxu1 %v1243_v5  ;;  %v1290_v22 = vld [vmem:[%s1810_s1 + $0x140] sm:$0xf]  ;;  %v1372_v23 = vld [vmem:[%s1810_s1 + $0x144] sm:$0xf0]  ;;  %v1191_v24 = vor.u32 %v1345_v19, %v1188_v20  ;;  %v1343_v25 = vld [vmem:[%s1810_s1 + $0x64] sm:$0xf]  ;;  %v1227_v30 = vor.u32 %v1356_v21, %v1226_v18 }
  0x84   : > { %850 = vmatpush.bf16.msra.mxu2 %v1307_v6  ;;  %v1154_v27 = vld [vmem:[%s1810_s1 + $0x30] sm:$0xf]  ;;  %v1338_v28 = vld [vmem:[%s1810_s1 + $0x34] sm:$0xf0]  ;;  %v1180_v29 = vld [vmem:[%s1810_s1 + $0x68] sm:$0xf0]  ;;  %v1291_v31 = vor.u32 %v1372_v23, %v1290_v22 }
  0x85   : > { %863 = vmatpush.bf16.msra.mxu3 %v1191_v24  ;;  %v1218_v32 = vld [vmem:[%s1810_s1 + $0xb0] sm:$0xf]  ;;  %v1354_v33 = vld [vmem:[%s1810_s1 + $0xb4] sm:$0xf0]  ;;  %v1183_v35 = vor.u32 %v1343_v25, %v1180_v29  ;;  %v1341_v37 = vld [vmem:[%s1810_s1 + $0x54] sm:$0xf]  ;;  %v1155_v39 = vor.u32 %v1338_v28, %v1154_v27 }
  0x86   : > { %823 = vmatpush.bf16.msra.mxu0 %v1171_v13  ;;  %v1282_v34 = vld [vmem:[%s1810_s1 + $0x130] sm:$0xf]  ;;  %v1370_v36 = vld [vmem:[%s1810_s1 + $0x134] sm:$0xf0]  ;;  %v1172_v38 = vld [vmem:[%s1810_s1 + $0x58] sm:$0xf0]  ;;  %v1219_v43 = vor.u32 %v1354_v33, %v1218_v32 }
  0x87   : > { %837 = vmatpush.bf16.msra.mxu1 %v1235_v16  ;;  %v1146_v40 = vld [vmem:[%s1810_s1 + $0x20] sm:$0xf]  ;;  %v1336_v41 = vld [vmem:[%s1810_s1 + $0x24] sm:$0xf0]  ;;  %v1175_v42 = vor.u32 %v1341_v37, %v1172_v38  ;;  %v1283_v44 = vor.u32 %v1370_v36, %v1282_v34  ;;  %v1339_v46 = vld [vmem:[%s1810_s1 + $0x44] sm:$0xf] }
  0x88   : > { %851 = vmatpush.bf16.msra.mxu2 %v1299_v17  ;;  %v1210_v45 = vld [vmem:[%s1810_s1 + $0xa0] sm:$0xf]  ;;  %v1164_v47 = vld [vmem:[%s1810_s1 + $0x48] sm:$0xf0]  ;;  %v1352_v48 = vld [vmem:[%s1810_s1 + $0xa4] sm:$0xf0]  ;;  %v1147_v51 = vor.u32 %v1336_v41, %v1146_v40 }
  0x89   : > { %864 = vmatpush.bf16.msra.mxu3 %v1183_v35  ;;  %v1274_v49 = vld [vmem:[%s1810_s1 + $0x120] sm:$0xf]  ;;  %v1368_v50 = vld [vmem:[%s1810_s1 + $0x124] sm:$0xf0]  ;;  %v1138_v52 = vld [vmem:[%s1810_s1 + $0x10] sm:$0xf]  ;;  %v1167_v54 = vor.u32 %v1339_v46, %v1164_v47  ;;  %v1211_v55 = vor.u32 %v1352_v48, %v1210_v45 }
  0x8a   : > { %824 = vmatpush.bf16.msra.mxu0 %v1163_v26  ;;  %v1334_v53 = vld [vmem:[%s1810_s1 + $0x14] sm:$0xf0]  ;;  %v1275_v56 = vor.u32 %v1368_v50, %v1274_v49  ;;  %v1202_v57 = vld [vmem:[%s1810_s1 + $0x90] sm:$0xf]  ;;  %v1337_v58 = vld [vmem:[%s1810_s1 + $0x34] sm:$0xf] }
  0x8b   : > { %838 = vmatpush.bf16.msra.mxu1 %v1227_v30  ;;  %v1156_v59 = vld [vmem:[%s1810_s1 + $0x38] sm:$0xf0]  ;;  %v1350_v60 = vld [vmem:[%s1810_s1 + $0x94] sm:$0xf0]  ;;  %v1266_v61 = vld [vmem:[%s1810_s1 + $0x110] sm:$0xf]  ;;  %v1139_v63 = vor.u32 %v1334_v53, %v1138_v52 }
  0x8c   : > { %852 = vmatpush.bf16.msra.mxu2 %v1291_v31  ;;  %v1366_v62 = vld [vmem:[%s1810_s1 + $0x114] sm:$0xf0]  ;;  %v1130_v0 = vld [vmem:[%s1810_s1] sm:$0xf]  ;;  %v1332_v1 = vld [vmem:[%s1810_s1 + $0x4] sm:$0xf0]  ;;  %v1159_v3 = vor.u32 %v1337_v58, %v1156_v59  ;;  %v1203_v4 = vor.u32 %v1350_v60, %v1202_v57 }
  0x8d   : > { %865 = vmatpush.bf16.msra.mxu3 %v1175_v42  ;;  %v1194_v2 = vld [vmem:[%s1810_s1 + $0x80] sm:$0xf]  ;;  %v1267_v5 = vor.u32 %v1366_v62, %v1266_v61  ;;  %v1348_v6 = vld [vmem:[%s1810_s1 + $0x84] sm:$0xf0]  ;;  %v1335_v7 = vld [vmem:[%s1810_s1 + $0x24] sm:$0xf]  ;;  %v1131_v15 = vor.u32 %v1332_v1, %v1130_v0 }
  0x8e   : > { %825 = vmatpush.bf16.msra.mxu0 %v1155_v39  ;;  %v1148_v8 = vld [vmem:[%s1810_s1 + $0x28] sm:$0xf0]  ;;  %v1258_v9 = vld [vmem:[%s1810_s1 + $0x100] sm:$0xf]  ;;  %v1364_v10 = vld [vmem:[%s1810_s1 + $0x104] sm:$0xf0]  ;;  %v1195_v20 = vor.u32 %v1348_v6, %v1194_v2 }
  0x8f   : > { %839 = vmatpush.bf16.msra.mxu1 %v1219_v43  ;;  %v1361_v11 = vld [vmem:[%s1810_s1 + $0xf4] sm:$0xf]  ;;  %v1252_v12 = vld [vmem:[%s1810_s1 + $0xf8] sm:$0xf0]  ;;  %v1126_v16 = vld [vmem:[%s1808_s6 + $0x8] sm:$0xf]  ;;  %v1151_v17 = vor.u32 %v1335_v7, %v1148_v8  ;;  %v1259_v21 = vor.u32 %v1364_v10, %v1258_v9 }
  0x90   : > { %853 = vmatpush.bf16.msra.mxu2 %v1283_v44  ;;  %v1377_v13 = vld [vmem:[%s1810_s1 + $0x174] sm:$0xf]  ;;  %v1316_v14 = vld [vmem:[%s1810_s1 + $0x178] sm:$0xf0]  ;;  %v1118_v18 = vld [vmem:[%s1808_s6] sm:$0xf]  ;;  %v1255_v25 = vor.u32 %v1361_v11, %v1252_v12 }
  0x91   : > { %866 = vmatpush.bf16.msra.mxu3 %v1167_v54  ;;  %v1329_v19 = vld [vmem:[%s1808_s6 + $0x8] sm:$0xf0]  ;;  %v1330_v22 = vld [vmem:[%s1808_s6 + $0x10] sm:$0xf0]  ;;  %v1328_v23 = vld [vmem:[%s1808_s6 + $0x4] sm:$0xf]  ;;  %v1319_v26 = vor.u32 %v1377_v13, %v1316_v14 }
  0x92   : > { %826 = vmatpush.bf16.msra.mxu0 %v1147_v51  ;;  %v1120_v24 = vld [vmem:[%s1808_s6 + $0xc] sm:$0xf0]  ;;  %v1359_v27 = vld [vmem:[%s1810_s1 + $0xe4] sm:$0xf]  ;;  %v1333_v28 = vld [vmem:[%s1810_s1 + $0x14] sm:$0xf]  ;;  %v1119_v33 = vor.u32 %v1329_v19, %v1118_v18  ;;  %v1891_v34 = vor.u32 %v1330_v22, %v1126_v16 }
  0x93   : > { %840 = vmatpush.bf16.msra.mxu1 %v1211_v55  ;;  %v1140_v29 = vld [vmem:[%s1810_s1 + $0x18] sm:$0xf0]  ;;  %v1244_v30 = vld [vmem:[%s1810_s1 + $0xe8] sm:$0xf0]  ;;  %v1375_v31 = vld [vmem:[%s1810_s1 + $0x164] sm:$0xf]  ;;  %v1893_v35 = vor.u32 %v1328_v23, %v1120_v24 }
  0x94   : > { %854 = vmatpush.bf16.msra.mxu2 %v1275_v56  ;;  %v1308_v32 = vld [vmem:[%s1810_s1 + $0x168] sm:$0xf0]  ;;  %v1143_v36 = vor.u32 %v1333_v28, %v1140_v29  ;;  %v1247_v37 = vor.u32 %v1359_v27, %v1244_v30  ;;  %v1357_v39 = vld [vmem:[%s1810_s1 + $0xd4] sm:$0xf]  ;;  %v1331_v40 = vld [vmem:[%s1810_s1 + $0x4] sm:$0xf] }
  0x95   : > { %867 = vmatpush.bf16.msra.mxu3 %v1159_v3  ;;  %v1311_v38 = vor.u32 %v1375_v31, %v1308_v32  ;;  %v1132_v41 = vld [vmem:[%s1810_s1 + $0x8] sm:$0xf0]  ;;  %v1236_v42 = vld [vmem:[%s1810_s1 + $0xd8] sm:$0xf0]  ;;  %v1373_v43 = vld [vmem:[%s1810_s1 + $0x154] sm:$0xf] }
  0x96   : > { %827 = vmatpush.bf16.msra.mxu0 %v1139_v63  ;;  %v1300_v44 = vld [vmem:[%s1810_s1 + $0x158] sm:$0xf0]  ;;  %v1135_v45 = vor.u32 %v1331_v40, %v1132_v41  ;;  %v1239_v46 = vor.u32 %v1357_v39, %v1236_v42  ;;  %v1355_v48 = vld [vmem:[%s1810_s1 + $0xc4] sm:$0xf]  ;;  %v1228_v49 = vld [vmem:[%s1810_s1 + $0xc8] sm:$0xf0] }
  0x97   : > { %841 = vmatpush.bf16.msra.mxu1 %v1203_v4  ;;  %v1303_v47 = vor.u32 %v1373_v43, %v1300_v44  ;;  %v1371_v50 = vld [vmem:[%s1810_s1 + $0x144] sm:$0xf]  ;;  %v1292_v51 = vld [vmem:[%s1810_s1 + $0x148] sm:$0xf0]  ;;  %v1231_v52 = vor.u32 %v1355_v48, %v1228_v49  ;;  %v1353_v54 = vld [vmem:[%s1810_s1 + $0xb4] sm:$0xf] }
  0x98   : > { %855 = vmatpush.bf16.msra.mxu2 %v1267_v5  ;;  %v1295_v53 = vor.u32 %v1371_v50, %v1292_v51  ;;  %v1220_v55 = vld [vmem:[%s1810_s1 + $0xb8] sm:$0xf0]  ;;  %v1369_v56 = vld [vmem:[%s1810_s1 + $0x134] sm:$0xf]  ;;  %v1351_v60 = vld [vmem:[%s1810_s1 + $0xa4] sm:$0xf] }
  0x99   : > { %868 = vmatpush.bf16.msra.mxu3 %v1151_v17  ;;  %v1284_v57 = vld [vmem:[%s1810_s1 + $0x138] sm:$0xf0]  ;;  %v1223_v58 = vor.u32 %v1353_v54, %v1220_v55  ;;  %v1212_v61 = vld [vmem:[%s1810_s1 + $0xa8] sm:$0xf0]  ;;  %v1367_v62 = vld [vmem:[%s1810_s1 + $0x124] sm:$0xf] }
  0x9a   : > { %828 = vmatpush.bf16.msra.mxu0 %v1131_v15  ;;  %v1287_v59 = vor.u32 %v1369_v56, %v1284_v57  ;;  %v1276_v63 = vld [vmem:[%s1810_s1 + $0x128] sm:$0xf0]  ;;  %v1215_v0 = vor.u32 %v1351_v60, %v1212_v61  ;;  %v1349_v2 = vld [vmem:[%s1810_s1 + $0x94] sm:$0xf]  ;;  %v1204_v3 = vld [vmem:[%s1810_s1 + $0x98] sm:$0xf0] }
  0x9b   : > { %842 = vmatpush.bf16.msra.mxu1 %v1195_v20  ;;  %v1279_v1 = vor.u32 %v1367_v62, %v1276_v63  ;;  %v1365_v4 = vld [vmem:[%s1810_s1 + $0x114] sm:$0xf]  ;;  %v1268_v5 = vld [vmem:[%s1810_s1 + $0x118] sm:$0xf0]  ;;  %v1207_v6 = vor.u32 %v1349_v2, %v1204_v3  ;;  %v1347_v8 = vld [vmem:[%s1810_s1 + $0x84] sm:$0xf] }
  0x9c   : > { %856 = vmatpush.bf16.msra.mxu2 %v1259_v21  ;;  %v1271_v7 = vor.u32 %v1365_v4, %v1268_v5  ;;  %v1196_v9 = vld [vmem:[%s1810_s1 + $0x88] sm:$0xf0]  ;;  %v1363_v10 = vld [vmem:[%s1810_s1 + $0x104] sm:$0xf]  ;;  %v510_v32 = vld [vmem:[#allocation2] sm:$0xff]  ;;  %p1320_p5 = scmp.ne.s32.totalorder %s1543_s18, 5 }
  0x9d   : > { %829 = vmatmul.bf16.vlgmr.msra.gmra.mxu0 %v1119_v33  ;;  %869 = vmatpush.bf16.msra.mxu3 %v1143_v36  ;;  %v1260_v11 = vld [vmem:[%s1810_s1 + $0x108] sm:$0xf0]  ;;  %v1199_v12 = vor.u32 %v1347_v8, %v1196_v9  ;;  %v509_v17 = vld [vmem:[#allocation2 + $0x10] sm:$0xff] }
  0x9e   : > { %877 = vmatpush.bf16.msrb.mxu0 %v1255_v25  ;;  %843 = vmatmul.bf16.vlgmr.msra.gmra.mxu1 %v1893_v35  ;;  %v1263_v13 = vor.u32 %v1363_v10, %v1260_v11  ;;  %v511_v24 = vld [vmem:[#allocation2 + $0x18] sm:$0xff] }
  0x9f   : > { %891 = vmatpush.bf16.msrb.mxu1 %v1319_v26  ;;  %857 = vmatmul.bf16.vlgmr.msra.gmra.mxu2 %v1891_v34 }
  0xa1   : > { %870 = vmatpush.bf16.msra.mxu3 %v1135_v45 }
  0xa2   : > { %878 = vmatpush.bf16.msrb.mxu0 %v1247_v37 }
  0xa3   : > { %892 = vmatpush.bf16.msrb.mxu1 %v1311_v38  ;;  %v512_v38 = vld [vmem:[#allocation2 + $0x8] sm:$0xff] }
  0xa4   : > { %871 = vmatmul.bf16.vlgmr.msra.gmra.mxu3 %v1119_v33 }
  0xa6   : > { %879 = vmatpush.bf16.msrb.mxu0 %v1239_v46 }
  0xa7   : > { %893 = vmatpush.bf16.msrb.mxu1 %v1303_v47 }
  0xaa   : > { %880 = vmatpush.bf16.msrb.mxu0 %v1231_v52 }
  0xab   : > { %894 = vmatpush.bf16.msrb.mxu1 %v1295_v53 }
  0xae   : > { %881 = vmatpush.bf16.msrb.mxu0 %v1223_v58 }
  0xaf   : > { %895 = vmatpush.bf16.msrb.mxu1 %v1287_v59 }
  0xb2   : > { %882 = vmatpush.bf16.msrb.mxu0 %v1215_v0 }
  0xb3   : > { %896 = vmatpush.bf16.msrb.mxu1 %v1279_v1 }
  0xb6   : > { %883 = vmatpush.bf16.msrb.mxu0 %v1207_v6 }
  0xb7   : > { %897 = vmatpush.bf16.msrb.mxu1 %v1271_v7 }
  0xba   : > { %884 = vmatpush.bf16.msrb.mxu0 %v1199_v12 }
  0xbb   : > { %898 = vmatpush.bf16.msrb.mxu1 %v1263_v13 }
  0xbd   : > { %885 = vmatmul.bf16.vlgmr.msrb.gmra.mxu0 %v1893_v35 }
  0xbe   : > { %899 = vmatmul.bf16.vlgmr.msrb.gmra.mxu1 %v1891_v34 }
 0x11a   : > { %v830_v14 = vpop.f32.mrf.mxu0 }
 0x11b   : > { %v844_v15 = vpop.f32.mrf.mxu1 }
 0x11c   : > { %v845_v16 = vadd.f32 %v844_v15, %v830_v14 }
 0x122   : > { %v858_v18 = vpop.f32.mrf.mxu2  ;;  %v832_v20 = vpop.f32.mrf.mxu0 }
 0x123   : > { %v859_v19 = vadd.f32 %v858_v18, %v845_v16  ;;  %v846_v21 = vpop.f32.mrf.mxu1 }
 0x124   : > { %v847_v23 = vadd.f32 %v846_v21, %v832_v20 }
 0x125   : > { %v905_v22 = vadd.f32 %v859_v19, %v509_v17 }
 0x127   : > { %909 = vst [vmem:[#allocation2 + $0x10] sm:$0xff] %v905_v22  ;;  %v872_v28 = vpop.f32.mrf.mxu3 }
 0x12a   : > { %v860_v25 = vpop.f32.mrf.mxu2 }
 0x12b   : > { %v861_v26 = vadd.f32 %v860_v25, %v847_v23 }
 0x12d   : > { %v907_v27 = vadd.f32 %v861_v26, %v511_v24 }
 0x12f   : > { %911 = vst [vmem:[#allocation2 + $0x18] sm:$0xff] %v907_v27  ;;  %v874_v35 = vpop.f32.mrf.mxu3 }
 0x13a   : > { %v886_v29 = vpop.f32.mrf.mxu0 }
 0x13b   : > { %v900_v30 = vpop.f32.mrf.mxu1  ;;  %v887_v31 = vadd.f32 %v886_v29, %v872_v28 }
 0x13d   : > { %v901_v33 = vadd.f32 %v900_v30, %v887_v31 }
 0x13f   : > { %v906_v34 = vadd.f32 %v901_v33, %v510_v32 }
 0x141   : > { %910 = vst [vmem:[#allocation2] sm:$0xff] %v906_v34 }
 0x142   : > { %v888_v36 = vpop.f32.mrf.mxu0 }
 0x143   : > { %v889_v37 = vadd.f32 %v888_v36, %v874_v35  ;;  %v902_v39 = vpop.f32.mrf.mxu1 }
 0x145   : > { %v903_v40 = vadd.f32 %v902_v39, %v889_v37  ;;  %916 = sbr.rel (%p1320_p5) target bundleno = 344 (0x158), region = 104 }
 0x147   : > { %v908_v41 = vadd.f32 %v903_v40, %v512_v38 }
 0x149   : > { %912 = vst [vmem:[#allocation2 + $0x8] sm:$0xff] %v908_v41 }
 0x14a   : > { %v917_v42 = vld [vmem:[#allocation2 + $0x10] sm:$0xff]  ;;  %v918_v43 = vld [vmem:[#allocation2] sm:$0xff]  ;;  %v919_v47 = vld [vmem:[#allocation2 + $0x18] sm:$0xff] }
 0x14b   : > { %v921_v44 = vld [vmem:[%s497_s5] sm:$0x3] }
 0x14c   : > { %v923_v45 = vperm.slane %v921_v44, 0  ;;  %v924_v46 = vperm.slane %v921_v44, 1 }
 0x14e   : > { %v927_v49 = vadd.f32 %v923_v45, %v917_v42  ;;  %v928_v50 = vadd.f32 %v924_v46, %v918_v43  ;;  %v929_v51 = vadd.f32 %v923_v45, %v919_v47 }
 0x150   : > { %v920_v48 = vld [vmem:[#allocation2 + $0x8] sm:$0xff]  ;;  %v931_v53 = vmax.f32 %v927_v49, 0.0  ;;  %v932_v54 = vmax.f32 %v928_v50, 0.0  ;;  %v933_v55 = vmax.f32 %v929_v51, 0.0 }
 0x151   : > { %v930_v52 = vadd.f32 %v924_v46, %v920_v48 }
 0x152   : > { %v935_v57 = vpack.c.bf16 %v932_v54, %v931_v53 }
 0x153   : > { %v934_v56 = vmax.f32 %v930_v52, 0.0 }
 0x154   : > { %937 = vst [vmem:[%s1812_s25] sm:$0xff] %v935_v57 }
 0x155   : > { %v936_v58 = vpack.c.bf16 %v934_v56, %v933_v55 }
 0x157   : > { %938 = vst [vmem:[%s1812_s25 + $0x8] sm:$0xff] %v936_v58 }
 0x158 PF: > { %945 = sbr.rel (!%p1676_p12) target bundleno = 352 (0x160), region = 108  ;;  %s1379_s14 = sshll.u32 (%p1676_p12), %s1547_s19, 3 }
 0x159   : > { %s951_s0 = scalar_lea.vmem (%p1676_p12), %s1977_s3, %s1379_s14 }
 0x15b   : > { %v982_v59 = vld [vmem:[%s1812_s25] sm:$0xff] (%p1676_p12) }
 0x15c   : > { %983 = vst [vmem:[%s951_s0] sm:$0xff] (%p1676_p12), %v982_v59 }
 0x15e   : > { %v984_v60 = vld [vmem:[%s1812_s25 + $0x8] sm:$0xff] }
 0x15f   : > { %985 = vst [vmem:[%s951_s0 + $0x10] sm:$0xff] %v984_v60 }
 0x160 PF: > { %s13_s22 = sadd.s32 1, %s1559_s22   ;;  %s1987_s25 = sld [smem:[#allocation6_spill]] }
 0x161   : > { %p10_p6 = scmp.ge.s32.totalorder %s13_s22, 14   ;;  %s1988_s12 = smov %s1523_s13 }
 0x162   : > { %s1989_s13 = smov %s1674_s9  ;;  %s1990_s14 = smov %s1531_s15 }
 0x163   : > { %s1991_s15 = smov %s1671_s8  ;;  %s1992_s16 = smov %s1539_s17 }
 0x164   : > { %s1993_s17 = smov %s1657_s30  ;;  %s1994_s18 = smov %s1551_s20 }
 0x165   : > { %s1995_s19 = smov %s1555_s21  ;;  %s1996_s20 = smov %s1999_s24 }
 0x166   : > { %s1997_s21 = smov %s1987_s25  ;;  %12 = sbr.rel (!%p10_p6) target bundleno = 9 (0x9), region = 194 }

// kernel: _lambda_.37
= control target key start
LH: loop header
LB: loop body
LE: loop exit
PB: predicated region body
PF: predicated region fallthrough
CT: control target
= control target key end

     0   :  { %s1159_s12 = smov 0   ;;  %s1161_s13 = smov 0   ;;  %s1385_s0 = inlined_call_operand.vmem [shape: bf16[16,256], index: 0, kind: input, shape index: {}]   ;;  %s1386_s1 = inlined_call_operand.vmem [shape: bf16[256,512], index: 1, kind: input, shape index: {}]   ;;  %s1387_s2 = inlined_call_operand.vmem [shape: f32[1,512], index: 2, kind: input, shape index: {}]   ;;  %s1388_s3 = inlined_call_operand.vmem [shape: bf16[16,512], index: 3, kind: output, shape index: {}]  }
   0x1   :  { %s1163_s14 = smov 0   ;;  %s1165_s15 = smov 0  }
   0x2   :  { %s1167_s16 = smov 0  }
   0x3 LB: > { %s28_s17 = sadd.s32 1, %s1133_s15  ;;  %s870_s18 = sadd.s32 4294967295, %s1137_s16   ;;  %s1137_s16 = sphi %s1167_s16, %s13_s16   ;;  %s1133_s15 = sphi %s1165_s15, %s1393_s15   ;;  %s1129_s14 = sphi %s1163_s14, %s1392_s14   ;;  %s1125_s13 = sphi %s1161_s13, %s1391_s13   ;;  %s1121_s12 = sphi %s1159_s12, %s1390_s12  }
   0x4   : > { %p30_p0 = scmp.ge.s32.totalorder %s28_s17, 2  ;;  %p76_p1 = scmp.ne.s32.totalorder %s1125_s13, %s1121_s12 }
   0x5   : > { %p77_p2 = scmp.eq.s32.totalorder %s1137_s16, 0  ;;  %p134_p4 = scmp.eq.s32.totalorder %s870_s18, 1 }
   0x6   : > { %s1395_s17 = smov (%p30_p0, %s28_s17), 0  ;;  %s69_s20 = sadd.s32 1, %s1125_s13 }
   0x7   : > { %p78_p3 = por %p77_p2, %p76_p1  ;;  %s65_s19 = ssub.s32 %s1133_s15, %s1395_s17 }
   0x8   : > { %p67_p5 = scmp.eq.s32.totalorder %s65_s19, 0  ;;  %p1194_p6 = por %p134_p4, %p76_p1 }
   0x9   : > { %p874_p7 = scmp.ge.s32.totalorder %s1137_s16, 2 }
   0xa   : > { %s1199_s22 = scalar_select %p67_p5, %s1125_s13, %s69_s20  }
   0xb   : > { %171 = sbr.rel (%p874_p7) target bundleno = 52 (0x34), region = 20 }
  0x10   : > { %174 = sbr.rel (!%p78_p3) target bundleno = 52 (0x34), region = 24  ;;  %s176_s23 = sand.u32 (%p78_p3), 1, %s1125_s13  }
  0x11   : > { %s1023_s24 = sshll.u32 (%p78_p3), %s1133_s15, 3  ;;  %s875_s25 = sshll.u32 (%p78_p3), %s176_s23, 8 }
  0x12   : > { %s1207_s28 = scalar_lea.vmem (%p78_p3), %s1386_s1, %s1023_s24  ;;  %s1212_s29 = scalar_lea.vmem (%p78_p3), [#allocation3], %s875_s25 }
  0x13   : > { %v275_v0 = vld [vmem:[%s1207_s28] sm:$0xff] (%p78_p3)  ;;  %v277_v1 = vld [vmem:[%s1207_s28 + $0x10] sm:$0xff] (%p78_p3) }
  0x14   : > { %v279_v2 = vld [vmem:[%s1207_s28 + $0x20] sm:$0xff] (%p78_p3)  ;;  %276 = vst [vmem:[%s1212_s29] sm:$0xff] (%p78_p3), %v275_v0  ;;  %v281_v3 = vld [vmem:[%s1207_s28 + $0x30] sm:$0xff] (%p78_p3) }
  0x15   : > { %278 = vst [vmem:[%s1212_s29 + $0x8] sm:$0xff] %v277_v1  ;;  %v283_v4 = vld [vmem:[%s1207_s28 + $0x40] sm:$0xff]  ;;  %v285_v5 = vld [vmem:[%s1207_s28 + $0x50] sm:$0xff] }
  0x16   : > { %280 = vst [vmem:[%s1212_s29 + $0x10] sm:$0xff] %v279_v2  ;;  %v287_v6 = vld [vmem:[%s1207_s28 + $0x60] sm:$0xff]  ;;  %v289_v7 = vld [vmem:[%s1207_s28 + $0x70] sm:$0xff] }
  0x17   : > { %282 = vst [vmem:[%s1212_s29 + $0x18] sm:$0xff] %v281_v3  ;;  %v291_v8 = vld [vmem:[%s1207_s28 + $0x80] sm:$0xff]  ;;  %v293_v9 = vld [vmem:[%s1207_s28 + $0x90] sm:$0xff] }
  0x18   : > { %284 = vst [vmem:[%s1212_s29 + $0x20] sm:$0xff] %v283_v4  ;;  %v295_v10 = vld [vmem:[%s1207_s28 + $0xa0] sm:$0xff]  ;;  %v297_v11 = vld [vmem:[%s1207_s28 + $0xb0] sm:$0xff] }
  0x19   : > { %286 = vst [vmem:[%s1212_s29 + $0x28] sm:$0xff] %v285_v5  ;;  %v299_v12 = vld [vmem:[%s1207_s28 + $0xc0] sm:$0xff]  ;;  %v301_v13 = vld [vmem:[%s1207_s28 + $0xd0] sm:$0xff] }
  0x1a   : > { %288 = vst [vmem:[%s1212_s29 + $0x30] sm:$0xff] %v287_v6  ;;  %v303_v14 = vld [vmem:[%s1207_s28 + $0xe0] sm:$0xff]  ;;  %v305_v15 = vld [vmem:[%s1207_s28 + $0xf0] sm:$0xff] }
  0x1b   : > { %290 = vst [vmem:[%s1212_s29 + $0x38] sm:$0xff] %v289_v7  ;;  %v307_v16 = vld [vmem:[%s1207_s28 + $0x100] sm:$0xff]  ;;  %v309_v17 = vld [vmem:[%s1207_s28 + $0x110] sm:$0xff] }
  0x1c   : > { %292 = vst [vmem:[%s1212_s29 + $0x40] sm:$0xff] %v291_v8  ;;  %v311_v18 = vld [vmem:[%s1207_s28 + $0x120] sm:$0xff]  ;;  %v313_v19 = vld [vmem:[%s1207_s28 + $0x130] sm:$0xff] }
  0x1d   : > { %294 = vst [vmem:[%s1212_s29 + $0x48] sm:$0xff] %v293_v9  ;;  %v315_v20 = vld [vmem:[%s1207_s28 + $0x140] sm:$0xff]  ;;  %v317_v21 = vld [vmem:[%s1207_s28 + $0x150] sm:$0xff] }
  0x1e   : > { %296 = vst [vmem:[%s1212_s29 + $0x50] sm:$0xff] %v295_v10  ;;  %v319_v22 = vld [vmem:[%s1207_s28 + $0x160] sm:$0xff]  ;;  %v321_v23 = vld [vmem:[%s1207_s28 + $0x170] sm:$0xff] }
  0x1f   : > { %298 = vst [vmem:[%s1212_s29 + $0x58] sm:$0xff] %v297_v11  ;;  %v323_v24 = vld [vmem:[%s1207_s28 + $0x180] sm:$0xff]  ;;  %v325_v25 = vld [vmem:[%s1207_s28 + $0x190] sm:$0xff] }
  0x20   : > { %300 = vst [vmem:[%s1212_s29 + $0x60] sm:$0xff] %v299_v12  ;;  %v327_v26 = vld [vmem:[%s1207_s28 + $0x1a0] sm:$0xff]  ;;  %v329_v27 = vld [vmem:[%s1207_s28 + $0x1b0] sm:$0xff] }
  0x21   : > { %302 = vst [vmem:[%s1212_s29 + $0x68] sm:$0xff] %v301_v13  ;;  %v331_v28 = vld [vmem:[%s1207_s28 + $0x1c0] sm:$0xff]  ;;  %v333_v29 = vld [vmem:[%s1207_s28 + $0x1d0] sm:$0xff] }
  0x22   : > { %304 = vst [vmem:[%s1212_s29 + $0x70] sm:$0xff] %v303_v14  ;;  %v335_v30 = vld [vmem:[%s1207_s28 + $0x1e0] sm:$0xff]  ;;  %v337_v31 = vld [vmem:[%s1207_s28 + $0x1f0] sm:$0xff] }
  0x23   : > { %306 = vst [vmem:[%s1212_s29 + $0x78] sm:$0xff] %v305_v15 }
  0x24   : > { %308 = vst [vmem:[%s1212_s29 + $0x80] sm:$0xff] %v307_v16 }
  0x25   : > { %310 = vst [vmem:[%s1212_s29 + $0x88] sm:$0xff] %v309_v17 }
  0x26   : > { %312 = vst [vmem:[%s1212_s29 + $0x90] sm:$0xff] %v311_v18 }
  0x27   : > { %314 = vst [vmem:[%s1212_s29 + $0x98] sm:$0xff] %v313_v19 }
  0x28   : > { %316 = vst [vmem:[%s1212_s29 + $0xa0] sm:$0xff] %v315_v20 }
  0x29   : > { %318 = vst [vmem:[%s1212_s29 + $0xa8] sm:$0xff] %v317_v21 }
  0x2a   : > { %320 = vst [vmem:[%s1212_s29 + $0xb0] sm:$0xff] %v319_v22 }
  0x2b   : > { %322 = vst [vmem:[%s1212_s29 + $0xb8] sm:$0xff] %v321_v23 }
  0x2c   : > { %324 = vst [vmem:[%s1212_s29 + $0xc0] sm:$0xff] %v323_v24 }
  0x2d   : > { %326 = vst [vmem:[%s1212_s29 + $0xc8] sm:$0xff] %v325_v25 }
  0x2e   : > { %328 = vst [vmem:[%s1212_s29 + $0xd0] sm:$0xff] %v327_v26 }
  0x2f   : > { %330 = vst [vmem:[%s1212_s29 + $0xd8] sm:$0xff] %v329_v27 }
  0x30   : > { %332 = vst [vmem:[%s1212_s29 + $0xe0] sm:$0xff] %v331_v28 }
  0x31   : > { %334 = vst [vmem:[%s1212_s29 + $0xe8] sm:$0xff] %v333_v29 }
  0x32   : > { %336 = vst [vmem:[%s1212_s29 + $0xf0] sm:$0xff] %v335_v30 }
  0x33   : > { %338 = vst [vmem:[%s1212_s29 + $0xf8] sm:$0xff] %v337_v31 }
  0x34 PF: > { %p878_p8 = scmp.ge.s32.totalorder %s1137_s16, 1  ;;  %p351_p9 = scmp.lt.s32.totalorder %s1137_s16, 3 }
  0x36   : > { %p352_p10 = pnand %p878_p8, %p351_p9 }
  0x37   : > { %s358_s30 = sand.u32 (!%p352_p10), 1, %s1121_s12   ;;  %s881_s20 = sshll.u32 (!%p352_p10), %s1129_s14, 1 }
  0x38   : > { %355 = sbr.rel (%p352_p10) target bundleno = 252 (0xfc), region = 66  ;;  %s879_s4 = sshll.u32 (!%p352_p10), %s358_s30, 8 }
  0x39   : > { %s1280_s5 = scalar_lea.vmem (!%p352_p10), [#allocation3], %s879_s4  ;;  %p409_p11 = scmp.lt.s32.totalorder (!%p352_p10), %s881_s20, 3 }
  0x3a   : > { %s880_s26 = sshll.u32 (!%p352_p10), %s358_s30, 4 }
  0x3b   : > { %s393_s27 = scalar_lea.vmem (!%p352_p10), [#allocation4], %s880_s26 }
  0x3d   : > { %v948_v32 = vld [vmem:[%s1280_s5 + $0x70] sm:$0xf]  ;;  %v1041_v33 = vld [vmem:[%s1280_s5 + $0x74] sm:$0xf0]  ;;  %v1040_v37 = vld [vmem:[%s1280_s5 + $0x74] sm:$0xf] }
  0x3e   : > { %v1012_v34 = vld [vmem:[%s1280_s5 + $0xf0] sm:$0xf]  ;;  %v949_v35 = vor.u32 %v1041_v33, %v948_v32  ;;  %v1057_v36 = vld [vmem:[%s1280_s5 + $0xf4] sm:$0xf0]  ;;  %v950_v38 = vld [vmem:[%s1280_s5 + $0x78] sm:$0xf0] }
  0x3f   : > { %v1013_v39 = vor.u32 %v1057_v36, %v1012_v34  ;;  %v953_v40 = vor.u32 %v1040_v37, %v950_v38  ;;  %v1056_v41 = vld [vmem:[%s1280_s5 + $0xf4] sm:$0xf]  ;;  %v1014_v42 = vld [vmem:[%s1280_s5 + $0xf8] sm:$0xf0]  ;;  %v940_v43 = vld [vmem:[%s1280_s5 + $0x60] sm:$0xf] }
  0x40   : > { %631 = vmatpush.bf16.msra.mxu0 %v949_v35  ;;  %v1017_v44 = vor.u32 %v1056_v41, %v1014_v42  ;;  %v1039_v45 = vld [vmem:[%s1280_s5 + $0x64] sm:$0xf0]  ;;  %v1004_v46 = vld [vmem:[%s1280_s5 + $0xe0] sm:$0xf]  ;;  %v1038_v50 = vld [vmem:[%s1280_s5 + $0x64] sm:$0xf] }
  0x41   : > { %v1055_v47 = vld [vmem:[%s1280_s5 + $0xe4] sm:$0xf0]  ;;  %645 = vmatpush.bf16.msra.mxu1 %v1013_v39  ;;  %659 = vmatpush.bf16.msra.mxu2 %v953_v40  ;;  %v941_v48 = vor.u32 %v1039_v45, %v940_v43  ;;  %v942_v51 = vld [vmem:[%s1280_s5 + $0x68] sm:$0xf0]  ;;  %v1054_v52 = vld [vmem:[%s1280_s5 + $0xe4] sm:$0xf] }
  0x42   : > { %v1005_v49 = vor.u32 %v1055_v47, %v1004_v46  ;;  %673 = vmatpush.bf16.msra.mxu3 %v1017_v44  ;;  %v945_v53 = vor.u32 %v1038_v50, %v942_v51  ;;  %v1006_v54 = vld [vmem:[%s1280_s5 + $0xe8] sm:$0xf0]  ;;  %v932_v55 = vld [vmem:[%s1280_s5 + $0x50] sm:$0xf]  ;;  %v1037_v56 = vld [vmem:[%s1280_s5 + $0x54] sm:$0xf0] }
  0x43   : > { %v1009_v57 = vor.u32 %v1054_v52, %v1006_v54  ;;  %v996_v58 = vld [vmem:[%s1280_s5 + $0xd0] sm:$0xf]  ;;  %v1053_v59 = vld [vmem:[%s1280_s5 + $0xd4] sm:$0xf0]  ;;  %v1036_v60 = vld [vmem:[%s1280_s5 + $0x54] sm:$0xf]  ;;  %v933_v61 = vor.u32 %v1037_v56, %v932_v55 }
  0x44   : > { %632 = vmatpush.bf16.msra.mxu0 %v941_v48  ;;  %v934_v62 = vld [vmem:[%s1280_s5 + $0x58] sm:$0xf0]  ;;  %v1052_v63 = vld [vmem:[%s1280_s5 + $0xd4] sm:$0xf]  ;;  %v997_v1 = vor.u32 %v1053_v59, %v996_v58  ;;  %v924_v3 = vld [vmem:[%s1280_s5 + $0x40] sm:$0xf] }
  0x45   : > { %v998_v0 = vld [vmem:[%s1280_s5 + $0xd8] sm:$0xf0]  ;;  %646 = vmatpush.bf16.msra.mxu1 %v1005_v49  ;;  %660 = vmatpush.bf16.msra.mxu2 %v945_v53  ;;  %v937_v2 = vor.u32 %v1036_v60, %v934_v62  ;;  %v1035_v4 = vld [vmem:[%s1280_s5 + $0x44] sm:$0xf0]  ;;  %v988_v5 = vld [vmem:[%s1280_s5 + $0xc0] sm:$0xf] }
  0x46   : > { %674 = vmatpush.bf16.msra.mxu3 %v1009_v57  ;;  %v1001_v6 = vor.u32 %v1052_v63, %v998_v0  ;;  %v1051_v7 = vld [vmem:[%s1280_s5 + $0xc4] sm:$0xf0]  ;;  %v1034_v8 = vld [vmem:[%s1280_s5 + $0x44] sm:$0xf]  ;;  %v926_v9 = vld [vmem:[%s1280_s5 + $0x48] sm:$0xf0]  ;;  %v925_v12 = vor.u32 %v1035_v4, %v924_v3 }
  0x47   : > { %v1050_v10 = vld [vmem:[%s1280_s5 + $0xc4] sm:$0xf]  ;;  %v990_v11 = vld [vmem:[%s1280_s5 + $0xc8] sm:$0xf0]  ;;  %v989_v13 = vor.u32 %v1051_v7, %v988_v5  ;;  %v929_v14 = vor.u32 %v1034_v8, %v926_v9  ;;  %v916_v15 = vld [vmem:[%s1280_s5 + $0x30] sm:$0xf] }
  0x48   : > { %633 = vmatpush.bf16.msra.mxu0 %v933_v61  ;;  %v1033_v16 = vld [vmem:[%s1280_s5 + $0x34] sm:$0xf0]  ;;  %v980_v17 = vld [vmem:[%s1280_s5 + $0xb0] sm:$0xf]  ;;  %v993_v18 = vor.u32 %v1050_v10, %v990_v11  ;;  %v1032_v20 = vld [vmem:[%s1280_s5 + $0x34] sm:$0xf] }
  0x49   : > { %647 = vmatpush.bf16.msra.mxu1 %v997_v1  ;;  %661 = vmatpush.bf16.msra.mxu2 %v937_v2  ;;  %v1049_v19 = vld [vmem:[%s1280_s5 + $0xb4] sm:$0xf0]  ;;  %v918_v21 = vld [vmem:[%s1280_s5 + $0x38] sm:$0xf0]  ;;  %v1048_v22 = vld [vmem:[%s1280_s5 + $0xb4] sm:$0xf]  ;;  %v917_v24 = vor.u32 %v1033_v16, %v916_v15 }
  0x4a   : > { %675 = vmatpush.bf16.msra.mxu3 %v1001_v6  ;;  %v982_v23 = vld [vmem:[%s1280_s5 + $0xb8] sm:$0xf0]  ;;  %v981_v25 = vor.u32 %v1049_v19, %v980_v17  ;;  %v921_v26 = vor.u32 %v1032_v20, %v918_v21  ;;  %v908_v27 = vld [vmem:[%s1280_s5 + $0x20] sm:$0xf]  ;;  %v1031_v28 = vld [vmem:[%s1280_s5 + $0x24] sm:$0xf0] }
  0x4b   : > { %v972_v29 = vld [vmem:[%s1280_s5 + $0xa0] sm:$0xf]  ;;  %v985_v30 = vor.u32 %v1048_v22, %v982_v23  ;;  %v1047_v31 = vld [vmem:[%s1280_s5 + $0xa4] sm:$0xf0]  ;;  %v1030_v32 = vld [vmem:[%s1280_s5 + $0x24] sm:$0xf]  ;;  %v909_v36 = vor.u32 %v1031_v28, %v908_v27 }
  0x4c   : > { %634 = vmatpush.bf16.msra.mxu0 %v925_v12  ;;  %v910_v33 = vld [vmem:[%s1280_s5 + $0x28] sm:$0xf0]  ;;  %v1046_v34 = vld [vmem:[%s1280_s5 + $0xa4] sm:$0xf]  ;;  %v973_v37 = vor.u32 %v1047_v31, %v972_v29  ;;  %v900_v39 = vld [vmem:[%s1280_s5 + $0x10] sm:$0xf] }
  0x4d   : > { %648 = vmatpush.bf16.msra.mxu1 %v989_v13  ;;  %662 = vmatpush.bf16.msra.mxu2 %v929_v14  ;;  %v974_v35 = vld [vmem:[%s1280_s5 + $0xa8] sm:$0xf0]  ;;  %v913_v38 = vor.u32 %v1030_v32, %v910_v33  ;;  %v1029_v40 = vld [vmem:[%s1280_s5 + $0x14] sm:$0xf0]  ;;  %v964_v41 = vld [vmem:[%s1280_s5 + $0x90] sm:$0xf] }
  0x4e   : > { %676 = vmatpush.bf16.msra.mxu3 %v993_v18  ;;  %v977_v42 = vor.u32 %v1046_v34, %v974_v35  ;;  %v1045_v43 = vld [vmem:[%s1280_s5 + $0x94] sm:$0xf0]  ;;  %v1028_v44 = vld [vmem:[%s1280_s5 + $0x14] sm:$0xf]  ;;  %v902_v45 = vld [vmem:[%s1280_s5 + $0x18] sm:$0xf0]  ;;  %v901_v48 = vor.u32 %v1029_v40, %v900_v39 }
  0x4f   : > { %v1044_v46 = vld [vmem:[%s1280_s5 + $0x94] sm:$0xf]  ;;  %v966_v47 = vld [vmem:[%s1280_s5 + $0x98] sm:$0xf0]  ;;  %v965_v49 = vor.u32 %v1045_v43, %v964_v41  ;;  %v905_v50 = vor.u32 %v1028_v44, %v902_v45  ;;  %v892_v51 = vld [vmem:[%s1280_s5] sm:$0xf] }
  0x50   : > { %635 = vmatpush.bf16.msra.mxu0 %v917_v24  ;;  %v1027_v52 = vld [vmem:[%s1280_s5 + $0x4] sm:$0xf0]  ;;  %v956_v53 = vld [vmem:[%s1280_s5 + $0x80] sm:$0xf]  ;;  %v969_v54 = vor.u32 %v1044_v46, %v966_v47  ;;  %v1026_v56 = vld [vmem:[%s1280_s5 + $0x4] sm:$0xf] }
  0x51   : > { %649 = vmatpush.bf16.msra.mxu1 %v981_v25  ;;  %663 = vmatpush.bf16.msra.mxu2 %v921_v26  ;;  %v1043_v55 = vld [vmem:[%s1280_s5 + $0x84] sm:$0xf0]  ;;  %v894_v57 = vld [vmem:[%s1280_s5 + $0x8] sm:$0xf0]  ;;  %v1042_v58 = vld [vmem:[%s1280_s5 + $0x84] sm:$0xf]  ;;  %v893_v60 = vor.u32 %v1027_v52, %v892_v51 }
  0x52   : > { %677 = vmatpush.bf16.msra.mxu3 %v985_v30  ;;  %v958_v59 = vld [vmem:[%s1280_s5 + $0x88] sm:$0xf0]  ;;  %v884_v61 = vld [vmem:[%s1385_s0] sm:$0xf]  ;;  %v1025_v62 = vld [vmem:[%s1385_s0 + $0x4] sm:$0xf0]  ;;  %v957_v63 = vor.u32 %v1043_v55, %v956_v53  ;;  %v897_v0 = vor.u32 %v1026_v56, %v894_v57 }
  0x53   : > { %v1024_v1 = vld [vmem:[%s1385_s0 + $0x4] sm:$0xf]  ;;  %v886_v2 = vld [vmem:[%s1385_s0 + $0x8] sm:$0xf0]  ;;  %v961_v3 = vor.u32 %v1042_v58, %v958_v59  ;;  %v885_v4 = vor.u32 %v1025_v62, %v884_v61  ;;  %s1397_s20 = smov (!%p409_p11, %s881_s20), 3  ;;  %s1058_s12 = sshll.u32 (%p1194_p6), %s1129_s14, 3 }
  0x54   : > { %636 = vmatpush.bf16.msra.mxu0 %v909_v36  ;;  %v889_v5 = vor.u32 %v1024_v1, %v886_v2  ;;  %s411_s25 = scalar_lea.vmem %s1387_s2, %s1397_s20  ;;  %s728_s30 = scalar_lea.vmem (%p1194_p6), %s1388_s3, %s1058_s12 }
  0x55   : > { %650 = vmatpush.bf16.msra.mxu1 %v973_v37  ;;  %664 = vmatpush.bf16.msra.mxu2 %v913_v38  ;;  %v702_v8 = vld [vmem:[%s411_s25] sm:$0x3] }
  0x56   : > { %678 = vmatpush.bf16.msra.mxu3 %v977_v42  ;;  %v704_v10 = vperm.slane %v702_v8, 0  ;;  %v705_v12 = vperm.slane %v702_v8, 1 }
  0x58   : > { %637 = vmatpush.bf16.msra.mxu0 %v901_v48 }
  0x59   : > { %651 = vmatpush.bf16.msra.mxu1 %v965_v49  ;;  %665 = vmatpush.bf16.msra.mxu2 %v905_v50 }
  0x5a   : > { %679 = vmatpush.bf16.msra.mxu3 %v969_v54 }
  0x5c   : > { %638 = vmatpush.bf16.msra.mxu0 %v893_v60 }
  0x5d   : > { %652 = vmatpush.bf16.msra.mxu1 %v957_v63  ;;  %666 = vmatpush.bf16.msra.mxu2 %v897_v0 }
  0x5e   : > { %680 = vmatpush.bf16.msra.mxu3 %v961_v3 }
  0x5f   : > { %639 = vmatmul.bf16.vlgmr.msra.gmra.mxu0 %v885_v4 }
  0x60   : > { %653 = vmatmul.bf16.vlgmr.msra.gmra.mxu1 %v889_v5  ;;  %667 = vmatmul.bf16.vlgmr.msra.gmra.mxu2 %v885_v4 }
  0x61   : > { %681 = vmatmul.bf16.vlgmr.msra.gmra.mxu3 %v889_v5 }
  0xdc   : > { %v640_v6 = vpop.f32.mrf.mxu0 }
  0xdd   : > { %v654_v7 = vpop.f32.mrf.mxu1 }
  0xde   : > { %v655_v9 = vadd.f32 %v654_v7, %v640_v6 }
  0xe0   : > { %v708_v14 = vadd.f32 %v704_v10, %v655_v9 }
  0xe3   : > { %v668_v11 = vpop.f32.mrf.mxu2 }
  0xe4   : > { %v682_v13 = vpop.f32.mrf.mxu3  ;;  %v642_v17 = vpop.f32.mrf.mxu0 }
  0xe5   : > { %v683_v15 = vadd.f32 %v682_v13, %v668_v11  ;;  %v656_v18 = vpop.f32.mrf.mxu1 }
  0xe6   : > { %v657_v20 = vadd.f32 %v656_v18, %v642_v17 }
  0xe7   : > { %v709_v16 = vadd.f32 %v705_v12, %v683_v15 }
  0xe8   : > { %v710_v24 = vadd.f32 %v704_v10, %v657_v20 }
  0xe9   : > { %v712_v19 = vpack.c.bf16 %v709_v16, %v708_v14 }
  0xeb   : > { %714 = vst [vmem:[%s393_s27] sm:$0xff] %v712_v19  ;;  %v670_v21 = vpop.f32.mrf.mxu2 }
  0xec   : > { %v684_v22 = vpop.f32.mrf.mxu3 }
  0xed   : > { %v685_v23 = vadd.f32 %v684_v22, %v670_v21 }
  0xef   : > { %v711_v25 = vadd.f32 %v705_v12, %v685_v23  ;;  %722 = sbr.rel (!%p1194_p6) target bundleno = 252 (0xfc), region = 82 }
  0xf1   : > { %v713_v26 = vpack.c.bf16 %v711_v25, %v710_v24 }
  0xf2   : > { %v759_v27 = vld [vmem:[%s393_s27] sm:$0xff] (%p1194_p6) }
  0xf3   : > { %715 = vst [vmem:[%s393_s27 + $0x8] sm:$0xff] %v713_v26 }
  0xf4   : > { %760 = vst [vmem:[%s728_s30] sm:$0xff] %v759_v27 }
  0xfa   : > { %v761_v28 = vld [vmem:[%s393_s27 + $0x8] sm:$0xff] }
  0xfb   : > { %762 = vst [vmem:[%s728_s30 + $0x10] sm:$0xff] %v761_v28 }
  0xfc PF: > { %s13_s16 = sadd.s32 1, %s1137_s16   ;;  %s1390_s12 = smov %s1125_s13 }
  0xfd   : > { %p10_p12 = scmp.ge.s32.totalorder %s13_s16, 4   ;;  %s1391_s13 = smov %s1199_s22 }
  0xfe   : > { %s1392_s14 = smov %s1133_s15  ;;  %s1393_s15 = smov %s1395_s17 }
  0xff   :  { %12 = sbr.rel (!%p10_p12) target bundleno = 3 (0x3), region = 157 }

// kernel: _lambda_.38
= control target key start
LH: loop header
LB: loop body
LE: loop exit
PB: predicated region body
PF: predicated region fallthrough
CT: control target
= control target key end

     0   :  { %s2469_s0 = inlined_call_operand.vmem [shape: bf16[16,4608], index: 0, kind: input, shape index: {}]   ;;  %s2470_s1 = inlined_call_operand.vmem [shape: bf16[4608,512], index: 1, kind: input, shape index: {}]   ;;  %s2471_s2 = inlined_call_operand.vmem [shape: f32[1,512], index: 2, kind: input, shape index: {}]   ;;  %s2472_s3 = inlined_call_operand.vmem [shape: bf16[16,512], index: 3, kind: input, shape index: {}]   ;;  %s2473_s4 = inlined_call_operand.vmem [shape: bf16[16,512], index: 4, kind: output, shape index: {}]  }
   0x1   :  { %2476 = sst [smem:[#allocation9_spill]] %s2469_s0 }
   0x2   :  { %s1978_s15 = smov 0   ;;  %s1980_s16 = smov 0  }
   0x3   :  { %s1982_s17 = smov 0   ;;  %s1984_s18 = smov 0  }
   0x4   :  { %s1986_s19 = smov 0   ;;  %s1988_s20 = smov 0  }
   0x5   :  { %s1990_s21 = smov 0   ;;  %s1992_s22 = smov 0  }
   0x6   :  { %s1994_s23 = smov 0   ;;  %s1996_s24 = smov 0  }
   0x7   :  { %s1998_s25 = smov 0  }
   0x8 LB: > { %s1403_s26 = sadd.s32 4294967295, %s1950_s25   ;;  %s26_s27 = sadd.s32 1, %s1942_s23  ;;  %s1950_s25 = sphi %s1998_s25, %s14_s25   ;;  %s1946_s24 = sphi %s1996_s24, %s2495_s24   ;;  %s1942_s23 = sphi %s1994_s23, %s2494_s23   ;;  %s1938_s22 = sphi %s1992_s22, %s2493_s22   ;;  %s1934_s21 = sphi %s1990_s21, %s2492_s21   ;;  %s1930_s20 = sphi %s1988_s20, %s2491_s20   ;;  %s1926_s19 = sphi %s1986_s19, %s2490_s19   ;;  %s1922_s18 = sphi %s1984_s18, %s2489_s18   ;;  %s1918_s17 = sphi %s1982_s17, %s2488_s17   ;;  %s1914_s16 = sphi %s1980_s16, %s2487_s16   ;;  %s1910_s15 = sphi %s1978_s15, %s2486_s15  }
   0x9   : > { %p27_p0 = scmp.ge.s32.totalorder %s26_s27, 9  ;;  %s29_s28 = sadd.s32 1, %s1946_s24 }
   0xa   : > { %s42_s29 = sadd.s32 1, %s1930_s20  ;;  %p49_p1 = scmp.ne.s32.totalorder %s1930_s20, %s1926_s19 }
   0xb   : > { %s2497_s27 = smov (%p27_p0, %s26_s27), 0  ;;  %s2499_s28 = smov (!%p27_p0, %s29_s28), %s1946_s24 }
   0xc   : > { %2477 = sst [smem:[#allocation7_spill]] %s2497_s27  ;;  %s38_s30 = ssub.s32 %s1942_s23, %s2497_s27 }
   0xd   : > { %p50_p2 = scmp.eq.s32.totalorder %s1950_s25, 0  ;;  %p31_p3 = scmp.ge.s32.totalorder %s2499_s28, 2 }
   0xe   : > { %p40_p4 = scmp.eq.s32.totalorder %s38_s30, 0  ;;  %s70_s6 = sadd.s32 1, %s1922_s18 }
   0xf   : > { %p2047_p5 = por %p50_p2, %p49_p1  ;;  %s2501_s28 = smov (%p31_p3, %s2499_s28), 0 }
  0x10   : > { %2479 = sst [smem:[#allocation8_spill]] %s2501_s28  ;;  %s66_s8 = ssub.s32 %s1946_s24, %s2501_s28 }
  0x11   : > { %s2055_s7 = scalar_select %p40_p4, %s1930_s20, %s42_s29  }
  0x12   : > { %p77_p6 = scmp.ne.s32.totalorder %s1922_s18, %s1918_s17  ;;  %s67_s9 = sor.u32 %s66_s8, %s38_s30 }
  0x13   : > { %p122_p7 = scmp.eq.s32.totalorder %s66_s8, 0  ;;  %p68_p8 = scmp.eq.s32.totalorder %s67_s9, 0 }
  0x14   : > { %p2063_p9 = por %p77_p6, %p50_p2  ;;  %s124_s11 = sadd.s32 1, %s1914_s16 }
  0x15   : > { %p131_p10 = scmp.ne.s32.totalorder %s1914_s16, %s1910_s15  ;;  %p163_p12 = scmp.eq.s32.totalorder %s1403_s26, 17 }
  0x16   : > { %s2071_s12 = scalar_select %p68_p8, %s1922_s18, %s70_s6  }
  0x17   : > { %s2074_s13 = scalar_select %p122_p7, %s1914_s16, %s124_s11  }
  0x18   : > { %p2078_p11 = por %p131_p10, %p50_p2  ;;  %p2082_p13 = por %p163_p12, %p131_p10 }
  0x19   : > { %p1406_p0 = scmp.ge.s32.totalorder %s1950_s25, 18 }
  0x1b   : > { %185 = sbr.rel (%p1406_p0) target bundleno = 123 (0x7b), region = 16 }
  0x20   : > { %188 = sbr.rel (!%p2047_p5) target bundleno = 46 (0x2e), region = 20  ;;  %s190_s30 = sand.u32 (%p2047_p5), 1, %s1930_s20  }
  0x21   : > { %s1703_s6 = sshll.u32 (%p2047_p5), %s1942_s23, 4  ;;  %s1407_s8 = sshll.u32 (%p2047_p5), %s190_s30, 5 }
  0x22   : > { %s2483_s0 = sld [smem:[#allocation9_spill]] (%p2047_p5)  ;;  %s192_s26 = scalar_lea.vmem (%p2047_p5), [#allocation3], %s1407_s8 }
  0x28   : > { %s198_s28 = scalar_lea.vmem %s2483_s0, %s1703_s6 }
  0x29   : > { %v211_v0 = vld [vmem:[%s198_s28] sm:$0xff]  ;;  %v213_v1 = vld [vmem:[%s198_s28 + $0x8] sm:$0xff]  ;;  %v215_v2 = vld [vmem:[%s198_s28 + $0x90] sm:$0xff] }
  0x2a   : > { %212 = vst [vmem:[%s192_s26] sm:$0xff] %v211_v0  ;;  %v217_v3 = vld [vmem:[%s198_s28 + $0x98] sm:$0xff] }
  0x2b   : > { %214 = vst [vmem:[%s192_s26 + $0x8] sm:$0xff] %v213_v1 }
  0x2c   : > { %216 = vst [vmem:[%s192_s26 + $0x10] sm:$0xff] %v215_v2 }
  0x2d   : > { %218 = vst [vmem:[%s192_s26 + $0x18] sm:$0xff] %v217_v3 }
  0x2e PF: > { %224 = sbr.rel (!%p2063_p9) target bundleno = 117 (0x75), region = 43  ;;  %s226_s5 = sand.u32 (%p2063_p9), 1, %s1922_s18  }
  0x2f   : > { %s1412_s30 = sshll.u32 (%p2063_p9), %s1946_s24, 1  ;;  %s1410_s9 = sshll.u32 (%p2063_p9), %s226_s5, 9 }
  0x30   : > { %s1704_s6 = sshll.u32 (%p2063_p9), %s1942_s23, 8  ;;  %s2107_s10 = scalar_lea.vmem (%p2063_p9), [#allocation4], %s1410_s9 }
  0x31   : > { %s232_s11 = sadd.s32 (%p2063_p9), %s1704_s6, %s1412_s30 }
  0x32   : > { %s1414_s0 = sshll.u32 (%p2063_p9), %s232_s11, 2 }
  0x33   : > { %s2102_s28 = scalar_lea.vmem %s2470_s1, %s1414_s0 }
  0x34   : > { %v389_v4 = vld [vmem:[%s2102_s28] sm:$0xff]  ;;  %v391_v5 = vld [vmem:[%s2102_s28 + $0x10] sm:$0xff] }
  0x35   : > { %v393_v6 = vld [vmem:[%s2102_s28 + $0x20] sm:$0xff]  ;;  %390 = vst [vmem:[%s2107_s10] sm:$0xff] %v389_v4  ;;  %v395_v7 = vld [vmem:[%s2102_s28 + $0x30] sm:$0xff] }
  0x36   : > { %392 = vst [vmem:[%s2107_s10 + $0x8] sm:$0xff] %v391_v5  ;;  %v397_v8 = vld [vmem:[%s2102_s28 + $0x40] sm:$0xff]  ;;  %v399_v9 = vld [vmem:[%s2102_s28 + $0x50] sm:$0xff] }
  0x37   : > { %394 = vst [vmem:[%s2107_s10 + $0x10] sm:$0xff] %v393_v6  ;;  %v401_v10 = vld [vmem:[%s2102_s28 + $0x60] sm:$0xff]  ;;  %v403_v11 = vld [vmem:[%s2102_s28 + $0x70] sm:$0xff] }
  0x38   : > { %396 = vst [vmem:[%s2107_s10 + $0x18] sm:$0xff] %v395_v7  ;;  %v405_v12 = vld [vmem:[%s2102_s28 + $0x80] sm:$0xff]  ;;  %v407_v13 = vld [vmem:[%s2102_s28 + $0x90] sm:$0xff] }
  0x39   : > { %398 = vst [vmem:[%s2107_s10 + $0x20] sm:$0xff] %v397_v8  ;;  %v409_v14 = vld [vmem:[%s2102_s28 + $0xa0] sm:$0xff]  ;;  %v411_v15 = vld [vmem:[%s2102_s28 + $0xb0] sm:$0xff] }
  0x3a   : > { %400 = vst [vmem:[%s2107_s10 + $0x28] sm:$0xff] %v399_v9  ;;  %v413_v16 = vld [vmem:[%s2102_s28 + $0xc0] sm:$0xff]  ;;  %v415_v17 = vld [vmem:[%s2102_s28 + $0xd0] sm:$0xff] }
  0x3b   : > { %402 = vst [vmem:[%s2107_s10 + $0x30] sm:$0xff] %v401_v10  ;;  %v417_v18 = vld [vmem:[%s2102_s28 + $0xe0] sm:$0xff]  ;;  %v419_v19 = vld [vmem:[%s2102_s28 + $0xf0] sm:$0xff] }
  0x3c   : > { %404 = vst [vmem:[%s2107_s10 + $0x38] sm:$0xff] %v403_v11  ;;  %v421_v20 = vld [vmem:[%s2102_s28 + $0x100] sm:$0xff]  ;;  %v423_v21 = vld [vmem:[%s2102_s28 + $0x110] sm:$0xff] }
  0x3d   : > { %406 = vst [vmem:[%s2107_s10 + $0x40] sm:$0xff] %v405_v12  ;;  %v425_v22 = vld [vmem:[%s2102_s28 + $0x120] sm:$0xff]  ;;  %v427_v23 = vld [vmem:[%s2102_s28 + $0x130] sm:$0xff] }
  0x3e   : > { %408 = vst [vmem:[%s2107_s10 + $0x48] sm:$0xff] %v407_v13  ;;  %v429_v24 = vld [vmem:[%s2102_s28 + $0x140] sm:$0xff]  ;;  %v431_v25 = vld [vmem:[%s2102_s28 + $0x150] sm:$0xff] }
  0x3f   : > { %410 = vst [vmem:[%s2107_s10 + $0x50] sm:$0xff] %v409_v14  ;;  %v433_v26 = vld [vmem:[%s2102_s28 + $0x160] sm:$0xff]  ;;  %v435_v27 = vld [vmem:[%s2102_s28 + $0x170] sm:$0xff] }
  0x40   : > { %412 = vst [vmem:[%s2107_s10 + $0x58] sm:$0xff] %v411_v15  ;;  %v437_v28 = vld [vmem:[%s2102_s28 + $0x180] sm:$0xff]  ;;  %v439_v29 = vld [vmem:[%s2102_s28 + $0x190] sm:$0xff] }
  0x41   : > { %414 = vst [vmem:[%s2107_s10 + $0x60] sm:$0xff] %v413_v16  ;;  %v441_v30 = vld [vmem:[%s2102_s28 + $0x1a0] sm:$0xff]  ;;  %v443_v31 = vld [vmem:[%s2102_s28 + $0x1b0] sm:$0xff] }
  0x42   : > { %416 = vst [vmem:[%s2107_s10 + $0x68] sm:$0xff] %v415_v17  ;;  %v445_v32 = vld [vmem:[%s2102_s28 + $0x1c0] sm:$0xff]  ;;  %v447_v33 = vld [vmem:[%s2102_s28 + $0x1d0] sm:$0xff] }
  0x43   : > { %418 = vst [vmem:[%s2107_s10 + $0x70] sm:$0xff] %v417_v18  ;;  %v449_v34 = vld [vmem:[%s2102_s28 + $0x1e0] sm:$0xff]  ;;  %v451_v35 = vld [vmem:[%s2102_s28 + $0x1f0] sm:$0xff] }
  0x44   : > { %420 = vst [vmem:[%s2107_s10 + $0x78] sm:$0xff] %v419_v19  ;;  %v453_v36 = vld [vmem:[%s2102_s28 + $0x200] sm:$0xff]  ;;  %v455_v37 = vld [vmem:[%s2102_s28 + $0x210] sm:$0xff] }
  0x45   : > { %422 = vst [vmem:[%s2107_s10 + $0x80] sm:$0xff] %v421_v20  ;;  %v457_v38 = vld [vmem:[%s2102_s28 + $0x220] sm:$0xff]  ;;  %v459_v39 = vld [vmem:[%s2102_s28 + $0x230] sm:$0xff] }
  0x46   : > { %424 = vst [vmem:[%s2107_s10 + $0x88] sm:$0xff] %v423_v21  ;;  %v461_v40 = vld [vmem:[%s2102_s28 + $0x240] sm:$0xff]  ;;  %v463_v41 = vld [vmem:[%s2102_s28 + $0x250] sm:$0xff] }
  0x47   : > { %426 = vst [vmem:[%s2107_s10 + $0x90] sm:$0xff] %v425_v22  ;;  %v465_v42 = vld [vmem:[%s2102_s28 + $0x260] sm:$0xff]  ;;  %v467_v43 = vld [vmem:[%s2102_s28 + $0x270] sm:$0xff] }
  0x48   : > { %428 = vst [vmem:[%s2107_s10 + $0x98] sm:$0xff] %v427_v23  ;;  %v469_v44 = vld [vmem:[%s2102_s28 + $0x280] sm:$0xff]  ;;  %v471_v45 = vld [vmem:[%s2102_s28 + $0x290] sm:$0xff] }
  0x49   : > { %430 = vst [vmem:[%s2107_s10 + $0xa0] sm:$0xff] %v429_v24  ;;  %v473_v46 = vld [vmem:[%s2102_s28 + $0x2a0] sm:$0xff]  ;;  %v475_v47 = vld [vmem:[%s2102_s28 + $0x2b0] sm:$0xff] }
  0x4a   : > { %432 = vst [vmem:[%s2107_s10 + $0xa8] sm:$0xff] %v431_v25  ;;  %v477_v48 = vld [vmem:[%s2102_s28 + $0x2c0] sm:$0xff]  ;;  %v479_v49 = vld [vmem:[%s2102_s28 + $0x2d0] sm:$0xff] }
  0x4b   : > { %434 = vst [vmem:[%s2107_s10 + $0xb0] sm:$0xff] %v433_v26  ;;  %v481_v50 = vld [vmem:[%s2102_s28 + $0x2e0] sm:$0xff]  ;;  %v483_v51 = vld [vmem:[%s2102_s28 + $0x2f0] sm:$0xff] }
  0x4c   : > { %436 = vst [vmem:[%s2107_s10 + $0xb8] sm:$0xff] %v435_v27  ;;  %v485_v52 = vld [vmem:[%s2102_s28 + $0x300] sm:$0xff]  ;;  %v487_v53 = vld [vmem:[%s2102_s28 + $0x310] sm:$0xff] }
  0x4d   : > { %438 = vst [vmem:[%s2107_s10 + $0xc0] sm:$0xff] %v437_v28  ;;  %v489_v54 = vld [vmem:[%s2102_s28 + $0x320] sm:$0xff]  ;;  %v491_v55 = vld [vmem:[%s2102_s28 + $0x330] sm:$0xff] }
  0x4e   : > { %440 = vst [vmem:[%s2107_s10 + $0xc8] sm:$0xff] %v439_v29  ;;  %v493_v56 = vld [vmem:[%s2102_s28 + $0x340] sm:$0xff]  ;;  %v495_v57 = vld [vmem:[%s2102_s28 + $0x350] sm:$0xff] }
  0x4f   : > { %442 = vst [vmem:[%s2107_s10 + $0xd0] sm:$0xff] %v441_v30  ;;  %v497_v58 = vld [vmem:[%s2102_s28 + $0x360] sm:$0xff]  ;;  %v499_v59 = vld [vmem:[%s2102_s28 + $0x370] sm:$0xff] }
  0x50   : > { %444 = vst [vmem:[%s2107_s10 + $0xd8] sm:$0xff] %v443_v31  ;;  %v501_v60 = vld [vmem:[%s2102_s28 + $0x380] sm:$0xff]  ;;  %v503_v61 = vld [vmem:[%s2102_s28 + $0x390] sm:$0xff] }
  0x51   : > { %446 = vst [vmem:[%s2107_s10 + $0xe0] sm:$0xff] %v445_v32  ;;  %v505_v62 = vld [vmem:[%s2102_s28 + $0x3a0] sm:$0xff]  ;;  %v507_v63 = vld [vmem:[%s2102_s28 + $0x3b0] sm:$0xff] }
  0x52   : > { %448 = vst [vmem:[%s2107_s10 + $0xe8] sm:$0xff] %v447_v33  ;;  %v509_v0 = vld [vmem:[%s2102_s28 + $0x3c0] sm:$0xff]  ;;  %v511_v1 = vld [vmem:[%s2102_s28 + $0x3d0] sm:$0xff] }
  0x53   : > { %450 = vst [vmem:[%s2107_s10 + $0xf0] sm:$0xff] %v449_v34  ;;  %v513_v2 = vld [vmem:[%s2102_s28 + $0x3e0] sm:$0xff]  ;;  %v515_v3 = vld [vmem:[%s2102_s28 + $0x3f0] sm:$0xff] }
  0x54   : > { %452 = vst [vmem:[%s2107_s10 + $0xf8] sm:$0xff] %v451_v35 }
  0x55   : > { %454 = vst [vmem:[%s2107_s10 + $0x100] sm:$0xff] %v453_v36 }
  0x56   : > { %456 = vst [vmem:[%s2107_s10 + $0x108] sm:$0xff] %v455_v37 }
  0x57   : > { %458 = vst [vmem:[%s2107_s10 + $0x110] sm:$0xff] %v457_v38 }
  0x58   : > { %460 = vst [vmem:[%s2107_s10 + $0x118] sm:$0xff] %v459_v39 }
  0x59   : > { %462 = vst [vmem:[%s2107_s10 + $0x120] sm:$0xff] %v461_v40 }
  0x5a   : > { %464 = vst [vmem:[%s2107_s10 + $0x128] sm:$0xff] %v463_v41 }
  0x5b   : > { %466 = vst [vmem:[%s2107_s10 + $0x130] sm:$0xff] %v465_v42 }
  0x5c   : > { %468 = vst [vmem:[%s2107_s10 + $0x138] sm:$0xff] %v467_v43 }
  0x5d   : > { %470 = vst [vmem:[%s2107_s10 + $0x140] sm:$0xff] %v469_v44 }
  0x5e   : > { %472 = vst [vmem:[%s2107_s10 + $0x148] sm:$0xff] %v471_v45 }
  0x5f   : > { %474 = vst [vmem:[%s2107_s10 + $0x150] sm:$0xff] %v473_v46 }
  0x60   : > { %476 = vst [vmem:[%s2107_s10 + $0x158] sm:$0xff] %v475_v47 }
  0x61   : > { %478 = vst [vmem:[%s2107_s10 + $0x160] sm:$0xff] %v477_v48 }
  0x62   : > { %480 = vst [vmem:[%s2107_s10 + $0x168] sm:$0xff] %v479_v49 }
  0x63   : > { %482 = vst [vmem:[%s2107_s10 + $0x170] sm:$0xff] %v481_v50 }
  0x64   : > { %484 = vst [vmem:[%s2107_s10 + $0x178] sm:$0xff] %v483_v51 }
  0x65   : > { %486 = vst [vmem:[%s2107_s10 + $0x180] sm:$0xff] %v485_v52 }
  0x66   : > { %488 = vst [vmem:[%s2107_s10 + $0x188] sm:$0xff] %v487_v53 }
  0x67   : > { %490 = vst [vmem:[%s2107_s10 + $0x190] sm:$0xff] %v489_v54 }
  0x68   : > { %492 = vst [vmem:[%s2107_s10 + $0x198] sm:$0xff] %v491_v55 }
  0x69   : > { %494 = vst [vmem:[%s2107_s10 + $0x1a0] sm:$0xff] %v493_v56 }
  0x6a   : > { %496 = vst [vmem:[%s2107_s10 + $0x1a8] sm:$0xff] %v495_v57 }
  0x6b   : > { %498 = vst [vmem:[%s2107_s10 + $0x1b0] sm:$0xff] %v497_v58 }
  0x6c   : > { %500 = vst [vmem:[%s2107_s10 + $0x1b8] sm:$0xff] %v499_v59 }
  0x6d   : > { %502 = vst [vmem:[%s2107_s10 + $0x1c0] sm:$0xff] %v501_v60 }
  0x6e   : > { %504 = vst [vmem:[%s2107_s10 + $0x1c8] sm:$0xff] %v503_v61 }
  0x6f   : > { %506 = vst [vmem:[%s2107_s10 + $0x1d0] sm:$0xff] %v505_v62 }
  0x70   : > { %508 = vst [vmem:[%s2107_s10 + $0x1d8] sm:$0xff] %v507_v63 }
  0x71   : > { %510 = vst [vmem:[%s2107_s10 + $0x1e0] sm:$0xff] %v509_v0 }
  0x72   : > { %512 = vst [vmem:[%s2107_s10 + $0x1e8] sm:$0xff] %v511_v1 }
  0x73   : > { %514 = vst [vmem:[%s2107_s10 + $0x1f0] sm:$0xff] %v513_v2 }
  0x74   : > { %516 = vst [vmem:[%s2107_s10 + $0x1f8] sm:$0xff] %v515_v3 }
  0x75 PF: > { %530 = sbr.rel (!%p2078_p11) target bundleno = 123 (0x7b), region = 85  ;;  %s532_s0 = sand.u32 (%p2078_p11), 1, %s1914_s16  }
  0x76   : > { %s1705_s27 = sshll.u32 (%p2078_p11), %s1946_s24, 3  ;;  %s1415_s26 = sshll.u32 (%p2078_p11), %s532_s0, 4 }
  0x77   : > { %s540_s9 = scalar_lea.vmem (%p2078_p11), %s2472_s3, %s1705_s27  ;;  %s534_s6 = scalar_lea.vmem (%p2078_p11), [#allocation5], %s1415_s26 }
  0x78   : > { %v571_v4 = vld [vmem:[%s540_s9] sm:$0xff] (%p2078_p11)  ;;  %v573_v5 = vld [vmem:[%s540_s9 + $0x10] sm:$0xff] (%p2078_p11) }
  0x79   : > { %572 = vst [vmem:[%s534_s6] sm:$0xff] (%p2078_p11), %v571_v4 }
  0x7a   : > { %574 = vst [vmem:[%s534_s6 + $0x8] sm:$0xff] %v573_v5 }
  0x7b PF: > { %p1418_p1 = scmp.ge.s32.totalorder %s1950_s25, 1  ;;  %p579_p2 = scmp.lt.s32.totalorder %s1950_s25, 19 }
  0x7d   : > { %p580_p3 = pnand %p1418_p1, %p579_p2 }
  0x7e   : > { %s586_s14 = sand.u32 (!%p580_p3), 1, %s1926_s19   ;;  %s593_s11 = sand.u32 (!%p580_p3), 1, %s1918_s17  }
  0x7f   : > { %583 = sbr.rel (%p580_p3) target bundleno = 384 (0x180), region = 123  ;;  %s1419_s8 = sshll.u32 (!%p580_p3), %s586_s14, 5 }
  0x80   : > { %s1420_s28 = sshll.u32 (!%p580_p3), %s593_s11, 9  ;;  %s600_s10 = sand.u32 (!%p580_p3), 1, %s1910_s15  }
  0x81   : > { %s1423_s0 = sshll.u32 (!%p580_p3), %s1938_s22, 1  ;;  %s2247_s27 = sshll.u32 (!%p580_p3), %s600_s10, 4 }
  0x82   : > { %p641_p4 = scmp.lt.s32.totalorder (!%p580_p3), %s1423_s0, 3  ;;  %s2255_s9 = scalar_lea.vmem (!%p580_p3), [#allocation3], %s1419_s8 }
  0x83   : > { %s2257_s19 = scalar_lea.vmem (!%p580_p3), [#allocation4], %s1420_s28  ;;  %s602_s17 = scalar_lea.vmem (!%p580_p3), [#allocation5], %s2247_s27 }
  0x84   : > { %s2503_s0 = smov (!%p641_p4, %s1423_s0), 3  ;;  %s2261_s6 = scalar_lea.vmem [#allocation6], %s2247_s27 }
  0x85   : > { %s643_s30 = scalar_lea.vmem %s2471_s2, %s2503_s0  ;;  %p1424_p5 = scmp.ne.s32.totalorder %s1934_s21, 0 }
  0x87   : > { %652 = sbr.rel (%p1424_p5) target bundleno = 145 (0x91), region = 139 }
  0x8c   : > { %v1952_v6 = vmov 0.0  }
  0x8d   : > { %653 = vst [vmem:[#allocation2 + $0x10] sm:$0xff] %v1952_v6 }
  0x8e   : > { %654 = vst [vmem:[#allocation2] sm:$0xff] %v1952_v6 }
  0x8f   : > { %655 = vst [vmem:[#allocation2 + $0x18] sm:$0xff] %v1952_v6 }
  0x90   : > { %656 = vst [vmem:[#allocation2 + $0x8] sm:$0xff] %v1952_v6 }
  0x91 PF: > { %v1499_v7 = vld [vmem:[%s2257_s19 + $0x70] sm:$0xf]  ;;  %v1725_v8 = vld [vmem:[%s2257_s19 + $0x74] sm:$0xf0]  ;;  %v1491_v18 = vld [vmem:[%s2257_s19 + $0x60] sm:$0xf] }
  0x92   : > { %v1563_v9 = vld [vmem:[%s2257_s19 + $0xf0] sm:$0xf]  ;;  %v1500_v10 = vor.u32 %v1725_v8, %v1499_v7  ;;  %v1741_v11 = vld [vmem:[%s2257_s19 + $0xf4] sm:$0xf0]  ;;  %v1723_v20 = vld [vmem:[%s2257_s19 + $0x64] sm:$0xf0] }
  0x93   : > { %v1627_v12 = vld [vmem:[%s2257_s19 + $0x170] sm:$0xf]  ;;  %v1757_v13 = vld [vmem:[%s2257_s19 + $0x174] sm:$0xf0]  ;;  %v1564_v14 = vor.u32 %v1741_v11, %v1563_v9  ;;  %v1555_v21 = vld [vmem:[%s2257_s19 + $0xe0] sm:$0xf]  ;;  %v1492_v23 = vor.u32 %v1723_v20, %v1491_v18 }
  0x94   : > { %v1628_v15 = vor.u32 %v1757_v13, %v1627_v12  ;;  %v1691_v16 = vld [vmem:[%s2257_s19 + $0x1f0] sm:$0xf]  ;;  %v1773_v17 = vld [vmem:[%s2257_s19 + $0x1f4] sm:$0xf0]  ;;  %1069 = vmatpush.bf16.msra.mxu0 %v1500_v10  ;;  %v1739_v22 = vld [vmem:[%s2257_s19 + $0xe4] sm:$0xf0] }
  0x95   : > { %v1692_v19 = vor.u32 %v1773_v17, %v1691_v16  ;;  %1083 = vmatpush.bf16.msra.mxu1 %v1564_v14  ;;  %v1556_v24 = vor.u32 %v1739_v22, %v1555_v21  ;;  %v1619_v25 = vld [vmem:[%s2257_s19 + $0x160] sm:$0xf]  ;;  %v1755_v26 = vld [vmem:[%s2257_s19 + $0x164] sm:$0xf0]  ;;  %v1483_v30 = vld [vmem:[%s2257_s19 + $0x50] sm:$0xf] }
  0x96   : > { %1097 = vmatpush.bf16.msra.mxu2 %v1628_v15  ;;  %v1683_v27 = vld [vmem:[%s2257_s19 + $0x1e0] sm:$0xf]  ;;  %v1620_v28 = vor.u32 %v1755_v26, %v1619_v25  ;;  %v1771_v29 = vld [vmem:[%s2257_s19 + $0x1e4] sm:$0xf0]  ;;  %v1721_v31 = vld [vmem:[%s2257_s19 + $0x54] sm:$0xf0] }
  0x97   : > { %1111 = vmatpush.bf16.msra.mxu3 %v1692_v19  ;;  %v1684_v32 = vor.u32 %v1771_v29, %v1683_v27  ;;  %v1547_v33 = vld [vmem:[%s2257_s19 + $0xd0] sm:$0xf]  ;;  %v1737_v34 = vld [vmem:[%s2257_s19 + $0xd4] sm:$0xf0]  ;;  %v1484_v36 = vor.u32 %v1721_v31, %v1483_v30  ;;  %v1475_v42 = vld [vmem:[%s2257_s19 + $0x40] sm:$0xf] }
  0x98   : > { %v1611_v35 = vld [vmem:[%s2257_s19 + $0x150] sm:$0xf]  ;;  %1070 = vmatpush.bf16.msra.mxu0 %v1492_v23  ;;  %v1753_v37 = vld [vmem:[%s2257_s19 + $0x154] sm:$0xf0]  ;;  %v1548_v40 = vor.u32 %v1737_v34, %v1547_v33  ;;  %v1719_v43 = vld [vmem:[%s2257_s19 + $0x44] sm:$0xf0] }
  0x99   : > { %v1675_v38 = vld [vmem:[%s2257_s19 + $0x1d0] sm:$0xf]  ;;  %v1769_v39 = vld [vmem:[%s2257_s19 + $0x1d4] sm:$0xf0]  ;;  %1084 = vmatpush.bf16.msra.mxu1 %v1556_v24  ;;  %v1612_v41 = vor.u32 %v1753_v37, %v1611_v35  ;;  %v1539_v44 = vld [vmem:[%s2257_s19 + $0xc0] sm:$0xf]  ;;  %v1476_v51 = vor.u32 %v1719_v43, %v1475_v42 }
  0x9a   : > { %1098 = vmatpush.bf16.msra.mxu2 %v1620_v28  ;;  %v1676_v45 = vor.u32 %v1769_v39, %v1675_v38  ;;  %v1735_v46 = vld [vmem:[%s2257_s19 + $0xc4] sm:$0xf0]  ;;  %v1603_v47 = vld [vmem:[%s2257_s19 + $0x140] sm:$0xf]  ;;  %v1467_v54 = vld [vmem:[%s2257_s19 + $0x30] sm:$0xf] }
  0x9b   : > { %1112 = vmatpush.bf16.msra.mxu3 %v1684_v32  ;;  %v1751_v48 = vld [vmem:[%s2257_s19 + $0x144] sm:$0xf0]  ;;  %v1667_v49 = vld [vmem:[%s2257_s19 + $0x1c0] sm:$0xf]  ;;  %v1540_v52 = vor.u32 %v1735_v46, %v1539_v44  ;;  %v1717_v55 = vld [vmem:[%s2257_s19 + $0x34] sm:$0xf0] }
  0x9c   : > { %v1767_v50 = vld [vmem:[%s2257_s19 + $0x1c4] sm:$0xf0]  ;;  %1071 = vmatpush.bf16.msra.mxu0 %v1484_v36  ;;  %v1604_v53 = vor.u32 %v1751_v48, %v1603_v47  ;;  %v1531_v56 = vld [vmem:[%s2257_s19 + $0xb0] sm:$0xf]  ;;  %v1733_v58 = vld [vmem:[%s2257_s19 + $0xb4] sm:$0xf0]  ;;  %v1468_v63 = vor.u32 %v1717_v55, %v1467_v54 }
  0x9d   : > { %1085 = vmatpush.bf16.msra.mxu1 %v1548_v40  ;;  %v1668_v57 = vor.u32 %v1767_v50, %v1667_v49  ;;  %v1595_v59 = vld [vmem:[%s2257_s19 + $0x130] sm:$0xf]  ;;  %v1749_v60 = vld [vmem:[%s2257_s19 + $0x134] sm:$0xf0]  ;;  %v1532_v0 = vor.u32 %v1733_v58, %v1531_v56  ;;  %v1459_v2 = vld [vmem:[%s2257_s19 + $0x20] sm:$0xf] }
  0x9e   : > { %1099 = vmatpush.bf16.msra.mxu2 %v1612_v41  ;;  %v1659_v61 = vld [vmem:[%s2257_s19 + $0x1b0] sm:$0xf]  ;;  %v1765_v62 = vld [vmem:[%s2257_s19 + $0x1b4] sm:$0xf0]  ;;  %v1596_v1 = vor.u32 %v1749_v60, %v1595_v59  ;;  %v1715_v3 = vld [vmem:[%s2257_s19 + $0x24] sm:$0xf0] }
  0x9f   : > { %1113 = vmatpush.bf16.msra.mxu3 %v1676_v45  ;;  %v1523_v4 = vld [vmem:[%s2257_s19 + $0xa0] sm:$0xf]  ;;  %v1660_v5 = vor.u32 %v1765_v62, %v1659_v61  ;;  %v1731_v6 = vld [vmem:[%s2257_s19 + $0xa4] sm:$0xf0]  ;;  %v1460_v11 = vor.u32 %v1715_v3, %v1459_v2  ;;  %v1451_v14 = vld [vmem:[%s2257_s19 + $0x10] sm:$0xf] }
  0xa0   : > { %1072 = vmatpush.bf16.msra.mxu0 %v1476_v51  ;;  %v1587_v7 = vld [vmem:[%s2257_s19 + $0x120] sm:$0xf]  ;;  %v1747_v8 = vld [vmem:[%s2257_s19 + $0x124] sm:$0xf0]  ;;  %v1524_v12 = vor.u32 %v1731_v6, %v1523_v4  ;;  %v1713_v15 = vld [vmem:[%s2257_s19 + $0x14] sm:$0xf0] }
  0xa1   : > { %1086 = vmatpush.bf16.msra.mxu1 %v1540_v52  ;;  %v1651_v9 = vld [vmem:[%s2257_s19 + $0x1a0] sm:$0xf]  ;;  %v1763_v10 = vld [vmem:[%s2257_s19 + $0x1a4] sm:$0xf0]  ;;  %v1588_v13 = vor.u32 %v1747_v8, %v1587_v7  ;;  %v1515_v16 = vld [vmem:[%s2257_s19 + $0x90] sm:$0xf]  ;;  %v1452_v24 = vor.u32 %v1713_v15, %v1451_v14 }
  0xa2   : > { %1100 = vmatpush.bf16.msra.mxu2 %v1604_v53  ;;  %v1652_v17 = vor.u32 %v1763_v10, %v1651_v9  ;;  %v1729_v18 = vld [vmem:[%s2257_s19 + $0x94] sm:$0xf0]  ;;  %v1579_v19 = vld [vmem:[%s2257_s19 + $0x110] sm:$0xf]  ;;  %v1443_v23 = vld [vmem:[%s2257_s19] sm:$0xf] }
  0xa3   : > { %1114 = vmatpush.bf16.msra.mxu3 %v1668_v57  ;;  %v1745_v20 = vld [vmem:[%s2257_s19 + $0x114] sm:$0xf0]  ;;  %v1643_v21 = vld [vmem:[%s2257_s19 + $0x190] sm:$0xf]  ;;  %v1711_v25 = vld [vmem:[%s2257_s19 + $0x4] sm:$0xf0]  ;;  %v1516_v28 = vor.u32 %v1729_v18, %v1515_v16 }
  0xa4   : > { %1073 = vmatpush.bf16.msra.mxu0 %v1468_v63  ;;  %v1761_v22 = vld [vmem:[%s2257_s19 + $0x194] sm:$0xf0]  ;;  %v1507_v26 = vld [vmem:[%s2257_s19 + $0x80] sm:$0xf]  ;;  %v1727_v27 = vld [vmem:[%s2257_s19 + $0x84] sm:$0xf0]  ;;  %v1580_v29 = vor.u32 %v1745_v20, %v1579_v19  ;;  %v1444_v40 = vor.u32 %v1711_v25, %v1443_v23 }
  0xa5   : > { %1087 = vmatpush.bf16.msra.mxu1 %v1532_v0  ;;  %v1571_v30 = vld [vmem:[%s2257_s19 + $0x100] sm:$0xf]  ;;  %v1743_v31 = vld [vmem:[%s2257_s19 + $0x104] sm:$0xf0]  ;;  %v1644_v33 = vor.u32 %v1761_v22, %v1643_v21  ;;  %v1724_v35 = vld [vmem:[%s2257_s19 + $0x74] sm:$0xf]  ;;  %v1508_v44 = vor.u32 %v1727_v27, %v1507_v26 }
  0xa6   : > { %1101 = vmatpush.bf16.msra.mxu2 %v1596_v1  ;;  %v1635_v32 = vld [vmem:[%s2257_s19 + $0x180] sm:$0xf]  ;;  %v1759_v34 = vld [vmem:[%s2257_s19 + $0x184] sm:$0xf0]  ;;  %v1501_v36 = vld [vmem:[%s2257_s19 + $0x78] sm:$0xf0]  ;;  %v1572_v45 = vor.u32 %v1743_v31, %v1571_v30 }
  0xa7   : > { %1115 = vmatpush.bf16.msra.mxu3 %v1660_v5  ;;  %v1740_v37 = vld [vmem:[%s2257_s19 + $0xf4] sm:$0xf]  ;;  %v1565_v38 = vld [vmem:[%s2257_s19 + $0xf8] sm:$0xf0]  ;;  %v1722_v46 = vld [vmem:[%s2257_s19 + $0x64] sm:$0xf]  ;;  %v1636_v50 = vor.u32 %v1759_v34, %v1635_v32  ;;  %v1504_v51 = vor.u32 %v1724_v35, %v1501_v36 }
  0xa8   : > { %1074 = vmatpush.bf16.msra.mxu0 %v1460_v11  ;;  %v1756_v39 = vld [vmem:[%s2257_s19 + $0x174] sm:$0xf]  ;;  %v1629_v41 = vld [vmem:[%s2257_s19 + $0x178] sm:$0xf0]  ;;  %v1493_v47 = vld [vmem:[%s2257_s19 + $0x68] sm:$0xf0]  ;;  %v1568_v56 = vor.u32 %v1740_v37, %v1565_v38 }
  0xa9   : > { %1088 = vmatpush.bf16.msra.mxu1 %v1524_v12  ;;  %v1772_v42 = vld [vmem:[%s2257_s19 + $0x1f4] sm:$0xf]  ;;  %v1693_v43 = vld [vmem:[%s2257_s19 + $0x1f8] sm:$0xf0]  ;;  %v1435_v48 = vld [vmem:[%s2255_s9 + $0x8] sm:$0xf]  ;;  %v1632_v57 = vor.u32 %v1756_v39, %v1629_v41  ;;  %v1496_v6 = vor.u32 %v1722_v46, %v1493_v47 }
  0xaa   : > { %1102 = vmatpush.bf16.msra.mxu2 %v1588_v13  ;;  %v1709_v49 = vld [vmem:[%s2255_s9 + $0x14] sm:$0xf0]  ;;  %v1738_v52 = vld [vmem:[%s2257_s19 + $0xe4] sm:$0xf]  ;;  %v1557_v53 = vld [vmem:[%s2257_s19 + $0xe8] sm:$0xf0]  ;;  %v1696_v61 = vor.u32 %v1772_v42, %v1693_v43 }
  0xab   : > { %1116 = vmatpush.bf16.msra.mxu3 %v1652_v17  ;;  %v1754_v54 = vld [vmem:[%s2257_s19 + $0x164] sm:$0xf]  ;;  %v1621_v55 = vld [vmem:[%s2257_s19 + $0x168] sm:$0xf0]  ;;  %v1437_v59 = vld [vmem:[%s2255_s9 + $0x18] sm:$0xf0]  ;;  %v2347_v62 = vor.u32 %v1709_v49, %v1435_v48  ;;  %v1560_v8 = vor.u32 %v1738_v52, %v1557_v53 }
  0xac   : > { %1075 = vmatpush.bf16.msra.mxu0 %v1452_v24  ;;  %v1707_v58 = vld [vmem:[%s2255_s9 + $0xc] sm:$0xf]  ;;  %v1427_v60 = vld [vmem:[%s2255_s9] sm:$0xf]  ;;  %v1708_v63 = vld [vmem:[%s2255_s9 + $0xc] sm:$0xf0]  ;;  %v1624_v9 = vor.u32 %v1754_v54, %v1621_v55 }
  0xad   : > { %1089 = vmatpush.bf16.msra.mxu1 %v1516_v28  ;;  %v1706_v0 = vld [vmem:[%s2255_s9 + $0x4] sm:$0xf]  ;;  %v1429_v1 = vld [vmem:[%s2255_s9 + $0x10] sm:$0xf0]  ;;  %v1685_v3 = vld [vmem:[%s2257_s19 + $0x1e8] sm:$0xf0]  ;;  %v2354_v4 = vor.u32 %v1707_v58, %v1437_v59  ;;  %v2356_v5 = vor.u32 %v1708_v63, %v1427_v60 }
  0xae   : > { %1103 = vmatpush.bf16.msra.mxu2 %v1580_v29  ;;  %v1770_v2 = vld [vmem:[%s2257_s19 + $0x1e4] sm:$0xf]  ;;  %v2358_v7 = vor.u32 %v1706_v0, %v1429_v1  ;;  %v1720_v10 = vld [vmem:[%s2257_s19 + $0x54] sm:$0xf]  ;;  %v1485_v11 = vld [vmem:[%s2257_s19 + $0x58] sm:$0xf0] }
  0xaf   : > { %1117 = vmatpush.bf16.msra.mxu3 %v1644_v33  ;;  %v1736_v12 = vld [vmem:[%s2257_s19 + $0xd4] sm:$0xf]  ;;  %v1688_v13 = vor.u32 %v1770_v2, %v1685_v3  ;;  %v1549_v14 = vld [vmem:[%s2257_s19 + $0xd8] sm:$0xf0]  ;;  %v1488_v19 = vor.u32 %v1720_v10, %v1485_v11  ;;  %v1718_v22 = vld [vmem:[%s2257_s19 + $0x44] sm:$0xf] }
  0xb0   : > { %1076 = vmatpush.bf16.msra.mxu0 %v1444_v40  ;;  %v1752_v15 = vld [vmem:[%s2257_s19 + $0x154] sm:$0xf]  ;;  %v1613_v16 = vld [vmem:[%s2257_s19 + $0x158] sm:$0xf0]  ;;  %v1552_v20 = vor.u32 %v1736_v12, %v1549_v14  ;;  %v1477_v23 = vld [vmem:[%s2257_s19 + $0x48] sm:$0xf0] }
  0xb1   : > { %1090 = vmatpush.bf16.msra.mxu1 %v1508_v44  ;;  %v1768_v17 = vld [vmem:[%s2257_s19 + $0x1d4] sm:$0xf]  ;;  %v1677_v18 = vld [vmem:[%s2257_s19 + $0x1d8] sm:$0xf0]  ;;  %v1616_v21 = vor.u32 %v1752_v15, %v1613_v16  ;;  %v1734_v24 = vld [vmem:[%s2257_s19 + $0xc4] sm:$0xf]  ;;  %v1480_v31 = vor.u32 %v1718_v22, %v1477_v23 }
  0xb2   : > { %1104 = vmatpush.bf16.msra.mxu2 %v1572_v45  ;;  %v1680_v25 = vor.u32 %v1768_v17, %v1677_v18  ;;  %v1541_v26 = vld [vmem:[%s2257_s19 + $0xc8] sm:$0xf0]  ;;  %v1750_v27 = vld [vmem:[%s2257_s19 + $0x144] sm:$0xf]  ;;  %v1716_v34 = vld [vmem:[%s2257_s19 + $0x34] sm:$0xf] }
  0xb3   : > { %1118 = vmatpush.bf16.msra.mxu3 %v1636_v50  ;;  %1077 = vmatmul.bf16.vlgmr.msra.gmra.mxu0 %v2356_v5  ;;  %v1605_v28 = vld [vmem:[%s2257_s19 + $0x148] sm:$0xf0]  ;;  %v1766_v29 = vld [vmem:[%s2257_s19 + $0x1c4] sm:$0xf]  ;;  %v1544_v32 = vor.u32 %v1734_v24, %v1541_v26  ;;  %v1469_v35 = vld [vmem:[%s2257_s19 + $0x38] sm:$0xf0] }
  0xb4   : > { %1125 = vmatpush.bf16.msrb.mxu0 %v1504_v51  ;;  %1091 = vmatmul.bf16.vlgmr.msra.gmra.mxu1 %v2358_v7  ;;  %v1669_v30 = vld [vmem:[%s2257_s19 + $0x1c8] sm:$0xf0]  ;;  %v1608_v33 = vor.u32 %v1750_v27, %v1605_v28  ;;  %v1732_v36 = vld [vmem:[%s2257_s19 + $0xb4] sm:$0xf]  ;;  %v1533_v38 = vld [vmem:[%s2257_s19 + $0xb8] sm:$0xf0]  ;;  %v1472_v43 = vor.u32 %v1716_v34, %v1469_v35 }
  0xb5   : > { %1139 = vmatpush.bf16.msrb.mxu1 %v1568_v56  ;;  %1105 = vmatmul.bf16.vlgmr.msra.gmra.mxu2 %v2347_v62  ;;  %v1672_v37 = vor.u32 %v1766_v29, %v1669_v30  ;;  %v1748_v39 = vld [vmem:[%s2257_s19 + $0x134] sm:$0xf]  ;;  %v1597_v40 = vld [vmem:[%s2257_s19 + $0x138] sm:$0xf0]  ;;  %v1536_v44 = vor.u32 %v1732_v36, %v1533_v38  ;;  %v1714_v46 = vld [vmem:[%s2257_s19 + $0x24] sm:$0xf] }
  0xb6   : > { %1153 = vmatpush.bf16.msrb.mxu2 %v1632_v57  ;;  %1119 = vmatmul.bf16.vlgmr.msra.gmra.mxu3 %v2354_v4  ;;  %v1764_v41 = vld [vmem:[%s2257_s19 + $0x1b4] sm:$0xf]  ;;  %v1661_v42 = vld [vmem:[%s2257_s19 + $0x1b8] sm:$0xf0]  ;;  %v1600_v45 = vor.u32 %v1748_v39, %v1597_v40  ;;  %v1461_v47 = vld [vmem:[%s2257_s19 + $0x28] sm:$0xf0] }
  0xb7   : > { %1167 = vmatpush.bf16.msrb.mxu3 %v1696_v61  ;;  %v1730_v48 = vld [vmem:[%s2257_s19 + $0xa4] sm:$0xf]  ;;  %v1664_v49 = vor.u32 %v1764_v41, %v1661_v42  ;;  %v1525_v50 = vld [vmem:[%s2257_s19 + $0xa8] sm:$0xf0]  ;;  %v1464_v55 = vor.u32 %v1714_v46, %v1461_v47  ;;  %v1712_v58 = vld [vmem:[%s2257_s19 + $0x14] sm:$0xf] }
  0xb8   : > { %1126 = vmatpush.bf16.msrb.mxu0 %v1496_v6  ;;  %v1746_v51 = vld [vmem:[%s2257_s19 + $0x124] sm:$0xf]  ;;  %v1589_v52 = vld [vmem:[%s2257_s19 + $0x128] sm:$0xf0]  ;;  %v1528_v56 = vor.u32 %v1730_v48, %v1525_v50  ;;  %v1453_v59 = vld [vmem:[%s2257_s19 + $0x18] sm:$0xf0] }
  0xb9   : > { %1140 = vmatpush.bf16.msrb.mxu1 %v1560_v8  ;;  %v1762_v53 = vld [vmem:[%s2257_s19 + $0x1a4] sm:$0xf]  ;;  %v1653_v54 = vld [vmem:[%s2257_s19 + $0x1a8] sm:$0xf0]  ;;  %v1592_v57 = vor.u32 %v1746_v51, %v1589_v52  ;;  %v1728_v60 = vld [vmem:[%s2257_s19 + $0x94] sm:$0xf]  ;;  %v1456_v6 = vor.u32 %v1712_v58, %v1453_v59 }
  0xba   : > { %1154 = vmatpush.bf16.msrb.mxu2 %v1624_v9  ;;  %v1656_v61 = vor.u32 %v1762_v53, %v1653_v54  ;;  %v1517_v63 = vld [vmem:[%s2257_s19 + $0x98] sm:$0xf0]  ;;  %v1744_v0 = vld [vmem:[%s2257_s19 + $0x114] sm:$0xf]  ;;  %v1710_v10 = vld [vmem:[%s2257_s19 + $0x4] sm:$0xf] }
  0xbb   : > { %1168 = vmatpush.bf16.msrb.mxu3 %v1688_v13  ;;  %v1581_v1 = vld [vmem:[%s2257_s19 + $0x118] sm:$0xf0]  ;;  %v1760_v2 = vld [vmem:[%s2257_s19 + $0x194] sm:$0xf]  ;;  %v1520_v8 = vor.u32 %v1728_v60, %v1517_v63  ;;  %v1445_v11 = vld [vmem:[%s2257_s19 + $0x8] sm:$0xf0] }
  0xbc   : > { %1127 = vmatpush.bf16.msrb.mxu0 %v1488_v19  ;;  %v1645_v3 = vld [vmem:[%s2257_s19 + $0x198] sm:$0xf0]  ;;  %v1584_v9 = vor.u32 %v1744_v0, %v1581_v1  ;;  %v1726_v12 = vld [vmem:[%s2257_s19 + $0x84] sm:$0xf]  ;;  %v1509_v14 = vld [vmem:[%s2257_s19 + $0x88] sm:$0xf0]  ;;  %v1448_v19 = vor.u32 %v1710_v10, %v1445_v11 }
  0xbd   : > { %1141 = vmatpush.bf16.msrb.mxu1 %v1552_v20  ;;  %v1648_v13 = vor.u32 %v1760_v2, %v1645_v3  ;;  %v1742_v15 = vld [vmem:[%s2257_s19 + $0x104] sm:$0xf]  ;;  %v1573_v16 = vld [vmem:[%s2257_s19 + $0x108] sm:$0xf0]  ;;  %v1512_v20 = vor.u32 %v1726_v12, %v1509_v14  ;;  %v657_v29 = vld [vmem:[#allocation2 + $0x10] sm:$0xff]  ;;  %p1697_p6 = scmp.ne.s32.totalorder %s1934_s21, 8 }
  0xbe   : > { %1155 = vmatpush.bf16.msrb.mxu2 %v1616_v21  ;;  %v1758_v17 = vld [vmem:[%s2257_s19 + $0x184] sm:$0xf]  ;;  %v1637_v18 = vld [vmem:[%s2257_s19 + $0x188] sm:$0xf0]  ;;  %v1576_v21 = vor.u32 %v1742_v15, %v1573_v16  ;;  %v659_v36 = vld [vmem:[#allocation2 + $0x18] sm:$0xff] }
  0xbf   : > { %1169 = vmatpush.bf16.msrb.mxu3 %v1680_v25  ;;  %v1640_v22 = vor.u32 %v1758_v17, %v1637_v18  ;;  %v660_v51 = vld [vmem:[#allocation2 + $0x8] sm:$0xff] }
  0xc0   : > { %1128 = vmatpush.bf16.msrb.mxu0 %v1480_v31 }
  0xc1   : > { %1142 = vmatpush.bf16.msrb.mxu1 %v1544_v32 }
  0xc2   : > { %1156 = vmatpush.bf16.msrb.mxu2 %v1608_v33 }
  0xc3   : > { %1170 = vmatpush.bf16.msrb.mxu3 %v1672_v37 }
  0xc4   : > { %1129 = vmatpush.bf16.msrb.mxu0 %v1472_v43  ;;  %v658_v43 = vld [vmem:[#allocation2] sm:$0xff] }
  0xc5   : > { %1143 = vmatpush.bf16.msrb.mxu1 %v1536_v44 }
  0xc6   : > { %1157 = vmatpush.bf16.msrb.mxu2 %v1600_v45 }
  0xc7   : > { %1171 = vmatpush.bf16.msrb.mxu3 %v1664_v49 }
  0xc8   : > { %1130 = vmatpush.bf16.msrb.mxu0 %v1464_v55 }
  0xc9   : > { %1144 = vmatpush.bf16.msrb.mxu1 %v1528_v56 }
  0xca   : > { %1158 = vmatpush.bf16.msrb.mxu2 %v1592_v57 }
  0xcb   : > { %1172 = vmatpush.bf16.msrb.mxu3 %v1656_v61 }
  0xcc   : > { %1131 = vmatpush.bf16.msrb.mxu0 %v1456_v6 }
  0xcd   : > { %1145 = vmatpush.bf16.msrb.mxu1 %v1520_v8 }
  0xce   : > { %1159 = vmatpush.bf16.msrb.mxu2 %v1584_v9 }
  0xcf   : > { %1173 = vmatpush.bf16.msrb.mxu3 %v1648_v13 }
  0xd0   : > { %1132 = vmatpush.bf16.msrb.mxu0 %v1448_v19 }
  0xd1   : > { %1146 = vmatpush.bf16.msrb.mxu1 %v1512_v20 }
  0xd2   : > { %1160 = vmatpush.bf16.msrb.mxu2 %v1576_v21 }
  0xd3   : > { %1174 = vmatpush.bf16.msrb.mxu3 %v1640_v22  ;;  %1133 = vmatmul.bf16.vlgmr.msrb.gmra.mxu0 %v2356_v5 }
  0xd4   : > { %1147 = vmatmul.bf16.vlgmr.msrb.gmra.mxu1 %v2358_v7 }
  0xd5   : > { %1161 = vmatmul.bf16.vlgmr.msrb.gmra.mxu2 %v2347_v62 }
  0xd6   : > { %1175 = vmatmul.bf16.vlgmr.msrb.gmra.mxu3 %v2354_v4 }
 0x130   : > { %v1078_v23 = vpop.f32.mrf.mxu0 }
 0x131   : > { %v1092_v24 = vpop.f32.mrf.mxu1 }
 0x132   : > { %v1093_v25 = vadd.f32 %v1092_v24, %v1078_v23 }
 0x138   : > { %v1106_v26 = vpop.f32.mrf.mxu2  ;;  %v1080_v31 = vpop.f32.mrf.mxu0 }
 0x139   : > { %v1107_v27 = vadd.f32 %v1106_v26, %v1093_v25  ;;  %v1120_v28 = vpop.f32.mrf.mxu3  ;;  %v1094_v32 = vpop.f32.mrf.mxu1 }
 0x13a   : > { %v1095_v34 = vadd.f32 %v1094_v32, %v1080_v31 }
 0x13b   : > { %v1121_v30 = vadd.f32 %v1120_v28, %v1107_v27 }
 0x13d   : > { %v1181_v33 = vadd.f32 %v1121_v30, %v657_v29 }
 0x13f   : > { %1185 = vst [vmem:[#allocation2 + $0x10] sm:$0xff] %v1181_v33 }
 0x140   : > { %v1108_v5 = vpop.f32.mrf.mxu2 }
 0x141   : > { %v1109_v35 = vadd.f32 %v1108_v5, %v1095_v34  ;;  %v1122_v7 = vpop.f32.mrf.mxu3 }
 0x143   : > { %v1123_v62 = vadd.f32 %v1122_v7, %v1109_v35 }
 0x145   : > { %v1183_v37 = vadd.f32 %v1123_v62, %v659_v36 }
 0x147   : > { %1187 = vst [vmem:[#allocation2 + $0x18] sm:$0xff] %v1183_v37 }
 0x150   : > { %v1134_v4 = vpop.f32.mrf.mxu0 }
 0x151   : > { %v1148_v38 = vpop.f32.mrf.mxu1 }
 0x152   : > { %v1149_v39 = vadd.f32 %v1148_v38, %v1134_v4 }
 0x158   : > { %v1162_v40 = vpop.f32.mrf.mxu2  ;;  %v1136_v45 = vpop.f32.mrf.mxu0 }
 0x159   : > { %v1163_v41 = vadd.f32 %v1162_v40, %v1149_v39  ;;  %v1176_v42 = vpop.f32.mrf.mxu3  ;;  %v1150_v46 = vpop.f32.mrf.mxu1 }
 0x15a   : > { %v1151_v48 = vadd.f32 %v1150_v46, %v1136_v45 }
 0x15b   : > { %v1177_v44 = vadd.f32 %v1176_v42, %v1163_v41 }
 0x15d   : > { %v1182_v47 = vadd.f32 %v1177_v44, %v658_v43 }
 0x15f   : > { %1186 = vst [vmem:[#allocation2] sm:$0xff] %v1182_v47 }
 0x160   : > { %v1164_v49 = vpop.f32.mrf.mxu2 }
 0x161   : > { %v1165_v50 = vadd.f32 %v1164_v49, %v1151_v48  ;;  %v1178_v52 = vpop.f32.mrf.mxu3 }
 0x163   : > { %v1179_v53 = vadd.f32 %v1178_v52, %v1165_v50  ;;  %1192 = sbr.rel (%p1697_p6) target bundleno = 376 (0x178), region = 143 }
 0x165   : > { %v1184_v54 = vadd.f32 %v1179_v53, %v660_v51 }
 0x167   : > { %1188 = vst [vmem:[#allocation2 + $0x8] sm:$0xff] %v1184_v54 }
 0x168   : > { %v1193_v55 = vld [vmem:[#allocation2 + $0x10] sm:$0xff]  ;;  %v1194_v56 = vld [vmem:[#allocation2] sm:$0xff]  ;;  %v1195_v61 = vld [vmem:[#allocation2 + $0x18] sm:$0xff] }
 0x169   : > { %v1197_v57 = vld [vmem:[%s643_s30] sm:$0x3]  ;;  %v1208_v2 = vld [vmem:[%s602_s17 + $0x8] sm:$0xff] }
 0x16a   : > { %v1199_v58 = vperm.slane %v1197_v57, 0  ;;  %v1200_v59 = vperm.slane %v1197_v57, 1  ;;  %v1207_v60 = vld [vmem:[%s602_s17] sm:$0xff]  ;;  %v1211_v10 = vunpack.c.l.bf16 %v1208_v2  ;;  %v1212_v11 = vunpack.c.h.bf16 %v1208_v2 }
 0x16b   : > { %v1209_v0 = vunpack.c.l.bf16 %v1207_v60  ;;  %v1210_v1 = vunpack.c.h.bf16 %v1207_v60 }
 0x16c   : > { %v1203_v3 = vadd.f32 %v1199_v58, %v1193_v55  ;;  %v1204_v6 = vadd.f32 %v1200_v59, %v1194_v56  ;;  %v1205_v8 = vadd.f32 %v1199_v58, %v1195_v61 }
 0x16e   : > { %v1196_v63 = vld [vmem:[#allocation2 + $0x8] sm:$0xff]  ;;  %v1213_v12 = vadd.f32 %v1209_v0, %v1203_v3  ;;  %v1214_v13 = vadd.f32 %v1210_v1, %v1204_v6  ;;  %v1215_v14 = vadd.f32 %v1211_v10, %v1205_v8 }
 0x16f   : > { %v1206_v9 = vadd.f32 %v1200_v59, %v1196_v63 }
 0x170   : > { %v1217_v16 = vmax.f32 %v1213_v12, 0.0  ;;  %v1218_v17 = vmax.f32 %v1214_v13, 0.0  ;;  %v1219_v18 = vmax.f32 %v1215_v14, 0.0 }
 0x171   : > { %v1216_v15 = vadd.f32 %v1212_v11, %v1206_v9 }
 0x172   : > { %v1221_v20 = vpack.c.bf16 %v1218_v17, %v1217_v16 }
 0x173   : > { %v1220_v19 = vmax.f32 %v1216_v15, 0.0 }
 0x174   : > { %1223 = vst [vmem:[%s2261_s6] sm:$0xff] %v1221_v20 }
 0x175   : > { %v1222_v21 = vpack.c.bf16 %v1220_v19, %v1219_v18 }
 0x177   : > { %1224 = vst [vmem:[%s2261_s6 + $0x8] sm:$0xff] %v1222_v21 }
 0x178 PF: > { %1231 = sbr.rel (!%p2082_p13) target bundleno = 384 (0x180), region = 147  ;;  %s1774_s21 = sshll.u32 (%p2082_p13), %s1938_s22, 3 }
 0x179   : > { %s1237_s28 = scalar_lea.vmem (%p2082_p13), %s2473_s4, %s1774_s21 }
 0x17b   : > { %v1268_v22 = vld [vmem:[%s2261_s6] sm:$0xff] (%p2082_p13) }
 0x17c   : > { %1269 = vst [vmem:[%s1237_s28] sm:$0xff] (%p2082_p13), %v1268_v22 }
 0x17e   : > { %v1270_v23 = vld [vmem:[%s2261_s6 + $0x8] sm:$0xff] }
 0x17f   : > { %1271 = vst [vmem:[%s1237_s28 + $0x10] sm:$0xff] %v1270_v23 }
 0x180 PF: > { %s14_s25 = sadd.s32 1, %s1950_s25   ;;  %s2484_s29 = sld [smem:[#allocation7_spill]] }
 0x181   : > { %p11_p7 = scmp.ge.s32.totalorder %s14_s25, 20   ;;  %s2485_s10 = sld [smem:[#allocation8_spill]] }
 0x182   : > { %s2486_s15 = smov %s1914_s16  ;;  %s2487_s16 = smov %s2074_s13 }
 0x183   : > { %s2488_s17 = smov %s1922_s18  ;;  %s2489_s18 = smov %s2071_s12 }
 0x184   : > { %s2490_s19 = smov %s1930_s20  ;;  %s2491_s20 = smov %s2055_s7 }
 0x185   : > { %s2492_s21 = smov %s1942_s23  ;;  %s2493_s22 = smov %s1946_s24 }
 0x186   : > { %s2494_s23 = smov %s2484_s29  ;;  %13 = sbr.rel (!%p11_p7) target bundleno = 8 (0x8), region = 235 }
 0x187   : > { %s2495_s24 = smov %s2485_s10 }

// kernel: _lambda_.39
= control target key start
LH: loop header
LB: loop body
LE: loop exit
PB: predicated region body
PF: predicated region fallthrough
CT: control target
= control target key end

     0   :  { %s2309_s0 = inlined_call_operand.vmem [shape: bf16[16,4608], index: 0, kind: input, shape index: {}]   ;;  %s2310_s1 = inlined_call_operand.vmem [shape: bf16[4608,512], index: 1, kind: input, shape index: {}]   ;;  %s2311_s2 = inlined_call_operand.vmem [shape: f32[1,512], index: 2, kind: input, shape index: {}]   ;;  %s2312_s3 = inlined_call_operand.vmem [shape: bf16[16,512], index: 3, kind: output, shape index: {}]  }
   0x1   :  { %2314 = sst [smem:[#allocation7_spill]] %s2309_s0 }
   0x2   :  { %2315 = sst [smem:[#allocation8_spill]] %s2310_s1 }
   0x3   :  { %s1843_s12 = smov 0   ;;  %s1845_s13 = smov 0  }
   0x4   :  { %s1847_s14 = smov 0   ;;  %s1849_s15 = smov 0  }
   0x5   :  { %s1851_s16 = smov 0   ;;  %s1853_s17 = smov 0  }
   0x6   :  { %s1855_s18 = smov 0   ;;  %s1857_s19 = smov 0  }
   0x7   :  { %s1859_s20 = smov 0   ;;  %s1861_s21 = smov 0  }
   0x8   :  { %s1863_s22 = smov 0  }
   0x9 LB: > { %s1278_s23 = sadd.s32 4294967295, %s1820_s22   ;;  %s25_s24 = sadd.s32 1, %s1812_s20  ;;  %s1820_s22 = sphi %s1863_s22, %s13_s22   ;;  %s1816_s21 = sphi %s1861_s21, %s2332_s21   ;;  %s1812_s20 = sphi %s1859_s20, %s2331_s20   ;;  %s1808_s19 = sphi %s1857_s19, %s2330_s19   ;;  %s1804_s18 = sphi %s1855_s18, %s2329_s18   ;;  %s1800_s17 = sphi %s1853_s17, %s2328_s17   ;;  %s1796_s16 = sphi %s1851_s16, %s2327_s16   ;;  %s1792_s15 = sphi %s1849_s15, %s2326_s15   ;;  %s1788_s14 = sphi %s1847_s14, %s2325_s14   ;;  %s1784_s13 = sphi %s1845_s13, %s2324_s13   ;;  %s1780_s12 = sphi %s1843_s12, %s2323_s12  }
   0xa   : > { %p26_p0 = scmp.ge.s32.totalorder %s25_s24, 9  ;;  %s28_s25 = sadd.s32 1, %s1816_s21 }
   0xb   : > { %s41_s26 = sadd.s32 1, %s1800_s17  ;;  %p48_p1 = scmp.ne.s32.totalorder %s1800_s17, %s1796_s16 }
   0xc   : > { %s2334_s24 = smov (%p26_p0, %s25_s24), 0  ;;  %s2336_s25 = smov (!%p26_p0, %s28_s25), %s1816_s21 }
   0xd   : > { %s37_s27 = ssub.s32 %s1812_s20, %s2334_s24  ;;  %p49_p2 = scmp.eq.s32.totalorder %s1820_s22, 0 }
   0xe   : > { %p30_p3 = scmp.ge.s32.totalorder %s2336_s25, 2  ;;  %p39_p4 = scmp.eq.s32.totalorder %s37_s27, 0 }
   0xf   : > { %p1910_p5 = por %p49_p2, %p48_p1  ;;  %s69_s29 = sadd.s32 1, %s1792_s15 }
  0x10   : > { %s2338_s25 = smov (%p30_p3, %s2336_s25), 0  ;;  %p76_p6 = scmp.ne.s32.totalorder %s1792_s15, %s1788_s14 }
  0x11   : > { %2317 = sst [smem:[#allocation6_spill]] %s2338_s25  ;;  %s65_s4 = ssub.s32 %s1816_s21, %s2338_s25 }
  0x12   : > { %s1918_s30 = scalar_select %p39_p4, %s1800_s17, %s41_s26  }
  0x13   : > { %s66_s5 = sor.u32 %s65_s4, %s37_s27  ;;  %p121_p7 = scmp.eq.s32.totalorder %s65_s4, 0 }
  0x14   : > { %p67_p8 = scmp.eq.s32.totalorder %s66_s5, 0  ;;  %p1924_p9 = por %p76_p6, %p49_p2 }
  0x15   : > { %s123_s7 = sadd.s32 1, %s1784_s13  ;;  %p133_p10 = scmp.ne.s32.totalorder %s1784_s13, %s1780_s12 }
  0x16   : > { %s1932_s8 = scalar_select %p67_p8, %s1792_s15, %s69_s29  }
  0x17   : > { %s1935_s9 = scalar_select %p121_p7, %s1784_s13, %s123_s7  }
  0x18   : > { %p134_p11 = scmp.eq.s32.totalorder %s1278_s23, 17  ;;  %p1281_p13 = scmp.ge.s32.totalorder %s1820_s22, 18 }
  0x1a   : > { %p1937_p12 = por %p134_p11, %p133_p10  ;;  %156 = sbr.rel (%p1281_p13) target bundleno = 119 (0x77), region = 16 }
  0x1f   : > { %159 = sbr.rel (!%p1910_p5) target bundleno = 45 (0x2d), region = 20  ;;  %s161_s11 = sand.u32 (%p1910_p5), 1, %s1800_s17  }
  0x20   : > { %s1574_s26 = sshll.u32 (%p1910_p5), %s1812_s20, 4  ;;  %s1282_s27 = sshll.u32 (%p1910_p5), %s161_s11, 5 }
  0x21   : > { %s2320_s0 = sld [smem:[#allocation7_spill]] (%p1910_p5)  ;;  %s163_s23 = scalar_lea.vmem (%p1910_p5), [#allocation3], %s1282_s27 }
  0x27   : > { %s169_s5 = scalar_lea.vmem %s2320_s0, %s1574_s26 }
  0x28   : > { %v182_v0 = vld [vmem:[%s169_s5] sm:$0xff]  ;;  %v184_v1 = vld [vmem:[%s169_s5 + $0x8] sm:$0xff]  ;;  %v186_v2 = vld [vmem:[%s169_s5 + $0x90] sm:$0xff] }
  0x29   : > { %183 = vst [vmem:[%s163_s23] sm:$0xff] %v182_v0  ;;  %v188_v3 = vld [vmem:[%s169_s5 + $0x98] sm:$0xff] }
  0x2a   : > { %185 = vst [vmem:[%s163_s23 + $0x8] sm:$0xff] %v184_v1 }
  0x2b   : > { %187 = vst [vmem:[%s163_s23 + $0x10] sm:$0xff] %v186_v2 }
  0x2c   : > { %189 = vst [vmem:[%s163_s23 + $0x18] sm:$0xff] %v188_v3 }
  0x2d PF: > { %195 = sbr.rel (!%p1924_p9) target bundleno = 119 (0x77), region = 43  ;;  %s197_s28 = sand.u32 (%p1924_p9), 1, %s1792_s15  }
  0x2e   : > { %s1287_s7 = sshll.u32 (%p1924_p9), %s1816_s21, 1  ;;  %s1285_s11 = sshll.u32 (%p1924_p9), %s197_s28, 9 }
  0x2f   : > { %s1575_s26 = sshll.u32 (%p1924_p9), %s1812_s20, 8  ;;  %s2321_s1 = sld [smem:[#allocation8_spill]] (%p1924_p9) }
  0x30   : > { %s203_s29 = sadd.s32 (%p1924_p9), %s1575_s26, %s1287_s7  ;;  %s1962_s6 = scalar_lea.vmem (%p1924_p9), [#allocation4], %s1285_s11 }
  0x31   : > { %s1289_s4 = sshll.u32 (%p1924_p9), %s203_s29, 2 }
  0x35   : > { %s1957_s5 = scalar_lea.vmem %s2321_s1, %s1289_s4 }
  0x36   : > { %v360_v4 = vld [vmem:[%s1957_s5] sm:$0xff]  ;;  %v362_v5 = vld [vmem:[%s1957_s5 + $0x10] sm:$0xff] }
  0x37   : > { %v364_v6 = vld [vmem:[%s1957_s5 + $0x20] sm:$0xff]  ;;  %361 = vst [vmem:[%s1962_s6] sm:$0xff] %v360_v4  ;;  %v366_v7 = vld [vmem:[%s1957_s5 + $0x30] sm:$0xff] }
  0x38   : > { %363 = vst [vmem:[%s1962_s6 + $0x8] sm:$0xff] %v362_v5  ;;  %v368_v8 = vld [vmem:[%s1957_s5 + $0x40] sm:$0xff]  ;;  %v370_v9 = vld [vmem:[%s1957_s5 + $0x50] sm:$0xff] }
  0x39   : > { %365 = vst [vmem:[%s1962_s6 + $0x10] sm:$0xff] %v364_v6  ;;  %v372_v10 = vld [vmem:[%s1957_s5 + $0x60] sm:$0xff]  ;;  %v374_v11 = vld [vmem:[%s1957_s5 + $0x70] sm:$0xff] }
  0x3a   : > { %367 = vst [vmem:[%s1962_s6 + $0x18] sm:$0xff] %v366_v7  ;;  %v376_v12 = vld [vmem:[%s1957_s5 + $0x80] sm:$0xff]  ;;  %v378_v13 = vld [vmem:[%s1957_s5 + $0x90] sm:$0xff] }
  0x3b   : > { %369 = vst [vmem:[%s1962_s6 + $0x20] sm:$0xff] %v368_v8  ;;  %v380_v14 = vld [vmem:[%s1957_s5 + $0xa0] sm:$0xff]  ;;  %v382_v15 = vld [vmem:[%s1957_s5 + $0xb0] sm:$0xff] }
  0x3c   : > { %371 = vst [vmem:[%s1962_s6 + $0x28] sm:$0xff] %v370_v9  ;;  %v384_v16 = vld [vmem:[%s1957_s5 + $0xc0] sm:$0xff]  ;;  %v386_v17 = vld [vmem:[%s1957_s5 + $0xd0] sm:$0xff] }
  0x3d   : > { %373 = vst [vmem:[%s1962_s6 + $0x30] sm:$0xff] %v372_v10  ;;  %v388_v18 = vld [vmem:[%s1957_s5 + $0xe0] sm:$0xff]  ;;  %v390_v19 = vld [vmem:[%s1957_s5 + $0xf0] sm:$0xff] }
  0x3e   : > { %375 = vst [vmem:[%s1962_s6 + $0x38] sm:$0xff] %v374_v11  ;;  %v392_v20 = vld [vmem:[%s1957_s5 + $0x100] sm:$0xff]  ;;  %v394_v21 = vld [vmem:[%s1957_s5 + $0x110] sm:$0xff] }
  0x3f   : > { %377 = vst [vmem:[%s1962_s6 + $0x40] sm:$0xff] %v376_v12  ;;  %v396_v22 = vld [vmem:[%s1957_s5 + $0x120] sm:$0xff]  ;;  %v398_v23 = vld [vmem:[%s1957_s5 + $0x130] sm:$0xff] }
  0x40   : > { %379 = vst [vmem:[%s1962_s6 + $0x48] sm:$0xff] %v378_v13  ;;  %v400_v24 = vld [vmem:[%s1957_s5 + $0x140] sm:$0xff]  ;;  %v402_v25 = vld [vmem:[%s1957_s5 + $0x150] sm:$0xff] }
  0x41   : > { %381 = vst [vmem:[%s1962_s6 + $0x50] sm:$0xff] %v380_v14  ;;  %v404_v26 = vld [vmem:[%s1957_s5 + $0x160] sm:$0xff]  ;;  %v406_v27 = vld [vmem:[%s1957_s5 + $0x170] sm:$0xff] }
  0x42   : > { %383 = vst [vmem:[%s1962_s6 + $0x58] sm:$0xff] %v382_v15  ;;  %v408_v28 = vld [vmem:[%s1957_s5 + $0x180] sm:$0xff]  ;;  %v410_v29 = vld [vmem:[%s1957_s5 + $0x190] sm:$0xff] }
  0x43   : > { %385 = vst [vmem:[%s1962_s6 + $0x60] sm:$0xff] %v384_v16  ;;  %v412_v30 = vld [vmem:[%s1957_s5 + $0x1a0] sm:$0xff]  ;;  %v414_v31 = vld [vmem:[%s1957_s5 + $0x1b0] sm:$0xff] }
  0x44   : > { %387 = vst [vmem:[%s1962_s6 + $0x68] sm:$0xff] %v386_v17  ;;  %v416_v32 = vld [vmem:[%s1957_s5 + $0x1c0] sm:$0xff]  ;;  %v418_v33 = vld [vmem:[%s1957_s5 + $0x1d0] sm:$0xff] }
  0x45   : > { %389 = vst [vmem:[%s1962_s6 + $0x70] sm:$0xff] %v388_v18  ;;  %v420_v34 = vld [vmem:[%s1957_s5 + $0x1e0] sm:$0xff]  ;;  %v422_v35 = vld [vmem:[%s1957_s5 + $0x1f0] sm:$0xff] }
  0x46   : > { %391 = vst [vmem:[%s1962_s6 + $0x78] sm:$0xff] %v390_v19  ;;  %v424_v36 = vld [vmem:[%s1957_s5 + $0x200] sm:$0xff]  ;;  %v426_v37 = vld [vmem:[%s1957_s5 + $0x210] sm:$0xff] }
  0x47   : > { %393 = vst [vmem:[%s1962_s6 + $0x80] sm:$0xff] %v392_v20  ;;  %v428_v38 = vld [vmem:[%s1957_s5 + $0x220] sm:$0xff]  ;;  %v430_v39 = vld [vmem:[%s1957_s5 + $0x230] sm:$0xff] }
  0x48   : > { %395 = vst [vmem:[%s1962_s6 + $0x88] sm:$0xff] %v394_v21  ;;  %v432_v40 = vld [vmem:[%s1957_s5 + $0x240] sm:$0xff]  ;;  %v434_v41 = vld [vmem:[%s1957_s5 + $0x250] sm:$0xff] }
  0x49   : > { %397 = vst [vmem:[%s1962_s6 + $0x90] sm:$0xff] %v396_v22  ;;  %v436_v42 = vld [vmem:[%s1957_s5 + $0x260] sm:$0xff]  ;;  %v438_v43 = vld [vmem:[%s1957_s5 + $0x270] sm:$0xff] }
  0x4a   : > { %399 = vst [vmem:[%s1962_s6 + $0x98] sm:$0xff] %v398_v23  ;;  %v440_v44 = vld [vmem:[%s1957_s5 + $0x280] sm:$0xff]  ;;  %v442_v45 = vld [vmem:[%s1957_s5 + $0x290] sm:$0xff] }
  0x4b   : > { %401 = vst [vmem:[%s1962_s6 + $0xa0] sm:$0xff] %v400_v24  ;;  %v444_v46 = vld [vmem:[%s1957_s5 + $0x2a0] sm:$0xff]  ;;  %v446_v47 = vld [vmem:[%s1957_s5 + $0x2b0] sm:$0xff] }
  0x4c   : > { %403 = vst [vmem:[%s1962_s6 + $0xa8] sm:$0xff] %v402_v25  ;;  %v448_v48 = vld [vmem:[%s1957_s5 + $0x2c0] sm:$0xff]  ;;  %v450_v49 = vld [vmem:[%s1957_s5 + $0x2d0] sm:$0xff] }
  0x4d   : > { %405 = vst [vmem:[%s1962_s6 + $0xb0] sm:$0xff] %v404_v26  ;;  %v452_v50 = vld [vmem:[%s1957_s5 + $0x2e0] sm:$0xff]  ;;  %v454_v51 = vld [vmem:[%s1957_s5 + $0x2f0] sm:$0xff] }
  0x4e   : > { %407 = vst [vmem:[%s1962_s6 + $0xb8] sm:$0xff] %v406_v27  ;;  %v456_v52 = vld [vmem:[%s1957_s5 + $0x300] sm:$0xff]  ;;  %v458_v53 = vld [vmem:[%s1957_s5 + $0x310] sm:$0xff] }
  0x4f   : > { %409 = vst [vmem:[%s1962_s6 + $0xc0] sm:$0xff] %v408_v28  ;;  %v460_v54 = vld [vmem:[%s1957_s5 + $0x320] sm:$0xff]  ;;  %v462_v55 = vld [vmem:[%s1957_s5 + $0x330] sm:$0xff] }
  0x50   : > { %411 = vst [vmem:[%s1962_s6 + $0xc8] sm:$0xff] %v410_v29  ;;  %v464_v56 = vld [vmem:[%s1957_s5 + $0x340] sm:$0xff]  ;;  %v466_v57 = vld [vmem:[%s1957_s5 + $0x350] sm:$0xff] }
  0x51   : > { %413 = vst [vmem:[%s1962_s6 + $0xd0] sm:$0xff] %v412_v30  ;;  %v468_v58 = vld [vmem:[%s1957_s5 + $0x360] sm:$0xff]  ;;  %v470_v59 = vld [vmem:[%s1957_s5 + $0x370] sm:$0xff] }
  0x52   : > { %415 = vst [vmem:[%s1962_s6 + $0xd8] sm:$0xff] %v414_v31  ;;  %v472_v60 = vld [vmem:[%s1957_s5 + $0x380] sm:$0xff]  ;;  %v474_v61 = vld [vmem:[%s1957_s5 + $0x390] sm:$0xff] }
  0x53   : > { %417 = vst [vmem:[%s1962_s6 + $0xe0] sm:$0xff] %v416_v32  ;;  %v476_v62 = vld [vmem:[%s1957_s5 + $0x3a0] sm:$0xff]  ;;  %v478_v63 = vld [vmem:[%s1957_s5 + $0x3b0] sm:$0xff] }
  0x54   : > { %419 = vst [vmem:[%s1962_s6 + $0xe8] sm:$0xff] %v418_v33  ;;  %v480_v0 = vld [vmem:[%s1957_s5 + $0x3c0] sm:$0xff]  ;;  %v482_v1 = vld [vmem:[%s1957_s5 + $0x3d0] sm:$0xff] }
  0x55   : > { %421 = vst [vmem:[%s1962_s6 + $0xf0] sm:$0xff] %v420_v34  ;;  %v484_v2 = vld [vmem:[%s1957_s5 + $0x3e0] sm:$0xff]  ;;  %v486_v3 = vld [vmem:[%s1957_s5 + $0x3f0] sm:$0xff] }
  0x56   : > { %423 = vst [vmem:[%s1962_s6 + $0xf8] sm:$0xff] %v422_v35 }
  0x57   : > { %425 = vst [vmem:[%s1962_s6 + $0x100] sm:$0xff] %v424_v36 }
  0x58   : > { %427 = vst [vmem:[%s1962_s6 + $0x108] sm:$0xff] %v426_v37 }
  0x59   : > { %429 = vst [vmem:[%s1962_s6 + $0x110] sm:$0xff] %v428_v38 }
  0x5a   : > { %431 = vst [vmem:[%s1962_s6 + $0x118] sm:$0xff] %v430_v39 }
  0x5b   : > { %433 = vst [vmem:[%s1962_s6 + $0x120] sm:$0xff] %v432_v40 }
  0x5c   : > { %435 = vst [vmem:[%s1962_s6 + $0x128] sm:$0xff] %v434_v41 }
  0x5d   : > { %437 = vst [vmem:[%s1962_s6 + $0x130] sm:$0xff] %v436_v42 }
  0x5e   : > { %439 = vst [vmem:[%s1962_s6 + $0x138] sm:$0xff] %v438_v43 }
  0x5f   : > { %441 = vst [vmem:[%s1962_s6 + $0x140] sm:$0xff] %v440_v44 }
  0x60   : > { %443 = vst [vmem:[%s1962_s6 + $0x148] sm:$0xff] %v442_v45 }
  0x61   : > { %445 = vst [vmem:[%s1962_s6 + $0x150] sm:$0xff] %v444_v46 }
  0x62   : > { %447 = vst [vmem:[%s1962_s6 + $0x158] sm:$0xff] %v446_v47 }
  0x63   : > { %449 = vst [vmem:[%s1962_s6 + $0x160] sm:$0xff] %v448_v48 }
  0x64   : > { %451 = vst [vmem:[%s1962_s6 + $0x168] sm:$0xff] %v450_v49 }
  0x65   : > { %453 = vst [vmem:[%s1962_s6 + $0x170] sm:$0xff] %v452_v50 }
  0x66   : > { %455 = vst [vmem:[%s1962_s6 + $0x178] sm:$0xff] %v454_v51 }
  0x67   : > { %457 = vst [vmem:[%s1962_s6 + $0x180] sm:$0xff] %v456_v52 }
  0x68   : > { %459 = vst [vmem:[%s1962_s6 + $0x188] sm:$0xff] %v458_v53 }
  0x69   : > { %461 = vst [vmem:[%s1962_s6 + $0x190] sm:$0xff] %v460_v54 }
  0x6a   : > { %463 = vst [vmem:[%s1962_s6 + $0x198] sm:$0xff] %v462_v55 }
  0x6b   : > { %465 = vst [vmem:[%s1962_s6 + $0x1a0] sm:$0xff] %v464_v56 }
  0x6c   : > { %467 = vst [vmem:[%s1962_s6 + $0x1a8] sm:$0xff] %v466_v57 }
  0x6d   : > { %469 = vst [vmem:[%s1962_s6 + $0x1b0] sm:$0xff] %v468_v58 }
  0x6e   : > { %471 = vst [vmem:[%s1962_s6 + $0x1b8] sm:$0xff] %v470_v59 }
  0x6f   : > { %473 = vst [vmem:[%s1962_s6 + $0x1c0] sm:$0xff] %v472_v60 }
  0x70   : > { %475 = vst [vmem:[%s1962_s6 + $0x1c8] sm:$0xff] %v474_v61 }
  0x71   : > { %477 = vst [vmem:[%s1962_s6 + $0x1d0] sm:$0xff] %v476_v62 }
  0x72   : > { %479 = vst [vmem:[%s1962_s6 + $0x1d8] sm:$0xff] %v478_v63 }
  0x73   : > { %481 = vst [vmem:[%s1962_s6 + $0x1e0] sm:$0xff] %v480_v0 }
  0x74   : > { %483 = vst [vmem:[%s1962_s6 + $0x1e8] sm:$0xff] %v482_v1 }
  0x75   : > { %485 = vst [vmem:[%s1962_s6 + $0x1f0] sm:$0xff] %v484_v2 }
  0x76   : > { %487 = vst [vmem:[%s1962_s6 + $0x1f8] sm:$0xff] %v486_v3 }
  0x77 PF: > { %p1290_p0 = scmp.ge.s32.totalorder %s1820_s22, 1  ;;  %p500_p1 = scmp.lt.s32.totalorder %s1820_s22, 19 }
  0x79   : > { %p501_p2 = pnand %p1290_p0, %p500_p1 }
  0x7a   : > { %s507_s0 = sand.u32 (!%p501_p2), 1, %s1796_s16   ;;  %s514_s23 = sand.u32 (!%p501_p2), 1, %s1788_s14  }
  0x7b   : > { %504 = sbr.rel (%p501_p2) target bundleno = 377 (0x179), region = 85  ;;  %s1291_s28 = sshll.u32 (!%p501_p2), %s507_s0, 5 }
  0x7c   : > { %s1292_s7 = sshll.u32 (!%p501_p2), %s514_s23, 9  ;;  %s541_s11 = sand.u32 (!%p501_p2), 1, %s1780_s12  }
  0x7d   : > { %s1294_s26 = sshll.u32 (!%p501_p2), %s1808_s19, 1  ;;  %s1293_s29 = sshll.u32 (!%p501_p2), %s541_s11, 4 }
  0x7e   : > { %p549_p3 = scmp.lt.s32.totalorder (!%p501_p2), %s1294_s26, 3  ;;  %s2101_s6 = scalar_lea.vmem (!%p501_p2), [#allocation3], %s1291_s28 }
  0x7f   : > { %s2103_s1 = scalar_lea.vmem (!%p501_p2), [#allocation4], %s1292_s7  ;;  %s2105_s25 = scalar_lea.vmem (!%p501_p2), [#allocation5], %s1293_s29 }
  0x80   : > { %s2340_s26 = smov (!%p549_p3, %s1294_s26), 3  ;;  %p1295_p4 = scmp.ne.s32.totalorder %s1804_s18, 0 }
  0x81   : > { %s551_s5 = scalar_lea.vmem %s2311_s2, %s2340_s26 }
  0x82   : > { %558 = sbr.rel (%p1295_p4) target bundleno = 140 (0x8c), region = 97 }
  0x87   : > { %v1822_v4 = vmov 0.0  }
  0x88   : > { %559 = vst [vmem:[#allocation2 + $0x10] sm:$0xff] %v1822_v4 }
  0x89   : > { %560 = vst [vmem:[#allocation2] sm:$0xff] %v1822_v4 }
  0x8a   : > { %561 = vst [vmem:[#allocation2 + $0x18] sm:$0xff] %v1822_v4 }
  0x8b   : > { %562 = vst [vmem:[#allocation2 + $0x8] sm:$0xff] %v1822_v4 }
  0x8c PF: > { %v1370_v5 = vld [vmem:[%s2103_s1 + $0x70] sm:$0xf]  ;;  %v1595_v6 = vld [vmem:[%s2103_s1 + $0x74] sm:$0xf0]  ;;  %v1362_v16 = vld [vmem:[%s2103_s1 + $0x60] sm:$0xf] }
  0x8d   : > { %v1434_v7 = vld [vmem:[%s2103_s1 + $0xf0] sm:$0xf]  ;;  %v1371_v8 = vor.u32 %v1595_v6, %v1370_v5  ;;  %v1611_v9 = vld [vmem:[%s2103_s1 + $0xf4] sm:$0xf0]  ;;  %v1593_v18 = vld [vmem:[%s2103_s1 + $0x64] sm:$0xf0] }
  0x8e   : > { %v1498_v10 = vld [vmem:[%s2103_s1 + $0x170] sm:$0xf]  ;;  %v1627_v11 = vld [vmem:[%s2103_s1 + $0x174] sm:$0xf0]  ;;  %v1435_v12 = vor.u32 %v1611_v9, %v1434_v7  ;;  %v1426_v19 = vld [vmem:[%s2103_s1 + $0xe0] sm:$0xf]  ;;  %v1363_v21 = vor.u32 %v1593_v18, %v1362_v16 }
  0x8f   : > { %v1499_v13 = vor.u32 %v1627_v11, %v1498_v10  ;;  %v1562_v14 = vld [vmem:[%s2103_s1 + $0x1f0] sm:$0xf]  ;;  %v1643_v15 = vld [vmem:[%s2103_s1 + $0x1f4] sm:$0xf0]  ;;  %975 = vmatpush.bf16.msra.mxu0 %v1371_v8  ;;  %v1609_v20 = vld [vmem:[%s2103_s1 + $0xe4] sm:$0xf0] }
  0x90   : > { %v1563_v17 = vor.u32 %v1643_v15, %v1562_v14  ;;  %989 = vmatpush.bf16.msra.mxu1 %v1435_v12  ;;  %v1427_v22 = vor.u32 %v1609_v20, %v1426_v19  ;;  %v1490_v23 = vld [vmem:[%s2103_s1 + $0x160] sm:$0xf]  ;;  %v1625_v24 = vld [vmem:[%s2103_s1 + $0x164] sm:$0xf0]  ;;  %v1354_v28 = vld [vmem:[%s2103_s1 + $0x50] sm:$0xf] }
  0x91   : > { %1003 = vmatpush.bf16.msra.mxu2 %v1499_v13  ;;  %v1554_v25 = vld [vmem:[%s2103_s1 + $0x1e0] sm:$0xf]  ;;  %v1491_v26 = vor.u32 %v1625_v24, %v1490_v23  ;;  %v1641_v27 = vld [vmem:[%s2103_s1 + $0x1e4] sm:$0xf0]  ;;  %v1591_v29 = vld [vmem:[%s2103_s1 + $0x54] sm:$0xf0] }
  0x92   : > { %1017 = vmatpush.bf16.msra.mxu3 %v1563_v17  ;;  %v1555_v30 = vor.u32 %v1641_v27, %v1554_v25  ;;  %v1418_v31 = vld [vmem:[%s2103_s1 + $0xd0] sm:$0xf]  ;;  %v1607_v32 = vld [vmem:[%s2103_s1 + $0xd4] sm:$0xf0]  ;;  %v1355_v34 = vor.u32 %v1591_v29, %v1354_v28  ;;  %v1346_v40 = vld [vmem:[%s2103_s1 + $0x40] sm:$0xf] }
  0x93   : > { %v1482_v33 = vld [vmem:[%s2103_s1 + $0x150] sm:$0xf]  ;;  %976 = vmatpush.bf16.msra.mxu0 %v1363_v21  ;;  %v1623_v35 = vld [vmem:[%s2103_s1 + $0x154] sm:$0xf0]  ;;  %v1419_v38 = vor.u32 %v1607_v32, %v1418_v31  ;;  %v1589_v41 = vld [vmem:[%s2103_s1 + $0x44] sm:$0xf0] }
  0x94   : > { %v1546_v36 = vld [vmem:[%s2103_s1 + $0x1d0] sm:$0xf]  ;;  %v1639_v37 = vld [vmem:[%s2103_s1 + $0x1d4] sm:$0xf0]  ;;  %990 = vmatpush.bf16.msra.mxu1 %v1427_v22  ;;  %v1483_v39 = vor.u32 %v1623_v35, %v1482_v33  ;;  %v1410_v42 = vld [vmem:[%s2103_s1 + $0xc0] sm:$0xf]  ;;  %v1347_v49 = vor.u32 %v1589_v41, %v1346_v40 }
  0x95   : > { %1004 = vmatpush.bf16.msra.mxu2 %v1491_v26  ;;  %v1547_v43 = vor.u32 %v1639_v37, %v1546_v36  ;;  %v1605_v44 = vld [vmem:[%s2103_s1 + $0xc4] sm:$0xf0]  ;;  %v1474_v45 = vld [vmem:[%s2103_s1 + $0x140] sm:$0xf]  ;;  %v1338_v52 = vld [vmem:[%s2103_s1 + $0x30] sm:$0xf] }
  0x96   : > { %1018 = vmatpush.bf16.msra.mxu3 %v1555_v30  ;;  %v1621_v46 = vld [vmem:[%s2103_s1 + $0x144] sm:$0xf0]  ;;  %v1538_v47 = vld [vmem:[%s2103_s1 + $0x1c0] sm:$0xf]  ;;  %v1411_v50 = vor.u32 %v1605_v44, %v1410_v42  ;;  %v1587_v53 = vld [vmem:[%s2103_s1 + $0x34] sm:$0xf0] }
  0x97   : > { %v1637_v48 = vld [vmem:[%s2103_s1 + $0x1c4] sm:$0xf0]  ;;  %977 = vmatpush.bf16.msra.mxu0 %v1355_v34  ;;  %v1475_v51 = vor.u32 %v1621_v46, %v1474_v45  ;;  %v1402_v54 = vld [vmem:[%s2103_s1 + $0xb0] sm:$0xf]  ;;  %v1603_v56 = vld [vmem:[%s2103_s1 + $0xb4] sm:$0xf0]  ;;  %v1339_v61 = vor.u32 %v1587_v53, %v1338_v52 }
  0x98   : > { %991 = vmatpush.bf16.msra.mxu1 %v1419_v38  ;;  %v1539_v55 = vor.u32 %v1637_v48, %v1538_v47  ;;  %v1466_v57 = vld [vmem:[%s2103_s1 + $0x130] sm:$0xf]  ;;  %v1619_v58 = vld [vmem:[%s2103_s1 + $0x134] sm:$0xf0]  ;;  %v1403_v62 = vor.u32 %v1603_v56, %v1402_v54  ;;  %v1330_v0 = vld [vmem:[%s2103_s1 + $0x20] sm:$0xf] }
  0x99   : > { %1005 = vmatpush.bf16.msra.mxu2 %v1483_v39  ;;  %v1530_v59 = vld [vmem:[%s2103_s1 + $0x1b0] sm:$0xf]  ;;  %v1635_v60 = vld [vmem:[%s2103_s1 + $0x1b4] sm:$0xf0]  ;;  %v1467_v63 = vor.u32 %v1619_v58, %v1466_v57  ;;  %v1585_v1 = vld [vmem:[%s2103_s1 + $0x24] sm:$0xf0] }
  0x9a   : > { %1019 = vmatpush.bf16.msra.mxu3 %v1547_v43  ;;  %v1394_v2 = vld [vmem:[%s2103_s1 + $0xa0] sm:$0xf]  ;;  %v1531_v3 = vor.u32 %v1635_v60, %v1530_v59  ;;  %v1601_v4 = vld [vmem:[%s2103_s1 + $0xa4] sm:$0xf0]  ;;  %v1331_v9 = vor.u32 %v1585_v1, %v1330_v0  ;;  %v1322_v12 = vld [vmem:[%s2103_s1 + $0x10] sm:$0xf] }
  0x9b   : > { %978 = vmatpush.bf16.msra.mxu0 %v1347_v49  ;;  %v1458_v5 = vld [vmem:[%s2103_s1 + $0x120] sm:$0xf]  ;;  %v1617_v6 = vld [vmem:[%s2103_s1 + $0x124] sm:$0xf0]  ;;  %v1395_v10 = vor.u32 %v1601_v4, %v1394_v2  ;;  %v1583_v13 = vld [vmem:[%s2103_s1 + $0x14] sm:$0xf0] }
  0x9c   : > { %992 = vmatpush.bf16.msra.mxu1 %v1411_v50  ;;  %v1522_v7 = vld [vmem:[%s2103_s1 + $0x1a0] sm:$0xf]  ;;  %v1633_v8 = vld [vmem:[%s2103_s1 + $0x1a4] sm:$0xf0]  ;;  %v1459_v11 = vor.u32 %v1617_v6, %v1458_v5  ;;  %v1386_v14 = vld [vmem:[%s2103_s1 + $0x90] sm:$0xf]  ;;  %v1323_v22 = vor.u32 %v1583_v13, %v1322_v12 }
  0x9d   : > { %1006 = vmatpush.bf16.msra.mxu2 %v1475_v51  ;;  %v1523_v15 = vor.u32 %v1633_v8, %v1522_v7  ;;  %v1599_v16 = vld [vmem:[%s2103_s1 + $0x94] sm:$0xf0]  ;;  %v1450_v17 = vld [vmem:[%s2103_s1 + $0x110] sm:$0xf]  ;;  %v1314_v21 = vld [vmem:[%s2103_s1] sm:$0xf] }
  0x9e   : > { %1020 = vmatpush.bf16.msra.mxu3 %v1539_v55  ;;  %v1615_v18 = vld [vmem:[%s2103_s1 + $0x114] sm:$0xf0]  ;;  %v1514_v19 = vld [vmem:[%s2103_s1 + $0x190] sm:$0xf]  ;;  %v1581_v23 = vld [vmem:[%s2103_s1 + $0x4] sm:$0xf0]  ;;  %v1387_v26 = vor.u32 %v1599_v16, %v1386_v14 }
  0x9f   : > { %979 = vmatpush.bf16.msra.mxu0 %v1339_v61  ;;  %v1631_v20 = vld [vmem:[%s2103_s1 + $0x194] sm:$0xf0]  ;;  %v1378_v24 = vld [vmem:[%s2103_s1 + $0x80] sm:$0xf]  ;;  %v1597_v25 = vld [vmem:[%s2103_s1 + $0x84] sm:$0xf0]  ;;  %v1451_v27 = vor.u32 %v1615_v18, %v1450_v17  ;;  %v1315_v38 = vor.u32 %v1581_v23, %v1314_v21 }
  0xa0   : > { %993 = vmatpush.bf16.msra.mxu1 %v1403_v62  ;;  %v1442_v28 = vld [vmem:[%s2103_s1 + $0x100] sm:$0xf]  ;;  %v1613_v29 = vld [vmem:[%s2103_s1 + $0x104] sm:$0xf0]  ;;  %v1515_v31 = vor.u32 %v1631_v20, %v1514_v19  ;;  %v1594_v33 = vld [vmem:[%s2103_s1 + $0x74] sm:$0xf]  ;;  %v1379_v42 = vor.u32 %v1597_v25, %v1378_v24 }
  0xa1   : > { %1007 = vmatpush.bf16.msra.mxu2 %v1467_v63  ;;  %v1506_v30 = vld [vmem:[%s2103_s1 + $0x180] sm:$0xf]  ;;  %v1629_v32 = vld [vmem:[%s2103_s1 + $0x184] sm:$0xf0]  ;;  %v1372_v34 = vld [vmem:[%s2103_s1 + $0x78] sm:$0xf0]  ;;  %v1443_v43 = vor.u32 %v1613_v29, %v1442_v28 }
  0xa2   : > { %1021 = vmatpush.bf16.msra.mxu3 %v1531_v3  ;;  %v1610_v35 = vld [vmem:[%s2103_s1 + $0xf4] sm:$0xf]  ;;  %v1436_v36 = vld [vmem:[%s2103_s1 + $0xf8] sm:$0xf0]  ;;  %v1592_v44 = vld [vmem:[%s2103_s1 + $0x64] sm:$0xf]  ;;  %v1507_v48 = vor.u32 %v1629_v32, %v1506_v30  ;;  %v1375_v49 = vor.u32 %v1594_v33, %v1372_v34 }
  0xa3   : > { %980 = vmatpush.bf16.msra.mxu0 %v1331_v9  ;;  %v1626_v37 = vld [vmem:[%s2103_s1 + $0x174] sm:$0xf]  ;;  %v1500_v39 = vld [vmem:[%s2103_s1 + $0x178] sm:$0xf0]  ;;  %v1364_v45 = vld [vmem:[%s2103_s1 + $0x68] sm:$0xf0]  ;;  %v1439_v54 = vor.u32 %v1610_v35, %v1436_v36 }
  0xa4   : > { %994 = vmatpush.bf16.msra.mxu1 %v1395_v10  ;;  %v1642_v40 = vld [vmem:[%s2103_s1 + $0x1f4] sm:$0xf]  ;;  %v1564_v41 = vld [vmem:[%s2103_s1 + $0x1f8] sm:$0xf0]  ;;  %v1306_v46 = vld [vmem:[%s2101_s6 + $0x8] sm:$0xf]  ;;  %v1503_v55 = vor.u32 %v1626_v37, %v1500_v39  ;;  %v1367_v4 = vor.u32 %v1592_v44, %v1364_v45 }
  0xa5   : > { %1008 = vmatpush.bf16.msra.mxu2 %v1459_v11  ;;  %v1579_v47 = vld [vmem:[%s2101_s6 + $0x14] sm:$0xf0]  ;;  %v1608_v50 = vld [vmem:[%s2103_s1 + $0xe4] sm:$0xf]  ;;  %v1428_v51 = vld [vmem:[%s2103_s1 + $0xe8] sm:$0xf0]  ;;  %v1567_v59 = vor.u32 %v1642_v40, %v1564_v41 }
  0xa6   : > { %1022 = vmatpush.bf16.msra.mxu3 %v1523_v15  ;;  %v1624_v52 = vld [vmem:[%s2103_s1 + $0x164] sm:$0xf]  ;;  %v1492_v53 = vld [vmem:[%s2103_s1 + $0x168] sm:$0xf0]  ;;  %v1308_v57 = vld [vmem:[%s2101_s6 + $0x18] sm:$0xf0]  ;;  %v2191_v60 = vor.u32 %v1579_v47, %v1306_v46  ;;  %v1431_v6 = vor.u32 %v1608_v50, %v1428_v51 }
  0xa7   : > { %981 = vmatpush.bf16.msra.mxu0 %v1323_v22  ;;  %v1577_v56 = vld [vmem:[%s2101_s6 + $0xc] sm:$0xf]  ;;  %v1298_v58 = vld [vmem:[%s2101_s6] sm:$0xf]  ;;  %v1578_v61 = vld [vmem:[%s2101_s6 + $0xc] sm:$0xf0]  ;;  %v1495_v7 = vor.u32 %v1624_v52, %v1492_v53 }
  0xa8   : > { %995 = vmatpush.bf16.msra.mxu1 %v1387_v26  ;;  %v1576_v62 = vld [vmem:[%s2101_s6 + $0x4] sm:$0xf]  ;;  %v1300_v63 = vld [vmem:[%s2101_s6 + $0x10] sm:$0xf0]  ;;  %v1556_v1 = vld [vmem:[%s2103_s1 + $0x1e8] sm:$0xf0]  ;;  %v2198_v2 = vor.u32 %v1577_v56, %v1308_v57  ;;  %v2200_v3 = vor.u32 %v1578_v61, %v1298_v58 }
  0xa9   : > { %1009 = vmatpush.bf16.msra.mxu2 %v1451_v27  ;;  %v1640_v0 = vld [vmem:[%s2103_s1 + $0x1e4] sm:$0xf]  ;;  %v2202_v5 = vor.u32 %v1576_v62, %v1300_v63  ;;  %v1590_v8 = vld [vmem:[%s2103_s1 + $0x54] sm:$0xf]  ;;  %v1356_v9 = vld [vmem:[%s2103_s1 + $0x58] sm:$0xf0] }
  0xaa   : > { %1023 = vmatpush.bf16.msra.mxu3 %v1515_v31  ;;  %v1606_v10 = vld [vmem:[%s2103_s1 + $0xd4] sm:$0xf]  ;;  %v1559_v11 = vor.u32 %v1640_v0, %v1556_v1  ;;  %v1420_v12 = vld [vmem:[%s2103_s1 + $0xd8] sm:$0xf0]  ;;  %v1359_v17 = vor.u32 %v1590_v8, %v1356_v9  ;;  %v1588_v20 = vld [vmem:[%s2103_s1 + $0x44] sm:$0xf] }
  0xab   : > { %982 = vmatpush.bf16.msra.mxu0 %v1315_v38  ;;  %v1622_v13 = vld [vmem:[%s2103_s1 + $0x154] sm:$0xf]  ;;  %v1484_v14 = vld [vmem:[%s2103_s1 + $0x158] sm:$0xf0]  ;;  %v1423_v18 = vor.u32 %v1606_v10, %v1420_v12  ;;  %v1348_v21 = vld [vmem:[%s2103_s1 + $0x48] sm:$0xf0] }
  0xac   : > { %996 = vmatpush.bf16.msra.mxu1 %v1379_v42  ;;  %v1638_v15 = vld [vmem:[%s2103_s1 + $0x1d4] sm:$0xf]  ;;  %v1548_v16 = vld [vmem:[%s2103_s1 + $0x1d8] sm:$0xf0]  ;;  %v1487_v19 = vor.u32 %v1622_v13, %v1484_v14  ;;  %v1604_v22 = vld [vmem:[%s2103_s1 + $0xc4] sm:$0xf]  ;;  %v1351_v29 = vor.u32 %v1588_v20, %v1348_v21 }
  0xad   : > { %1010 = vmatpush.bf16.msra.mxu2 %v1443_v43  ;;  %v1551_v23 = vor.u32 %v1638_v15, %v1548_v16  ;;  %v1412_v24 = vld [vmem:[%s2103_s1 + $0xc8] sm:$0xf0]  ;;  %v1620_v25 = vld [vmem:[%s2103_s1 + $0x144] sm:$0xf]  ;;  %v1586_v32 = vld [vmem:[%s2103_s1 + $0x34] sm:$0xf] }
  0xae   : > { %1024 = vmatpush.bf16.msra.mxu3 %v1507_v48  ;;  %983 = vmatmul.bf16.vlgmr.msra.gmra.mxu0 %v2200_v3  ;;  %v1476_v26 = vld [vmem:[%s2103_s1 + $0x148] sm:$0xf0]  ;;  %v1636_v27 = vld [vmem:[%s2103_s1 + $0x1c4] sm:$0xf]  ;;  %v1415_v30 = vor.u32 %v1604_v22, %v1412_v24  ;;  %v1340_v33 = vld [vmem:[%s2103_s1 + $0x38] sm:$0xf0] }
  0xaf   : > { %1031 = vmatpush.bf16.msrb.mxu0 %v1375_v49  ;;  %997 = vmatmul.bf16.vlgmr.msra.gmra.mxu1 %v2202_v5  ;;  %v1540_v28 = vld [vmem:[%s2103_s1 + $0x1c8] sm:$0xf0]  ;;  %v1479_v31 = vor.u32 %v1620_v25, %v1476_v26  ;;  %v1602_v34 = vld [vmem:[%s2103_s1 + $0xb4] sm:$0xf]  ;;  %v1404_v36 = vld [vmem:[%s2103_s1 + $0xb8] sm:$0xf0]  ;;  %v1343_v41 = vor.u32 %v1586_v32, %v1340_v33 }
  0xb0   : > { %1045 = vmatpush.bf16.msrb.mxu1 %v1439_v54  ;;  %1011 = vmatmul.bf16.vlgmr.msra.gmra.mxu2 %v2191_v60  ;;  %v1543_v35 = vor.u32 %v1636_v27, %v1540_v28  ;;  %v1618_v37 = vld [vmem:[%s2103_s1 + $0x134] sm:$0xf]  ;;  %v1468_v38 = vld [vmem:[%s2103_s1 + $0x138] sm:$0xf0]  ;;  %v1407_v42 = vor.u32 %v1602_v34, %v1404_v36  ;;  %v1584_v44 = vld [vmem:[%s2103_s1 + $0x24] sm:$0xf] }
  0xb1   : > { %1059 = vmatpush.bf16.msrb.mxu2 %v1503_v55  ;;  %1025 = vmatmul.bf16.vlgmr.msra.gmra.mxu3 %v2198_v2  ;;  %v1634_v39 = vld [vmem:[%s2103_s1 + $0x1b4] sm:$0xf]  ;;  %v1532_v40 = vld [vmem:[%s2103_s1 + $0x1b8] sm:$0xf0]  ;;  %v1471_v43 = vor.u32 %v1618_v37, %v1468_v38  ;;  %v1332_v45 = vld [vmem:[%s2103_s1 + $0x28] sm:$0xf0] }
  0xb2   : > { %1073 = vmatpush.bf16.msrb.mxu3 %v1567_v59  ;;  %v1600_v46 = vld [vmem:[%s2103_s1 + $0xa4] sm:$0xf]  ;;  %v1535_v47 = vor.u32 %v1634_v39, %v1532_v40  ;;  %v1396_v48 = vld [vmem:[%s2103_s1 + $0xa8] sm:$0xf0]  ;;  %v1335_v53 = vor.u32 %v1584_v44, %v1332_v45  ;;  %v1582_v56 = vld [vmem:[%s2103_s1 + $0x14] sm:$0xf] }
  0xb3   : > { %1032 = vmatpush.bf16.msrb.mxu0 %v1367_v4  ;;  %v1616_v49 = vld [vmem:[%s2103_s1 + $0x124] sm:$0xf]  ;;  %v1460_v50 = vld [vmem:[%s2103_s1 + $0x128] sm:$0xf0]  ;;  %v1399_v54 = vor.u32 %v1600_v46, %v1396_v48  ;;  %v1324_v57 = vld [vmem:[%s2103_s1 + $0x18] sm:$0xf0] }
  0xb4   : > { %1046 = vmatpush.bf16.msrb.mxu1 %v1431_v6  ;;  %v1632_v51 = vld [vmem:[%s2103_s1 + $0x1a4] sm:$0xf]  ;;  %v1524_v52 = vld [vmem:[%s2103_s1 + $0x1a8] sm:$0xf0]  ;;  %v1463_v55 = vor.u32 %v1616_v49, %v1460_v50  ;;  %v1598_v58 = vld [vmem:[%s2103_s1 + $0x94] sm:$0xf]  ;;  %v1327_v4 = vor.u32 %v1582_v56, %v1324_v57 }
  0xb5   : > { %1060 = vmatpush.bf16.msrb.mxu2 %v1495_v7  ;;  %v1527_v59 = vor.u32 %v1632_v51, %v1524_v52  ;;  %v1388_v61 = vld [vmem:[%s2103_s1 + $0x98] sm:$0xf0]  ;;  %v1614_v62 = vld [vmem:[%s2103_s1 + $0x114] sm:$0xf]  ;;  %v1580_v8 = vld [vmem:[%s2103_s1 + $0x4] sm:$0xf] }
  0xb6   : > { %1074 = vmatpush.bf16.msrb.mxu3 %v1559_v11  ;;  %v1452_v63 = vld [vmem:[%s2103_s1 + $0x118] sm:$0xf0]  ;;  %v1630_v0 = vld [vmem:[%s2103_s1 + $0x194] sm:$0xf]  ;;  %v1391_v6 = vor.u32 %v1598_v58, %v1388_v61  ;;  %v1316_v9 = vld [vmem:[%s2103_s1 + $0x8] sm:$0xf0] }
  0xb7   : > { %1033 = vmatpush.bf16.msrb.mxu0 %v1359_v17  ;;  %v1516_v1 = vld [vmem:[%s2103_s1 + $0x198] sm:$0xf0]  ;;  %v1455_v7 = vor.u32 %v1614_v62, %v1452_v63  ;;  %v1596_v10 = vld [vmem:[%s2103_s1 + $0x84] sm:$0xf]  ;;  %v1380_v12 = vld [vmem:[%s2103_s1 + $0x88] sm:$0xf0]  ;;  %v1319_v17 = vor.u32 %v1580_v8, %v1316_v9 }
  0xb8   : > { %1047 = vmatpush.bf16.msrb.mxu1 %v1423_v18  ;;  %v1519_v11 = vor.u32 %v1630_v0, %v1516_v1  ;;  %v1612_v13 = vld [vmem:[%s2103_s1 + $0x104] sm:$0xf]  ;;  %v1444_v14 = vld [vmem:[%s2103_s1 + $0x108] sm:$0xf0]  ;;  %v1383_v18 = vor.u32 %v1596_v10, %v1380_v12  ;;  %v563_v27 = vld [vmem:[#allocation2 + $0x10] sm:$0xff]  ;;  %p1568_p5 = scmp.ne.s32.totalorder %s1804_s18, 8 }
  0xb9   : > { %1061 = vmatpush.bf16.msrb.mxu2 %v1487_v19  ;;  %v1628_v15 = vld [vmem:[%s2103_s1 + $0x184] sm:$0xf]  ;;  %v1508_v16 = vld [vmem:[%s2103_s1 + $0x188] sm:$0xf0]  ;;  %v1447_v19 = vor.u32 %v1612_v13, %v1444_v14  ;;  %v565_v34 = vld [vmem:[#allocation2 + $0x18] sm:$0xff] }
  0xba   : > { %1075 = vmatpush.bf16.msrb.mxu3 %v1551_v23  ;;  %v1511_v20 = vor.u32 %v1628_v15, %v1508_v16  ;;  %v566_v49 = vld [vmem:[#allocation2 + $0x8] sm:$0xff] }
  0xbb   : > { %1034 = vmatpush.bf16.msrb.mxu0 %v1351_v29 }
  0xbc   : > { %1048 = vmatpush.bf16.msrb.mxu1 %v1415_v30 }
  0xbd   : > { %1062 = vmatpush.bf16.msrb.mxu2 %v1479_v31 }
  0xbe   : > { %1076 = vmatpush.bf16.msrb.mxu3 %v1543_v35 }
  0xbf   : > { %1035 = vmatpush.bf16.msrb.mxu0 %v1343_v41  ;;  %v564_v41 = vld [vmem:[#allocation2] sm:$0xff] }
  0xc0   : > { %1049 = vmatpush.bf16.msrb.mxu1 %v1407_v42 }
  0xc1   : > { %1063 = vmatpush.bf16.msrb.mxu2 %v1471_v43 }
  0xc2   : > { %1077 = vmatpush.bf16.msrb.mxu3 %v1535_v47 }
  0xc3   : > { %1036 = vmatpush.bf16.msrb.mxu0 %v1335_v53 }
  0xc4   : > { %1050 = vmatpush.bf16.msrb.mxu1 %v1399_v54 }
  0xc5   : > { %1064 = vmatpush.bf16.msrb.mxu2 %v1463_v55 }
  0xc6   : > { %1078 = vmatpush.bf16.msrb.mxu3 %v1527_v59 }
  0xc7   : > { %1037 = vmatpush.bf16.msrb.mxu0 %v1327_v4 }
  0xc8   : > { %1051 = vmatpush.bf16.msrb.mxu1 %v1391_v6 }
  0xc9   : > { %1065 = vmatpush.bf16.msrb.mxu2 %v1455_v7 }
  0xca   : > { %1079 = vmatpush.bf16.msrb.mxu3 %v1519_v11 }
  0xcb   : > { %1038 = vmatpush.bf16.msrb.mxu0 %v1319_v17 }
  0xcc   : > { %1052 = vmatpush.bf16.msrb.mxu1 %v1383_v18 }
  0xcd   : > { %1066 = vmatpush.bf16.msrb.mxu2 %v1447_v19 }
  0xce   : > { %1080 = vmatpush.bf16.msrb.mxu3 %v1511_v20  ;;  %1039 = vmatmul.bf16.vlgmr.msrb.gmra.mxu0 %v2200_v3 }
  0xcf   : > { %1053 = vmatmul.bf16.vlgmr.msrb.gmra.mxu1 %v2202_v5 }
  0xd0   : > { %1067 = vmatmul.bf16.vlgmr.msrb.gmra.mxu2 %v2191_v60 }
  0xd1   : > { %1081 = vmatmul.bf16.vlgmr.msrb.gmra.mxu3 %v2198_v2 }
 0x12b   : > { %v984_v21 = vpop.f32.mrf.mxu0 }
 0x12c   : > { %v998_v22 = vpop.f32.mrf.mxu1 }
 0x12d   : > { %v999_v23 = vadd.f32 %v998_v22, %v984_v21 }
 0x133   : > { %v1012_v24 = vpop.f32.mrf.mxu2  ;;  %v986_v29 = vpop.f32.mrf.mxu0 }
 0x134   : > { %v1013_v25 = vadd.f32 %v1012_v24, %v999_v23  ;;  %v1026_v26 = vpop.f32.mrf.mxu3  ;;  %v1000_v30 = vpop.f32.mrf.mxu1 }
 0x135   : > { %v1001_v32 = vadd.f32 %v1000_v30, %v986_v29 }
 0x136   : > { %v1027_v28 = vadd.f32 %v1026_v26, %v1013_v25 }
 0x138   : > { %v1087_v31 = vadd.f32 %v1027_v28, %v563_v27 }
 0x13a   : > { %1091 = vst [vmem:[#allocation2 + $0x10] sm:$0xff] %v1087_v31 }
 0x13b   : > { %v1014_v3 = vpop.f32.mrf.mxu2 }
 0x13c   : > { %v1015_v33 = vadd.f32 %v1014_v3, %v1001_v32  ;;  %v1028_v5 = vpop.f32.mrf.mxu3 }
 0x13e   : > { %v1029_v60 = vadd.f32 %v1028_v5, %v1015_v33 }
 0x140   : > { %v1089_v35 = vadd.f32 %v1029_v60, %v565_v34 }
 0x142   : > { %1093 = vst [vmem:[#allocation2 + $0x18] sm:$0xff] %v1089_v35 }
 0x14b   : > { %v1040_v2 = vpop.f32.mrf.mxu0 }
 0x14c   : > { %v1054_v36 = vpop.f32.mrf.mxu1 }
 0x14d   : > { %v1055_v37 = vadd.f32 %v1054_v36, %v1040_v2 }
 0x153   : > { %v1068_v38 = vpop.f32.mrf.mxu2  ;;  %v1042_v43 = vpop.f32.mrf.mxu0 }
 0x154   : > { %v1069_v39 = vadd.f32 %v1068_v38, %v1055_v37  ;;  %v1082_v40 = vpop.f32.mrf.mxu3  ;;  %v1056_v44 = vpop.f32.mrf.mxu1 }
 0x155   : > { %v1057_v46 = vadd.f32 %v1056_v44, %v1042_v43 }
 0x156   : > { %v1083_v42 = vadd.f32 %v1082_v40, %v1069_v39 }
 0x158   : > { %v1088_v45 = vadd.f32 %v1083_v42, %v564_v41 }
 0x15a   : > { %1092 = vst [vmem:[#allocation2] sm:$0xff] %v1088_v45 }
 0x15b   : > { %v1070_v47 = vpop.f32.mrf.mxu2 }
 0x15c   : > { %v1071_v48 = vadd.f32 %v1070_v47, %v1057_v46  ;;  %v1084_v50 = vpop.f32.mrf.mxu3 }
 0x15e   : > { %v1085_v51 = vadd.f32 %v1084_v50, %v1071_v48  ;;  %1098 = sbr.rel (%p1568_p5) target bundleno = 369 (0x171), region = 101 }
 0x160   : > { %v1090_v52 = vadd.f32 %v1085_v51, %v566_v49 }
 0x162   : > { %1094 = vst [vmem:[#allocation2 + $0x8] sm:$0xff] %v1090_v52 }
 0x163   : > { %v1099_v53 = vld [vmem:[#allocation2 + $0x10] sm:$0xff]  ;;  %v1100_v54 = vld [vmem:[#allocation2] sm:$0xff]  ;;  %v1101_v58 = vld [vmem:[#allocation2 + $0x18] sm:$0xff] }
 0x164   : > { %v1103_v55 = vld [vmem:[%s551_s5] sm:$0x3] }
 0x165   : > { %v1105_v56 = vperm.slane %v1103_v55, 0  ;;  %v1106_v57 = vperm.slane %v1103_v55, 1 }
 0x167   : > { %v1109_v61 = vadd.f32 %v1105_v56, %v1099_v53  ;;  %v1110_v62 = vadd.f32 %v1106_v57, %v1100_v54  ;;  %v1111_v63 = vadd.f32 %v1105_v56, %v1101_v58 }
 0x169   : > { %v1102_v59 = vld [vmem:[#allocation2 + $0x8] sm:$0xff]  ;;  %v1113_v1 = vmax.f32 %v1109_v61, 0.0  ;;  %v1114_v4 = vmax.f32 %v1110_v62, 0.0  ;;  %v1115_v6 = vmax.f32 %v1111_v63, 0.0 }
 0x16a   : > { %v1112_v0 = vadd.f32 %v1106_v57, %v1102_v59 }
 0x16b   : > { %v1117_v8 = vpack.c.bf16 %v1114_v4, %v1113_v1 }
 0x16c   : > { %v1116_v7 = vmax.f32 %v1112_v0, 0.0 }
 0x16d   : > { %1119 = vst [vmem:[%s2105_s25] sm:$0xff] %v1117_v8 }
 0x16e   : > { %v1118_v9 = vpack.c.bf16 %v1116_v7, %v1115_v6 }
 0x170   : > { %1120 = vst [vmem:[%s2105_s25 + $0x8] sm:$0xff] %v1118_v9 }
 0x171 PF: > { %1127 = sbr.rel (!%p1937_p12) target bundleno = 377 (0x179), region = 105  ;;  %s1644_s14 = sshll.u32 (%p1937_p12), %s1808_s19, 3 }
 0x172   : > { %s1133_s0 = scalar_lea.vmem (%p1937_p12), %s2312_s3, %s1644_s14 }
 0x174   : > { %v1164_v10 = vld [vmem:[%s2105_s25] sm:$0xff] (%p1937_p12) }
 0x175   : > { %1165 = vst [vmem:[%s1133_s0] sm:$0xff] (%p1937_p12), %v1164_v10 }
 0x177   : > { %v1166_v11 = vld [vmem:[%s2105_s25 + $0x8] sm:$0xff] }
 0x178   : > { %1167 = vst [vmem:[%s1133_s0 + $0x10] sm:$0xff] %v1166_v11 }
 0x179 PF: > { %s13_s22 = sadd.s32 1, %s1820_s22   ;;  %s2322_s25 = sld [smem:[#allocation6_spill]] }
 0x17a   : > { %p10_p6 = scmp.ge.s32.totalorder %s13_s22, 20   ;;  %s2323_s12 = smov %s1784_s13 }
 0x17b   : > { %s2324_s13 = smov %s1935_s9  ;;  %s2325_s14 = smov %s1792_s15 }
 0x17c   : > { %s2326_s15 = smov %s1932_s8  ;;  %s2327_s16 = smov %s1800_s17 }
 0x17d   : > { %s2328_s17 = smov %s1918_s30  ;;  %s2329_s18 = smov %s1812_s20 }
 0x17e   : > { %s2330_s19 = smov %s1816_s21  ;;  %s2331_s20 = smov %s2334_s24 }
 0x17f   : > { %s2332_s21 = smov %s2322_s25  ;;  %12 = sbr.rel (!%p10_p6) target bundleno = 9 (0x9), region = 185 }

// kernel: _lambda_.41
= control target key start
LH: loop header
LB: loop body
LE: loop exit
PB: predicated region body
PF: predicated region fallthrough
CT: control target
= control target key end

     0   :  { %s1703_s12 = smov 0   ;;  %s1705_s13 = smov 0   ;;  %s2095_s0 = inlined_call_operand.vmem [shape: bf16[16,512], index: 0, kind: input, shape index: {}]   ;;  %s2096_s1 = inlined_call_operand.vmem [shape: bf16[512,512], index: 1, kind: input, shape index: {}]   ;;  %s2097_s2 = inlined_call_operand.vmem [shape: f32[1,512], index: 2, kind: input, shape index: {}]   ;;  %s2098_s3 = inlined_call_operand.vmem [shape: f32[16,512], index: 3, kind: output, shape index: {}]  }
   0x1   :  { %s1707_s14 = smov 0   ;;  %s1709_s15 = smov 0  }
   0x2   :  { %s1711_s16 = smov 0  }
   0x3 LB: > { %s28_s17 = sadd.s32 1, %s1677_s15  ;;  %s1244_s18 = sadd.s32 4294967295, %s1681_s16   ;;  %s1681_s16 = sphi %s1711_s16, %s13_s16   ;;  %s1677_s15 = sphi %s1709_s15, %s2103_s15   ;;  %s1673_s14 = sphi %s1707_s14, %s2102_s14   ;;  %s1669_s13 = sphi %s1705_s13, %s2101_s13   ;;  %s1665_s12 = sphi %s1703_s12, %s2100_s12  }
   0x4   : > { %p30_p0 = scmp.ge.s32.totalorder %s28_s17, 2  ;;  %p76_p1 = scmp.ne.s32.totalorder %s1669_s13, %s1665_s12 }
   0x5   : > { %p77_p2 = scmp.eq.s32.totalorder %s1681_s16, 0  ;;  %p134_p4 = scmp.eq.s32.totalorder %s1244_s18, 1 }
   0x6   : > { %s2105_s17 = smov (%p30_p0, %s28_s17), 0  ;;  %s69_s20 = sadd.s32 1, %s1669_s13 }
   0x7   : > { %p78_p3 = por %p77_p2, %p76_p1  ;;  %s65_s19 = ssub.s32 %s1677_s15, %s2105_s17 }
   0x8   : > { %p67_p5 = scmp.eq.s32.totalorder %s65_s19, 0  ;;  %p1738_p6 = por %p134_p4, %p76_p1 }
   0x9   : > { %p1248_p7 = scmp.ge.s32.totalorder %s1681_s16, 2 }
   0xa   : > { %s1743_s22 = scalar_select %p67_p5, %s1669_s13, %s69_s20  }
   0xb   : > { %171 = sbr.rel (%p1248_p7) target bundleno = 84 (0x54), region = 20 }
  0x10   : > { %174 = sbr.rel (!%p78_p3) target bundleno = 84 (0x54), region = 24  ;;  %s176_s23 = sand.u32 (%p78_p3), 1, %s1669_s13  }
  0x11   : > { %s1533_s24 = sshll.u32 (%p78_p3), %s1677_s15, 3  ;;  %s1249_s25 = sshll.u32 (%p78_p3), %s176_s23, 9 }
  0x12   : > { %s1751_s28 = scalar_lea.vmem (%p78_p3), %s2096_s1, %s1533_s24  ;;  %s1756_s29 = scalar_lea.vmem (%p78_p3), [#allocation3], %s1249_s25 }
  0x13   : > { %v339_v0 = vld [vmem:[%s1751_s28] sm:$0xff] (%p78_p3)  ;;  %v341_v1 = vld [vmem:[%s1751_s28 + $0x10] sm:$0xff] (%p78_p3) }
  0x14   : > { %v343_v2 = vld [vmem:[%s1751_s28 + $0x20] sm:$0xff] (%p78_p3)  ;;  %340 = vst [vmem:[%s1756_s29] sm:$0xff] (%p78_p3), %v339_v0  ;;  %v345_v3 = vld [vmem:[%s1751_s28 + $0x30] sm:$0xff] (%p78_p3) }
  0x15   : > { %342 = vst [vmem:[%s1756_s29 + $0x8] sm:$0xff] %v341_v1  ;;  %v347_v4 = vld [vmem:[%s1751_s28 + $0x40] sm:$0xff]  ;;  %v349_v5 = vld [vmem:[%s1751_s28 + $0x50] sm:$0xff] }
  0x16   : > { %344 = vst [vmem:[%s1756_s29 + $0x10] sm:$0xff] %v343_v2  ;;  %v351_v6 = vld [vmem:[%s1751_s28 + $0x60] sm:$0xff]  ;;  %v353_v7 = vld [vmem:[%s1751_s28 + $0x70] sm:$0xff] }
  0x17   : > { %346 = vst [vmem:[%s1756_s29 + $0x18] sm:$0xff] %v345_v3  ;;  %v355_v8 = vld [vmem:[%s1751_s28 + $0x80] sm:$0xff]  ;;  %v357_v9 = vld [vmem:[%s1751_s28 + $0x90] sm:$0xff] }
  0x18   : > { %348 = vst [vmem:[%s1756_s29 + $0x20] sm:$0xff] %v347_v4  ;;  %v359_v10 = vld [vmem:[%s1751_s28 + $0xa0] sm:$0xff]  ;;  %v361_v11 = vld [vmem:[%s1751_s28 + $0xb0] sm:$0xff] }
  0x19   : > { %350 = vst [vmem:[%s1756_s29 + $0x28] sm:$0xff] %v349_v5  ;;  %v363_v12 = vld [vmem:[%s1751_s28 + $0xc0] sm:$0xff]  ;;  %v365_v13 = vld [vmem:[%s1751_s28 + $0xd0] sm:$0xff] }
  0x1a   : > { %352 = vst [vmem:[%s1756_s29 + $0x30] sm:$0xff] %v351_v6  ;;  %v367_v14 = vld [vmem:[%s1751_s28 + $0xe0] sm:$0xff]  ;;  %v369_v15 = vld [vmem:[%s1751_s28 + $0xf0] sm:$0xff] }
  0x1b   : > { %354 = vst [vmem:[%s1756_s29 + $0x38] sm:$0xff] %v353_v7  ;;  %v371_v16 = vld [vmem:[%s1751_s28 + $0x100] sm:$0xff]  ;;  %v373_v17 = vld [vmem:[%s1751_s28 + $0x110] sm:$0xff] }
  0x1c   : > { %356 = vst [vmem:[%s1756_s29 + $0x40] sm:$0xff] %v355_v8  ;;  %v375_v18 = vld [vmem:[%s1751_s28 + $0x120] sm:$0xff]  ;;  %v377_v19 = vld [vmem:[%s1751_s28 + $0x130] sm:$0xff] }
  0x1d   : > { %358 = vst [vmem:[%s1756_s29 + $0x48] sm:$0xff] %v357_v9  ;;  %v379_v20 = vld [vmem:[%s1751_s28 + $0x140] sm:$0xff]  ;;  %v381_v21 = vld [vmem:[%s1751_s28 + $0x150] sm:$0xff] }
  0x1e   : > { %360 = vst [vmem:[%s1756_s29 + $0x50] sm:$0xff] %v359_v10  ;;  %v383_v22 = vld [vmem:[%s1751_s28 + $0x160] sm:$0xff]  ;;  %v385_v23 = vld [vmem:[%s1751_s28 + $0x170] sm:$0xff] }
  0x1f   : > { %362 = vst [vmem:[%s1756_s29 + $0x58] sm:$0xff] %v361_v11  ;;  %v387_v24 = vld [vmem:[%s1751_s28 + $0x180] sm:$0xff]  ;;  %v389_v25 = vld [vmem:[%s1751_s28 + $0x190] sm:$0xff] }
  0x20   : > { %364 = vst [vmem:[%s1756_s29 + $0x60] sm:$0xff] %v363_v12  ;;  %v391_v26 = vld [vmem:[%s1751_s28 + $0x1a0] sm:$0xff]  ;;  %v393_v27 = vld [vmem:[%s1751_s28 + $0x1b0] sm:$0xff] }
  0x21   : > { %366 = vst [vmem:[%s1756_s29 + $0x68] sm:$0xff] %v365_v13  ;;  %v395_v28 = vld [vmem:[%s1751_s28 + $0x1c0] sm:$0xff]  ;;  %v397_v29 = vld [vmem:[%s1751_s28 + $0x1d0] sm:$0xff] }
  0x22   : > { %368 = vst [vmem:[%s1756_s29 + $0x70] sm:$0xff] %v367_v14  ;;  %v399_v30 = vld [vmem:[%s1751_s28 + $0x1e0] sm:$0xff]  ;;  %v401_v31 = vld [vmem:[%s1751_s28 + $0x1f0] sm:$0xff] }
  0x23   : > { %370 = vst [vmem:[%s1756_s29 + $0x78] sm:$0xff] %v369_v15  ;;  %v403_v32 = vld [vmem:[%s1751_s28 + $0x200] sm:$0xff]  ;;  %v405_v33 = vld [vmem:[%s1751_s28 + $0x210] sm:$0xff] }
  0x24   : > { %372 = vst [vmem:[%s1756_s29 + $0x80] sm:$0xff] %v371_v16  ;;  %v407_v34 = vld [vmem:[%s1751_s28 + $0x220] sm:$0xff]  ;;  %v409_v35 = vld [vmem:[%s1751_s28 + $0x230] sm:$0xff] }
  0x25   : > { %374 = vst [vmem:[%s1756_s29 + $0x88] sm:$0xff] %v373_v17  ;;  %v411_v36 = vld [vmem:[%s1751_s28 + $0x240] sm:$0xff]  ;;  %v413_v37 = vld [vmem:[%s1751_s28 + $0x250] sm:$0xff] }
  0x26   : > { %376 = vst [vmem:[%s1756_s29 + $0x90] sm:$0xff] %v375_v18  ;;  %v415_v38 = vld [vmem:[%s1751_s28 + $0x260] sm:$0xff]  ;;  %v417_v39 = vld [vmem:[%s1751_s28 + $0x270] sm:$0xff] }
  0x27   : > { %378 = vst [vmem:[%s1756_s29 + $0x98] sm:$0xff] %v377_v19  ;;  %v419_v40 = vld [vmem:[%s1751_s28 + $0x280] sm:$0xff]  ;;  %v421_v41 = vld [vmem:[%s1751_s28 + $0x290] sm:$0xff] }
  0x28   : > { %380 = vst [vmem:[%s1756_s29 + $0xa0] sm:$0xff] %v379_v20  ;;  %v423_v42 = vld [vmem:[%s1751_s28 + $0x2a0] sm:$0xff]  ;;  %v425_v43 = vld [vmem:[%s1751_s28 + $0x2b0] sm:$0xff] }
  0x29   : > { %382 = vst [vmem:[%s1756_s29 + $0xa8] sm:$0xff] %v381_v21  ;;  %v427_v44 = vld [vmem:[%s1751_s28 + $0x2c0] sm:$0xff]  ;;  %v429_v45 = vld [vmem:[%s1751_s28 + $0x2d0] sm:$0xff] }
  0x2a   : > { %384 = vst [vmem:[%s1756_s29 + $0xb0] sm:$0xff] %v383_v22  ;;  %v431_v46 = vld [vmem:[%s1751_s28 + $0x2e0] sm:$0xff]  ;;  %v433_v47 = vld [vmem:[%s1751_s28 + $0x2f0] sm:$0xff] }
  0x2b   : > { %386 = vst [vmem:[%s1756_s29 + $0xb8] sm:$0xff] %v385_v23  ;;  %v435_v48 = vld [vmem:[%s1751_s28 + $0x300] sm:$0xff]  ;;  %v437_v49 = vld [vmem:[%s1751_s28 + $0x310] sm:$0xff] }
  0x2c   : > { %388 = vst [vmem:[%s1756_s29 + $0xc0] sm:$0xff] %v387_v24  ;;  %v439_v50 = vld [vmem:[%s1751_s28 + $0x320] sm:$0xff]  ;;  %v441_v51 = vld [vmem:[%s1751_s28 + $0x330] sm:$0xff] }
  0x2d   : > { %390 = vst [vmem:[%s1756_s29 + $0xc8] sm:$0xff] %v389_v25  ;;  %v443_v52 = vld [vmem:[%s1751_s28 + $0x340] sm:$0xff]  ;;  %v445_v53 = vld [vmem:[%s1751_s28 + $0x350] sm:$0xff] }
  0x2e   : > { %392 = vst [vmem:[%s1756_s29 + $0xd0] sm:$0xff] %v391_v26  ;;  %v447_v54 = vld [vmem:[%s1751_s28 + $0x360] sm:$0xff]  ;;  %v449_v55 = vld [vmem:[%s1751_s28 + $0x370] sm:$0xff] }
  0x2f   : > { %394 = vst [vmem:[%s1756_s29 + $0xd8] sm:$0xff] %v393_v27  ;;  %v451_v56 = vld [vmem:[%s1751_s28 + $0x380] sm:$0xff]  ;;  %v453_v57 = vld [vmem:[%s1751_s28 + $0x390] sm:$0xff] }
  0x30   : > { %396 = vst [vmem:[%s1756_s29 + $0xe0] sm:$0xff] %v395_v28  ;;  %v455_v58 = vld [vmem:[%s1751_s28 + $0x3a0] sm:$0xff]  ;;  %v457_v59 = vld [vmem:[%s1751_s28 + $0x3b0] sm:$0xff] }
  0x31   : > { %398 = vst [vmem:[%s1756_s29 + $0xe8] sm:$0xff] %v397_v29  ;;  %v459_v60 = vld [vmem:[%s1751_s28 + $0x3c0] sm:$0xff]  ;;  %v461_v61 = vld [vmem:[%s1751_s28 + $0x3d0] sm:$0xff] }
  0x32   : > { %400 = vst [vmem:[%s1756_s29 + $0xf0] sm:$0xff] %v399_v30  ;;  %v463_v62 = vld [vmem:[%s1751_s28 + $0x3e0] sm:$0xff]  ;;  %v465_v63 = vld [vmem:[%s1751_s28 + $0x3f0] sm:$0xff] }
  0x33   : > { %402 = vst [vmem:[%s1756_s29 + $0xf8] sm:$0xff] %v401_v31 }
  0x34   : > { %404 = vst [vmem:[%s1756_s29 + $0x100] sm:$0xff] %v403_v32 }
  0x35   : > { %406 = vst [vmem:[%s1756_s29 + $0x108] sm:$0xff] %v405_v33 }
  0x36   : > { %408 = vst [vmem:[%s1756_s29 + $0x110] sm:$0xff] %v407_v34 }
  0x37   : > { %410 = vst [vmem:[%s1756_s29 + $0x118] sm:$0xff] %v409_v35 }
  0x38   : > { %412 = vst [vmem:[%s1756_s29 + $0x120] sm:$0xff] %v411_v36 }
  0x39   : > { %414 = vst [vmem:[%s1756_s29 + $0x128] sm:$0xff] %v413_v37 }
  0x3a   : > { %416 = vst [vmem:[%s1756_s29 + $0x130] sm:$0xff] %v415_v38 }
  0x3b   : > { %418 = vst [vmem:[%s1756_s29 + $0x138] sm:$0xff] %v417_v39 }
  0x3c   : > { %420 = vst [vmem:[%s1756_s29 + $0x140] sm:$0xff] %v419_v40 }
  0x3d   : > { %422 = vst [vmem:[%s1756_s29 + $0x148] sm:$0xff] %v421_v41 }
  0x3e   : > { %424 = vst [vmem:[%s1756_s29 + $0x150] sm:$0xff] %v423_v42 }
  0x3f   : > { %426 = vst [vmem:[%s1756_s29 + $0x158] sm:$0xff] %v425_v43 }
  0x40   : > { %428 = vst [vmem:[%s1756_s29 + $0x160] sm:$0xff] %v427_v44 }
  0x41   : > { %430 = vst [vmem:[%s1756_s29 + $0x168] sm:$0xff] %v429_v45 }
  0x42   : > { %432 = vst [vmem:[%s1756_s29 + $0x170] sm:$0xff] %v431_v46 }
  0x43   : > { %434 = vst [vmem:[%s1756_s29 + $0x178] sm:$0xff] %v433_v47 }
  0x44   : > { %436 = vst [vmem:[%s1756_s29 + $0x180] sm:$0xff] %v435_v48 }
  0x45   : > { %438 = vst [vmem:[%s1756_s29 + $0x188] sm:$0xff] %v437_v49 }
  0x46   : > { %440 = vst [vmem:[%s1756_s29 + $0x190] sm:$0xff] %v439_v50 }
  0x47   : > { %442 = vst [vmem:[%s1756_s29 + $0x198] sm:$0xff] %v441_v51 }
  0x48   : > { %444 = vst [vmem:[%s1756_s29 + $0x1a0] sm:$0xff] %v443_v52 }
  0x49   : > { %446 = vst [vmem:[%s1756_s29 + $0x1a8] sm:$0xff] %v445_v53 }
  0x4a   : > { %448 = vst [vmem:[%s1756_s29 + $0x1b0] sm:$0xff] %v447_v54 }
  0x4b   : > { %450 = vst [vmem:[%s1756_s29 + $0x1b8] sm:$0xff] %v449_v55 }
  0x4c   : > { %452 = vst [vmem:[%s1756_s29 + $0x1c0] sm:$0xff] %v451_v56 }
  0x4d   : > { %454 = vst [vmem:[%s1756_s29 + $0x1c8] sm:$0xff] %v453_v57 }
  0x4e   : > { %456 = vst [vmem:[%s1756_s29 + $0x1d0] sm:$0xff] %v455_v58 }
  0x4f   : > { %458 = vst [vmem:[%s1756_s29 + $0x1d8] sm:$0xff] %v457_v59 }
  0x50   : > { %460 = vst [vmem:[%s1756_s29 + $0x1e0] sm:$0xff] %v459_v60 }
  0x51   : > { %462 = vst [vmem:[%s1756_s29 + $0x1e8] sm:$0xff] %v461_v61 }
  0x52   : > { %464 = vst [vmem:[%s1756_s29 + $0x1f0] sm:$0xff] %v463_v62 }
  0x53   : > { %466 = vst [vmem:[%s1756_s29 + $0x1f8] sm:$0xff] %v465_v63 }
  0x54 PF: > { %p1252_p8 = scmp.ge.s32.totalorder %s1681_s16, 1  ;;  %p479_p9 = scmp.lt.s32.totalorder %s1681_s16, 3 }
  0x56   : > { %p480_p10 = pnand %p1252_p8, %p479_p9 }
  0x57   : > { %s486_s30 = sand.u32 (!%p480_p10), 1, %s1665_s12  }
  0x58   : > { %483 = sbr.rel (%p480_p10) target bundleno = 316 (0x13c), region = 66  ;;  %s1253_s4 = sshll.u32 (!%p480_p10), %s486_s30, 9 }
  0x59   : > { %s1888_s5 = scalar_lea.vmem (!%p480_p10), [#allocation3], %s1253_s4  ;;  %s1255_s4 = sshll.u32 (!%p480_p10), %s1673_s14, 1 }
  0x5a   : > { %p537_p11 = scmp.lt.s32.totalorder (!%p480_p10), %s1255_s4, 3  ;;  %s1254_s8 = sshll.u32 (!%p480_p10), %s486_s30, 5 }
  0x5b   : > { %s2064_s9 = scalar_lea.vmem (!%p480_p10), [#allocation4], %s1254_s8 }
  0x5d   : > { %v1330_v0 = vld [vmem:[%s1888_s5 + $0x70] sm:$0xf]  ;;  %v1553_v1 = vld [vmem:[%s1888_s5 + $0x74] sm:$0xf0]  ;;  %v1322_v11 = vld [vmem:[%s1888_s5 + $0x60] sm:$0xf] }
  0x5e   : > { %v1394_v2 = vld [vmem:[%s1888_s5 + $0xf0] sm:$0xf]  ;;  %v1331_v3 = vor.u32 %v1553_v1, %v1330_v0  ;;  %v1569_v4 = vld [vmem:[%s1888_s5 + $0xf4] sm:$0xf0]  ;;  %v1551_v13 = vld [vmem:[%s1888_s5 + $0x64] sm:$0xf0] }
  0x5f   : > { %v1458_v5 = vld [vmem:[%s1888_s5 + $0x170] sm:$0xf]  ;;  %v1585_v6 = vld [vmem:[%s1888_s5 + $0x174] sm:$0xf0]  ;;  %v1395_v7 = vor.u32 %v1569_v4, %v1394_v2  ;;  %v1386_v14 = vld [vmem:[%s1888_s5 + $0xe0] sm:$0xf]  ;;  %v1323_v16 = vor.u32 %v1551_v13, %v1322_v11 }
  0x60   : > { %v1459_v8 = vor.u32 %v1585_v6, %v1458_v5  ;;  %v1522_v9 = vld [vmem:[%s1888_s5 + $0x1f0] sm:$0xf]  ;;  %v1601_v10 = vld [vmem:[%s1888_s5 + $0x1f4] sm:$0xf0]  ;;  %963 = vmatpush.bf16.msra.mxu0 %v1331_v3  ;;  %v1567_v15 = vld [vmem:[%s1888_s5 + $0xe4] sm:$0xf0] }
  0x61   : > { %v1523_v12 = vor.u32 %v1601_v10, %v1522_v9  ;;  %977 = vmatpush.bf16.msra.mxu1 %v1395_v7  ;;  %v1387_v17 = vor.u32 %v1567_v15, %v1386_v14  ;;  %v1450_v18 = vld [vmem:[%s1888_s5 + $0x160] sm:$0xf]  ;;  %v1583_v19 = vld [vmem:[%s1888_s5 + $0x164] sm:$0xf0]  ;;  %v1314_v23 = vld [vmem:[%s1888_s5 + $0x50] sm:$0xf] }
  0x62   : > { %991 = vmatpush.bf16.msra.mxu2 %v1459_v8  ;;  %v1514_v20 = vld [vmem:[%s1888_s5 + $0x1e0] sm:$0xf]  ;;  %v1451_v21 = vor.u32 %v1583_v19, %v1450_v18  ;;  %v1599_v22 = vld [vmem:[%s1888_s5 + $0x1e4] sm:$0xf0]  ;;  %v1549_v24 = vld [vmem:[%s1888_s5 + $0x54] sm:$0xf0] }
  0x63   : > { %1005 = vmatpush.bf16.msra.mxu3 %v1523_v12  ;;  %v1515_v25 = vor.u32 %v1599_v22, %v1514_v20  ;;  %v1378_v26 = vld [vmem:[%s1888_s5 + $0xd0] sm:$0xf]  ;;  %v1565_v27 = vld [vmem:[%s1888_s5 + $0xd4] sm:$0xf0]  ;;  %v1315_v29 = vor.u32 %v1549_v24, %v1314_v23  ;;  %v1306_v35 = vld [vmem:[%s1888_s5 + $0x40] sm:$0xf] }
  0x64   : > { %v1442_v28 = vld [vmem:[%s1888_s5 + $0x150] sm:$0xf]  ;;  %964 = vmatpush.bf16.msra.mxu0 %v1323_v16  ;;  %v1581_v30 = vld [vmem:[%s1888_s5 + $0x154] sm:$0xf0]  ;;  %v1379_v33 = vor.u32 %v1565_v27, %v1378_v26  ;;  %v1547_v36 = vld [vmem:[%s1888_s5 + $0x44] sm:$0xf0] }
  0x65   : > { %v1506_v31 = vld [vmem:[%s1888_s5 + $0x1d0] sm:$0xf]  ;;  %v1597_v32 = vld [vmem:[%s1888_s5 + $0x1d4] sm:$0xf0]  ;;  %978 = vmatpush.bf16.msra.mxu1 %v1387_v17  ;;  %v1443_v34 = vor.u32 %v1581_v30, %v1442_v28  ;;  %v1370_v37 = vld [vmem:[%s1888_s5 + $0xc0] sm:$0xf]  ;;  %v1307_v44 = vor.u32 %v1547_v36, %v1306_v35 }
  0x66   : > { %992 = vmatpush.bf16.msra.mxu2 %v1451_v21  ;;  %v1507_v38 = vor.u32 %v1597_v32, %v1506_v31  ;;  %v1563_v39 = vld [vmem:[%s1888_s5 + $0xc4] sm:$0xf0]  ;;  %v1434_v40 = vld [vmem:[%s1888_s5 + $0x140] sm:$0xf]  ;;  %v1298_v47 = vld [vmem:[%s1888_s5 + $0x30] sm:$0xf] }
  0x67   : > { %1006 = vmatpush.bf16.msra.mxu3 %v1515_v25  ;;  %v1579_v41 = vld [vmem:[%s1888_s5 + $0x144] sm:$0xf0]  ;;  %v1498_v42 = vld [vmem:[%s1888_s5 + $0x1c0] sm:$0xf]  ;;  %v1371_v45 = vor.u32 %v1563_v39, %v1370_v37  ;;  %v1545_v48 = vld [vmem:[%s1888_s5 + $0x34] sm:$0xf0] }
  0x68   : > { %v1595_v43 = vld [vmem:[%s1888_s5 + $0x1c4] sm:$0xf0]  ;;  %965 = vmatpush.bf16.msra.mxu0 %v1315_v29  ;;  %v1435_v46 = vor.u32 %v1579_v41, %v1434_v40  ;;  %v1362_v49 = vld [vmem:[%s1888_s5 + $0xb0] sm:$0xf]  ;;  %v1561_v51 = vld [vmem:[%s1888_s5 + $0xb4] sm:$0xf0]  ;;  %v1299_v56 = vor.u32 %v1545_v48, %v1298_v47 }
  0x69   : > { %979 = vmatpush.bf16.msra.mxu1 %v1379_v33  ;;  %v1499_v50 = vor.u32 %v1595_v43, %v1498_v42  ;;  %v1426_v52 = vld [vmem:[%s1888_s5 + $0x130] sm:$0xf]  ;;  %v1577_v53 = vld [vmem:[%s1888_s5 + $0x134] sm:$0xf0]  ;;  %v1363_v57 = vor.u32 %v1561_v51, %v1362_v49  ;;  %v1290_v59 = vld [vmem:[%s1888_s5 + $0x20] sm:$0xf] }
  0x6a   : > { %993 = vmatpush.bf16.msra.mxu2 %v1443_v34  ;;  %v1490_v54 = vld [vmem:[%s1888_s5 + $0x1b0] sm:$0xf]  ;;  %v1593_v55 = vld [vmem:[%s1888_s5 + $0x1b4] sm:$0xf0]  ;;  %v1427_v58 = vor.u32 %v1577_v53, %v1426_v52  ;;  %v1543_v60 = vld [vmem:[%s1888_s5 + $0x24] sm:$0xf0] }
  0x6b   : > { %1007 = vmatpush.bf16.msra.mxu3 %v1507_v38  ;;  %v1354_v61 = vld [vmem:[%s1888_s5 + $0xa0] sm:$0xf]  ;;  %v1491_v62 = vor.u32 %v1593_v55, %v1490_v54  ;;  %v1559_v63 = vld [vmem:[%s1888_s5 + $0xa4] sm:$0xf0]  ;;  %v1291_v4 = vor.u32 %v1543_v60, %v1290_v59  ;;  %v1282_v7 = vld [vmem:[%s1888_s5 + $0x10] sm:$0xf] }
  0x6c   : > { %966 = vmatpush.bf16.msra.mxu0 %v1307_v44  ;;  %v1418_v0 = vld [vmem:[%s1888_s5 + $0x120] sm:$0xf]  ;;  %v1575_v1 = vld [vmem:[%s1888_s5 + $0x124] sm:$0xf0]  ;;  %v1355_v5 = vor.u32 %v1559_v63, %v1354_v61  ;;  %v1541_v8 = vld [vmem:[%s1888_s5 + $0x14] sm:$0xf0] }
  0x6d   : > { %980 = vmatpush.bf16.msra.mxu1 %v1371_v45  ;;  %v1482_v2 = vld [vmem:[%s1888_s5 + $0x1a0] sm:$0xf]  ;;  %v1591_v3 = vld [vmem:[%s1888_s5 + $0x1a4] sm:$0xf0]  ;;  %v1419_v6 = vor.u32 %v1575_v1, %v1418_v0  ;;  %v1346_v9 = vld [vmem:[%s1888_s5 + $0x90] sm:$0xf]  ;;  %v1283_v17 = vor.u32 %v1541_v8, %v1282_v7 }
  0x6e   : > { %994 = vmatpush.bf16.msra.mxu2 %v1435_v46  ;;  %v1483_v10 = vor.u32 %v1591_v3, %v1482_v2  ;;  %v1557_v11 = vld [vmem:[%s1888_s5 + $0x94] sm:$0xf0]  ;;  %v1410_v12 = vld [vmem:[%s1888_s5 + $0x110] sm:$0xf]  ;;  %v1274_v16 = vld [vmem:[%s1888_s5] sm:$0xf] }
  0x6f   : > { %1008 = vmatpush.bf16.msra.mxu3 %v1499_v50  ;;  %v1573_v13 = vld [vmem:[%s1888_s5 + $0x114] sm:$0xf0]  ;;  %v1474_v14 = vld [vmem:[%s1888_s5 + $0x190] sm:$0xf]  ;;  %v1539_v18 = vld [vmem:[%s1888_s5 + $0x4] sm:$0xf0]  ;;  %v1347_v21 = vor.u32 %v1557_v11, %v1346_v9 }
  0x70   : > { %967 = vmatpush.bf16.msra.mxu0 %v1299_v56  ;;  %v1589_v15 = vld [vmem:[%s1888_s5 + $0x194] sm:$0xf0]  ;;  %v1338_v19 = vld [vmem:[%s1888_s5 + $0x80] sm:$0xf]  ;;  %v1555_v20 = vld [vmem:[%s1888_s5 + $0x84] sm:$0xf0]  ;;  %v1411_v22 = vor.u32 %v1573_v13, %v1410_v12  ;;  %v1275_v33 = vor.u32 %v1539_v18, %v1274_v16 }
  0x71   : > { %981 = vmatpush.bf16.msra.mxu1 %v1363_v57  ;;  %v1402_v23 = vld [vmem:[%s1888_s5 + $0x100] sm:$0xf]  ;;  %v1571_v24 = vld [vmem:[%s1888_s5 + $0x104] sm:$0xf0]  ;;  %v1475_v26 = vor.u32 %v1589_v15, %v1474_v14  ;;  %v1552_v28 = vld [vmem:[%s1888_s5 + $0x74] sm:$0xf]  ;;  %v1339_v37 = vor.u32 %v1555_v20, %v1338_v19 }
  0x72   : > { %995 = vmatpush.bf16.msra.mxu2 %v1427_v58  ;;  %v1466_v25 = vld [vmem:[%s1888_s5 + $0x180] sm:$0xf]  ;;  %v1587_v27 = vld [vmem:[%s1888_s5 + $0x184] sm:$0xf0]  ;;  %v1332_v29 = vld [vmem:[%s1888_s5 + $0x78] sm:$0xf0]  ;;  %v1403_v38 = vor.u32 %v1571_v24, %v1402_v23 }
  0x73   : > { %1009 = vmatpush.bf16.msra.mxu3 %v1491_v62  ;;  %v1568_v30 = vld [vmem:[%s1888_s5 + $0xf4] sm:$0xf]  ;;  %v1396_v31 = vld [vmem:[%s1888_s5 + $0xf8] sm:$0xf0]  ;;  %v1550_v39 = vld [vmem:[%s1888_s5 + $0x64] sm:$0xf]  ;;  %v1467_v43 = vor.u32 %v1587_v27, %v1466_v25  ;;  %v1335_v44 = vor.u32 %v1552_v28, %v1332_v29 }
  0x74   : > { %968 = vmatpush.bf16.msra.mxu0 %v1291_v4  ;;  %v1584_v32 = vld [vmem:[%s1888_s5 + $0x174] sm:$0xf]  ;;  %v1460_v34 = vld [vmem:[%s1888_s5 + $0x178] sm:$0xf0]  ;;  %v1324_v40 = vld [vmem:[%s1888_s5 + $0x68] sm:$0xf0]  ;;  %v1399_v49 = vor.u32 %v1568_v30, %v1396_v31 }
  0x75   : > { %982 = vmatpush.bf16.msra.mxu1 %v1355_v5  ;;  %v1600_v35 = vld [vmem:[%s1888_s5 + $0x1f4] sm:$0xf]  ;;  %v1524_v36 = vld [vmem:[%s1888_s5 + $0x1f8] sm:$0xf0]  ;;  %v1266_v41 = vld [vmem:[%s2095_s0 + $0x8] sm:$0xf]  ;;  %v1463_v50 = vor.u32 %v1584_v32, %v1460_v34  ;;  %v1327_v63 = vor.u32 %v1550_v39, %v1324_v40 }
  0x76   : > { %996 = vmatpush.bf16.msra.mxu2 %v1419_v6  ;;  %v1537_v42 = vld [vmem:[%s2095_s0 + $0x14] sm:$0xf0]  ;;  %v1566_v45 = vld [vmem:[%s1888_s5 + $0xe4] sm:$0xf]  ;;  %v1388_v46 = vld [vmem:[%s1888_s5 + $0xe8] sm:$0xf0]  ;;  %v1527_v54 = vor.u32 %v1600_v35, %v1524_v36 }
  0x77   : > { %1010 = vmatpush.bf16.msra.mxu3 %v1483_v10  ;;  %v1582_v47 = vld [vmem:[%s1888_s5 + $0x164] sm:$0xf]  ;;  %v1452_v48 = vld [vmem:[%s1888_s5 + $0x168] sm:$0xf0]  ;;  %v1268_v52 = vld [vmem:[%s2095_s0 + $0x18] sm:$0xf0]  ;;  %v1983_v55 = vor.u32 %v1537_v42, %v1266_v41  ;;  %v1391_v1 = vor.u32 %v1566_v45, %v1388_v46 }
  0x78   : > { %969 = vmatpush.bf16.msra.mxu0 %v1283_v17  ;;  %v1535_v51 = vld [vmem:[%s2095_s0 + $0xc] sm:$0xf]  ;;  %v1258_v53 = vld [vmem:[%s2095_s0] sm:$0xf]  ;;  %v1536_v56 = vld [vmem:[%s2095_s0 + $0xc] sm:$0xf0]  ;;  %v1455_v2 = vor.u32 %v1582_v47, %v1452_v48 }
  0x79   : > { %983 = vmatpush.bf16.msra.mxu1 %v1347_v21  ;;  %v1534_v57 = vld [vmem:[%s2095_s0 + $0x4] sm:$0xf]  ;;  %v1260_v58 = vld [vmem:[%s2095_s0 + $0x10] sm:$0xf0]  ;;  %v1516_v60 = vld [vmem:[%s1888_s5 + $0x1e8] sm:$0xf0]  ;;  %v1996_v61 = vor.u32 %v1535_v51, %v1268_v52  ;;  %v1998_v62 = vor.u32 %v1536_v56, %v1258_v53 }
  0x7a   : > { %997 = vmatpush.bf16.msra.mxu2 %v1411_v22  ;;  %v1598_v59 = vld [vmem:[%s1888_s5 + $0x1e4] sm:$0xf]  ;;  %v2000_v0 = vor.u32 %v1534_v57, %v1260_v58  ;;  %v1548_v3 = vld [vmem:[%s1888_s5 + $0x54] sm:$0xf]  ;;  %v1316_v4 = vld [vmem:[%s1888_s5 + $0x58] sm:$0xf0] }
  0x7b   : > { %1011 = vmatpush.bf16.msra.mxu3 %v1475_v26  ;;  %v1564_v5 = vld [vmem:[%s1888_s5 + $0xd4] sm:$0xf]  ;;  %v1519_v6 = vor.u32 %v1598_v59, %v1516_v60  ;;  %v1380_v7 = vld [vmem:[%s1888_s5 + $0xd8] sm:$0xf0]  ;;  %v1319_v12 = vor.u32 %v1548_v3, %v1316_v4  ;;  %v1546_v15 = vld [vmem:[%s1888_s5 + $0x44] sm:$0xf] }
  0x7c   : > { %970 = vmatpush.bf16.msra.mxu0 %v1275_v33  ;;  %v1580_v8 = vld [vmem:[%s1888_s5 + $0x154] sm:$0xf]  ;;  %v1444_v9 = vld [vmem:[%s1888_s5 + $0x158] sm:$0xf0]  ;;  %v1383_v13 = vor.u32 %v1564_v5, %v1380_v7  ;;  %v1308_v16 = vld [vmem:[%s1888_s5 + $0x48] sm:$0xf0] }
  0x7d   : > { %984 = vmatpush.bf16.msra.mxu1 %v1339_v37  ;;  %v1596_v10 = vld [vmem:[%s1888_s5 + $0x1d4] sm:$0xf]  ;;  %v1508_v11 = vld [vmem:[%s1888_s5 + $0x1d8] sm:$0xf0]  ;;  %v1447_v14 = vor.u32 %v1580_v8, %v1444_v9  ;;  %v1562_v17 = vld [vmem:[%s1888_s5 + $0xc4] sm:$0xf]  ;;  %v1311_v24 = vor.u32 %v1546_v15, %v1308_v16 }
  0x7e   : > { %998 = vmatpush.bf16.msra.mxu2 %v1403_v38  ;;  %v1511_v18 = vor.u32 %v1596_v10, %v1508_v11  ;;  %v1372_v19 = vld [vmem:[%s1888_s5 + $0xc8] sm:$0xf0]  ;;  %v1578_v20 = vld [vmem:[%s1888_s5 + $0x144] sm:$0xf]  ;;  %v1544_v27 = vld [vmem:[%s1888_s5 + $0x34] sm:$0xf] }
  0x7f   : > { %1012 = vmatpush.bf16.msra.mxu3 %v1467_v43  ;;  %971 = vmatmul.bf16.vlgmr.msra.gmra.mxu0 %v1998_v62  ;;  %v1436_v21 = vld [vmem:[%s1888_s5 + $0x148] sm:$0xf0]  ;;  %v1594_v22 = vld [vmem:[%s1888_s5 + $0x1c4] sm:$0xf]  ;;  %v1375_v25 = vor.u32 %v1562_v17, %v1372_v19  ;;  %v1300_v28 = vld [vmem:[%s1888_s5 + $0x38] sm:$0xf0] }
  0x80   : > { %1019 = vmatpush.bf16.msrb.mxu0 %v1335_v44  ;;  %985 = vmatmul.bf16.vlgmr.msra.gmra.mxu1 %v2000_v0  ;;  %v1500_v23 = vld [vmem:[%s1888_s5 + $0x1c8] sm:$0xf0]  ;;  %v1439_v26 = vor.u32 %v1578_v20, %v1436_v21  ;;  %v1560_v29 = vld [vmem:[%s1888_s5 + $0xb4] sm:$0xf]  ;;  %v1364_v31 = vld [vmem:[%s1888_s5 + $0xb8] sm:$0xf0]  ;;  %v1303_v36 = vor.u32 %v1544_v27, %v1300_v28 }
  0x81   : > { %1033 = vmatpush.bf16.msrb.mxu1 %v1399_v49  ;;  %999 = vmatmul.bf16.vlgmr.msra.gmra.mxu2 %v1983_v55  ;;  %v1503_v30 = vor.u32 %v1594_v22, %v1500_v23  ;;  %v1576_v32 = vld [vmem:[%s1888_s5 + $0x134] sm:$0xf]  ;;  %v1428_v33 = vld [vmem:[%s1888_s5 + $0x138] sm:$0xf0]  ;;  %v1367_v37 = vor.u32 %v1560_v29, %v1364_v31  ;;  %v1542_v39 = vld [vmem:[%s1888_s5 + $0x24] sm:$0xf] }
  0x82   : > { %1047 = vmatpush.bf16.msrb.mxu2 %v1463_v50  ;;  %1013 = vmatmul.bf16.vlgmr.msra.gmra.mxu3 %v1996_v61  ;;  %v1592_v34 = vld [vmem:[%s1888_s5 + $0x1b4] sm:$0xf]  ;;  %v1492_v35 = vld [vmem:[%s1888_s5 + $0x1b8] sm:$0xf0]  ;;  %v1431_v38 = vor.u32 %v1576_v32, %v1428_v33  ;;  %v1292_v40 = vld [vmem:[%s1888_s5 + $0x28] sm:$0xf0] }
  0x83   : > { %1061 = vmatpush.bf16.msrb.mxu3 %v1527_v54  ;;  %v1558_v41 = vld [vmem:[%s1888_s5 + $0xa4] sm:$0xf]  ;;  %v1495_v42 = vor.u32 %v1592_v34, %v1492_v35  ;;  %v1356_v43 = vld [vmem:[%s1888_s5 + $0xa8] sm:$0xf0]  ;;  %v1295_v48 = vor.u32 %v1542_v39, %v1292_v40  ;;  %v1540_v51 = vld [vmem:[%s1888_s5 + $0x14] sm:$0xf] }
  0x84   : > { %1020 = vmatpush.bf16.msrb.mxu0 %v1327_v63  ;;  %v1574_v44 = vld [vmem:[%s1888_s5 + $0x124] sm:$0xf]  ;;  %v1420_v45 = vld [vmem:[%s1888_s5 + $0x128] sm:$0xf0]  ;;  %v1359_v49 = vor.u32 %v1558_v41, %v1356_v43  ;;  %v1284_v52 = vld [vmem:[%s1888_s5 + $0x18] sm:$0xf0] }
  0x85   : > { %1034 = vmatpush.bf16.msrb.mxu1 %v1391_v1  ;;  %v1590_v46 = vld [vmem:[%s1888_s5 + $0x1a4] sm:$0xf]  ;;  %v1484_v47 = vld [vmem:[%s1888_s5 + $0x1a8] sm:$0xf0]  ;;  %v1423_v50 = vor.u32 %v1574_v44, %v1420_v45  ;;  %v1556_v53 = vld [vmem:[%s1888_s5 + $0x94] sm:$0xf]  ;;  %v1287_v63 = vor.u32 %v1540_v51, %v1284_v52 }
  0x86   : > { %1048 = vmatpush.bf16.msrb.mxu2 %v1455_v2  ;;  %v1487_v54 = vor.u32 %v1590_v46, %v1484_v47  ;;  %v1348_v56 = vld [vmem:[%s1888_s5 + $0x98] sm:$0xf0]  ;;  %v1572_v57 = vld [vmem:[%s1888_s5 + $0x114] sm:$0xf]  ;;  %v1538_v3 = vld [vmem:[%s1888_s5 + $0x4] sm:$0xf] }
  0x87   : > { %1062 = vmatpush.bf16.msrb.mxu3 %v1519_v6  ;;  %v1412_v58 = vld [vmem:[%s1888_s5 + $0x118] sm:$0xf0]  ;;  %v1588_v59 = vld [vmem:[%s1888_s5 + $0x194] sm:$0xf]  ;;  %v1351_v1 = vor.u32 %v1556_v53, %v1348_v56  ;;  %v1276_v4 = vld [vmem:[%s1888_s5 + $0x8] sm:$0xf0] }
  0x88   : > { %1021 = vmatpush.bf16.msrb.mxu0 %v1319_v12  ;;  %v1476_v60 = vld [vmem:[%s1888_s5 + $0x198] sm:$0xf0]  ;;  %v1415_v2 = vor.u32 %v1572_v57, %v1412_v58  ;;  %v1554_v5 = vld [vmem:[%s1888_s5 + $0x84] sm:$0xf]  ;;  %v1340_v7 = vld [vmem:[%s1888_s5 + $0x88] sm:$0xf0]  ;;  %v1279_v12 = vor.u32 %v1538_v3, %v1276_v4 }
  0x89   : > { %1035 = vmatpush.bf16.msrb.mxu1 %v1383_v13  ;;  %v1479_v6 = vor.u32 %v1588_v59, %v1476_v60  ;;  %v1570_v8 = vld [vmem:[%s1888_s5 + $0x104] sm:$0xf]  ;;  %v1404_v9 = vld [vmem:[%s1888_s5 + $0x108] sm:$0xf0]  ;;  %v1343_v13 = vor.u32 %v1554_v5, %v1340_v7  ;;  %s2107_s4 = smov (!%p537_p11, %s1255_s4), 3  ;;  %s1602_s12 = sshll.u32 (%p1738_p6), %s1673_s14, 4 }
  0x8a   : > { %1049 = vmatpush.bf16.msrb.mxu2 %v1447_v14  ;;  %v1586_v10 = vld [vmem:[%s1888_s5 + $0x184] sm:$0xf]  ;;  %v1468_v11 = vld [vmem:[%s1888_s5 + $0x188] sm:$0xf0]  ;;  %v1407_v14 = vor.u32 %v1570_v8, %v1404_v9  ;;  %s539_s7 = scalar_lea.vmem %s2097_s2, %s2107_s4  ;;  %s1116_s11 = scalar_lea.vmem (%p1738_p6), %s2098_s3, %s1602_s12 }
  0x8b   : > { %1063 = vmatpush.bf16.msrb.mxu3 %v1511_v18  ;;  %v1471_v15 = vor.u32 %v1586_v10, %v1468_v11  ;;  %v1090_v19 = vld [vmem:[%s539_s7] sm:$0x3] }
  0x8c   : > { %1022 = vmatpush.bf16.msrb.mxu0 %v1311_v24 }
  0x8d   : > { %1036 = vmatpush.bf16.msrb.mxu1 %v1375_v25 }
  0x8e   : > { %1050 = vmatpush.bf16.msrb.mxu2 %v1439_v26 }
  0x8f   : > { %1064 = vmatpush.bf16.msrb.mxu3 %v1503_v30 }
  0x90   : > { %1023 = vmatpush.bf16.msrb.mxu0 %v1303_v36  ;;  %v1093_v36 = vperm.slane %v1090_v19, 1 }
  0x91   : > { %1037 = vmatpush.bf16.msrb.mxu1 %v1367_v37 }
  0x92   : > { %1051 = vmatpush.bf16.msrb.mxu2 %v1431_v38 }
  0x93   : > { %1065 = vmatpush.bf16.msrb.mxu3 %v1495_v42 }
  0x94   : > { %1024 = vmatpush.bf16.msrb.mxu0 %v1295_v48 }
  0x95   : > { %1038 = vmatpush.bf16.msrb.mxu1 %v1359_v49 }
  0x96   : > { %1052 = vmatpush.bf16.msrb.mxu2 %v1423_v50 }
  0x97   : > { %1066 = vmatpush.bf16.msrb.mxu3 %v1487_v54 }
  0x98   : > { %1025 = vmatpush.bf16.msrb.mxu0 %v1287_v63 }
  0x99   : > { %1039 = vmatpush.bf16.msrb.mxu1 %v1351_v1 }
  0x9a   : > { %1053 = vmatpush.bf16.msrb.mxu2 %v1415_v2 }
  0x9b   : > { %1067 = vmatpush.bf16.msrb.mxu3 %v1479_v6 }
  0x9c   : > { %1026 = vmatpush.bf16.msrb.mxu0 %v1279_v12 }
  0x9d   : > { %1040 = vmatpush.bf16.msrb.mxu1 %v1343_v13 }
  0x9e   : > { %1054 = vmatpush.bf16.msrb.mxu2 %v1407_v14 }
  0x9f   : > { %1068 = vmatpush.bf16.msrb.mxu3 %v1471_v15  ;;  %1027 = vmatmul.bf16.vlgmr.msrb.gmra.mxu0 %v1998_v62 }
  0xa0   : > { %1041 = vmatmul.bf16.vlgmr.msrb.gmra.mxu1 %v2000_v0  ;;  %v1092_v0 = vperm.slane %v1090_v19, 0 }
  0xa1   : > { %1055 = vmatmul.bf16.vlgmr.msrb.gmra.mxu2 %v1983_v55 }
  0xa2   : > { %1069 = vmatmul.bf16.vlgmr.msrb.gmra.mxu3 %v1996_v61 }
  0xfc   : > { %v972_v16 = vpop.f32.mrf.mxu0 }
  0xfd   : > { %v986_v17 = vpop.f32.mrf.mxu1 }
  0xfe   : > { %v987_v18 = vadd.f32 %v986_v17, %v972_v16 }
 0x104   : > { %v1000_v20 = vpop.f32.mrf.mxu2  ;;  %v974_v22 = vpop.f32.mrf.mxu0 }
 0x105   : > { %v1001_v21 = vadd.f32 %v1000_v20, %v987_v18  ;;  %v1014_v62 = vpop.f32.mrf.mxu3  ;;  %v988_v61 = vpop.f32.mrf.mxu1 }
 0x106   : > { %v989_v24 = vadd.f32 %v988_v61, %v974_v22 }
 0x107   : > { %v1015_v55 = vadd.f32 %v1014_v62, %v1001_v21 }
 0x109   : > { %v1096_v23 = vadd.f32 %v1092_v0, %v1015_v55 }
 0x10b   : > { %1100 = vst [vmem:[%s2064_s9] sm:$0xff] %v1096_v23 }
 0x10c   : > { %v1002_v25 = vpop.f32.mrf.mxu2 }
 0x10d   : > { %v1003_v26 = vadd.f32 %v1002_v25, %v989_v24  ;;  %v1016_v27 = vpop.f32.mrf.mxu3 }
 0x10f   : > { %v1017_v28 = vadd.f32 %v1016_v27, %v1003_v26 }
 0x111   : > { %v1098_v29 = vadd.f32 %v1092_v0, %v1017_v28 }
 0x112   : > { %v1129_v47 = vld [vmem:[%s2064_s9] sm:$0xff] (%p1738_p6) }
 0x113   : > { %1102 = vst [vmem:[%s2064_s9 + $0x10] sm:$0xff] %v1098_v29 }
 0x114   : > { %1130 = vst [vmem:[%s1116_s11] sm:$0xff] (%p1738_p6), %v1129_v47 }
 0x11a   : > { %v1133_v49 = vld [vmem:[%s2064_s9 + $0x10] sm:$0xff] (%p1738_p6) }
 0x11b   : > { %1134 = vst [vmem:[%s1116_s11 + $0x20] sm:$0xff] (%p1738_p6), %v1133_v49 }
 0x11c   : > { %v1028_v30 = vpop.f32.mrf.mxu0 }
 0x11d   : > { %v1042_v31 = vpop.f32.mrf.mxu1 }
 0x11e   : > { %v1043_v32 = vadd.f32 %v1042_v31, %v1028_v30 }
 0x124   : > { %v1056_v33 = vpop.f32.mrf.mxu2  ;;  %v1030_v38 = vpop.f32.mrf.mxu0 }
 0x125   : > { %v1057_v34 = vadd.f32 %v1056_v33, %v1043_v32  ;;  %v1070_v35 = vpop.f32.mrf.mxu3  ;;  %v1044_v39 = vpop.f32.mrf.mxu1 }
 0x126   : > { %v1045_v41 = vadd.f32 %v1044_v39, %v1030_v38 }
 0x127   : > { %v1071_v37 = vadd.f32 %v1070_v35, %v1057_v34 }
 0x129   : > { %v1097_v40 = vadd.f32 %v1093_v36, %v1071_v37 }
 0x12b   : > { %1101 = vst [vmem:[%s2064_s9 + $0x8] sm:$0xff] %v1097_v40 }
 0x12c   : > { %v1058_v42 = vpop.f32.mrf.mxu2 }
 0x12d   : > { %v1059_v43 = vadd.f32 %v1058_v42, %v1045_v41  ;;  %v1072_v44 = vpop.f32.mrf.mxu3 }
 0x12f   : > { %v1073_v45 = vadd.f32 %v1072_v44, %v1059_v43  ;;  %1110 = sbr.rel (!%p1738_p6) target bundleno = 316 (0x13c), region = 82 }
 0x131   : > { %v1099_v46 = vadd.f32 %v1093_v36, %v1073_v45 }
 0x132   : > { %v1131_v48 = vld [vmem:[%s2064_s9 + $0x8] sm:$0xff] (%p1738_p6) }
 0x133   : > { %1103 = vst [vmem:[%s2064_s9 + $0x18] sm:$0xff] %v1099_v46 }
 0x134   : > { %1132 = vst [vmem:[%s1116_s11 + $0x8] sm:$0xff] %v1131_v48 }
 0x13a   : > { %v1135_v50 = vld [vmem:[%s2064_s9 + $0x18] sm:$0xff] }
 0x13b   : > { %1136 = vst [vmem:[%s1116_s11 + $0x28] sm:$0xff] %v1135_v50 }
 0x13c PF: > { %s13_s16 = sadd.s32 1, %s1681_s16   ;;  %s2100_s12 = smov %s1669_s13 }
 0x13d   : > { %p10_p12 = scmp.ge.s32.totalorder %s13_s16, 4   ;;  %s2101_s13 = smov %s1743_s22 }
 0x13e   : > { %s2102_s14 = smov %s1677_s15  ;;  %s2103_s15 = smov %s2105_s17 }
 0x13f   :  { %12 = sbr.rel (!%p10_p12) target bundleno = 3 (0x3), region = 142 }

</bundles_post_ra>
